<compile_context>
chip_gen: v7x
topology: tpu7x:2x2x1
jax: 0.10.0
libtpu: 0.0.40
codegen_flags: <defaults>
</compile_context>

<pallas_src>
import jax
import jax.numpy as jnp
from jax.experimental import pallas as pl
from jax.experimental.pallas import tpu as pltpu

HIDDEN = 1024
NUM_HIDDEN_LAYERS = 4
BATCH_TILE = 512  # rows per grid step for large batches


def domain_classifier_kernel(x_ref, w_ref, b_ref, wd_ref, bd_ref, o_ref, h_ref):
    """One grid step = one batch tile through all 4 hidden layers + domain head.

    x_ref : (tb, 1024) f32      streamed per batch tile
    w_ref : (4, 1024, 1024) bf16 VMEM-resident (whole stack)
    b_ref : (4, 1, 1024) f32     VMEM-resident
    wd_ref: (1, 1024) f32        VMEM-resident (domain head weight row)
    bd_ref: (1, 1) f32           VMEM-resident (domain head bias)
    o_ref : (tb, 1) f32
    h_ref : (tb, 1024) bf16      activation carry scratch
    """
    h_ref[...] = x_ref[...].astype(jnp.bfloat16)

    # Unrolled layer loop: bf16 MXU matmul with f32 accumulation, f32 bias + ReLU.
    for layer in range(NUM_HIDDEN_LAYERS):
        z = jnp.dot(h_ref[...], w_ref[layer],
                    preferred_element_type=jnp.float32) + b_ref[layer]
        h_ref[...] = jnp.maximum(z, 0.0).astype(jnp.bfloat16)
        # TODO(synk): Dropout(0.5) train-mode masking not emitted (identity == eval mode).

    # Final 1024 -> 1 domain head: VPU multiply + lane reduction.
    h = h_ref[...].astype(jnp.float32)
    dom = jnp.sum(h * wd_ref[...], axis=-1, keepdims=True) + bd_ref[...]
    o_ref[...] = dom.astype(o_ref.dtype)


@jax.jit
def domain_classifier_forward(x, params, iter_num=0):
    """x: (B, 1024) f32. params: (w_stack bf16, b_stack f32, wd_row f32, bd f32).

    iter_num only parameterizes the backward-pass gradient-reversal coefficient
    in the original module; the forward output does not depend on it.
    Returns (B, 1) f32.
    """
    del iter_num
    w_stack, b_stack, wd_row, bd = params
    B = x.shape[0]

    # Batch tiling: single full-batch tile for small B (full-dim block, no
    # divisibility constraint); 512-row tiles with zero padding for large B.
    if B <= BATCH_TILE:
        tb, Bp = B, B
    else:
        tb = BATCH_TILE
        Bp = pl.cdiv(B, tb) * tb
    if Bp != B:
        x = jnp.pad(x, ((0, Bp - B), (0, 0)))
    nb = Bp // tb

    resident = pl.BlockSpec(memory_space=pltpu.MemorySpace.VMEM)  # whole array in VMEM, fetched once

    out = pl.pallas_call(
        domain_classifier_kernel,
        out_shape=jax.ShapeDtypeStruct((Bp, 1), jnp.float32),
        grid=(nb,),
        in_specs=[
            pl.BlockSpec((tb, HIDDEN), lambda bi: (bi, 0)),  # x (streamed, double-buffered)
            resident,                                        # stacked hidden weights (bf16)
            resident,                                        # stacked hidden biases (f32)
            resident,                                        # domain head weight row (f32)
            resident,                                        # domain head bias (f32)
        ],
        out_specs=pl.BlockSpec((tb, 1), lambda bi: (bi, 0)),
        scratch_shapes=[pltpu.VMEM((tb, HIDDEN), jnp.bfloat16)],  # activation carry
        compiler_params=pltpu.CompilerParams(
            dimension_semantics=("parallel",),
            vmem_limit_bytes=32 * 1024 * 1024,
        ),
    )(x, w_stack, b_stack, wd_row, bd)

    return out[:B]


def init_params(key):
    """Deterministic init mimicking nn.Linear default (uniform(-1/sqrt(fan_in), +))."""
    keys = jax.random.split(key, 10)
    bound = 1.0 / jnp.sqrt(jnp.float32(HIDDEN))
    ws, bs = [], []
    for i in range(NUM_HIDDEN_LAYERS):
        w = jax.random.uniform(keys[2 * i], (HIDDEN, HIDDEN), jnp.float32,
                               minval=-bound, maxval=bound)
        b = jax.random.uniform(keys[2 * i + 1], (1, HIDDEN), jnp.float32,
                               minval=-bound, maxval=bound)
        ws.append(w)
        bs.append(b)
    # Hidden weights stored/transferred in bf16 (HBM-bound workload); f32 accumulate in-kernel.
    w_stack = jnp.stack(ws).astype(jnp.bfloat16)   # (4, 1024, 1024) bf16
    b_stack = jnp.stack(bs)                        # (4, 1, 1024)   f32
    wd_row = jax.random.uniform(keys[8], (1, HIDDEN), jnp.float32,
                                minval=-bound, maxval=bound)          # W_domain^T as a row
    bd = jax.random.uniform(keys[9], (1, 1), jnp.float32,
                            minval=-bound, maxval=bound)
    return (w_stack, b_stack, wd_row, bd)


def reference_forward(x, params):
    """Pure-JAX reference (f32 math on the same bf16-at-rest weights)."""
    w_stack, b_stack, wd_row, bd = params
    h = x
    for l in range(NUM_HIDDEN_LAYERS):
        h = jnp.maximum(h @ w_stack[l].astype(jnp.float32) + b_stack[l], 0.0)
    return h @ wd_row.T + bd


if __name__ == "__main__":
    key = jax.random.PRNGKey(0)
    kx, kp = jax.random.split(key)

    B = 8  # feature dim is fixed at 1024 by the module definition
    x = jax.random.normal(kx, (B, HIDDEN), jnp.float32)
    iter_num = 100  # only influences the backward GRL coefficient; forward is unaffected
    params = init_params(kp)

    out = jax.block_until_ready(domain_classifier_forward(x, params, iter_num))
    ref = reference_forward(x, params)

    assert out.shape == (B, 1), out.shape
    max_err = float(jnp.max(jnp.abs(out - ref)))
    assert jnp.allclose(out, ref, atol=5e-2, rtol=5e-2), ("mismatch vs reference", max_err)

    print("KERNEL_OK")
</pallas_src>

<mosaic_0001>
module attributes {stable_mosaic.version = 11 : i64} {
  func.func @domain_classifier_kernel(%arg0: i32, %arg1: memref<8x1024xf32, #tpu.memory_space<vmem>>, %arg2: memref<4x1024x1024xbf16, #tpu.memory_space<vmem>>, %arg3: memref<4x1x1024xf32, #tpu.memory_space<vmem>>, %arg4: memref<1x1024xf32, #tpu.memory_space<vmem>>, %arg5: memref<1x1xf32, #tpu.memory_space<vmem>>, %arg6: memref<8x1xf32, #tpu.memory_space<vmem>>, %arg7: memref<8x1024xbf16, #tpu.memory_space<vmem>>) attributes {dimension_semantics = [#tpu.dimension_semantics<parallel>], iteration_bounds = array<i64: 1>, scalar_prefetch = 0 : i64, scratch_operands = 1 : i64, tpu.core_type = #tpu.core_type<tc>, window_params = [{transform_indices = @transform_0, window_bounds = array<i64: 8, 1024>}, {pipeline_mode = #tpu.pipeline_mode<synchronous>, transform_indices = @transform_1, window_bounds = array<i64: 4, 1024, 1024>}, {pipeline_mode = #tpu.pipeline_mode<synchronous>, transform_indices = @transform_2, window_bounds = array<i64: 4, 1, 1024>}, {pipeline_mode = #tpu.pipeline_mode<synchronous>, transform_indices = @transform_3, window_bounds = array<i64: 1, 1024>}, {pipeline_mode = #tpu.pipeline_mode<synchronous>, transform_indices = @transform_4, window_bounds = array<i64: 1, 1>}, {transform_indices = @transform_5, window_bounds = array<i64: 8, 1>}]} {
    %c0 = arith.constant 0 : index
    %c0_0 = arith.constant 0 : index
    %0 = vector.load %arg1[%c0, %c0_0] : memref<8x1024xf32, #tpu.memory_space<vmem>>, vector<8x1024xf32>
    %1 = arith.truncf %0 : vector<8x1024xf32> to vector<8x1024xbf16>
    %c0_1 = arith.constant 0 : index
    %c0_2 = arith.constant 0 : index
    %2 = vector.load %arg7[%c0_1, %c0_2] : memref<8x1024xbf16, #tpu.memory_space<vmem>>, vector<8x1024xbf16>
    tpu.vector_store %arg7[%c0_1, %c0_2], %1 {strides = array<i32>} : memref<8x1024xbf16, #tpu.memory_space<vmem>>, vector<8x1024xbf16>,
    %c0_3 = arith.constant 0 : index
    %c0_4 = arith.constant 0 : index
    %3 = vector.load %arg7[%c0_3, %c0_4] : memref<8x1024xbf16, #tpu.memory_space<vmem>>, vector<8x1024xbf16>
    %c0_5 = arith.constant 0 : index
    %c0_6 = arith.constant 0 : index
    %c0_7 = arith.constant 0 : index
    %4 = vector.load %arg2[%c0_5, %c0_6, %c0_7] : memref<4x1024x1024xbf16, #tpu.memory_space<vmem>>, vector<1x1024x1024xbf16>
    %5 = vector.shape_cast %4 : vector<1x1024x1024xbf16> to vector<1024x1024xbf16>
    %cst = arith.constant dense<0.000000e+00> : vector<8x1024xf32>
    %6 = tpu.matmul %3, %5, %cst {dimension_numbers = #tpu.dot_dimension_numbers<[1], [0], [0], [1], [0, 0, 1, 1], [], []>} : vector<8x1024xbf16>, vector<1024x1024xbf16>, vector<8x1024xf32> -> vector<8x1024xf32>
    %c0_8 = arith.constant 0 : index
    %c0_9 = arith.constant 0 : index
    %c0_10 = arith.constant 0 : index
    %7 = vector.load %arg3[%c0_8, %c0_9, %c0_10] : memref<4x1x1024xf32, #tpu.memory_space<vmem>>, vector<1x1x1024xf32>
    %8 = vector.shape_cast %7 : vector<1x1x1024xf32> to vector<1x1024xf32>
    %9 = vector.broadcast %8 : vector<1x1024xf32> to vector<8x1024xf32>
    %10 = arith.addf %6, %9 : vector<8x1024xf32>
    %cst_11 = arith.constant 0.000000e+00 : f32
    %11 = vector.broadcast %cst_11 : f32 to vector<8x1024xf32>
    %12 = arith.maximumf %10, %11 : vector<8x1024xf32>
    %13 = arith.truncf %12 : vector<8x1024xf32> to vector<8x1024xbf16>
    %c0_12 = arith.constant 0 : index
    %c0_13 = arith.constant 0 : index
    %14 = vector.load %arg7[%c0_12, %c0_13] : memref<8x1024xbf16, #tpu.memory_space<vmem>>, vector<8x1024xbf16>
    tpu.vector_store %arg7[%c0_12, %c0_13], %13 {strides = array<i32>} : memref<8x1024xbf16, #tpu.memory_space<vmem>>, vector<8x1024xbf16>,
    %c0_14 = arith.constant 0 : index
    %c0_15 = arith.constant 0 : index
    %15 = vector.load %arg7[%c0_14, %c0_15] : memref<8x1024xbf16, #tpu.memory_space<vmem>>, vector<8x1024xbf16>
    %c1 = arith.constant 1 : index
    %c0_16 = arith.constant 0 : index
    %c0_17 = arith.constant 0 : index
    %16 = vector.load %arg2[%c1, %c0_16, %c0_17] : memref<4x1024x1024xbf16, #tpu.memory_space<vmem>>, vector<1x1024x1024xbf16>
    %17 = vector.shape_cast %16 : vector<1x1024x1024xbf16> to vector<1024x1024xbf16>
    %cst_18 = arith.constant dense<0.000000e+00> : vector<8x1024xf32>
    %18 = tpu.matmul %15, %17, %cst_18 {dimension_numbers = #tpu.dot_dimension_numbers<[1], [0], [0], [1], [0, 0, 1, 1], [], []>} : vector<8x1024xbf16>, vector<1024x1024xbf16>, vector<8x1024xf32> -> vector<8x1024xf32>
    %c1_19 = arith.constant 1 : index
    %c0_20 = arith.constant 0 : index
    %c0_21 = arith.constant 0 : index
    %19 = vector.load %arg3[%c1_19, %c0_20, %c0_21] : memref<4x1x1024xf32, #tpu.memory_space<vmem>>, vector<1x1x1024xf32>
    %20 = vector.shape_cast %19 : vector<1x1x1024xf32> to vector<1x1024xf32>
    %21 = vector.broadcast %20 : vector<1x1024xf32> to vector<8x1024xf32>
    %22 = arith.addf %18, %21 : vector<8x1024xf32>
    %cst_22 = arith.constant 0.000000e+00 : f32
    %23 = vector.broadcast %cst_22 : f32 to vector<8x1024xf32>
    %24 = arith.maximumf %22, %23 : vector<8x1024xf32>
    %25 = arith.truncf %24 : vector<8x1024xf32> to vector<8x1024xbf16>
    %c0_23 = arith.constant 0 : index
    %c0_24 = arith.constant 0 : index
    %26 = vector.load %arg7[%c0_23, %c0_24] : memref<8x1024xbf16, #tpu.memory_space<vmem>>, vector<8x1024xbf16>
    tpu.vector_store %arg7[%c0_23, %c0_24], %25 {strides = array<i32>} : memref<8x1024xbf16, #tpu.memory_space<vmem>>, vector<8x1024xbf16>,
    %c0_25 = arith.constant 0 : index
    %c0_26 = arith.constant 0 : index
    %27 = vector.load %arg7[%c0_25, %c0_26] : memref<8x1024xbf16, #tpu.memory_space<vmem>>, vector<8x1024xbf16>
    %c2 = arith.constant 2 : index
    %c0_27 = arith.constant 0 : index
    %c0_28 = arith.constant 0 : index
    %28 = vector.load %arg2[%c2, %c0_27, %c0_28] : memref<4x1024x1024xbf16, #tpu.memory_space<vmem>>, vector<1x1024x1024xbf16>
    %29 = vector.shape_cast %28 : vector<1x1024x1024xbf16> to vector<1024x1024xbf16>
    %cst_29 = arith.constant dense<0.000000e+00> : vector<8x1024xf32>
    %30 = tpu.matmul %27, %29, %cst_29 {dimension_numbers = #tpu.dot_dimension_numbers<[1], [0], [0], [1], [0, 0, 1, 1], [], []>} : vector<8x1024xbf16>, vector<1024x1024xbf16>, vector<8x1024xf32> -> vector<8x1024xf32>
    %c2_30 = arith.constant 2 : index
    %c0_31 = arith.constant 0 : index
    %c0_32 = arith.constant 0 : index
    %31 = vector.load %arg3[%c2_30, %c0_31, %c0_32] : memref<4x1x1024xf32, #tpu.memory_space<vmem>>, vector<1x1x1024xf32>
    %32 = vector.shape_cast %31 : vector<1x1x1024xf32> to vector<1x1024xf32>
    %33 = vector.broadcast %32 : vector<1x1024xf32> to vector<8x1024xf32>
    %34 = arith.addf %30, %33 : vector<8x1024xf32>
    %cst_33 = arith.constant 0.000000e+00 : f32
    %35 = vector.broadcast %cst_33 : f32 to vector<8x1024xf32>
    %36 = arith.maximumf %34, %35 : vector<8x1024xf32>
    %37 = arith.truncf %36 : vector<8x1024xf32> to vector<8x1024xbf16>
    %c0_34 = arith.constant 0 : index
    %c0_35 = arith.constant 0 : index
    %38 = vector.load %arg7[%c0_34, %c0_35] : memref<8x1024xbf16, #tpu.memory_space<vmem>>, vector<8x1024xbf16>
    tpu.vector_store %arg7[%c0_34, %c0_35], %37 {strides = array<i32>} : memref<8x1024xbf16, #tpu.memory_space<vmem>>, vector<8x1024xbf16>,
    %c0_36 = arith.constant 0 : index
    %c0_37 = arith.constant 0 : index
    %39 = vector.load %arg7[%c0_36, %c0_37] : memref<8x1024xbf16, #tpu.memory_space<vmem>>, vector<8x1024xbf16>
    %c3 = arith.constant 3 : index
    %c0_38 = arith.constant 0 : index
    %c0_39 = arith.constant 0 : index
    %40 = vector.load %arg2[%c3, %c0_38, %c0_39] : memref<4x1024x1024xbf16, #tpu.memory_space<vmem>>, vector<1x1024x1024xbf16>
    %41 = vector.shape_cast %40 : vector<1x1024x1024xbf16> to vector<1024x1024xbf16>
    %cst_40 = arith.constant dense<0.000000e+00> : vector<8x1024xf32>
    %42 = tpu.matmul %39, %41, %cst_40 {dimension_numbers = #tpu.dot_dimension_numbers<[1], [0], [0], [1], [0, 0, 1, 1], [], []>} : vector<8x1024xbf16>, vector<1024x1024xbf16>, vector<8x1024xf32> -> vector<8x1024xf32>
    %c3_41 = arith.constant 3 : index
    %c0_42 = arith.constant 0 : index
    %c0_43 = arith.constant 0 : index
    %43 = vector.load %arg3[%c3_41, %c0_42, %c0_43] : memref<4x1x1024xf32, #tpu.memory_space<vmem>>, vector<1x1x1024xf32>
    %44 = vector.shape_cast %43 : vector<1x1x1024xf32> to vector<1x1024xf32>
    %45 = vector.broadcast %44 : vector<1x1024xf32> to vector<8x1024xf32>
    %46 = arith.addf %42, %45 : vector<8x1024xf32>
    %cst_44 = arith.constant 0.000000e+00 : f32
    %47 = vector.broadcast %cst_44 : f32 to vector<8x1024xf32>
    %48 = arith.maximumf %46, %47 : vector<8x1024xf32>
    %49 = arith.truncf %48 : vector<8x1024xf32> to vector<8x1024xbf16>
    %c0_45 = arith.constant 0 : index
    %c0_46 = arith.constant 0 : index
    %50 = vector.load %arg7[%c0_45, %c0_46] : memref<8x1024xbf16, #tpu.memory_space<vmem>>, vector<8x1024xbf16>
    tpu.vector_store %arg7[%c0_45, %c0_46], %49 {strides = array<i32>} : memref<8x1024xbf16, #tpu.memory_space<vmem>>, vector<8x1024xbf16>,
    %c0_47 = arith.constant 0 : index
    %c0_48 = arith.constant 0 : index
    %51 = vector.load %arg7[%c0_47, %c0_48] : memref<8x1024xbf16, #tpu.memory_space<vmem>>, vector<8x1024xbf16>
    %52 = arith.extf %51 : vector<8x1024xbf16> to vector<8x1024xf32>
    %c0_49 = arith.constant 0 : index
    %c0_50 = arith.constant 0 : index
    %53 = vector.load %arg4[%c0_49, %c0_50] : memref<1x1024xf32, #tpu.memory_space<vmem>>, vector<1x1024xf32>
    %54 = vector.broadcast %53 : vector<1x1024xf32> to vector<8x1024xf32>
    %55 = arith.mulf %52, %54 : vector<8x1024xf32>
    %cst_51 = arith.constant dense<0.000000e+00> : vector<8xf32>
    %56 = vector.multi_reduction <add>, %55, %cst_51 [1] : vector<8x1024xf32> to vector<8xf32>
    %57 = vector.shape_cast %56 : vector<8xf32> to vector<8x1xf32>
    %c0_52 = arith.constant 0 : index
    %c0_53 = arith.constant 0 : index
    %58 = vector.load %arg5[%c0_52, %c0_53] : memref<1x1xf32, #tpu.memory_space<vmem>>, vector<1x1xf32>
    %59 = vector.broadcast %58 : vector<1x1xf32> to vector<8x1xf32>
    %60 = arith.addf %57, %59 : vector<8x1xf32>
    %c0_54 = arith.constant 0 : index
    %c0_55 = arith.constant 0 : index
    %61 = vector.load %arg6[%c0_54, %c0_55] : memref<8x1xf32, #tpu.memory_space<vmem>>, vector<8x1xf32>
    tpu.vector_store %arg6[%c0_54, %c0_55], %60 {strides = array<i32>} : memref<8x1xf32, #tpu.memory_space<vmem>>, vector<8x1xf32>,
    return
  }
  func.func @transform_0(%arg0: i32) -> (i32, i32) {
    %c0_i32 = arith.constant 0 : i32
    %c0_i32_0 = arith.constant 0 : i32
    return %arg0, %c0_i32 : i32, i32
  }
  func.func @transform_1(%arg0: i32) -> (i32, i32, i32) {
    %c0_i32 = arith.constant 0 : i32
    %c0_i32_0 = arith.constant 0 : i32
    %c0_i32_1 = arith.constant 0 : i32
    %c0_i32_2 = arith.constant 0 : i32
    return %c0_i32, %c0_i32_0, %c0_i32_1 : i32, i32, i32
  }
  func.func @transform_2(%arg0: i32) -> (i32, i32, i32) {
    %c0_i32 = arith.constant 0 : i32
    %c0_i32_0 = arith.constant 0 : i32
    %c0_i32_1 = arith.constant 0 : i32
    %c0_i32_2 = arith.constant 0 : i32
    return %c0_i32, %c0_i32_0, %c0_i32_1 : i32, i32, i32
  }
  func.func @transform_3(%arg0: i32) -> (i32, i32) {
    %c0_i32 = arith.constant 0 : i32
    %c0_i32_0 = arith.constant 0 : i32
    %c0_i32_1 = arith.constant 0 : i32
    return %c0_i32, %c0_i32_0 : i32, i32
  }
  func.func @transform_4(%arg0: i32) -> (i32, i32) {
    %c0_i32 = arith.constant 0 : i32
    %c0_i32_0 = arith.constant 0 : i32
    %c0_i32_1 = arith.constant 0 : i32
    return %c0_i32, %c0_i32_0 : i32, i32
  }
  func.func @transform_5(%arg0: i32) -> (i32, i32) {
    %c0_i32 = arith.constant 0 : i32
    %c0_i32_0 = arith.constant 0 : i32
    return %arg0, %c0_i32 : i32, i32
  }
}

</mosaic_0001>

<bundles_post_ra>
// kernel: domain_classifier_forward.1
= control target key start
LH: loop header
LB: loop body
LE: loop exit
PB: predicated region body
PF: predicated region fallthrough
CT: control target
= control target key end

     0   :  { %s18531_s0 = inlined_call_operand.hbm [shape: f32[8,1024], index: 0, kind: input, shape index: {}]   ;;  %s18532_s1 = inlined_call_operand.hbm [shape: bf16[4,1024,1024], index: 1, kind: input, shape index: {}]   ;;  %s18533_s2 = inlined_call_operand.hbm [shape: f32[4,1,1024], index: 2, kind: input, shape index: {}]   ;;  %s18534_s3 = inlined_call_operand.hbm [shape: f32[1,1024], index: 3, kind: input, shape index: {}]   ;;  %s18535_s4 = inlined_call_operand.<no memory space> [shape: f32[1,1], index: 4, kind: input, shape index: {}]   ;;  %s18536_s5 = inlined_call_operand.vmem [shape: f32[8,1], index: 5, kind: output, shape index: {}]  }
   0x1   :  { %v10_v0 = vstv %s18535_s4 }
   0x2   :  { %11 = vst [vmem:[#allocation3] sm:$0x1] %v10_v0 }
   0x3   :  { %12 = vsyncpa [#allocation5], 0 }
   0x4   :  { %13 = vsyncpa [#allocation7], 0 }
   0x5   :  { %14 = vsyncpa [#allocation10], 0  ;;  %s18077_s20 = smov [#allocation6]   ;;  %s17983_s24 = scalar_lea.hbm %s18532_s1, 262144 }
   0x6   :  { %s30_s21 = sshll.u32 %s18077_s20, 4  ;;  %p17984_p0 = scmp.ne.s32.totalorder %s18532_s1, %s17983_s24  ;;  %s31_s21 = int_to_ptr.vmem [resolvable:$true] %s30_s21 }
   0x7   :  { %p17987_p1 = scmp.lt.u32.totalorder %s17983_s24, %s18532_s1 }
   0x9   :  { %p17989_p2 = pnand %p17987_p1, %p17984_p0 }
   0xb   :  { %17992 = shalt.err (!%p17989_p2)
}
   0xc   :  { %s17993_s4 = scalar_lea.vmem %s31_s21, 262144  ;;  %p17998_p4 = scmp.lt.s32.totalorder %s31_s21, %s31_s21 }
   0xd   :  { %p17994_p3 = scmp.ne.s32.totalorder %s31_s21, %s17993_s4  ;;  %p17999_p5 = scmp.lt.s32.totalorder %s17993_s4, %s17993_s4 }
   0xf   :  { %p18000_p6 = por %p17999_p5, %p17998_p4 }
  0x11   :  { %p18001_p7 = pnand %p18000_p6, %p17994_p3 }
  0x13   :  { %18004 = shalt.err (!%p18001_p7)
}
  0x14   :  { %s18078_s29 = smov 512   ;;  %s18079_s30 = smov 32  }
  0x15   :  { %36 = dma.hbm_to_vmem [thread:$0]  %s18532_s1, 262144, %s31_s21, [#allocation7], %s18078_s29, %s18078_s29, %s18079_s30  }
  0x16   :  { %s18080_s8 = smov [#allocation4]   ;;  %s18081_s10 = smov [#allocation8]  }
  0x17   :  { %s21_s9 = sshll.u32 %s18080_s8, 4  ;;  %s42_s11 = sshll.u32 %s18081_s10, 4  ;;  %s22_s9 = int_to_ptr.vmem [resolvable:$true] %s21_s9  ;;  %s43_s11 = int_to_ptr.vmem [resolvable:$true] %s42_s11 }
  0x18   :  { %s18005_s14 = scalar_lea.hbm %s18531_s0, 1024 }
  0x19   :  { %p18006_p8 = scmp.ne.s32.totalorder %s18531_s0, %s18005_s14  ;;  %p18009_p9 = scmp.lt.u32.totalorder %s18005_s14, %s18531_s0 }
  0x1b   :  { %p18011_p10 = pnand %p18009_p9, %p18006_p8 }
  0x1d   :  { %18014 = shalt.err (!%p18011_p10)
}
  0x1e   :  { %s18015_s1 = scalar_lea.vmem %s22_s9, 1024  ;;  %p18020_p12 = scmp.lt.s32.totalorder %s22_s9, %s22_s9 }
  0x1f   :  { %p18016_p11 = scmp.ne.s32.totalorder %s22_s9, %s18015_s1  ;;  %p18021_p13 = scmp.lt.s32.totalorder %s18015_s1, %s18015_s1 }
  0x21   :  { %p18022_p0 = por %p18021_p13, %p18020_p12 }
  0x23   :  { %p18023_p1 = pnand %p18022_p0, %p18016_p11 }
  0x25   :  { %18026 = shalt.err (!%p18023_p1)
}
  0x26   :  { %24 = dma.hbm_to_vmem [thread:$0]  %s18531_s0, 1024, %s22_s9, [#allocation5]  }
  0x27   :  { %s18027_s23 = scalar_lea.hbm %s18533_s2, 512 }
  0x28   :  { %p18028_p2 = scmp.ne.s32.totalorder %s18533_s2, %s18027_s23  ;;  %p18031_p3 = scmp.lt.u32.totalorder %s18027_s23, %s18533_s2 }
  0x2a   :  { %p18033_p4 = pnand %p18031_p3, %p18028_p2 }
  0x2c   :  { %18036 = shalt.err (!%p18033_p4)
}
  0x2d   :  { %s18037_s28 = scalar_lea.vmem %s43_s11, 512  ;;  %p18042_p6 = scmp.lt.s32.totalorder %s43_s11, %s43_s11 }
  0x2e   :  { %p18038_p5 = scmp.ne.s32.totalorder %s43_s11, %s18037_s28  ;;  %p18043_p7 = scmp.lt.s32.totalorder %s18037_s28, %s18037_s28 }
  0x30   :  { %p18044_p8 = por %p18043_p7, %p18042_p6 }
  0x32   :  { %p18045_p9 = pnand %p18044_p8, %p18038_p5 }
  0x34   :  { %18048 = shalt.err (!%p18045_p9)
}
  0x35   :  { %s18082_s0 = smov 128   ;;  %s18083_s4 = smov 8  }
  0x36   :  { %48 = dma.hbm_to_vmem [thread:$0]  %s18533_s2, 512, %s43_s11, [#allocation7], %s18082_s0, %s18082_s0, %s18083_s4  }
  0x37   :  { %s18084_s6 = smov [#allocation9]   ;;  %s18049_s10 = scalar_lea.hbm %s18534_s3, 128 }
  0x38   :  { %s55_s7 = sshll.u32 %s18084_s6, 4  ;;  %p18050_p10 = scmp.ne.s32.totalorder %s18534_s3, %s18049_s10  ;;  %s56_s7 = int_to_ptr.vmem [resolvable:$true] %s55_s7 }
  0x39   :  { %p18053_p11 = scmp.lt.u32.totalorder %s18049_s10, %s18534_s3 }
  0x3b   :  { %p18055_p12 = pnand %p18053_p11, %p18050_p10 }
  0x3d   :  { %18058 = shalt.err (!%p18055_p12)
}
  0x3e   :  { %s18059_s16 = scalar_lea.vmem %s56_s7, 128  ;;  %p18064_p0 = scmp.lt.s32.totalorder %s56_s7, %s56_s7 }
  0x3f   :  { %p18060_p13 = scmp.ne.s32.totalorder %s56_s7, %s18059_s16  ;;  %p18065_p1 = scmp.lt.s32.totalorder %s18059_s16, %s18059_s16 }
  0x41   :  { %p18066_p2 = por %p18065_p1, %p18064_p0 }
  0x43   :  { %p18067_p3 = pnand %p18066_p2, %p18060_p13 }
  0x45   :  { %18070 = shalt.err (!%p18067_p3)
}
  0x46   :  { %58 = dma.hbm_to_vmem [thread:$0]  %s18534_s3, 128, %s56_s7, [#allocation10]  }
  0x47   :  { %18071 = dma.done.wait [#allocation5], 1024  }
  0x48   :  { %18072 = vsyncadd [#allocation5], 4294966272 }
  0x49   :  { %18073 = dma.done.wait [#allocation7], 262656  }
  0x4a   :  { %18074 = vsyncadd [#allocation7], 4294704640 }
  0x4b   :  { %18075 = dma.done.wait [#allocation10], 128  }
  0x4c   :  { %18076 = vsyncadd [#allocation10], 4294967168  ;;  %v121_v1 = vld [vmem:[#allocation6] sm:$0xff]  ;;  %v122_v3 = vld [vmem:[#allocation6 + $0x8] sm:$0xff]  ;;  %vm15586_vm0 = vcmask 7168  }
  0x4d   :  { %v125_v2 = vld [vmem:[#allocation6 + $0x20] sm:$0xff]  ;;  %v126_v5 = vld [vmem:[#allocation6 + $0x28] sm:$0xff] }
  0x4e   :  { %v15608_v4 = vcombine.high %v121_v1, %v125_v2  ;;  %v15607_v6 = vcombine.low %v121_v1, %v125_v2  ;;  %v129_v7 = vld [vmem:[#allocation6 + $0x40] sm:$0xff]  ;;  %v15610_v9 = vcombine.high %v122_v3, %v126_v5  ;;  %v15609_v10 = vcombine.low %v122_v3, %v126_v5  ;;  %v130_v12 = vld [vmem:[#allocation6 + $0x48] sm:$0xff] }
  0x4f   :  { %v133_v8 = vld [vmem:[#allocation6 + $0x60] sm:$0xff]  ;;  %v134_v13 = vld [vmem:[#allocation6 + $0x68] sm:$0xff] }
  0x50   :  { %v15616_v11 = vcombine.high %v129_v7, %v133_v8  ;;  %v137_v14 = vld [vmem:[#allocation6 + $0x80] sm:$0xff]  ;;  %3263 = vmatprep.subr.bf16.mxu0 %v15608_v4  ;;  %v15618_v15 = vcombine.high %v130_v12, %v134_v13  ;;  %v138_v17 = vld [vmem:[#allocation6 + $0x88] sm:$0xff]  ;;  %3427 = vmatprep.subr.bf16.mxu1 %v15610_v9  ;;  %v15615_v19 = vcombine.low %v129_v7, %v133_v8 }
  0x51   :  { %v141_v16 = vld [vmem:[#allocation6 + $0xa0] sm:$0xff]  ;;  %v142_v18 = vld [vmem:[#allocation6 + $0xa8] sm:$0xff]  ;;  %3264 = vmatpush1.bf16.msra.mxu0 %v15607_v6  ;;  %3428 = vmatpush1.bf16.msra.mxu1 %v15609_v10  ;;  %v15617_v20 = vcombine.low %v130_v12, %v134_v13 }
  0x52   :  { %3265 = vmatprep.subr.bf16.mxu0 %v15616_v11  ;;  %v15624_v21 = vcombine.high %v137_v14, %v141_v16  ;;  %3429 = vmatprep.subr.bf16.mxu1 %v15618_v15  ;;  %v15626_v22 = vcombine.high %v138_v17, %v142_v18  ;;  %v145_v23 = vld [vmem:[#allocation6 + $0xc0] sm:$0xff]  ;;  %v146_v25 = vld [vmem:[#allocation6 + $0xc8] sm:$0xff]  ;;  %v15623_v27 = vcombine.low %v137_v14, %v141_v16 }
  0x53   :  { %v149_v24 = vld [vmem:[#allocation6 + $0xe0] sm:$0xff]  ;;  %v150_v26 = vld [vmem:[#allocation6 + $0xe8] sm:$0xff]  ;;  %v15625_v28 = vcombine.low %v138_v17, %v142_v18 }
  0x54   :  { %v15632_v29 = vcombine.high %v145_v23, %v149_v24  ;;  %v15634_v30 = vcombine.high %v146_v25, %v150_v26  ;;  %v153_v31 = vld [vmem:[#allocation6 + $0x100] sm:$0xff]  ;;  %v154_v33 = vld [vmem:[#allocation6 + $0x108] sm:$0xff]  ;;  %v15631_v35 = vcombine.low %v145_v23, %v149_v24  ;;  %v15633_v36 = vcombine.low %v146_v25, %v150_v26 }
  0x55   :  { %3266 = vmatpush1.bf16.msra.mxu0 %v15615_v19  ;;  %3430 = vmatpush1.bf16.msra.mxu1 %v15617_v20  ;;  %v157_v32 = vld [vmem:[#allocation6 + $0x120] sm:$0xff]  ;;  %v158_v34 = vld [vmem:[#allocation6 + $0x128] sm:$0xff] }
  0x56   :  { %3267 = vmatprep.subr.bf16.mxu0 %v15624_v21  ;;  %3431 = vmatprep.subr.bf16.mxu1 %v15626_v22  ;;  %v15640_v37 = vcombine.high %v153_v31, %v157_v32  ;;  %v15642_v38 = vcombine.high %v154_v33, %v158_v34  ;;  %v161_v39 = vld [vmem:[#allocation6 + $0x140] sm:$0xff]  ;;  %v162_v41 = vld [vmem:[#allocation6 + $0x148] sm:$0xff]  ;;  %v15639_v43 = vcombine.low %v153_v31, %v157_v32 }
  0x57   :  { %v165_v40 = vld [vmem:[#allocation6 + $0x160] sm:$0xff]  ;;  %v166_v42 = vld [vmem:[#allocation6 + $0x168] sm:$0xff]  ;;  %v15641_v44 = vcombine.low %v154_v33, %v158_v34 }
  0x58   :  { %v15648_v45 = vcombine.high %v161_v39, %v165_v40  ;;  %v15650_v46 = vcombine.high %v162_v41, %v166_v42  ;;  %v169_v47 = vld [vmem:[#allocation6 + $0x180] sm:$0xff]  ;;  %v170_v49 = vld [vmem:[#allocation6 + $0x188] sm:$0xff]  ;;  %v15647_v51 = vcombine.low %v161_v39, %v165_v40  ;;  %v15649_v52 = vcombine.low %v162_v41, %v166_v42 }
  0x59   :  { %3268 = vmatpush1.bf16.msra.mxu0 %v15623_v27  ;;  %3432 = vmatpush1.bf16.msra.mxu1 %v15625_v28  ;;  %v173_v48 = vld [vmem:[#allocation6 + $0x1a0] sm:$0xff]  ;;  %v174_v50 = vld [vmem:[#allocation6 + $0x1a8] sm:$0xff] }
  0x5a   :  { %3269 = vmatprep.subr.bf16.mxu0 %v15632_v29  ;;  %3433 = vmatprep.subr.bf16.mxu1 %v15634_v30  ;;  %v15656_v53 = vcombine.high %v169_v47, %v173_v48  ;;  %v74_v54 = vld [vmem:[#allocation4 + $0x8] sm:$0xff]  ;;  %v15658_v55 = vcombine.high %v170_v49, %v174_v50  ;;  %v177_v56 = vld [vmem:[#allocation6 + $0x1c0] sm:$0xff]  ;;  %v15655_v61 = vcombine.low %v169_v47, %v173_v48 }
  0x5b   :  { %v181_v57 = vld [vmem:[#allocation6 + $0x1e0] sm:$0xff]  ;;  %v18166_v58 = vpack.c.bf16 %v74_v54, %v74_v54  ;;  %v178_v59 = vld [vmem:[#allocation6 + $0x1c8] sm:$0xff]  ;;  %v15657_v62 = vcombine.low %v170_v49, %v174_v50 }
  0x5c   :  { %v182_v60 = vld [vmem:[#allocation6 + $0x1e8] sm:$0xff]  ;;  %v15664_v63 = vcombine.high %v177_v56, %v181_v57  ;;  %v185_v1 = vld [vmem:[#allocation6 + $0x200] sm:$0xff]  ;;  %v15663_v5 = vcombine.low %v177_v56, %v181_v57 }
  0x5d   :  { %3270 = vmatpush1.bf16.msra.mxu0 %v15631_v35  ;;  %3434 = vmatpush1.bf16.msra.mxu1 %v15633_v36  ;;  %v15666_v0 = vcombine.high %v178_v59, %v182_v60  ;;  %v189_v2 = vld [vmem:[#allocation6 + $0x220] sm:$0xff]  ;;  %v186_v3 = vld [vmem:[#allocation6 + $0x208] sm:$0xff]  ;;  %v15665_v6 = vcombine.low %v178_v59, %v182_v60 }
  0x5e   :  { %3271 = vmatprep.subr.bf16.mxu0 %v15640_v37  ;;  %3435 = vmatprep.subr.bf16.mxu1 %v15642_v38  ;;  %v190_v4 = vld [vmem:[#allocation6 + $0x228] sm:$0xff]  ;;  %v15672_v7 = vcombine.high %v185_v1, %v189_v2  ;;  %v193_v9 = vld [vmem:[#allocation6 + $0x240] sm:$0xff]  ;;  %v15671_v13 = vcombine.low %v185_v1, %v189_v2 }
  0x5f   :  { %3295 = vmatprep.mubr.bf16.mxu0 %v18166_v58  ;;  %3459 = vmatprep.mubr.bf16.mxu1 %v18166_v58  ;;  %v15674_v8 = vcombine.high %v186_v3, %v190_v4  ;;  %v197_v10 = vld [vmem:[#allocation6 + $0x260] sm:$0xff]  ;;  %v194_v11 = vld [vmem:[#allocation6 + $0x248] sm:$0xff]  ;;  %v15673_v14 = vcombine.low %v186_v3, %v190_v4 }
  0x60   :  { %v198_v12 = vld [vmem:[#allocation6 + $0x268] sm:$0xff]  ;;  %v15680_v15 = vcombine.high %v193_v9, %v197_v10  ;;  %v201_v17 = vld [vmem:[#allocation6 + $0x280] sm:$0xff]  ;;  %v15679_v21 = vcombine.low %v193_v9, %v197_v10 }
  0x61   :  { %3272 = vmatpush1.bf16.msra.mxu0 %v15639_v43  ;;  %3436 = vmatpush1.bf16.msra.mxu1 %v15641_v44  ;;  %v15682_v16 = vcombine.high %v194_v11, %v198_v12  ;;  %v205_v18 = vld [vmem:[#allocation6 + $0x2a0] sm:$0xff]  ;;  %v202_v19 = vld [vmem:[#allocation6 + $0x288] sm:$0xff]  ;;  %v15681_v22 = vcombine.low %v194_v11, %v198_v12 }
  0x62   :  { %3273 = vmatprep.subr.bf16.mxu0 %v15648_v45  ;;  %3437 = vmatprep.subr.bf16.mxu1 %v15650_v46  ;;  %v206_v20 = vld [vmem:[#allocation6 + $0x2a8] sm:$0xff]  ;;  %v15688_v23 = vcombine.high %v201_v17, %v205_v18  ;;  %v209_v25 = vld [vmem:[#allocation6 + $0x2c0] sm:$0xff]  ;;  %v15687_v29 = vcombine.low %v201_v17, %v205_v18 }
  0x63   :  { %v15690_v24 = vcombine.high %v202_v19, %v206_v20  ;;  %v213_v26 = vld [vmem:[#allocation6 + $0x2e0] sm:$0xff]  ;;  %v210_v27 = vld [vmem:[#allocation6 + $0x2c8] sm:$0xff]  ;;  %v15689_v30 = vcombine.low %v202_v19, %v206_v20 }
  0x64   :  { %v214_v28 = vld [vmem:[#allocation6 + $0x2e8] sm:$0xff]  ;;  %v15696_v31 = vcombine.high %v209_v25, %v213_v26  ;;  %v217_v33 = vld [vmem:[#allocation6 + $0x300] sm:$0xff]  ;;  %v15695_v37 = vcombine.low %v209_v25, %v213_v26 }
  0x65   :  { %3274 = vmatpush1.bf16.msra.mxu0 %v15647_v51  ;;  %3438 = vmatpush1.bf16.msra.mxu1 %v15649_v52  ;;  %v15698_v32 = vcombine.high %v210_v27, %v214_v28  ;;  %v221_v34 = vld [vmem:[#allocation6 + $0x320] sm:$0xff]  ;;  %v218_v35 = vld [vmem:[#allocation6 + $0x308] sm:$0xff]  ;;  %v15697_v38 = vcombine.low %v210_v27, %v214_v28 }
  0x66   :  { %3275 = vmatprep.subr.bf16.mxu0 %v15656_v53  ;;  %3439 = vmatprep.subr.bf16.mxu1 %v15658_v55  ;;  %v222_v36 = vld [vmem:[#allocation6 + $0x328] sm:$0xff]  ;;  %v15704_v39 = vcombine.high %v217_v33, %v221_v34  ;;  %v225_v41 = vld [vmem:[#allocation6 + $0x340] sm:$0xff]  ;;  %v15703_v45 = vcombine.low %v217_v33, %v221_v34 }
  0x67   :  { %v15706_v40 = vcombine.high %v218_v35, %v222_v36  ;;  %v229_v42 = vld [vmem:[#allocation6 + $0x360] sm:$0xff]  ;;  %v226_v43 = vld [vmem:[#allocation6 + $0x348] sm:$0xff]  ;;  %v15705_v46 = vcombine.low %v218_v35, %v222_v36 }
  0x68   :  { %v230_v44 = vld [vmem:[#allocation6 + $0x368] sm:$0xff]  ;;  %v15712_v47 = vcombine.high %v225_v41, %v229_v42  ;;  %v233_v49 = vld [vmem:[#allocation6 + $0x380] sm:$0xff]  ;;  %v15711_v53 = vcombine.low %v225_v41, %v229_v42 }
  0x69   :  { %3276 = vmatpush1.bf16.msra.mxu0 %v15655_v61  ;;  %3440 = vmatpush1.bf16.msra.mxu1 %v15657_v62  ;;  %v15714_v48 = vcombine.high %v226_v43, %v230_v44  ;;  %v237_v50 = vld [vmem:[#allocation6 + $0x3a0] sm:$0xff]  ;;  %v234_v51 = vld [vmem:[#allocation6 + $0x388] sm:$0xff]  ;;  %v15713_v54 = vcombine.low %v226_v43, %v230_v44 }
  0x6a   :  { %3277 = vmatprep.subr.bf16.mxu0 %v15664_v63  ;;  %3441 = vmatprep.subr.bf16.mxu1 %v15666_v0  ;;  %v238_v52 = vld [vmem:[#allocation6 + $0x3a8] sm:$0xff]  ;;  %v15720_v55 = vcombine.high %v233_v49, %v237_v50  ;;  %v241_v57 = vld [vmem:[#allocation6 + $0x3c0] sm:$0xff]  ;;  %v15719_v62 = vcombine.low %v233_v49, %v237_v50 }
  0x6b   :  { %v15722_v56 = vcombine.high %v234_v51, %v238_v52  ;;  %v245_v59 = vld [vmem:[#allocation6 + $0x3e0] sm:$0xff]  ;;  %v242_v60 = vld [vmem:[#allocation6 + $0x3c8] sm:$0xff]  ;;  %v15721_v63 = vcombine.low %v234_v51, %v238_v52 }
  0x6c   :  { %v246_v61 = vld [vmem:[#allocation6 + $0x3e8] sm:$0xff]  ;;  %v15728_v0 = vcombine.high %v241_v57, %v245_v59  ;;  %v249_v2 = vld [vmem:[#allocation6 + $0x400] sm:$0xff] }
  0x6d   :  { %3278 = vmatpush1.bf16.msra.mxu0 %v15663_v5  ;;  %3442 = vmatpush1.bf16.msra.mxu1 %v15665_v6  ;;  %v15730_v1 = vcombine.high %v242_v60, %v246_v61  ;;  %v253_v3 = vld [vmem:[#allocation6 + $0x420] sm:$0xff]  ;;  %v250_v4 = vld [vmem:[#allocation6 + $0x408] sm:$0xff]  ;;  %v15727_v6 = vcombine.low %v241_v57, %v245_v59 }
  0x6e   :  { %3279 = vmatprep.subr.bf16.mxu0 %v15672_v7  ;;  %3443 = vmatprep.subr.bf16.mxu1 %v15674_v8  ;;  %v254_v5 = vld [vmem:[#allocation6 + $0x428] sm:$0xff]  ;;  %v73_v7 = vld [vmem:[#allocation4] sm:$0xff]  ;;  %v15729_v8 = vcombine.low %v242_v60, %v246_v61  ;;  %v15736_v9 = vcombine.high %v249_v2, %v253_v3  ;;  %v15735_v17 = vcombine.low %v249_v2, %v253_v3 }
  0x6f   :  { %v15738_v10 = vcombine.high %v250_v4, %v254_v5  ;;  %v257_v11 = vld [vmem:[#allocation6 + $0x440] sm:$0xff]  ;;  %v15737_v18 = vcombine.low %v250_v4, %v254_v5  ;;  %v270_v25 = vld [vmem:[#allocation6 + $0x4a8] sm:$0xff] }
  0x70   :  { %v261_v12 = vld [vmem:[#allocation6 + $0x460] sm:$0xff]  ;;  %v278_v33 = vld [vmem:[#allocation6 + $0x4e8] sm:$0xff] }
  0x71   :  { %3280 = vmatpush1.bf16.msra.mxu0 %v15671_v13  ;;  %3444 = vmatpush1.bf16.msra.mxu1 %v15673_v14  ;;  %v18170_v13 = vpack.c.bf16 %v73_v7, %v73_v7  ;;  %v258_v14 = vld [vmem:[#allocation6 + $0x448] sm:$0xff]  ;;  %v15744_v19 = vcombine.high %v257_v11, %v261_v12  ;;  %v15743_v26 = vcombine.low %v257_v11, %v261_v12  ;;  %v313_v7 = vld [vmem:[#allocation6 + $0x600] sm:$0xff] }
  0x72   :  { %3281 = vmatprep.subr.bf16.mxu0 %v15680_v15  ;;  %3445 = vmatprep.subr.bf16.mxu1 %v15682_v16  ;;  %v262_v15 = vld [vmem:[#allocation6 + $0x468] sm:$0xff]  ;;  %v76_v16 = vld [vmem:[#allocation4 + $0x18] sm:$0xff] }
  0x73   :  { %v15746_v20 = vcombine.high %v258_v14, %v262_v15  ;;  %v15745_v27 = vcombine.low %v258_v14, %v262_v15  ;;  %v286_v41 = vld [vmem:[#allocation6 + $0x528] sm:$0xff] }
  0x74   :  { %v294_v49 = vld [vmem:[#allocation6 + $0x568] sm:$0xff] }
  0x75   :  { %3282 = vmatpush1.bf16.msra.mxu0 %v15679_v21  ;;  %3446 = vmatpush1.bf16.msra.mxu1 %v15681_v22  ;;  %v265_v21 = vld [vmem:[#allocation6 + $0x480] sm:$0xff]  ;;  %v302_v57 = vld [vmem:[#allocation6 + $0x5a8] sm:$0xff] }
  0x76   :  { %3283 = vmatprep.subr.bf16.mxu0 %v15688_v23  ;;  %3447 = vmatprep.subr.bf16.mxu1 %v15690_v24  ;;  %v269_v22 = vld [vmem:[#allocation6 + $0x4a0] sm:$0xff]  ;;  %v18172_v23 = vpack.c.bf16 %v76_v16, %v76_v16  ;;  %v266_v24 = vld [vmem:[#allocation6 + $0x488] sm:$0xff] }
  0x77   :  { %v15752_v28 = vcombine.high %v265_v21, %v269_v22  ;;  %v15751_v34 = vcombine.low %v265_v21, %v269_v22  ;;  %v15753_v35 = vcombine.low %v266_v24, %v270_v25  ;;  %v310_v2 = vld [vmem:[#allocation6 + $0x5e8] sm:$0xff]  ;;  %v321_v16 = vld [vmem:[#allocation6 + $0x640] sm:$0xff] }
  0x79   :  { %3284 = vmatpush1.bf16.msra.mxu0 %v15687_v29  ;;  %3448 = vmatpush1.bf16.msra.mxu1 %v15689_v30  ;;  %v15754_v29 = vcombine.high %v266_v24, %v270_v25  ;;  %v273_v30 = vld [vmem:[#allocation6 + $0x4c0] sm:$0xff] }
  0x7a   :  { %3285 = vmatprep.subr.bf16.mxu0 %v15696_v31  ;;  %3449 = vmatprep.subr.bf16.mxu1 %v15698_v32  ;;  %v277_v31 = vld [vmem:[#allocation6 + $0x4e0] sm:$0xff]  ;;  %v274_v32 = vld [vmem:[#allocation6 + $0x4c8] sm:$0xff] }
  0x7b   :  { %v15760_v36 = vcombine.high %v273_v30, %v277_v31  ;;  %v15759_v42 = vcombine.low %v273_v30, %v277_v31  ;;  %v15761_v43 = vcombine.low %v274_v32, %v278_v33  ;;  %v329_v25 = vld [vmem:[#allocation6 + $0x680] sm:$0xff] }
  0x7d   :  { %3286 = vmatpush1.bf16.msra.mxu0 %v15695_v37  ;;  %3450 = vmatpush1.bf16.msra.mxu1 %v15697_v38  ;;  %v15762_v37 = vcombine.high %v274_v32, %v278_v33  ;;  %v281_v38 = vld [vmem:[#allocation6 + $0x500] sm:$0xff] }
  0x7e   :  { %3287 = vmatprep.subr.bf16.mxu0 %v15704_v39  ;;  %3451 = vmatprep.subr.bf16.mxu1 %v15706_v40  ;;  %v285_v39 = vld [vmem:[#allocation6 + $0x520] sm:$0xff]  ;;  %v282_v40 = vld [vmem:[#allocation6 + $0x508] sm:$0xff] }
  0x7f   :  { %v15768_v44 = vcombine.high %v281_v38, %v285_v39  ;;  %v15767_v50 = vcombine.low %v281_v38, %v285_v39  ;;  %v15769_v51 = vcombine.low %v282_v40, %v286_v41  ;;  %v337_v33 = vld [vmem:[#allocation6 + $0x6c0] sm:$0xff] }
  0x81   :  { %3288 = vmatpush1.bf16.msra.mxu0 %v15703_v45  ;;  %3452 = vmatpush1.bf16.msra.mxu1 %v15705_v46  ;;  %v15770_v45 = vcombine.high %v282_v40, %v286_v41  ;;  %v289_v46 = vld [vmem:[#allocation6 + $0x540] sm:$0xff] }
  0x82   :  { %3289 = vmatprep.subr.bf16.mxu0 %v15712_v47  ;;  %3453 = vmatprep.subr.bf16.mxu1 %v15714_v48  ;;  %v293_v47 = vld [vmem:[#allocation6 + $0x560] sm:$0xff]  ;;  %v290_v48 = vld [vmem:[#allocation6 + $0x548] sm:$0xff] }
  0x83   :  { %v15776_v52 = vcombine.high %v289_v46, %v293_v47  ;;  %v15775_v59 = vcombine.low %v289_v46, %v293_v47  ;;  %v15777_v60 = vcombine.low %v290_v48, %v294_v49  ;;  %v345_v41 = vld [vmem:[#allocation6 + $0x700] sm:$0xff] }
  0x85   :  { %3290 = vmatpush1.bf16.msra.mxu0 %v15711_v53  ;;  %3454 = vmatpush1.bf16.msra.mxu1 %v15713_v54  ;;  %v15778_v53 = vcombine.high %v290_v48, %v294_v49  ;;  %v297_v54 = vld [vmem:[#allocation6 + $0x580] sm:$0xff] }
  0x86   :  { %3291 = vmatprep.subr.bf16.mxu0 %v15720_v55  ;;  %3455 = vmatprep.subr.bf16.mxu1 %v15722_v56  ;;  %v301_v55 = vld [vmem:[#allocation6 + $0x5a0] sm:$0xff]  ;;  %v298_v56 = vld [vmem:[#allocation6 + $0x588] sm:$0xff] }
  0x87   :  { %v15784_v61 = vcombine.high %v297_v54, %v301_v55  ;;  %v15783_v3 = vcombine.low %v297_v54, %v301_v55  ;;  %v15785_v4 = vcombine.low %v298_v56, %v302_v57  ;;  %v353_v49 = vld [vmem:[#allocation6 + $0x740] sm:$0xff] }
  0x89   :  { %3292 = vmatpush1.bf16.msra.mxu0 %v15719_v62  ;;  %3456 = vmatpush1.bf16.msra.mxu1 %v15721_v63  ;;  %v15786_v62 = vcombine.high %v298_v56, %v302_v57  ;;  %v305_v63 = vld [vmem:[#allocation6 + $0x5c0] sm:$0xff] }
  0x8a   :  { %3293 = vmatprep.subr.bf16.mxu0 %v15728_v0  ;;  %3457 = vmatprep.subr.bf16.mxu1 %v15730_v1  ;;  %v309_v0 = vld [vmem:[#allocation6 + $0x5e0] sm:$0xff]  ;;  %v306_v1 = vld [vmem:[#allocation6 + $0x5c8] sm:$0xff] }
  0x8b   :  { %v15792_v5 = vcombine.high %v305_v63, %v309_v0  ;;  %v15791_v11 = vcombine.low %v305_v63, %v309_v0  ;;  %v15793_v12 = vcombine.low %v306_v1, %v310_v2  ;;  %v361_v57 = vld [vmem:[#allocation6 + $0x780] sm:$0xff] }
  0x8d   :  { %3294 = vmatpush1.bf16.msra.mxu0 %v15727_v6  ;;  %3458 = vmatpush1.bf16.msra.mxu1 %v15729_v8  ;;  %v15794_v6 = vcombine.high %v306_v1, %v310_v2  ;;  %v317_v8 = vld [vmem:[#allocation6 + $0x620] sm:$0xff] }
  0x8e   :  { %3304 = vmatprep.subr.bf16.mxu0 %v15736_v9  ;;  %3468 = vmatprep.subr.bf16.mxu1 %v15738_v10  ;;  %v314_v9 = vld [vmem:[#allocation6 + $0x608] sm:$0xff]  ;;  %v15800_v14 = vcombine.high %v313_v7, %v317_v8  ;;  %v369_v2 = vld [vmem:[#allocation6 + $0x7c0] sm:$0xff] }
  0x8f   :  { %v318_v10 = vld [vmem:[#allocation6 + $0x628] sm:$0xff] }
  0x90   :  { %3296 = vmatmul.mubr.bf16.vlgmr.msra.gmra.mrb[0].mxu0 %v18170_v13  ;;  %3460 = vmatmul.mubr.bf16.vlgmr.msra.gmra.mrb[0].mxu1 %v18170_v13  ;;  %v15802_v15 = vcombine.high %v314_v9, %v318_v10  ;;  %v15801_v21 = vcombine.low %v314_v9, %v318_v10  ;;  %v377_v10 = vld [vmem:[#allocation6 + $0x800] sm:$0xff] }
  0x91   :  { %3305 = vmatpush1.bf16.msra.mxu0 %v15735_v17  ;;  %3469 = vmatpush1.bf16.msra.mxu1 %v15737_v18  ;;  %v325_v17 = vld [vmem:[#allocation6 + $0x660] sm:$0xff]  ;;  %v322_v18 = vld [vmem:[#allocation6 + $0x648] sm:$0xff] }
  0x92   :  { %3306 = vmatprep.subr.bf16.mxu0 %v15744_v19  ;;  %3470 = vmatprep.subr.bf16.mxu1 %v15746_v20  ;;  %v326_v19 = vld [vmem:[#allocation6 + $0x668] sm:$0xff]  ;;  %v15799_v20 = vcombine.low %v313_v7, %v317_v8  ;;  %v15808_v22 = vcombine.high %v321_v16, %v325_v17 }
  0x93   :  { %3336 = vmatprep.mubr.bf16.mxu0 %v18172_v23  ;;  %3500 = vmatprep.mubr.bf16.mxu1 %v18172_v23  ;;  %v15810_v24 = vcombine.high %v322_v18, %v326_v19  ;;  %v15809_v30 = vcombine.low %v322_v18, %v326_v19 }
  0x95   :  { %3307 = vmatpush1.bf16.msra.mxu0 %v15743_v26  ;;  %3471 = vmatpush1.bf16.msra.mxu1 %v15745_v27  ;;  %v333_v26 = vld [vmem:[#allocation6 + $0x6a0] sm:$0xff]  ;;  %v330_v27 = vld [vmem:[#allocation6 + $0x688] sm:$0xff] }
  0x96   :  { %3308 = vmatprep.subr.bf16.mxu0 %v15752_v28  ;;  %3472 = vmatprep.subr.bf16.mxu1 %v15754_v29  ;;  %v334_v28 = vld [vmem:[#allocation6 + $0x6a8] sm:$0xff]  ;;  %v15807_v29 = vcombine.low %v321_v16, %v325_v17  ;;  %v15816_v31 = vcombine.high %v329_v25, %v333_v26  ;;  %v75_v16 = vld [vmem:[#allocation4 + $0x10] sm:$0xff] }
  0x97   :  { %v15818_v32 = vcombine.high %v330_v27, %v334_v28  ;;  %v15817_v38 = vcombine.low %v330_v27, %v334_v28 }
  0x99   :  { %3309 = vmatpush1.bf16.msra.mxu0 %v15751_v34  ;;  %3473 = vmatpush1.bf16.msra.mxu1 %v15753_v35  ;;  %v341_v34 = vld [vmem:[#allocation6 + $0x6e0] sm:$0xff]  ;;  %v338_v35 = vld [vmem:[#allocation6 + $0x6c8] sm:$0xff] }
  0x9a   :  { %3310 = vmatprep.subr.bf16.mxu0 %v15760_v36  ;;  %3474 = vmatprep.subr.bf16.mxu1 %v15762_v37  ;;  %v342_v36 = vld [vmem:[#allocation6 + $0x6e8] sm:$0xff]  ;;  %v15815_v37 = vcombine.low %v329_v25, %v333_v26  ;;  %v15824_v39 = vcombine.high %v337_v33, %v341_v34 }
  0x9b   :  { %v15826_v40 = vcombine.high %v338_v35, %v342_v36  ;;  %v15825_v46 = vcombine.low %v338_v35, %v342_v36  ;;  %v390_v25 = vld [vmem:[#allocation6 + $0x868] sm:$0xff] }
  0x9c   :  { %v78_v26 = vld [vmem:[#allocation4 + $0x28] sm:$0xff] }
  0x9d   :  { %3311 = vmatpush1.bf16.msra.mxu0 %v15759_v42  ;;  %3475 = vmatpush1.bf16.msra.mxu1 %v15761_v43  ;;  %v349_v42 = vld [vmem:[#allocation6 + $0x720] sm:$0xff]  ;;  %v346_v43 = vld [vmem:[#allocation6 + $0x708] sm:$0xff] }
  0x9e   :  { %3312 = vmatprep.subr.bf16.mxu0 %v15768_v44  ;;  %3476 = vmatprep.subr.bf16.mxu1 %v15770_v45  ;;  %v350_v44 = vld [vmem:[#allocation6 + $0x728] sm:$0xff]  ;;  %v15823_v45 = vcombine.low %v337_v33, %v341_v34  ;;  %v15832_v47 = vcombine.high %v345_v41, %v349_v42  ;;  %v18180_v33 = vpack.c.bf16 %v78_v26, %v78_v26 }
  0x9f   :  { %v15834_v48 = vcombine.high %v346_v43, %v350_v44  ;;  %v15833_v54 = vcombine.low %v346_v43, %v350_v44  ;;  %v394_v34 = vld [vmem:[#allocation6 + $0x888] sm:$0xff] }
  0xa0   :  { %v398_v35 = vld [vmem:[#allocation6 + $0x8a8] sm:$0xff] }
  0xa1   :  { %3313 = vmatpush1.bf16.msra.mxu0 %v15767_v50  ;;  %3477 = vmatpush1.bf16.msra.mxu1 %v15769_v51  ;;  %v357_v50 = vld [vmem:[#allocation6 + $0x760] sm:$0xff]  ;;  %v354_v51 = vld [vmem:[#allocation6 + $0x748] sm:$0xff] }
  0xa2   :  { %3314 = vmatprep.subr.bf16.mxu0 %v15776_v52  ;;  %3478 = vmatprep.subr.bf16.mxu1 %v15778_v53  ;;  %v358_v52 = vld [vmem:[#allocation6 + $0x768] sm:$0xff]  ;;  %v15831_v53 = vcombine.low %v345_v41, %v349_v42  ;;  %v15840_v55 = vcombine.high %v353_v49, %v357_v50  ;;  %v405_v41 = vld [vmem:[#allocation6 + $0x8e0] sm:$0xff] }
  0xa3   :  { %v15842_v56 = vcombine.high %v354_v51, %v358_v52  ;;  %v15841_v63 = vcombine.low %v354_v51, %v358_v52  ;;  %v402_v42 = vld [vmem:[#allocation6 + $0x8c8] sm:$0xff] }
  0xa4   :  { %v406_v43 = vld [vmem:[#allocation6 + $0x8e8] sm:$0xff] }
  0xa5   :  { %3315 = vmatpush1.bf16.msra.mxu0 %v15775_v59  ;;  %3479 = vmatpush1.bf16.msra.mxu1 %v15777_v60  ;;  %v365_v59 = vld [vmem:[#allocation6 + $0x7a0] sm:$0xff]  ;;  %v362_v60 = vld [vmem:[#allocation6 + $0x788] sm:$0xff] }
  0xa6   :  { %3316 = vmatprep.subr.bf16.mxu0 %v15784_v61  ;;  %3480 = vmatprep.subr.bf16.mxu1 %v15786_v62  ;;  %v366_v61 = vld [vmem:[#allocation6 + $0x7a8] sm:$0xff]  ;;  %v15839_v62 = vcombine.low %v353_v49, %v357_v50  ;;  %v15848_v0 = vcombine.high %v361_v57, %v365_v59  ;;  %v413_v49 = vld [vmem:[#allocation6 + $0x920] sm:$0xff] }
  0xa7   :  { %v15850_v1 = vcombine.high %v362_v60, %v366_v61  ;;  %v15849_v7 = vcombine.low %v362_v60, %v366_v61  ;;  %v410_v50 = vld [vmem:[#allocation6 + $0x908] sm:$0xff] }
  0xa8   :  { %v414_v51 = vld [vmem:[#allocation6 + $0x928] sm:$0xff] }
  0xa9   :  { %3317 = vmatpush1.bf16.msra.mxu0 %v15783_v3  ;;  %3481 = vmatpush1.bf16.msra.mxu1 %v15785_v4  ;;  %v373_v3 = vld [vmem:[#allocation6 + $0x7e0] sm:$0xff]  ;;  %v370_v4 = vld [vmem:[#allocation6 + $0x7c8] sm:$0xff] }
  0xaa   :  { %3318 = vmatprep.subr.bf16.mxu0 %v15792_v5  ;;  %3482 = vmatprep.subr.bf16.mxu1 %v15794_v6  ;;  %v374_v5 = vld [vmem:[#allocation6 + $0x7e8] sm:$0xff]  ;;  %v15847_v6 = vcombine.low %v361_v57, %v365_v59  ;;  %v15856_v8 = vcombine.high %v369_v2, %v373_v3  ;;  %v421_v57 = vld [vmem:[#allocation6 + $0x960] sm:$0xff] }
  0xab   :  { %v15858_v9 = vcombine.high %v370_v4, %v374_v5  ;;  %v15857_v17 = vcombine.low %v370_v4, %v374_v5  ;;  %v418_v59 = vld [vmem:[#allocation6 + $0x948] sm:$0xff] }
  0xac   :  { %v422_v60 = vld [vmem:[#allocation6 + $0x968] sm:$0xff] }
  0xad   :  { %3319 = vmatpush1.bf16.msra.mxu0 %v15791_v11  ;;  %3483 = vmatpush1.bf16.msra.mxu1 %v15793_v12  ;;  %v381_v11 = vld [vmem:[#allocation6 + $0x820] sm:$0xff]  ;;  %v378_v12 = vld [vmem:[#allocation6 + $0x808] sm:$0xff] }
  0xae   :  { %3320 = vmatprep.subr.bf16.mxu0 %v15800_v14  ;;  %3484 = vmatprep.subr.bf16.mxu1 %v15802_v15  ;;  %v382_v14 = vld [vmem:[#allocation6 + $0x828] sm:$0xff]  ;;  %v15855_v15 = vcombine.low %v369_v2, %v373_v3  ;;  %v15864_v18 = vcombine.high %v377_v10, %v381_v11  ;;  %v15863_v27 = vcombine.low %v377_v10, %v381_v11  ;;  %v429_v2 = vld [vmem:[#allocation6 + $0x9a0] sm:$0xff] }
  0xaf   :  { %v15866_v19 = vcombine.high %v378_v12, %v382_v14  ;;  %v15865_v28 = vcombine.low %v378_v12, %v382_v14  ;;  %v426_v3 = vld [vmem:[#allocation6 + $0x988] sm:$0xff]  ;;  %v437_v10 = vld [vmem:[#allocation6 + $0x9e0] sm:$0xff] }
  0xb0   :  { %v430_v4 = vld [vmem:[#allocation6 + $0x9a8] sm:$0xff] }
  0xb1   :  { %3321 = vmatpush1.bf16.msra.mxu0 %v15799_v20  ;;  %3485 = vmatpush1.bf16.msra.mxu1 %v15801_v21  ;;  %v385_v20 = vld [vmem:[#allocation6 + $0x840] sm:$0xff]  ;;  %v434_v11 = vld [vmem:[#allocation6 + $0x9c8] sm:$0xff] }
  0xb2   :  { %3322 = vmatprep.subr.bf16.mxu0 %v15808_v22  ;;  %3486 = vmatprep.subr.bf16.mxu1 %v15810_v24  ;;  %v389_v21 = vld [vmem:[#allocation6 + $0x860] sm:$0xff]  ;;  %v18178_v22 = vpack.c.bf16 %v75_v16, %v75_v16  ;;  %v386_v24 = vld [vmem:[#allocation6 + $0x848] sm:$0xff] }
  0xb3   :  { %v15871_v36 = vcombine.low %v385_v20, %v389_v21  ;;  %v438_v12 = vld [vmem:[#allocation6 + $0x9e8] sm:$0xff] }
  0xb5   :  { %3323 = vmatpush1.bf16.msra.mxu0 %v15807_v29  ;;  %3487 = vmatpush1.bf16.msra.mxu1 %v15809_v30  ;;  %v15872_v29 = vcombine.high %v385_v20, %v389_v21  ;;  %v15874_v30 = vcombine.high %v386_v24, %v390_v25  ;;  %v442_v20 = vld [vmem:[#allocation6 + $0xa08] sm:$0xff] }
  0xb6   :  { %3324 = vmatprep.subr.bf16.mxu0 %v15816_v31  ;;  %3488 = vmatprep.subr.bf16.mxu1 %v15818_v32  ;;  %v393_v31 = vld [vmem:[#allocation6 + $0x880] sm:$0xff]  ;;  %v446_v21 = vld [vmem:[#allocation6 + $0xa28] sm:$0xff] }
  0xb7   :  { %v397_v32 = vld [vmem:[#allocation6 + $0x8a0] sm:$0xff] }
  0xb8   :  { %v15879_v44 = vcombine.low %v393_v31, %v397_v32 }
  0xb9   :  { %3325 = vmatpush1.bf16.msra.mxu0 %v15815_v37  ;;  %3489 = vmatpush1.bf16.msra.mxu1 %v15817_v38  ;;  %v15873_v37 = vcombine.low %v386_v24, %v390_v25  ;;  %v15880_v38 = vcombine.high %v393_v31, %v397_v32  ;;  %v15921_v25 = vcombine.low %v434_v11, %v438_v12  ;;  %v454_v31 = vld [vmem:[#allocation6 + $0xa68] sm:$0xff] }
  0xba   :  { %3326 = vmatprep.subr.bf16.mxu0 %v15824_v39  ;;  %3490 = vmatprep.subr.bf16.mxu1 %v15826_v40  ;;  %v15882_v39 = vcombine.high %v394_v34, %v398_v35  ;;  %v401_v40 = vld [vmem:[#allocation6 + $0x8c0] sm:$0xff] }
  0xbb   :  { %v15887_v52 = vcombine.low %v401_v40, %v405_v41 }
  0xbd   :  { %3327 = vmatpush1.bf16.msra.mxu0 %v15823_v45  ;;  %3491 = vmatpush1.bf16.msra.mxu1 %v15825_v46  ;;  %v15881_v45 = vcombine.low %v394_v34, %v398_v35  ;;  %v15888_v46 = vcombine.high %v401_v40, %v405_v41  ;;  %v15929_v34 = vcombine.low %v442_v20, %v446_v21  ;;  %v462_v40 = vld [vmem:[#allocation6 + $0xaa8] sm:$0xff] }
  0xbe   :  { %3328 = vmatprep.subr.bf16.mxu0 %v15832_v47  ;;  %3492 = vmatprep.subr.bf16.mxu1 %v15834_v48  ;;  %v15890_v47 = vcombine.high %v402_v42, %v406_v43  ;;  %v409_v48 = vld [vmem:[#allocation6 + $0x900] sm:$0xff] }
  0xbf   :  { %v15895_v61 = vcombine.low %v409_v48, %v413_v49 }
  0xc1   :  { %3329 = vmatpush1.bf16.msra.mxu0 %v15831_v53  ;;  %3493 = vmatpush1.bf16.msra.mxu1 %v15833_v54  ;;  %v15889_v53 = vcombine.low %v402_v42, %v406_v43  ;;  %v15896_v54 = vcombine.high %v409_v48, %v413_v49  ;;  %v470_v48 = vld [vmem:[#allocation6 + $0xae8] sm:$0xff] }
  0xc2   :  { %3330 = vmatprep.subr.bf16.mxu0 %v15840_v55  ;;  %3494 = vmatprep.subr.bf16.mxu1 %v15842_v56  ;;  %v15898_v55 = vcombine.high %v410_v50, %v414_v51  ;;  %v417_v56 = vld [vmem:[#allocation6 + $0x940] sm:$0xff] }
  0xc3   :  { %v15903_v5 = vcombine.low %v417_v56, %v421_v57 }
  0xc5   :  { %3331 = vmatpush1.bf16.msra.mxu0 %v15839_v62  ;;  %3495 = vmatpush1.bf16.msra.mxu1 %v15841_v63  ;;  %v15897_v62 = vcombine.low %v410_v50, %v414_v51  ;;  %v15904_v63 = vcombine.high %v417_v56, %v421_v57  ;;  %v478_v56 = vld [vmem:[#allocation6 + $0xb28] sm:$0xff] }
  0xc6   :  { %3332 = vmatprep.subr.bf16.mxu0 %v15848_v0  ;;  %3496 = vmatprep.subr.bf16.mxu1 %v15850_v1  ;;  %v15906_v0 = vcombine.high %v418_v59, %v422_v60  ;;  %v425_v1 = vld [vmem:[#allocation6 + $0x980] sm:$0xff] }
  0xc7   :  { %v15911_v14 = vcombine.low %v425_v1, %v429_v2 }
  0xc9   :  { %3333 = vmatpush1.bf16.msra.mxu0 %v15847_v6  ;;  %3497 = vmatpush1.bf16.msra.mxu1 %v15849_v7  ;;  %v15905_v6 = vcombine.low %v418_v59, %v422_v60  ;;  %v15912_v7 = vcombine.high %v425_v1, %v429_v2  ;;  %v486_v1 = vld [vmem:[#allocation6 + $0xb68] sm:$0xff] }
  0xca   :  { %3334 = vmatprep.subr.bf16.mxu0 %v15856_v8  ;;  %3498 = vmatprep.subr.bf16.mxu1 %v15858_v9  ;;  %v15914_v8 = vcombine.high %v426_v3, %v430_v4  ;;  %v433_v9 = vld [vmem:[#allocation6 + $0x9c0] sm:$0xff] }
  0xcb   :  { %v15920_v16 = vcombine.high %v433_v9, %v437_v10  ;;  %v15919_v24 = vcombine.low %v433_v9, %v437_v10  ;;  %v494_v9 = vld [vmem:[#allocation6 + $0xba8] sm:$0xff] }
  0xcd   :  { %3335 = vmatpush1.bf16.msra.mxu0 %v15855_v15  ;;  %3499 = vmatpush1.bf16.msra.mxu1 %v15857_v17  ;;  %v15913_v15 = vcombine.low %v426_v3, %v430_v4  ;;  %v15922_v17 = vcombine.high %v434_v11, %v438_v12 }
  0xce   :  { %3345 = vmatprep.subr.bf16.mxu0 %v15864_v18  ;;  %3509 = vmatprep.subr.bf16.mxu1 %v15866_v19  ;;  %v441_v18 = vld [vmem:[#allocation6 + $0xa00] sm:$0xff] }
  0xcf   :  { %v445_v19 = vld [vmem:[#allocation6 + $0xa20] sm:$0xff] }
  0xd0   :  { %3337 = vmatmul.mubr.bf16.vlgmr.msra.gmra.mrb[0].mxu0 %v18178_v22  ;;  %3501 = vmatmul.mubr.bf16.vlgmr.msra.gmra.mrb[0].mxu1 %v18178_v22  ;;  %v15928_v26 = vcombine.high %v441_v18, %v445_v19  ;;  %v15927_v32 = vcombine.low %v441_v18, %v445_v19  ;;  %v502_v18 = vld [vmem:[#allocation6 + $0xbe8] sm:$0xff] }
  0xd1   :  { %3346 = vmatpush1.bf16.msra.mxu0 %v15863_v27  ;;  %3510 = vmatpush1.bf16.msra.mxu1 %v15865_v28  ;;  %v15930_v27 = vcombine.high %v442_v20, %v446_v21  ;;  %v449_v28 = vld [vmem:[#allocation6 + $0xa40] sm:$0xff] }
  0xd2   :  { %3347 = vmatprep.subr.bf16.mxu0 %v15872_v29  ;;  %3511 = vmatprep.subr.bf16.mxu1 %v15874_v30  ;;  %v453_v29 = vld [vmem:[#allocation6 + $0xa60] sm:$0xff]  ;;  %v450_v30 = vld [vmem:[#allocation6 + $0xa48] sm:$0xff] }
  0xd3   :  { %3377 = vmatprep.mubr.bf16.mxu0 %v18180_v33  ;;  %3541 = vmatprep.mubr.bf16.mxu1 %v18180_v33  ;;  %v15936_v35 = vcombine.high %v449_v28, %v453_v29  ;;  %v15935_v41 = vcombine.low %v449_v28, %v453_v29  ;;  %v15937_v42 = vcombine.low %v450_v30, %v454_v31  ;;  %v510_v28 = vld [vmem:[#allocation6 + $0xc28] sm:$0xff] }
  0xd5   :  { %3348 = vmatpush1.bf16.msra.mxu0 %v15871_v36  ;;  %3512 = vmatpush1.bf16.msra.mxu1 %v15873_v37  ;;  %v15938_v36 = vcombine.high %v450_v30, %v454_v31  ;;  %v457_v37 = vld [vmem:[#allocation6 + $0xa80] sm:$0xff] }
  0xd6   :  { %3349 = vmatprep.subr.bf16.mxu0 %v15880_v38  ;;  %3513 = vmatprep.subr.bf16.mxu1 %v15882_v39  ;;  %v461_v38 = vld [vmem:[#allocation6 + $0xaa0] sm:$0xff]  ;;  %v458_v39 = vld [vmem:[#allocation6 + $0xa88] sm:$0xff] }
  0xd7   :  { %v15944_v43 = vcombine.high %v457_v37, %v461_v38  ;;  %v15943_v49 = vcombine.low %v457_v37, %v461_v38  ;;  %v15945_v50 = vcombine.low %v458_v39, %v462_v40  ;;  %v77_v30 = vld [vmem:[#allocation4 + $0x20] sm:$0xff]  ;;  %v514_v38 = vld [vmem:[#allocation6 + $0xc48] sm:$0xff] }
  0xd8   :  { %v18186_v37 = vpack.c.bf16 %v77_v30, %v77_v30 }
  0xd9   :  { %3350 = vmatpush1.bf16.msra.mxu0 %v15879_v44  ;;  %3514 = vmatpush1.bf16.msra.mxu1 %v15881_v45  ;;  %v15946_v44 = vcombine.high %v458_v39, %v462_v40  ;;  %v465_v45 = vld [vmem:[#allocation6 + $0xac0] sm:$0xff]  ;;  %v518_v39 = vld [vmem:[#allocation6 + $0xc68] sm:$0xff]  ;;  %v80_v40 = vld [vmem:[#allocation4 + $0x38] sm:$0xff] }
  0xda   :  { %3351 = vmatprep.subr.bf16.mxu0 %v15888_v46  ;;  %3515 = vmatprep.subr.bf16.mxu1 %v15890_v47  ;;  %v469_v46 = vld [vmem:[#allocation6 + $0xae0] sm:$0xff]  ;;  %v466_v47 = vld [vmem:[#allocation6 + $0xac8] sm:$0xff] }
  0xdb   :  { %v15952_v51 = vcombine.high %v465_v45, %v469_v46  ;;  %v15951_v57 = vcombine.low %v465_v45, %v469_v46  ;;  %v15953_v59 = vcombine.low %v466_v47, %v470_v48  ;;  %v521_v45 = vld [vmem:[#allocation6 + $0xc80] sm:$0xff] }
  0xdc   :  { %v525_v46 = vld [vmem:[#allocation6 + $0xca0] sm:$0xff] }
  0xdd   :  { %3352 = vmatpush1.bf16.msra.mxu0 %v15887_v52  ;;  %3516 = vmatpush1.bf16.msra.mxu1 %v15889_v53  ;;  %v15954_v52 = vcombine.high %v466_v47, %v470_v48  ;;  %v473_v53 = vld [vmem:[#allocation6 + $0xb00] sm:$0xff]  ;;  %v18188_v47 = vpack.c.bf16 %v80_v40, %v80_v40  ;;  %v522_v48 = vld [vmem:[#allocation6 + $0xc88] sm:$0xff] }
  0xde   :  { %3353 = vmatprep.subr.bf16.mxu0 %v15896_v54  ;;  %3517 = vmatprep.subr.bf16.mxu1 %v15898_v55  ;;  %v477_v54 = vld [vmem:[#allocation6 + $0xb20] sm:$0xff]  ;;  %v474_v55 = vld [vmem:[#allocation6 + $0xb08] sm:$0xff] }
  0xdf   :  { %v15960_v60 = vcombine.high %v473_v53, %v477_v54  ;;  %v15959_v2 = vcombine.low %v473_v53, %v477_v54  ;;  %v15961_v3 = vcombine.low %v474_v55, %v478_v56  ;;  %v529_v54 = vld [vmem:[#allocation6 + $0xcc0] sm:$0xff] }
  0xe1   :  { %3354 = vmatpush1.bf16.msra.mxu0 %v15895_v61  ;;  %3518 = vmatpush1.bf16.msra.mxu1 %v15897_v62  ;;  %v15962_v61 = vcombine.high %v474_v55, %v478_v56  ;;  %v481_v62 = vld [vmem:[#allocation6 + $0xb40] sm:$0xff]  ;;  %v530_v56 = vld [vmem:[#allocation6 + $0xcc8] sm:$0xff] }
  0xe2   :  { %3355 = vmatprep.subr.bf16.mxu0 %v15904_v63  ;;  %3519 = vmatprep.subr.bf16.mxu1 %v15906_v0  ;;  %v485_v63 = vld [vmem:[#allocation6 + $0xb60] sm:$0xff]  ;;  %v482_v0 = vld [vmem:[#allocation6 + $0xb48] sm:$0xff] }
  0xe3   :  { %v15968_v4 = vcombine.high %v481_v62, %v485_v63  ;;  %v15967_v10 = vcombine.low %v481_v62, %v485_v63  ;;  %v15969_v11 = vcombine.low %v482_v0, %v486_v1  ;;  %v533_v55 = vld [vmem:[#allocation6 + $0xce0] sm:$0xff] }
  0xe4   :  { %v537_v63 = vld [vmem:[#allocation6 + $0xd00] sm:$0xff] }
  0xe5   :  { %3356 = vmatpush1.bf16.msra.mxu0 %v15903_v5  ;;  %3520 = vmatpush1.bf16.msra.mxu1 %v15905_v6  ;;  %v15970_v5 = vcombine.high %v482_v0, %v486_v1  ;;  %v489_v6 = vld [vmem:[#allocation6 + $0xb80] sm:$0xff]  ;;  %v538_v1 = vld [vmem:[#allocation6 + $0xd08] sm:$0xff] }
  0xe6   :  { %3357 = vmatprep.subr.bf16.mxu0 %v15912_v7  ;;  %3521 = vmatprep.subr.bf16.mxu1 %v15914_v8  ;;  %v493_v7 = vld [vmem:[#allocation6 + $0xba0] sm:$0xff]  ;;  %v490_v8 = vld [vmem:[#allocation6 + $0xb88] sm:$0xff] }
  0xe7   :  { %v15976_v12 = vcombine.high %v489_v6, %v493_v7  ;;  %v15975_v19 = vcombine.low %v489_v6, %v493_v7  ;;  %v15977_v20 = vcombine.low %v490_v8, %v494_v9  ;;  %v541_v0 = vld [vmem:[#allocation6 + $0xd20] sm:$0xff] }
  0xe8   :  { %v545_v7 = vld [vmem:[#allocation6 + $0xd40] sm:$0xff] }
  0xe9   :  { %3358 = vmatpush1.bf16.msra.mxu0 %v15911_v14  ;;  %3522 = vmatpush1.bf16.msra.mxu1 %v15913_v15  ;;  %v15978_v14 = vcombine.high %v490_v8, %v494_v9  ;;  %v497_v15 = vld [vmem:[#allocation6 + $0xbc0] sm:$0xff]  ;;  %v546_v9 = vld [vmem:[#allocation6 + $0xd48] sm:$0xff] }
  0xea   :  { %3359 = vmatprep.subr.bf16.mxu0 %v15920_v16  ;;  %3523 = vmatprep.subr.bf16.mxu1 %v15922_v17  ;;  %v501_v16 = vld [vmem:[#allocation6 + $0xbe0] sm:$0xff]  ;;  %v498_v17 = vld [vmem:[#allocation6 + $0xbc8] sm:$0xff] }
  0xeb   :  { %v15984_v21 = vcombine.high %v497_v15, %v501_v16  ;;  %v15983_v29 = vcombine.low %v497_v15, %v501_v16  ;;  %v15985_v31 = vcombine.low %v498_v17, %v502_v18  ;;  %v549_v8 = vld [vmem:[#allocation6 + $0xd60] sm:$0xff] }
  0xec   :  { %v553_v16 = vld [vmem:[#allocation6 + $0xd80] sm:$0xff] }
  0xed   :  { %3360 = vmatpush1.bf16.msra.mxu0 %v15919_v24  ;;  %3524 = vmatpush1.bf16.msra.mxu1 %v15921_v25  ;;  %v15986_v24 = vcombine.high %v498_v17, %v502_v18  ;;  %v505_v25 = vld [vmem:[#allocation6 + $0xc00] sm:$0xff]  ;;  %v554_v18 = vld [vmem:[#allocation6 + $0xd88] sm:$0xff] }
  0xee   :  { %3361 = vmatprep.subr.bf16.mxu0 %v15928_v26  ;;  %3525 = vmatprep.subr.bf16.mxu1 %v15930_v27  ;;  %v509_v26 = vld [vmem:[#allocation6 + $0xc20] sm:$0xff]  ;;  %v506_v27 = vld [vmem:[#allocation6 + $0xc08] sm:$0xff] }
  0xef   :  { %v557_v17 = vld [vmem:[#allocation6 + $0xda0] sm:$0xff] }
  0xf0   :  { %v16039_v30 = vcombine.low %v553_v16, %v557_v17 }
  0xf1   :  { %3362 = vmatpush1.bf16.msra.mxu0 %v15927_v32  ;;  %3526 = vmatpush1.bf16.msra.mxu1 %v15929_v34  ;;  %v15992_v32 = vcombine.high %v505_v25, %v509_v26  ;;  %v15994_v34 = vcombine.high %v506_v27, %v510_v28 }
  0xf2   :  { %3363 = vmatprep.subr.bf16.mxu0 %v15936_v35  ;;  %3527 = vmatprep.subr.bf16.mxu1 %v15938_v36  ;;  %v513_v35 = vld [vmem:[#allocation6 + $0xc40] sm:$0xff] }
  0xf3   :  { %v517_v36 = vld [vmem:[#allocation6 + $0xc60] sm:$0xff] }
  0xf5   :  { %3364 = vmatpush1.bf16.msra.mxu0 %v15935_v41  ;;  %3528 = vmatpush1.bf16.msra.mxu1 %v15937_v42  ;;  %v15991_v41 = vcombine.low %v505_v25, %v509_v26  ;;  %v15993_v42 = vcombine.low %v506_v27, %v510_v28  ;;  %v561_v26 = vld [vmem:[#allocation6 + $0xdc0] sm:$0xff]  ;;  %v562_v28 = vld [vmem:[#allocation6 + $0xdc8] sm:$0xff] }
  0xf6   :  { %3365 = vmatprep.subr.bf16.mxu0 %v15944_v43  ;;  %3529 = vmatprep.subr.bf16.mxu1 %v15946_v44  ;;  %v16000_v43 = vcombine.high %v513_v35, %v517_v36  ;;  %v16002_v44 = vcombine.high %v514_v38, %v518_v39  ;;  %v565_v27 = vld [vmem:[#allocation6 + $0xde0] sm:$0xff] }
  0xf7   :  { %v16047_v40 = vcombine.low %v561_v26, %v565_v27 }
  0xf9   :  { %3366 = vmatpush1.bf16.msra.mxu0 %v15943_v49  ;;  %3530 = vmatpush1.bf16.msra.mxu1 %v15945_v50  ;;  %v526_v49 = vld [vmem:[#allocation6 + $0xca8] sm:$0xff]  ;;  %v15999_v50 = vcombine.low %v513_v35, %v517_v36  ;;  %v569_v35 = vld [vmem:[#allocation6 + $0xe00] sm:$0xff] }
  0xfa   :  { %3367 = vmatprep.subr.bf16.mxu0 %v15952_v51  ;;  %3531 = vmatprep.subr.bf16.mxu1 %v15954_v52  ;;  %v16001_v51 = vcombine.low %v514_v38, %v518_v39  ;;  %v16008_v52 = vcombine.high %v521_v45, %v525_v46  ;;  %v16010_v53 = vcombine.high %v522_v48, %v526_v49  ;;  %v573_v36 = vld [vmem:[#allocation6 + $0xe20] sm:$0xff]  ;;  %v570_v38 = vld [vmem:[#allocation6 + $0xe08] sm:$0xff] }
  0xfb   :  { %v574_v39 = vld [vmem:[#allocation6 + $0xe28] sm:$0xff] }
  0xfd   :  { %3368 = vmatpush1.bf16.msra.mxu0 %v15951_v57  ;;  %3532 = vmatpush1.bf16.msra.mxu1 %v15953_v59  ;;  %v534_v57 = vld [vmem:[#allocation6 + $0xce8] sm:$0xff]  ;;  %v16007_v59 = vcombine.low %v521_v45, %v525_v46  ;;  %v581_v45 = vld [vmem:[#allocation6 + $0xe60] sm:$0xff] }
  0xfe   :  { %3369 = vmatprep.subr.bf16.mxu0 %v15960_v60  ;;  %3533 = vmatprep.subr.bf16.mxu1 %v15962_v61  ;;  %v16009_v60 = vcombine.low %v522_v48, %v526_v49  ;;  %v16016_v61 = vcombine.high %v529_v54, %v533_v55  ;;  %v16018_v62 = vcombine.high %v530_v56, %v534_v57  ;;  %v578_v46 = vld [vmem:[#allocation6 + $0xe48] sm:$0xff] }
  0xff   :  { %v582_v48 = vld [vmem:[#allocation6 + $0xe68] sm:$0xff]  ;;  %v16055_v49 = vcombine.low %v569_v35, %v573_v36 }
 0x101   :  { %3370 = vmatpush1.bf16.msra.mxu0 %v15959_v2  ;;  %3534 = vmatpush1.bf16.msra.mxu1 %v15961_v3  ;;  %v542_v2 = vld [vmem:[#allocation6 + $0xd28] sm:$0xff]  ;;  %v16015_v3 = vcombine.low %v529_v54, %v533_v55  ;;  %v589_v54 = vld [vmem:[#allocation6 + $0xea0] sm:$0xff] }
 0x102   :  { %3371 = vmatprep.subr.bf16.mxu0 %v15968_v4  ;;  %3535 = vmatprep.subr.bf16.mxu1 %v15970_v5  ;;  %v16017_v4 = vcombine.low %v530_v56, %v534_v57  ;;  %v16024_v5 = vcombine.high %v537_v63, %v541_v0  ;;  %v16026_v6 = vcombine.high %v538_v1, %v542_v2  ;;  %v586_v55 = vld [vmem:[#allocation6 + $0xe88] sm:$0xff] }
 0x103   :  { %v590_v56 = vld [vmem:[#allocation6 + $0xea8] sm:$0xff] }
 0x105   :  { %3372 = vmatpush1.bf16.msra.mxu0 %v15967_v10  ;;  %3536 = vmatpush1.bf16.msra.mxu1 %v15969_v11  ;;  %v550_v10 = vld [vmem:[#allocation6 + $0xd68] sm:$0xff]  ;;  %v16023_v11 = vcombine.low %v537_v63, %v541_v0  ;;  %v597_v63 = vld [vmem:[#allocation6 + $0xee0] sm:$0xff] }
 0x106   :  { %3373 = vmatprep.subr.bf16.mxu0 %v15976_v12  ;;  %3537 = vmatprep.subr.bf16.mxu1 %v15978_v14  ;;  %v16025_v12 = vcombine.low %v538_v1, %v542_v2  ;;  %v16032_v14 = vcombine.high %v545_v7, %v549_v8  ;;  %v16034_v15 = vcombine.high %v546_v9, %v550_v10  ;;  %v594_v0 = vld [vmem:[#allocation6 + $0xec8] sm:$0xff] }
 0x107   :  { %v598_v1 = vld [vmem:[#allocation6 + $0xee8] sm:$0xff] }
 0x109   :  { %3374 = vmatpush1.bf16.msra.mxu0 %v15975_v19  ;;  %3538 = vmatpush1.bf16.msra.mxu1 %v15977_v20  ;;  %v558_v19 = vld [vmem:[#allocation6 + $0xda8] sm:$0xff]  ;;  %v16031_v20 = vcombine.low %v545_v7, %v549_v8  ;;  %v605_v7 = vld [vmem:[#allocation6 + $0xf20] sm:$0xff] }
 0x10a   :  { %3375 = vmatprep.subr.bf16.mxu0 %v15984_v21  ;;  %3539 = vmatprep.subr.bf16.mxu1 %v15986_v24  ;;  %v16033_v21 = vcombine.low %v546_v9, %v550_v10  ;;  %v16040_v24 = vcombine.high %v553_v16, %v557_v17  ;;  %v16042_v25 = vcombine.high %v554_v18, %v558_v19  ;;  %v602_v8 = vld [vmem:[#allocation6 + $0xf08] sm:$0xff]  ;;  %v613_v16 = vld [vmem:[#allocation6 + $0xf60] sm:$0xff] }
 0x10b   :  { %v606_v9 = vld [vmem:[#allocation6 + $0xf28] sm:$0xff] }
 0x10c   :  { %v610_v17 = vld [vmem:[#allocation6 + $0xf48] sm:$0xff] }
 0x10d   :  { %3376 = vmatpush1.bf16.msra.mxu0 %v15983_v29  ;;  %3540 = vmatpush1.bf16.msra.mxu1 %v15985_v31  ;;  %v566_v29 = vld [vmem:[#allocation6 + $0xde8] sm:$0xff]  ;;  %v16041_v31 = vcombine.low %v554_v18, %v558_v19 }
 0x10e   :  { %3386 = vmatprep.subr.bf16.mxu0 %v15992_v32  ;;  %3550 = vmatprep.subr.bf16.mxu1 %v15994_v34  ;;  %v16048_v32 = vcombine.high %v561_v26, %v565_v27  ;;  %v16050_v34 = vcombine.high %v562_v28, %v566_v29  ;;  %v614_v18 = vld [vmem:[#allocation6 + $0xf68] sm:$0xff]  ;;  %v621_v26 = vld [vmem:[#allocation6 + $0xfa0] sm:$0xff] }
 0x10f   :  { %v618_v27 = vld [vmem:[#allocation6 + $0xf88] sm:$0xff] }
 0x110   :  { %3378 = vmatmul.mubr.bf16.vlgmr.msra.gmra.mrb[0].mxu0 %v18186_v37  ;;  %3542 = vmatmul.mubr.bf16.vlgmr.msra.gmra.mrb[0].mxu1 %v18186_v37 }
 0x111   :  { %3387 = vmatpush1.bf16.msra.mxu0 %v15991_v41  ;;  %3551 = vmatpush1.bf16.msra.mxu1 %v15993_v42  ;;  %v16049_v41 = vcombine.low %v562_v28, %v566_v29  ;;  %v16056_v42 = vcombine.high %v569_v35, %v573_v36  ;;  %v622_v28 = vld [vmem:[#allocation6 + $0xfa8] sm:$0xff]  ;;  %v629_v35 = vld [vmem:[#allocation6 + $0xfe0] sm:$0xff] }
 0x112   :  { %3388 = vmatprep.subr.bf16.mxu0 %v16000_v43  ;;  %3552 = vmatprep.subr.bf16.mxu1 %v16002_v44  ;;  %v16058_v43 = vcombine.high %v570_v38, %v574_v39  ;;  %v577_v44 = vld [vmem:[#allocation6 + $0xe40] sm:$0xff]  ;;  %v626_v36 = vld [vmem:[#allocation6 + $0xfc8] sm:$0xff] }
 0x113   :  { %3418 = vmatprep.mubr.bf16.mxu0 %v18188_v47  ;;  %3582 = vmatprep.mubr.bf16.mxu1 %v18188_v47  ;;  %v16063_v57 = vcombine.low %v577_v44, %v581_v45 }
 0x115   :  { %3389 = vmatpush1.bf16.msra.mxu0 %v15999_v50  ;;  %3553 = vmatpush1.bf16.msra.mxu1 %v16001_v51  ;;  %v16057_v50 = vcombine.low %v570_v38, %v574_v39  ;;  %v16064_v51 = vcombine.high %v577_v44, %v581_v45  ;;  %v630_v38 = vld [vmem:[#allocation6 + $0xfe8] sm:$0xff]  ;;  %v127_v44 = vld [vmem:[#allocation6 + $0x30] sm:$0xff]  ;;  %v124_v45 = vld [vmem:[#allocation6 + $0x18] sm:$0xff] }
 0x116   :  { %3390 = vmatprep.subr.bf16.mxu0 %v16008_v52  ;;  %3554 = vmatprep.subr.bf16.mxu1 %v16010_v53  ;;  %v16066_v52 = vcombine.high %v578_v46, %v582_v48  ;;  %v585_v53 = vld [vmem:[#allocation6 + $0xe80] sm:$0xff] }
 0x117   :  { %v16071_v2 = vcombine.low %v585_v53, %v589_v54 }
 0x119   :  { %3391 = vmatpush1.bf16.msra.mxu0 %v16007_v59  ;;  %3555 = vmatpush1.bf16.msra.mxu1 %v16009_v60  ;;  %v16065_v59 = vcombine.low %v578_v46, %v582_v48  ;;  %v16072_v60 = vcombine.high %v585_v53, %v589_v54  ;;  %v128_v46 = vld [vmem:[#allocation6 + $0x38] sm:$0xff]  ;;  %v131_v53 = vld [vmem:[#allocation6 + $0x50] sm:$0xff] }
 0x11a   :  { %3392 = vmatprep.subr.bf16.mxu0 %v16016_v61  ;;  %3556 = vmatprep.subr.bf16.mxu1 %v16018_v62  ;;  %v16074_v61 = vcombine.high %v586_v55, %v590_v56  ;;  %v593_v62 = vld [vmem:[#allocation6 + $0xec0] sm:$0xff]  ;;  %v135_v54 = vld [vmem:[#allocation6 + $0x70] sm:$0xff] }
 0x11b   :  { %v16079_v10 = vcombine.low %v593_v62, %v597_v63 }
 0x11d   :  { %3393 = vmatpush1.bf16.msra.mxu0 %v16015_v3  ;;  %3557 = vmatpush1.bf16.msra.mxu1 %v16017_v4  ;;  %v16073_v3 = vcombine.low %v586_v55, %v590_v56  ;;  %v16080_v4 = vcombine.high %v593_v62, %v597_v63  ;;  %v132_v56 = vld [vmem:[#allocation6 + $0x58] sm:$0xff]  ;;  %v139_v63 = vld [vmem:[#allocation6 + $0x90] sm:$0xff] }
 0x11e   :  { %3394 = vmatprep.subr.bf16.mxu0 %v16024_v5  ;;  %3558 = vmatprep.subr.bf16.mxu1 %v16026_v6  ;;  %v16082_v5 = vcombine.high %v594_v0, %v598_v1  ;;  %v601_v6 = vld [vmem:[#allocation6 + $0xf00] sm:$0xff] }
 0x11f   :  { %v16087_v19 = vcombine.low %v601_v6, %v605_v7 }
 0x121   :  { %3395 = vmatpush1.bf16.msra.mxu0 %v16023_v11  ;;  %3559 = vmatpush1.bf16.msra.mxu1 %v16025_v12  ;;  %v16081_v11 = vcombine.low %v594_v0, %v598_v1  ;;  %v16088_v12 = vcombine.high %v601_v6, %v605_v7  ;;  %v143_v0 = vld [vmem:[#allocation6 + $0xb0] sm:$0xff]  ;;  %v140_v1 = vld [vmem:[#allocation6 + $0x98] sm:$0xff] }
 0x122   :  { %3396 = vmatprep.subr.bf16.mxu0 %v16032_v14  ;;  %3560 = vmatprep.subr.bf16.mxu1 %v16034_v15  ;;  %v16090_v14 = vcombine.high %v602_v8, %v606_v9  ;;  %v609_v15 = vld [vmem:[#allocation6 + $0xf40] sm:$0xff]  ;;  %v147_v7 = vld [vmem:[#allocation6 + $0xd0] sm:$0xff] }
 0x123   :  { %v16095_v29 = vcombine.low %v609_v15, %v613_v16 }
 0x125   :  { %3397 = vmatpush1.bf16.msra.mxu0 %v16031_v20  ;;  %3561 = vmatpush1.bf16.msra.mxu1 %v16033_v21  ;;  %v16089_v20 = vcombine.low %v602_v8, %v606_v9  ;;  %v16096_v21 = vcombine.high %v609_v15, %v613_v16  ;;  %v151_v8 = vld [vmem:[#allocation6 + $0xf0] sm:$0xff]  ;;  %v148_v9 = vld [vmem:[#allocation6 + $0xd8] sm:$0xff] }
 0x126   :  { %3398 = vmatprep.subr.bf16.mxu0 %v16040_v24  ;;  %3562 = vmatprep.subr.bf16.mxu1 %v16042_v25  ;;  %v16098_v24 = vcombine.high %v610_v17, %v614_v18  ;;  %v617_v25 = vld [vmem:[#allocation6 + $0xf80] sm:$0xff]  ;;  %v155_v16 = vld [vmem:[#allocation6 + $0x110] sm:$0xff] }
 0x127   :  { %v16103_v39 = vcombine.low %v617_v25, %v621_v26 }
 0x129   :  { %3399 = vmatpush1.bf16.msra.mxu0 %v16039_v30  ;;  %3563 = vmatpush1.bf16.msra.mxu1 %v16041_v31  ;;  %v16097_v30 = vcombine.low %v610_v17, %v614_v18  ;;  %v16104_v31 = vcombine.high %v617_v25, %v621_v26  ;;  %v159_v17 = vld [vmem:[#allocation6 + $0x130] sm:$0xff]  ;;  %v156_v18 = vld [vmem:[#allocation6 + $0x118] sm:$0xff] }
 0x12a   :  { %3400 = vmatprep.subr.bf16.mxu0 %v16048_v32  ;;  %3564 = vmatprep.subr.bf16.mxu1 %v16050_v34  ;;  %v16106_v32 = vcombine.high %v618_v27, %v622_v28  ;;  %v625_v34 = vld [vmem:[#allocation6 + $0xfc0] sm:$0xff]  ;;  %v163_v25 = vld [vmem:[#allocation6 + $0x150] sm:$0xff] }
 0x12b   :  { %v16111_v48 = vcombine.low %v625_v34, %v629_v35  ;;  %v167_v26 = vld [vmem:[#allocation6 + $0x170] sm:$0xff] }
 0x12d   :  { %3401 = vmatpush1.bf16.msra.mxu0 %v16047_v40  ;;  %3565 = vmatpush1.bf16.msra.mxu1 %v16049_v41  ;;  %v16105_v40 = vcombine.low %v618_v27, %v622_v28  ;;  %v16112_v41 = vcombine.high %v625_v34, %v629_v35  ;;  %v164_v27 = vld [vmem:[#allocation6 + $0x158] sm:$0xff]  ;;  %v171_v34 = vld [vmem:[#allocation6 + $0x190] sm:$0xff] }
 0x12e   :  { %3402 = vmatprep.subr.bf16.mxu0 %v16056_v42  ;;  %3566 = vmatprep.subr.bf16.mxu1 %v16058_v43  ;;  %v16114_v42 = vcombine.high %v626_v36, %v630_v38  ;;  %v123_v43 = vld [vmem:[#allocation6 + $0x10] sm:$0xff]  ;;  %v168_v28 = vld [vmem:[#allocation6 + $0x178] sm:$0xff] }
 0x12f   :  { %v175_v35 = vld [vmem:[#allocation6 + $0x1b0] sm:$0xff] }
 0x131   :  { %3403 = vmatpush1.bf16.msra.mxu0 %v16055_v49  ;;  %3567 = vmatpush1.bf16.msra.mxu1 %v16057_v50  ;;  %v79_v49 = vld [vmem:[#allocation4 + $0x30] sm:$0xff]  ;;  %v16113_v50 = vcombine.low %v626_v36, %v630_v38  ;;  %v172_v36 = vld [vmem:[#allocation6 + $0x198] sm:$0xff] }
 0x132   :  { %3404 = vmatprep.subr.bf16.mxu0 %v16064_v51  ;;  %3568 = vmatprep.subr.bf16.mxu1 %v16066_v52  ;;  %v15612_v51 = vcombine.high %v123_v43, %v127_v44  ;;  %v15614_v52 = vcombine.high %v124_v45, %v128_v46  ;;  %v18194_v55 = vpack.c.bf16 %v79_v49, %v79_v49  ;;  %v176_v38 = vld [vmem:[#allocation6 + $0x1b8] sm:$0xff] }
 0x133   :  { %v15661_v49 = vcombine.low %v172_v36, %v176_v38 }
 0x135   :  { %3405 = vmatpush1.bf16.msra.mxu0 %v16063_v57  ;;  %3569 = vmatpush1.bf16.msra.mxu1 %v16065_v59  ;;  %v136_v57 = vld [vmem:[#allocation6 + $0x78] sm:$0xff]  ;;  %v15611_v59 = vcombine.low %v123_v43, %v127_v44  ;;  %v179_v43 = vld [vmem:[#allocation6 + $0x1d0] sm:$0xff] }
 0x136   :  { %3406 = vmatprep.subr.bf16.mxu0 %v16072_v60  ;;  %3570 = vmatprep.subr.bf16.mxu1 %v16074_v61  ;;  %v15613_v60 = vcombine.low %v124_v45, %v128_v46  ;;  %v15620_v61 = vcombine.high %v131_v53, %v135_v54  ;;  %v15622_v62 = vcombine.high %v132_v56, %v136_v57  ;;  %v183_v44 = vld [vmem:[#allocation6 + $0x1f0] sm:$0xff]  ;;  %v180_v45 = vld [vmem:[#allocation6 + $0x1d8] sm:$0xff] }
 0x137   :  { %v184_v46 = vld [vmem:[#allocation6 + $0x1f8] sm:$0xff] }
 0x139   :  { %3407 = vmatpush1.bf16.msra.mxu0 %v16071_v2  ;;  %3571 = vmatpush1.bf16.msra.mxu1 %v16073_v3  ;;  %v144_v2 = vld [vmem:[#allocation6 + $0xb8] sm:$0xff]  ;;  %v15619_v3 = vcombine.low %v131_v53, %v135_v54  ;;  %v191_v53 = vld [vmem:[#allocation6 + $0x230] sm:$0xff] }
 0x13a   :  { %3408 = vmatprep.subr.bf16.mxu0 %v16080_v4  ;;  %3572 = vmatprep.subr.bf16.mxu1 %v16082_v5  ;;  %v15621_v4 = vcombine.low %v132_v56, %v136_v57  ;;  %v15628_v5 = vcombine.high %v139_v63, %v143_v0  ;;  %v15630_v6 = vcombine.high %v140_v1, %v144_v2  ;;  %v188_v54 = vld [vmem:[#allocation6 + $0x218] sm:$0xff] }
 0x13b   :  { %v192_v56 = vld [vmem:[#allocation6 + $0x238] sm:$0xff]  ;;  %v15667_v57 = vcombine.low %v179_v43, %v183_v44 }
 0x13d   :  { %3409 = vmatpush1.bf16.msra.mxu0 %v16079_v10  ;;  %3573 = vmatpush1.bf16.msra.mxu1 %v16081_v11  ;;  %v152_v10 = vld [vmem:[#allocation6 + $0xf8] sm:$0xff]  ;;  %v15627_v11 = vcombine.low %v139_v63, %v143_v0  ;;  %v199_v63 = vld [vmem:[#allocation6 + $0x270] sm:$0xff] }
 0x13e   :  { %3410 = vmatprep.subr.bf16.mxu0 %v16088_v12  ;;  %3574 = vmatprep.subr.bf16.mxu1 %v16090_v14  ;;  %v15629_v12 = vcombine.low %v140_v1, %v144_v2  ;;  %v15636_v14 = vcombine.high %v147_v7, %v151_v8  ;;  %v15638_v15 = vcombine.high %v148_v9, %v152_v10  ;;  %v196_v0 = vld [vmem:[#allocation6 + $0x258] sm:$0xff] }
 0x13f   :  { %v200_v1 = vld [vmem:[#allocation6 + $0x278] sm:$0xff] }
 0x141   :  { %3411 = vmatpush1.bf16.msra.mxu0 %v16087_v19  ;;  %3575 = vmatpush1.bf16.msra.mxu1 %v16089_v20  ;;  %v160_v19 = vld [vmem:[#allocation6 + $0x138] sm:$0xff]  ;;  %v15635_v20 = vcombine.low %v147_v7, %v151_v8  ;;  %v207_v7 = vld [vmem:[#allocation6 + $0x2b0] sm:$0xff] }
 0x142   :  { %3412 = vmatprep.subr.bf16.mxu0 %v16096_v21  ;;  %3576 = vmatprep.subr.bf16.mxu1 %v16098_v24  ;;  %v15637_v21 = vcombine.low %v148_v9, %v152_v10  ;;  %v15644_v24 = vcombine.high %v155_v16, %v159_v17  ;;  %v204_v8 = vld [vmem:[#allocation6 + $0x298] sm:$0xff] }
 0x143   :  { %v208_v9 = vld [vmem:[#allocation6 + $0x2b8] sm:$0xff] }
 0x145   :  { %3413 = vmatpush1.bf16.msra.mxu0 %v16095_v29  ;;  %3577 = vmatpush1.bf16.msra.mxu1 %v16097_v30  ;;  %v15643_v29 = vcombine.low %v155_v16, %v159_v17  ;;  %v15645_v30 = vcombine.low %v156_v18, %v160_v19  ;;  %v215_v16 = vld [vmem:[#allocation6 + $0x2f0] sm:$0xff]  ;;  %v212_v17 = vld [vmem:[#allocation6 + $0x2d8] sm:$0xff] }
 0x146   :  { %3414 = vmatprep.subr.bf16.mxu0 %v16104_v31  ;;  %3578 = vmatprep.subr.bf16.mxu1 %v16106_v32  ;;  %v15652_v31 = vcombine.high %v163_v25, %v167_v26  ;;  %v15654_v32 = vcombine.high %v164_v27, %v168_v28 }
 0x149   :  { %3415 = vmatpush1.bf16.msra.mxu0 %v16103_v39  ;;  %3579 = vmatpush1.bf16.msra.mxu1 %v16105_v40  ;;  %v15651_v39 = vcombine.low %v163_v25, %v167_v26  ;;  %v15653_v40 = vcombine.low %v164_v27, %v168_v28  ;;  %v223_v25 = vld [vmem:[#allocation6 + $0x330] sm:$0xff]  ;;  %v220_v26 = vld [vmem:[#allocation6 + $0x318] sm:$0xff] }
 0x14a   :  { %3416 = vmatprep.subr.bf16.mxu0 %v16112_v41  ;;  %3580 = vmatprep.subr.bf16.mxu1 %v16114_v42  ;;  %v15660_v41 = vcombine.high %v171_v34, %v175_v35  ;;  %v15662_v42 = vcombine.high %v172_v36, %v176_v38  ;;  %v224_v27 = vld [vmem:[#allocation6 + $0x338] sm:$0xff] }
 0x14b   :  { %v232_v36 = vld [vmem:[#allocation6 + $0x378] sm:$0xff] }
 0x14d   :  { %3417 = vmatpush1.bf16.msra.mxu0 %v16111_v48  ;;  %3581 = vmatpush1.bf16.msra.mxu1 %v16113_v50  ;;  %v15659_v48 = vcombine.low %v171_v34, %v175_v35  ;;  %v15668_v50 = vcombine.high %v179_v43, %v183_v44  ;;  %v231_v34 = vld [vmem:[#allocation6 + $0x370] sm:$0xff]  ;;  %v228_v35 = vld [vmem:[#allocation6 + $0x358] sm:$0xff] }
 0x14e   :  { %3591 = vmatprep.subr.bf16.mxu0 %v15612_v51  ;;  %3755 = vmatprep.subr.bf16.mxu1 %v15614_v52  ;;  %v15670_v51 = vcombine.high %v180_v45, %v184_v46  ;;  %v187_v52 = vld [vmem:[#allocation6 + $0x210] sm:$0xff]  ;;  %v236_v44 = vld [vmem:[#allocation6 + $0x398] sm:$0xff] }
 0x14f   :  { %v15675_v2 = vcombine.low %v187_v52, %v191_v53  ;;  %v239_v43 = vld [vmem:[#allocation6 + $0x3b0] sm:$0xff] }
 0x150   :  { %3419 = vmatmul.mubr.bf16.vlgmr.msra.gmra.mrb[0].mxu0 %v18194_v55  ;;  %3583 = vmatmul.mubr.bf16.vlgmr.msra.gmra.mrb[0].mxu1 %v18194_v55 }
 0x151   :  { %3592 = vmatpush1.bf16.msra.mxu0 %v15611_v59  ;;  %3756 = vmatpush1.bf16.msra.mxu1 %v15613_v60  ;;  %v15669_v59 = vcombine.low %v180_v45, %v184_v46  ;;  %v15676_v60 = vcombine.high %v187_v52, %v191_v53  ;;  %v240_v45 = vld [vmem:[#allocation6 + $0x3b8] sm:$0xff]  ;;  %v247_v52 = vld [vmem:[#allocation6 + $0x3f0] sm:$0xff] }
 0x152   :  { %3593 = vmatprep.subr.bf16.mxu0 %v15620_v61  ;;  %3757 = vmatprep.subr.bf16.mxu1 %v15622_v62  ;;  %v15678_v61 = vcombine.high %v188_v54, %v192_v56  ;;  %v195_v62 = vld [vmem:[#allocation6 + $0x250] sm:$0xff]  ;;  %v244_v53 = vld [vmem:[#allocation6 + $0x3d8] sm:$0xff] }
 0x153   :  { %3623 = vmatprep.mubr.bf16.mxu0 %v18166_v58  ;;  %3787 = vmatprep.mubr.bf16.mxu1 %v18166_v58  ;;  %v15646_v58 = vcombine.high %v156_v18, %v160_v19  ;;  %v15683_v10 = vcombine.low %v195_v62, %v199_v63  ;;  %v216_v18 = vld [vmem:[#allocation6 + $0x2f8] sm:$0xff] }
 0x155   :  { %3594 = vmatpush1.bf16.msra.mxu0 %v15619_v3  ;;  %3758 = vmatpush1.bf16.msra.mxu1 %v15621_v4  ;;  %v15677_v3 = vcombine.low %v188_v54, %v192_v56  ;;  %v15684_v4 = vcombine.high %v195_v62, %v199_v63  ;;  %v248_v54 = vld [vmem:[#allocation6 + $0x3f8] sm:$0xff]  ;;  %v255_v62 = vld [vmem:[#allocation6 + $0x430] sm:$0xff] }
 0x156   :  { %3595 = vmatprep.subr.bf16.mxu0 %v15628_v5  ;;  %3759 = vmatprep.subr.bf16.mxu1 %v15630_v6  ;;  %v15686_v5 = vcombine.high %v196_v0, %v200_v1  ;;  %v203_v6 = vld [vmem:[#allocation6 + $0x290] sm:$0xff]  ;;  %v252_v63 = vld [vmem:[#allocation6 + $0x418] sm:$0xff] }
 0x157   :  { %v15691_v19 = vcombine.low %v203_v6, %v207_v7 }
 0x159   :  { %3596 = vmatpush1.bf16.msra.mxu0 %v15627_v11  ;;  %3760 = vmatpush1.bf16.msra.mxu1 %v15629_v12  ;;  %v15685_v11 = vcombine.low %v196_v0, %v200_v1  ;;  %v15692_v12 = vcombine.high %v203_v6, %v207_v7  ;;  %v256_v0 = vld [vmem:[#allocation6 + $0x438] sm:$0xff]  ;;  %v263_v6 = vld [vmem:[#allocation6 + $0x470] sm:$0xff] }
 0x15a   :  { %3597 = vmatprep.subr.bf16.mxu0 %v15636_v14  ;;  %3761 = vmatprep.subr.bf16.mxu1 %v15638_v15  ;;  %v15694_v14 = vcombine.high %v204_v8, %v208_v9  ;;  %v211_v15 = vld [vmem:[#allocation6 + $0x2d0] sm:$0xff]  ;;  %v260_v7 = vld [vmem:[#allocation6 + $0x458] sm:$0xff] }
 0x15b   :  { %v15699_v28 = vcombine.low %v211_v15, %v215_v16 }
 0x15d   :  { %3598 = vmatpush1.bf16.msra.mxu0 %v15635_v20  ;;  %3762 = vmatpush1.bf16.msra.mxu1 %v15637_v21  ;;  %v15693_v20 = vcombine.low %v204_v8, %v208_v9  ;;  %v15700_v21 = vcombine.high %v211_v15, %v215_v16  ;;  %v264_v8 = vld [vmem:[#allocation6 + $0x478] sm:$0xff]  ;;  %v271_v15 = vld [vmem:[#allocation6 + $0x4b0] sm:$0xff] }
 0x15e   :  { %3599 = vmatprep.subr.bf16.mxu0 %v15644_v24  ;;  %3763 = vmatprep.subr.bf16.mxu1 %v15646_v58  ;;  %v15702_v24 = vcombine.high %v212_v17, %v216_v18  ;;  %v219_v58 = vld [vmem:[#allocation6 + $0x310] sm:$0xff]  ;;  %v268_v16 = vld [vmem:[#allocation6 + $0x498] sm:$0xff] }
 0x15f   :  { %v15707_v38 = vcombine.low %v219_v58, %v223_v25 }
 0x161   :  { %3600 = vmatpush1.bf16.msra.mxu0 %v15643_v29  ;;  %3764 = vmatpush1.bf16.msra.mxu1 %v15645_v30  ;;  %v15701_v29 = vcombine.low %v212_v17, %v216_v18  ;;  %v15708_v30 = vcombine.high %v219_v58, %v223_v25  ;;  %v272_v17 = vld [vmem:[#allocation6 + $0x4b8] sm:$0xff]  ;;  %v279_v58 = vld [vmem:[#allocation6 + $0x4f0] sm:$0xff] }
 0x162   :  { %3601 = vmatprep.subr.bf16.mxu0 %v15652_v31  ;;  %3765 = vmatprep.subr.bf16.mxu1 %v15654_v32  ;;  %v15710_v31 = vcombine.high %v220_v26, %v224_v27  ;;  %v227_v32 = vld [vmem:[#allocation6 + $0x350] sm:$0xff]  ;;  %v276_v25 = vld [vmem:[#allocation6 + $0x4d8] sm:$0xff] }
 0x163   :  { %v15715_v46 = vcombine.low %v227_v32, %v231_v34 }
 0x165   :  { %3602 = vmatpush1.bf16.msra.mxu0 %v15651_v39  ;;  %3766 = vmatpush1.bf16.msra.mxu1 %v15653_v40  ;;  %v15709_v39 = vcombine.low %v220_v26, %v224_v27  ;;  %v15716_v40 = vcombine.high %v227_v32, %v231_v34  ;;  %v280_v26 = vld [vmem:[#allocation6 + $0x4f8] sm:$0xff] }
 0x166   :  { %3603 = vmatprep.subr.bf16.mxu0 %v15660_v41  ;;  %3767 = vmatprep.subr.bf16.mxu1 %v15662_v42  ;;  %v15718_v41 = vcombine.high %v228_v35, %v232_v36  ;;  %v235_v42 = vld [vmem:[#allocation6 + $0x390] sm:$0xff]  ;;  %v284_v32 = vld [vmem:[#allocation6 + $0x518] sm:$0xff] }
 0x167   :  { %v15723_v56 = vcombine.low %v235_v42, %v239_v43  ;;  %v288_v34 = vld [vmem:[#allocation6 + $0x538] sm:$0xff] }
 0x169   :  { %3604 = vmatpush1.bf16.msra.mxu0 %v15659_v48  ;;  %3768 = vmatpush1.bf16.msra.mxu1 %v15661_v49  ;;  %v15717_v48 = vcombine.low %v228_v35, %v232_v36  ;;  %v15724_v49 = vcombine.high %v235_v42, %v239_v43  ;;  %v15765_v36 = vcombine.low %v276_v25, %v280_v26  ;;  %v296_v42 = vld [vmem:[#allocation6 + $0x578] sm:$0xff] }
 0x16a   :  { %3605 = vmatprep.subr.bf16.mxu0 %v15668_v50  ;;  %3769 = vmatprep.subr.bf16.mxu1 %v15670_v51  ;;  %v15726_v50 = vcombine.high %v236_v44, %v240_v45  ;;  %v243_v51 = vld [vmem:[#allocation6 + $0x3d0] sm:$0xff] }
 0x16b   :  { %v15731_v1 = vcombine.low %v243_v51, %v247_v52 }
 0x16d   :  { %3606 = vmatpush1.bf16.msra.mxu0 %v15667_v57  ;;  %3770 = vmatpush1.bf16.msra.mxu1 %v15669_v59  ;;  %v15725_v57 = vcombine.low %v236_v44, %v240_v45  ;;  %v15732_v59 = vcombine.high %v243_v51, %v247_v52  ;;  %v15773_v44 = vcombine.low %v284_v32, %v288_v34  ;;  %v304_v51 = vld [vmem:[#allocation6 + $0x5b8] sm:$0xff] }
 0x16e   :  { %3607 = vmatprep.subr.bf16.mxu0 %v15676_v60  ;;  %3771 = vmatprep.subr.bf16.mxu1 %v15678_v61  ;;  %v15734_v60 = vcombine.high %v244_v53, %v248_v54  ;;  %v251_v61 = vld [vmem:[#allocation6 + $0x410] sm:$0xff] }
 0x16f   :  { %v15739_v9 = vcombine.low %v251_v61, %v255_v62 }
 0x171   :  { %3608 = vmatpush1.bf16.msra.mxu0 %v15675_v2  ;;  %3772 = vmatpush1.bf16.msra.mxu1 %v15677_v3  ;;  %v15733_v2 = vcombine.low %v244_v53, %v248_v54  ;;  %v15740_v3 = vcombine.high %v251_v61, %v255_v62  ;;  %v312_v61 = vld [vmem:[#allocation6 + $0x5f8] sm:$0xff] }
 0x172   :  { %3609 = vmatprep.subr.bf16.mxu0 %v15684_v4  ;;  %3773 = vmatprep.subr.bf16.mxu1 %v15686_v5  ;;  %v15742_v4 = vcombine.high %v252_v63, %v256_v0  ;;  %v259_v5 = vld [vmem:[#allocation6 + $0x450] sm:$0xff] }
 0x173   :  { %v15747_v18 = vcombine.low %v259_v5, %v263_v6 }
 0x175   :  { %3610 = vmatpush1.bf16.msra.mxu0 %v15683_v10  ;;  %3774 = vmatpush1.bf16.msra.mxu1 %v15685_v11  ;;  %v15741_v10 = vcombine.low %v252_v63, %v256_v0  ;;  %v15748_v11 = vcombine.high %v259_v5, %v263_v6  ;;  %v320_v5 = vld [vmem:[#allocation6 + $0x638] sm:$0xff] }
 0x176   :  { %3611 = vmatprep.subr.bf16.mxu0 %v15692_v12  ;;  %3775 = vmatprep.subr.bf16.mxu1 %v15694_v14  ;;  %v15750_v12 = vcombine.high %v260_v7, %v264_v8  ;;  %v267_v14 = vld [vmem:[#allocation6 + $0x490] sm:$0xff] }
 0x177   :  { %v15755_v27 = vcombine.low %v267_v14, %v271_v15 }
 0x179   :  { %3612 = vmatpush1.bf16.msra.mxu0 %v15691_v19  ;;  %3776 = vmatpush1.bf16.msra.mxu1 %v15693_v20  ;;  %v15749_v19 = vcombine.low %v260_v7, %v264_v8  ;;  %v15756_v20 = vcombine.high %v267_v14, %v271_v15  ;;  %v328_v14 = vld [vmem:[#allocation6 + $0x678] sm:$0xff] }
 0x17a   :  { %3613 = vmatprep.subr.bf16.mxu0 %v15700_v21  ;;  %3777 = vmatprep.subr.bf16.mxu1 %v15702_v24  ;;  %v15758_v21 = vcombine.high %v268_v16, %v272_v17  ;;  %v275_v24 = vld [vmem:[#allocation6 + $0x4d0] sm:$0xff] }
 0x17b   :  { %v15763_v35 = vcombine.low %v275_v24, %v279_v58 }
 0x17d   :  { %3614 = vmatpush1.bf16.msra.mxu0 %v15699_v28  ;;  %3778 = vmatpush1.bf16.msra.mxu1 %v15701_v29  ;;  %v15764_v28 = vcombine.high %v275_v24, %v279_v58  ;;  %v15766_v29 = vcombine.high %v276_v25, %v280_v26  ;;  %v336_v24 = vld [vmem:[#allocation6 + $0x6b8] sm:$0xff] }
 0x17e   :  { %3615 = vmatprep.subr.bf16.mxu0 %v15708_v30  ;;  %3779 = vmatprep.subr.bf16.mxu1 %v15710_v31  ;;  %v283_v30 = vld [vmem:[#allocation6 + $0x510] sm:$0xff] }
 0x17f   :  { %v287_v31 = vld [vmem:[#allocation6 + $0x530] sm:$0xff] }
 0x180   :  { %v15771_v43 = vcombine.low %v283_v30, %v287_v31 }
 0x181   :  { %3616 = vmatpush1.bf16.msra.mxu0 %v15707_v38  ;;  %3780 = vmatpush1.bf16.msra.mxu1 %v15709_v39  ;;  %v15772_v38 = vcombine.high %v283_v30, %v287_v31  ;;  %v291_v39 = vld [vmem:[#allocation6 + $0x550] sm:$0xff]  ;;  %v344_v30 = vld [vmem:[#allocation6 + $0x6f8] sm:$0xff] }
 0x182   :  { %3617 = vmatprep.subr.bf16.mxu0 %v15716_v40  ;;  %3781 = vmatprep.subr.bf16.mxu1 %v15718_v41  ;;  %v295_v40 = vld [vmem:[#allocation6 + $0x570] sm:$0xff]  ;;  %v292_v41 = vld [vmem:[#allocation6 + $0x558] sm:$0xff] }
 0x183   :  { %v15780_v45 = vcombine.high %v291_v39, %v295_v40  ;;  %v15779_v52 = vcombine.low %v291_v39, %v295_v40  ;;  %v15781_v53 = vcombine.low %v292_v41, %v296_v42  ;;  %v352_v39 = vld [vmem:[#allocation6 + $0x738] sm:$0xff] }
 0x185   :  { %3618 = vmatpush1.bf16.msra.mxu0 %v15715_v46  ;;  %3782 = vmatpush1.bf16.msra.mxu1 %v15717_v48  ;;  %v15782_v46 = vcombine.high %v292_v41, %v296_v42  ;;  %v299_v48 = vld [vmem:[#allocation6 + $0x590] sm:$0xff] }
 0x186   :  { %3619 = vmatprep.subr.bf16.mxu0 %v15724_v49  ;;  %3783 = vmatprep.subr.bf16.mxu1 %v15726_v50  ;;  %v303_v49 = vld [vmem:[#allocation6 + $0x5b0] sm:$0xff]  ;;  %v300_v50 = vld [vmem:[#allocation6 + $0x598] sm:$0xff] }
 0x187   :  { %v15788_v54 = vcombine.high %v299_v48, %v303_v49  ;;  %v15787_v62 = vcombine.low %v299_v48, %v303_v49  ;;  %v15789_v63 = vcombine.low %v300_v50, %v304_v51  ;;  %v360_v48 = vld [vmem:[#allocation6 + $0x778] sm:$0xff] }
 0x189   :  { %3620 = vmatpush1.bf16.msra.mxu0 %v15723_v56  ;;  %3784 = vmatpush1.bf16.msra.mxu1 %v15725_v57  ;;  %v15790_v56 = vcombine.high %v300_v50, %v304_v51  ;;  %v307_v57 = vld [vmem:[#allocation6 + $0x5d0] sm:$0xff] }
 0x18a   :  { %3621 = vmatprep.subr.bf16.mxu0 %v15732_v59  ;;  %3785 = vmatprep.subr.bf16.mxu1 %v15734_v60  ;;  %v311_v59 = vld [vmem:[#allocation6 + $0x5f0] sm:$0xff]  ;;  %v308_v60 = vld [vmem:[#allocation6 + $0x5d8] sm:$0xff] }
 0x18b   :  { %v15796_v0 = vcombine.high %v307_v57, %v311_v59  ;;  %v15795_v6 = vcombine.low %v307_v57, %v311_v59  ;;  %v15797_v7 = vcombine.low %v308_v60, %v312_v61  ;;  %v368_v57 = vld [vmem:[#allocation6 + $0x7b8] sm:$0xff] }
 0x18d   :  { %3622 = vmatpush1.bf16.msra.mxu0 %v15731_v1  ;;  %3786 = vmatpush1.bf16.msra.mxu1 %v15733_v2  ;;  %v15798_v1 = vcombine.high %v308_v60, %v312_v61  ;;  %v315_v2 = vld [vmem:[#allocation6 + $0x610] sm:$0xff] }
 0x18e   :  { %3632 = vmatprep.subr.bf16.mxu0 %v15740_v3  ;;  %3796 = vmatprep.subr.bf16.mxu1 %v15742_v4  ;;  %v319_v3 = vld [vmem:[#allocation6 + $0x630] sm:$0xff]  ;;  %v316_v4 = vld [vmem:[#allocation6 + $0x618] sm:$0xff] }
 0x18f   :  { %v15804_v8 = vcombine.high %v315_v2, %v319_v3  ;;  %v15803_v15 = vcombine.low %v315_v2, %v319_v3  ;;  %v376_v2 = vld [vmem:[#allocation6 + $0x7f8] sm:$0xff] }
 0x190   :  { %3624 = vmatmul.mubr.bf16.vlgmr.msra.gmra.mrb[4].mxu0 %v18170_v13  ;;  %3788 = vmatmul.mubr.bf16.vlgmr.msra.gmra.mrb[4].mxu1 %v18170_v13  ;;  %v15757_v13 = vcombine.low %v268_v16, %v272_v17  ;;  %v15805_v16 = vcombine.low %v316_v4, %v320_v5 }
 0x191   :  { %3633 = vmatpush1.bf16.msra.mxu0 %v15739_v9  ;;  %3797 = vmatpush1.bf16.msra.mxu1 %v15741_v10  ;;  %v15806_v9 = vcombine.high %v316_v4, %v320_v5  ;;  %v323_v10 = vld [vmem:[#allocation6 + $0x650] sm:$0xff] }
 0x192   :  { %3634 = vmatprep.subr.bf16.mxu0 %v15748_v11  ;;  %3798 = vmatprep.subr.bf16.mxu1 %v15750_v12  ;;  %v327_v11 = vld [vmem:[#allocation6 + $0x670] sm:$0xff]  ;;  %v324_v12 = vld [vmem:[#allocation6 + $0x658] sm:$0xff] }
 0x193   :  { %3664 = vmatprep.mubr.bf16.mxu0 %v18172_v23  ;;  %3828 = vmatprep.mubr.bf16.mxu1 %v18172_v23  ;;  %v15774_v23 = vcombine.high %v284_v32, %v288_v34  ;;  %v15812_v17 = vcombine.high %v323_v10, %v327_v11  ;;  %v15811_v58 = vcombine.low %v323_v10, %v327_v11  ;;  %v384_v10 = vld [vmem:[#allocation6 + $0x838] sm:$0xff] }
 0x194   :  { %v15813_v25 = vcombine.low %v324_v12, %v328_v14 }
 0x195   :  { %3635 = vmatpush1.bf16.msra.mxu0 %v15747_v18  ;;  %3799 = vmatpush1.bf16.msra.mxu1 %v15749_v19  ;;  %v15814_v18 = vcombine.high %v324_v12, %v328_v14  ;;  %v331_v19 = vld [vmem:[#allocation6 + $0x690] sm:$0xff] }
 0x196   :  { %3636 = vmatprep.subr.bf16.mxu0 %v15756_v20  ;;  %3800 = vmatprep.subr.bf16.mxu1 %v15758_v21  ;;  %v335_v20 = vld [vmem:[#allocation6 + $0x6b0] sm:$0xff]  ;;  %v332_v21 = vld [vmem:[#allocation6 + $0x698] sm:$0xff] }
 0x197   :  { %v15820_v26 = vcombine.high %v331_v19, %v335_v20  ;;  %v15819_v31 = vcombine.low %v331_v19, %v335_v20  ;;  %v15821_v32 = vcombine.low %v332_v21, %v336_v24  ;;  %v392_v19 = vld [vmem:[#allocation6 + $0x878] sm:$0xff] }
 0x199   :  { %3637 = vmatpush1.bf16.msra.mxu0 %v15755_v27  ;;  %3801 = vmatpush1.bf16.msra.mxu1 %v15757_v13  ;;  %v15822_v27 = vcombine.high %v332_v21, %v336_v24  ;;  %v339_v13 = vld [vmem:[#allocation6 + $0x6d0] sm:$0xff] }
 0x19a   :  { %3638 = vmatprep.subr.bf16.mxu0 %v15764_v28  ;;  %3802 = vmatprep.subr.bf16.mxu1 %v15766_v29  ;;  %v343_v28 = vld [vmem:[#allocation6 + $0x6f0] sm:$0xff]  ;;  %v340_v29 = vld [vmem:[#allocation6 + $0x6d8] sm:$0xff] }
 0x19b   :  { %v15828_v34 = vcombine.high %v339_v13, %v343_v28  ;;  %v15827_v40 = vcombine.low %v339_v13, %v343_v28  ;;  %v15829_v41 = vcombine.low %v340_v29, %v344_v30  ;;  %v400_v13 = vld [vmem:[#allocation6 + $0x8b8] sm:$0xff] }
 0x19d   :  { %3639 = vmatpush1.bf16.msra.mxu0 %v15763_v35  ;;  %3803 = vmatpush1.bf16.msra.mxu1 %v15765_v36  ;;  %v15830_v35 = vcombine.high %v340_v29, %v344_v30  ;;  %v347_v36 = vld [vmem:[#allocation6 + $0x710] sm:$0xff] }
 0x19e   :  { %3640 = vmatprep.subr.bf16.mxu0 %v15772_v38  ;;  %3804 = vmatprep.subr.bf16.mxu1 %v15774_v23  ;;  %v351_v38 = vld [vmem:[#allocation6 + $0x730] sm:$0xff]  ;;  %v348_v23 = vld [vmem:[#allocation6 + $0x718] sm:$0xff] }
 0x19f   :  { %v15836_v42 = vcombine.high %v347_v36, %v351_v38  ;;  %v15835_v49 = vcombine.low %v347_v36, %v351_v38  ;;  %v15837_v50 = vcombine.low %v348_v23, %v352_v39  ;;  %v408_v36 = vld [vmem:[#allocation6 + $0x8f8] sm:$0xff] }
 0x1a1   :  { %3641 = vmatpush1.bf16.msra.mxu0 %v15771_v43  ;;  %3805 = vmatpush1.bf16.msra.mxu1 %v15773_v44  ;;  %v15838_v43 = vcombine.high %v348_v23, %v352_v39  ;;  %v355_v44 = vld [vmem:[#allocation6 + $0x750] sm:$0xff] }
 0x1a2   :  { %3642 = vmatprep.subr.bf16.mxu0 %v15780_v45  ;;  %3806 = vmatprep.subr.bf16.mxu1 %v15782_v46  ;;  %v359_v45 = vld [vmem:[#allocation6 + $0x770] sm:$0xff]  ;;  %v356_v46 = vld [vmem:[#allocation6 + $0x758] sm:$0xff] }
 0x1a3   :  { %v15844_v51 = vcombine.high %v355_v44, %v359_v45  ;;  %v15843_v59 = vcombine.low %v355_v44, %v359_v45  ;;  %v15845_v60 = vcombine.low %v356_v46, %v360_v48 }
 0x1a5   :  { %3643 = vmatpush1.bf16.msra.mxu0 %v15779_v52  ;;  %3807 = vmatpush1.bf16.msra.mxu1 %v15781_v53  ;;  %v15846_v52 = vcombine.high %v356_v46, %v360_v48  ;;  %v363_v53 = vld [vmem:[#allocation6 + $0x790] sm:$0xff] }
 0x1a6   :  { %3644 = vmatprep.subr.bf16.mxu0 %v15788_v54  ;;  %3808 = vmatprep.subr.bf16.mxu1 %v15790_v56  ;;  %v367_v54 = vld [vmem:[#allocation6 + $0x7b0] sm:$0xff]  ;;  %v364_v56 = vld [vmem:[#allocation6 + $0x798] sm:$0xff] }
 0x1a7   :  { %v15852_v61 = vcombine.high %v363_v53, %v367_v54  ;;  %v15851_v3 = vcombine.low %v363_v53, %v367_v54  ;;  %v15853_v4 = vcombine.low %v364_v56, %v368_v57  ;;  %v419_v48 = vld [vmem:[#allocation6 + $0x950] sm:$0xff] }
 0x1a9   :  { %3645 = vmatpush1.bf16.msra.mxu0 %v15787_v62  ;;  %3809 = vmatpush1.bf16.msra.mxu1 %v15789_v63  ;;  %v15854_v62 = vcombine.high %v364_v56, %v368_v57  ;;  %v371_v63 = vld [vmem:[#allocation6 + $0x7d0] sm:$0xff] }
 0x1aa   :  { %3646 = vmatprep.subr.bf16.mxu0 %v15796_v0  ;;  %3810 = vmatprep.subr.bf16.mxu1 %v15798_v1  ;;  %v375_v0 = vld [vmem:[#allocation6 + $0x7f0] sm:$0xff]  ;;  %v372_v1 = vld [vmem:[#allocation6 + $0x7d8] sm:$0xff] }
 0x1ab   :  { %v15860_v5 = vcombine.high %v371_v63, %v375_v0  ;;  %v15859_v11 = vcombine.low %v371_v63, %v375_v0  ;;  %v15861_v12 = vcombine.low %v372_v1, %v376_v2  ;;  %v427_v57 = vld [vmem:[#allocation6 + $0x990] sm:$0xff] }
 0x1ad   :  { %3647 = vmatpush1.bf16.msra.mxu0 %v15795_v6  ;;  %3811 = vmatpush1.bf16.msra.mxu1 %v15797_v7  ;;  %v15862_v6 = vcombine.high %v372_v1, %v376_v2  ;;  %v379_v7 = vld [vmem:[#allocation6 + $0x810] sm:$0xff] }
 0x1ae   :  { %3648 = vmatprep.subr.bf16.mxu0 %v15804_v8  ;;  %3812 = vmatprep.subr.bf16.mxu1 %v15806_v9  ;;  %v383_v8 = vld [vmem:[#allocation6 + $0x830] sm:$0xff]  ;;  %v380_v9 = vld [vmem:[#allocation6 + $0x818] sm:$0xff] }
 0x1af   :  { %v15868_v14 = vcombine.high %v379_v7, %v383_v8  ;;  %v15867_v20 = vcombine.low %v379_v7, %v383_v8  ;;  %v15869_v21 = vcombine.low %v380_v9, %v384_v10  ;;  %v435_v2 = vld [vmem:[#allocation6 + $0x9d0] sm:$0xff] }
 0x1b1   :  { %3649 = vmatpush1.bf16.msra.mxu0 %v15803_v15  ;;  %3813 = vmatpush1.bf16.msra.mxu1 %v15805_v16  ;;  %v15870_v15 = vcombine.high %v380_v9, %v384_v10  ;;  %v387_v16 = vld [vmem:[#allocation6 + $0x850] sm:$0xff] }
 0x1b2   :  { %3650 = vmatprep.subr.bf16.mxu0 %v15812_v17  ;;  %3814 = vmatprep.subr.bf16.mxu1 %v15814_v18  ;;  %v391_v17 = vld [vmem:[#allocation6 + $0x870] sm:$0xff]  ;;  %v388_v18 = vld [vmem:[#allocation6 + $0x858] sm:$0xff] }
 0x1b3   :  { %v15876_v24 = vcombine.high %v387_v16, %v391_v17  ;;  %v15875_v28 = vcombine.low %v387_v16, %v391_v17  ;;  %v15877_v29 = vcombine.low %v388_v18, %v392_v19  ;;  %v443_v10 = vld [vmem:[#allocation6 + $0xa10] sm:$0xff] }
 0x1b5   :  { %3651 = vmatpush1.bf16.msra.mxu0 %v15811_v58  ;;  %3815 = vmatpush1.bf16.msra.mxu1 %v15813_v25  ;;  %v15878_v58 = vcombine.high %v388_v18, %v392_v19  ;;  %v395_v25 = vld [vmem:[#allocation6 + $0x890] sm:$0xff] }
 0x1b6   :  { %3652 = vmatprep.subr.bf16.mxu0 %v15820_v26  ;;  %3816 = vmatprep.subr.bf16.mxu1 %v15822_v27  ;;  %v399_v26 = vld [vmem:[#allocation6 + $0x8b0] sm:$0xff]  ;;  %v396_v27 = vld [vmem:[#allocation6 + $0x898] sm:$0xff] }
 0x1b7   :  { %v15884_v30 = vcombine.high %v395_v25, %v399_v26  ;;  %v15883_v38 = vcombine.low %v395_v25, %v399_v26  ;;  %v451_v19 = vld [vmem:[#allocation6 + $0xa50] sm:$0xff] }
 0x1b9   :  { %3653 = vmatpush1.bf16.msra.mxu0 %v15819_v31  ;;  %3817 = vmatpush1.bf16.msra.mxu1 %v15821_v32  ;;  %v15886_v31 = vcombine.high %v396_v27, %v400_v13  ;;  %v403_v32 = vld [vmem:[#allocation6 + $0x8d0] sm:$0xff] }
 0x1ba   :  { %3654 = vmatprep.subr.bf16.mxu0 %v15828_v34  ;;  %3818 = vmatprep.subr.bf16.mxu1 %v15830_v35  ;;  %v407_v34 = vld [vmem:[#allocation6 + $0x8f0] sm:$0xff]  ;;  %v404_v35 = vld [vmem:[#allocation6 + $0x8d8] sm:$0xff] }
 0x1bb   :  { %v15892_v23 = vcombine.high %v403_v32, %v407_v34  ;;  %v15894_v39 = vcombine.high %v404_v35, %v408_v36  ;;  %v15891_v44 = vcombine.low %v403_v32, %v407_v34  ;;  %v15893_v45 = vcombine.low %v404_v35, %v408_v36  ;;  %v467_v36 = vld [vmem:[#allocation6 + $0xad0] sm:$0xff] }
 0x1bd   :  { %3655 = vmatpush1.bf16.msra.mxu0 %v15827_v40  ;;  %3819 = vmatpush1.bf16.msra.mxu1 %v15829_v41  ;;  %v411_v40 = vld [vmem:[#allocation6 + $0x910] sm:$0xff] }
 0x1be   :  { %3656 = vmatprep.subr.bf16.mxu0 %v15836_v42  ;;  %3820 = vmatprep.subr.bf16.mxu1 %v15838_v43  ;;  %v415_v41 = vld [vmem:[#allocation6 + $0x930] sm:$0xff]  ;;  %v412_v42 = vld [vmem:[#allocation6 + $0x918] sm:$0xff] }
 0x1bf   :  { %v416_v43 = vld [vmem:[#allocation6 + $0x938] sm:$0xff]  ;;  %v15900_v46 = vcombine.high %v411_v40, %v415_v41 }
 0x1c0   :  { %v15901_v53 = vcombine.low %v412_v42, %v416_v43 }
 0x1c1   :  { %3657 = vmatpush1.bf16.msra.mxu0 %v15835_v49  ;;  %3821 = vmatpush1.bf16.msra.mxu1 %v15837_v50  ;;  %v423_v49 = vld [vmem:[#allocation6 + $0x970] sm:$0xff]  ;;  %v420_v50 = vld [vmem:[#allocation6 + $0x958] sm:$0xff] }
 0x1c2   :  { %3658 = vmatprep.subr.bf16.mxu0 %v15844_v51  ;;  %3822 = vmatprep.subr.bf16.mxu1 %v15846_v52  ;;  %v424_v51 = vld [vmem:[#allocation6 + $0x978] sm:$0xff]  ;;  %v15899_v52 = vcombine.low %v411_v40, %v415_v41  ;;  %v15908_v54 = vcombine.high %v419_v48, %v423_v49 }
 0x1c3   :  { %v15910_v56 = vcombine.high %v420_v50, %v424_v51  ;;  %v15909_v63 = vcombine.low %v420_v50, %v424_v51  ;;  %v483_v51 = vld [vmem:[#allocation6 + $0xb50] sm:$0xff] }
 0x1c5   :  { %3659 = vmatpush1.bf16.msra.mxu0 %v15843_v59  ;;  %3823 = vmatpush1.bf16.msra.mxu1 %v15845_v60  ;;  %v431_v59 = vld [vmem:[#allocation6 + $0x9b0] sm:$0xff]  ;;  %v428_v60 = vld [vmem:[#allocation6 + $0x998] sm:$0xff] }
 0x1c6   :  { %3660 = vmatprep.subr.bf16.mxu0 %v15852_v61  ;;  %3824 = vmatprep.subr.bf16.mxu1 %v15854_v62  ;;  %v432_v61 = vld [vmem:[#allocation6 + $0x9b8] sm:$0xff]  ;;  %v15907_v62 = vcombine.low %v419_v48, %v423_v49  ;;  %v15916_v0 = vcombine.high %v427_v57, %v431_v59 }
 0x1c7   :  { %v15918_v1 = vcombine.high %v428_v60, %v432_v61  ;;  %v15917_v7 = vcombine.low %v428_v60, %v432_v61  ;;  %v491_v61 = vld [vmem:[#allocation6 + $0xb90] sm:$0xff] }
 0x1c9   :  { %3661 = vmatpush1.bf16.msra.mxu0 %v15851_v3  ;;  %3825 = vmatpush1.bf16.msra.mxu1 %v15853_v4  ;;  %v439_v3 = vld [vmem:[#allocation6 + $0x9f0] sm:$0xff]  ;;  %v436_v4 = vld [vmem:[#allocation6 + $0x9d8] sm:$0xff] }
 0x1ca   :  { %3662 = vmatprep.subr.bf16.mxu0 %v15860_v5  ;;  %3826 = vmatprep.subr.bf16.mxu1 %v15862_v6  ;;  %v440_v5 = vld [vmem:[#allocation6 + $0x9f8] sm:$0xff]  ;;  %v15915_v6 = vcombine.low %v427_v57, %v431_v59  ;;  %v15924_v8 = vcombine.high %v435_v2, %v439_v3 }
 0x1cb   :  { %v15926_v9 = vcombine.high %v436_v4, %v440_v5  ;;  %v15925_v16 = vcombine.low %v436_v4, %v440_v5  ;;  %v499_v5 = vld [vmem:[#allocation6 + $0xbd0] sm:$0xff] }
 0x1cd   :  { %3663 = vmatpush1.bf16.msra.mxu0 %v15859_v11  ;;  %3827 = vmatpush1.bf16.msra.mxu1 %v15861_v12  ;;  %v447_v11 = vld [vmem:[#allocation6 + $0xa30] sm:$0xff]  ;;  %v444_v12 = vld [vmem:[#allocation6 + $0xa18] sm:$0xff] }
 0x1ce   :  { %3673 = vmatprep.subr.bf16.mxu0 %v15868_v14  ;;  %3837 = vmatprep.subr.bf16.mxu1 %v15870_v15  ;;  %v448_v14 = vld [vmem:[#allocation6 + $0xa38] sm:$0xff]  ;;  %v15923_v15 = vcombine.low %v435_v2, %v439_v3  ;;  %v15932_v17 = vcombine.high %v443_v10, %v447_v11 }
 0x1cf   :  { %v15934_v18 = vcombine.high %v444_v12, %v448_v14  ;;  %v15933_v25 = vcombine.low %v444_v12, %v448_v14  ;;  %v507_v14 = vld [vmem:[#allocation6 + $0xc10] sm:$0xff] }
 0x1d0   :  { %3665 = vmatmul.mubr.bf16.vlgmr.msra.gmra.mrb[4].mxu0 %v18178_v22  ;;  %3829 = vmatmul.mubr.bf16.vlgmr.msra.gmra.mrb[4].mxu1 %v18178_v22  ;;  %v15885_v22 = vcombine.low %v396_v27, %v400_v13  ;;  %v459_v13 = vld [vmem:[#allocation6 + $0xa90] sm:$0xff] }
 0x1d1   :  { %3674 = vmatpush1.bf16.msra.mxu0 %v15867_v20  ;;  %3838 = vmatpush1.bf16.msra.mxu1 %v15869_v21  ;;  %v455_v20 = vld [vmem:[#allocation6 + $0xa70] sm:$0xff]  ;;  %v452_v21 = vld [vmem:[#allocation6 + $0xa58] sm:$0xff] }
 0x1d2   :  { %3675 = vmatprep.subr.bf16.mxu0 %v15876_v24  ;;  %3839 = vmatprep.subr.bf16.mxu1 %v15878_v58  ;;  %v456_v24 = vld [vmem:[#allocation6 + $0xa78] sm:$0xff]  ;;  %v15931_v58 = vcombine.low %v443_v10, %v447_v11  ;;  %v15940_v26 = vcombine.high %v451_v19, %v455_v20 }
 0x1d3   :  { %3705 = vmatprep.mubr.bf16.mxu0 %v18180_v33  ;;  %3869 = vmatprep.mubr.bf16.mxu1 %v18180_v33  ;;  %v15902_v33 = vcombine.high %v412_v42, %v416_v43  ;;  %v15942_v27 = vcombine.high %v452_v21, %v456_v24  ;;  %v15941_v32 = vcombine.low %v452_v21, %v456_v24  ;;  %v475_v43 = vld [vmem:[#allocation6 + $0xb10] sm:$0xff] }
 0x1d4   :  { %v515_v24 = vld [vmem:[#allocation6 + $0xc50] sm:$0xff] }
 0x1d5   :  { %3676 = vmatpush1.bf16.msra.mxu0 %v15875_v28  ;;  %3840 = vmatpush1.bf16.msra.mxu1 %v15877_v29  ;;  %v463_v28 = vld [vmem:[#allocation6 + $0xab0] sm:$0xff]  ;;  %v460_v29 = vld [vmem:[#allocation6 + $0xa98] sm:$0xff] }
 0x1d6   :  { %3677 = vmatprep.subr.bf16.mxu0 %v15884_v30  ;;  %3841 = vmatprep.subr.bf16.mxu1 %v15886_v31  ;;  %v464_v30 = vld [vmem:[#allocation6 + $0xab8] sm:$0xff]  ;;  %v15939_v31 = vcombine.low %v451_v19, %v455_v20  ;;  %v15948_v34 = vcombine.high %v459_v13, %v463_v28 }
 0x1d7   :  { %v15950_v35 = vcombine.high %v460_v29, %v464_v30  ;;  %v15949_v40 = vcombine.low %v460_v29, %v464_v30  ;;  %v523_v30 = vld [vmem:[#allocation6 + $0xc90] sm:$0xff] }
 0x1d9   :  { %3678 = vmatpush1.bf16.msra.mxu0 %v15883_v38  ;;  %3842 = vmatpush1.bf16.msra.mxu1 %v15885_v22  ;;  %v471_v38 = vld [vmem:[#allocation6 + $0xaf0] sm:$0xff]  ;;  %v468_v22 = vld [vmem:[#allocation6 + $0xad8] sm:$0xff] }
 0x1da   :  { %3679 = vmatprep.subr.bf16.mxu0 %v15892_v23  ;;  %3843 = vmatprep.subr.bf16.mxu1 %v15894_v39  ;;  %v472_v23 = vld [vmem:[#allocation6 + $0xaf8] sm:$0xff]  ;;  %v15947_v39 = vcombine.low %v459_v13, %v463_v28  ;;  %v15956_v41 = vcombine.high %v467_v36, %v471_v38 }
 0x1db   :  { %v15958_v42 = vcombine.high %v468_v22, %v472_v23  ;;  %v15957_v48 = vcombine.low %v468_v22, %v472_v23  ;;  %v531_v23 = vld [vmem:[#allocation6 + $0xcd0] sm:$0xff] }
 0x1dd   :  { %3680 = vmatpush1.bf16.msra.mxu0 %v15891_v44  ;;  %3844 = vmatpush1.bf16.msra.mxu1 %v15893_v45  ;;  %v479_v44 = vld [vmem:[#allocation6 + $0xb30] sm:$0xff]  ;;  %v476_v45 = vld [vmem:[#allocation6 + $0xb18] sm:$0xff] }
 0x1de   :  { %3681 = vmatprep.subr.bf16.mxu0 %v15900_v46  ;;  %3845 = vmatprep.subr.bf16.mxu1 %v15902_v33  ;;  %v480_v46 = vld [vmem:[#allocation6 + $0xb38] sm:$0xff]  ;;  %v15955_v33 = vcombine.low %v467_v36, %v471_v38  ;;  %v15964_v49 = vcombine.high %v475_v43, %v479_v44 }
 0x1df   :  { %v15966_v50 = vcombine.high %v476_v45, %v480_v46  ;;  %v15965_v57 = vcombine.low %v476_v45, %v480_v46  ;;  %v539_v45 = vld [vmem:[#allocation6 + $0xd10] sm:$0xff] }
 0x1e0   :  { %v543_v46 = vld [vmem:[#allocation6 + $0xd30] sm:$0xff] }
 0x1e1   :  { %3682 = vmatpush1.bf16.msra.mxu0 %v15899_v52  ;;  %3846 = vmatpush1.bf16.msra.mxu1 %v15901_v53  ;;  %v487_v52 = vld [vmem:[#allocation6 + $0xb70] sm:$0xff]  ;;  %v484_v53 = vld [vmem:[#allocation6 + $0xb58] sm:$0xff] }
 0x1e2   :  { %3683 = vmatprep.subr.bf16.mxu0 %v15908_v54  ;;  %3847 = vmatprep.subr.bf16.mxu1 %v15910_v56  ;;  %v488_v54 = vld [vmem:[#allocation6 + $0xb78] sm:$0xff]  ;;  %v15963_v56 = vcombine.low %v475_v43, %v479_v44  ;;  %v15972_v59 = vcombine.high %v483_v51, %v487_v52 }
 0x1e3   :  { %v15974_v60 = vcombine.high %v484_v53, %v488_v54  ;;  %v15973_v2 = vcombine.low %v484_v53, %v488_v54  ;;  %v551_v53 = vld [vmem:[#allocation6 + $0xd70] sm:$0xff]  ;;  %v548_v54 = vld [vmem:[#allocation6 + $0xd58] sm:$0xff] }
 0x1e5   :  { %3684 = vmatpush1.bf16.msra.mxu0 %v15907_v62  ;;  %3848 = vmatpush1.bf16.msra.mxu1 %v15909_v63  ;;  %v495_v62 = vld [vmem:[#allocation6 + $0xbb0] sm:$0xff]  ;;  %v492_v63 = vld [vmem:[#allocation6 + $0xb98] sm:$0xff] }
 0x1e6   :  { %3685 = vmatprep.subr.bf16.mxu0 %v15916_v0  ;;  %3849 = vmatprep.subr.bf16.mxu1 %v15918_v1  ;;  %v496_v0 = vld [vmem:[#allocation6 + $0xbb8] sm:$0xff]  ;;  %v15971_v1 = vcombine.low %v483_v51, %v487_v52  ;;  %v15980_v3 = vcombine.high %v491_v61, %v495_v62  ;;  %v16028_v51 = vcombine.high %v539_v45, %v543_v46  ;;  %v547_v52 = vld [vmem:[#allocation6 + $0xd50] sm:$0xff] }
 0x1e7   :  { %v15982_v4 = vcombine.high %v492_v63, %v496_v0  ;;  %v15981_v10 = vcombine.low %v492_v63, %v496_v0  ;;  %v559_v63 = vld [vmem:[#allocation6 + $0xdb0] sm:$0xff]  ;;  %v556_v0 = vld [vmem:[#allocation6 + $0xd98] sm:$0xff] }
 0x1e9   :  { %3686 = vmatpush1.bf16.msra.mxu0 %v15915_v6  ;;  %3850 = vmatpush1.bf16.msra.mxu1 %v15917_v7  ;;  %v503_v6 = vld [vmem:[#allocation6 + $0xbf0] sm:$0xff]  ;;  %v500_v7 = vld [vmem:[#allocation6 + $0xbd8] sm:$0xff] }
 0x1ea   :  { %3687 = vmatprep.subr.bf16.mxu0 %v15924_v8  ;;  %3851 = vmatprep.subr.bf16.mxu1 %v15926_v9  ;;  %v504_v8 = vld [vmem:[#allocation6 + $0xbf8] sm:$0xff]  ;;  %v15979_v9 = vcombine.low %v491_v61, %v495_v62  ;;  %v15988_v11 = vcombine.high %v499_v5, %v503_v6  ;;  %v555_v62 = vld [vmem:[#allocation6 + $0xd90] sm:$0xff] }
 0x1eb   :  { %v15990_v12 = vcombine.high %v500_v7, %v504_v8  ;;  %v15989_v19 = vcombine.low %v500_v7, %v504_v8  ;;  %v563_v7 = vld [vmem:[#allocation6 + $0xdd0] sm:$0xff] }
 0x1ec   :  { %v567_v8 = vld [vmem:[#allocation6 + $0xdf0] sm:$0xff] }
 0x1ed   :  { %3688 = vmatpush1.bf16.msra.mxu0 %v15923_v15  ;;  %3852 = vmatpush1.bf16.msra.mxu1 %v15925_v16  ;;  %v511_v15 = vld [vmem:[#allocation6 + $0xc30] sm:$0xff]  ;;  %v508_v16 = vld [vmem:[#allocation6 + $0xc18] sm:$0xff] }
 0x1ee   :  { %3689 = vmatprep.subr.bf16.mxu0 %v15932_v17  ;;  %3853 = vmatprep.subr.bf16.mxu1 %v15934_v18  ;;  %v512_v17 = vld [vmem:[#allocation6 + $0xc38] sm:$0xff]  ;;  %v15987_v18 = vcombine.low %v499_v5, %v503_v6  ;;  %v15996_v20 = vcombine.high %v507_v14, %v511_v15 }
 0x1ef   :  { %v15998_v21 = vcombine.high %v508_v16, %v512_v17  ;;  %v15997_v13 = vcombine.low %v508_v16, %v512_v17  ;;  %v16043_v16 = vcombine.low %v555_v62, %v559_v63 }
 0x1f1   :  { %3690 = vmatpush1.bf16.msra.mxu0 %v15931_v58  ;;  %3854 = vmatpush1.bf16.msra.mxu1 %v15933_v25  ;;  %v519_v58 = vld [vmem:[#allocation6 + $0xc70] sm:$0xff]  ;;  %v516_v25 = vld [vmem:[#allocation6 + $0xc58] sm:$0xff] }
 0x1f2   :  { %3691 = vmatprep.subr.bf16.mxu0 %v15940_v26  ;;  %3855 = vmatprep.subr.bf16.mxu1 %v15942_v27  ;;  %v520_v26 = vld [vmem:[#allocation6 + $0xc78] sm:$0xff]  ;;  %v15995_v27 = vcombine.low %v507_v14, %v511_v15  ;;  %v16004_v28 = vcombine.high %v515_v24, %v519_v58 }
 0x1f3   :  { %v16006_v29 = vcombine.high %v516_v25, %v520_v26  ;;  %v16005_v36 = vcombine.low %v516_v25, %v520_v26  ;;  %v575_v25 = vld [vmem:[#allocation6 + $0xe30] sm:$0xff]  ;;  %v572_v26 = vld [vmem:[#allocation6 + $0xe18] sm:$0xff] }
 0x1f5   :  { %3692 = vmatpush1.bf16.msra.mxu0 %v15939_v31  ;;  %3856 = vmatpush1.bf16.msra.mxu1 %v15941_v32  ;;  %v527_v31 = vld [vmem:[#allocation6 + $0xcb0] sm:$0xff]  ;;  %v524_v32 = vld [vmem:[#allocation6 + $0xc98] sm:$0xff] }
 0x1f6   :  { %3693 = vmatprep.subr.bf16.mxu0 %v15948_v34  ;;  %3857 = vmatprep.subr.bf16.mxu1 %v15950_v35  ;;  %v528_v34 = vld [vmem:[#allocation6 + $0xcb8] sm:$0xff]  ;;  %v16003_v35 = vcombine.low %v515_v24, %v519_v58  ;;  %v16012_v38 = vcombine.high %v523_v30, %v527_v31  ;;  %v571_v58 = vld [vmem:[#allocation6 + $0xe10] sm:$0xff] }
 0x1f7   :  { %v16014_v22 = vcombine.high %v524_v32, %v528_v34 }
 0x1f9   :  { %3694 = vmatpush1.bf16.msra.mxu0 %v15947_v39  ;;  %3858 = vmatpush1.bf16.msra.mxu1 %v15949_v40  ;;  %v535_v39 = vld [vmem:[#allocation6 + $0xcf0] sm:$0xff]  ;;  %v532_v40 = vld [vmem:[#allocation6 + $0xcd8] sm:$0xff] }
 0x1fa   :  { %3695 = vmatprep.subr.bf16.mxu0 %v15956_v41  ;;  %3859 = vmatprep.subr.bf16.mxu1 %v15958_v42  ;;  %v536_v41 = vld [vmem:[#allocation6 + $0xcf8] sm:$0xff]  ;;  %v16011_v42 = vcombine.low %v523_v30, %v527_v31  ;;  %v16020_v43 = vcombine.high %v531_v23, %v535_v39  ;;  %v579_v31 = vld [vmem:[#allocation6 + $0xe50] sm:$0xff] }
 0x1fb   :  { %v16022_v44 = vcombine.high %v532_v40, %v536_v41 }
 0x1fd   :  { %3696 = vmatpush1.bf16.msra.mxu0 %v15955_v33  ;;  %3860 = vmatpush1.bf16.msra.mxu1 %v15957_v48  ;;  %v540_v33 = vld [vmem:[#allocation6 + $0xd18] sm:$0xff] }
 0x1fe   :  { %3697 = vmatprep.subr.bf16.mxu0 %v15964_v49  ;;  %3861 = vmatprep.subr.bf16.mxu1 %v15966_v50  ;;  %v544_v48 = vld [vmem:[#allocation6 + $0xd38] sm:$0xff]  ;;  %v16019_v49 = vcombine.low %v531_v23, %v535_v39  ;;  %v16021_v50 = vcombine.low %v532_v40, %v536_v41  ;;  %v587_v39 = vld [vmem:[#allocation6 + $0xe90] sm:$0xff] }
 0x1ff   :  { %v591_v40 = vld [vmem:[#allocation6 + $0xeb0] sm:$0xff]  ;;  %v588_v41 = vld [vmem:[#allocation6 + $0xe98] sm:$0xff] }
 0x201   :  { %3698 = vmatpush1.bf16.msra.mxu0 %v15963_v56  ;;  %3862 = vmatpush1.bf16.msra.mxu1 %v15965_v57  ;;  %v552_v56 = vld [vmem:[#allocation6 + $0xd78] sm:$0xff]  ;;  %v16027_v57 = vcombine.low %v539_v45, %v543_v46  ;;  %v595_v46 = vld [vmem:[#allocation6 + $0xed0] sm:$0xff] }
 0x202   :  { %3699 = vmatprep.subr.bf16.mxu0 %v15972_v59  ;;  %3863 = vmatprep.subr.bf16.mxu1 %v15974_v60  ;;  %v16029_v59 = vcombine.low %v540_v33, %v544_v48  ;;  %v16036_v60 = vcombine.high %v547_v52, %v551_v53  ;;  %v16038_v61 = vcombine.high %v548_v54, %v552_v56 }
 0x205   :  { %3700 = vmatpush1.bf16.msra.mxu0 %v15971_v1  ;;  %3864 = vmatpush1.bf16.msra.mxu1 %v15973_v2  ;;  %v560_v1 = vld [vmem:[#allocation6 + $0xdb8] sm:$0xff]  ;;  %v16035_v2 = vcombine.low %v547_v52, %v551_v53  ;;  %v603_v53 = vld [vmem:[#allocation6 + $0xf10] sm:$0xff] }
 0x206   :  { %3701 = vmatprep.subr.bf16.mxu0 %v15980_v3  ;;  %3865 = vmatprep.subr.bf16.mxu1 %v15982_v4  ;;  %v16037_v3 = vcombine.low %v548_v54, %v552_v56  ;;  %v16044_v4 = vcombine.high %v555_v62, %v559_v63  ;;  %v16046_v6 = vcombine.high %v556_v0, %v560_v1  ;;  %v607_v54 = vld [vmem:[#allocation6 + $0xf30] sm:$0xff]  ;;  %v635_v56 = vlaneseq }
 0x207   :  { %v16092_v62 = vcombine.high %v603_v53, %v607_v54 }
 0x209   :  { %3702 = vmatpush1.bf16.msra.mxu0 %v15979_v9  ;;  %3866 = vmatpush1.bf16.msra.mxu1 %v15981_v10 }
 0x20a   :  { %3703 = vmatprep.subr.bf16.mxu0 %v15988_v11  ;;  %3867 = vmatprep.subr.bf16.mxu1 %v15990_v12  ;;  %v564_v11 = vld [vmem:[#allocation6 + $0xdd8] sm:$0xff] }
 0x20b   :  { %v568_v12 = vld [vmem:[#allocation6 + $0xdf8] sm:$0xff] }
 0x20c   :  { %v16054_v24 = vcombine.high %v564_v11, %v568_v12 }
 0x20d   :  { %3704 = vmatpush1.bf16.msra.mxu0 %v15987_v18  ;;  %3868 = vmatpush1.bf16.msra.mxu1 %v15989_v19  ;;  %v16045_v19 = vcombine.low %v556_v0, %v560_v1  ;;  %v611_v0 = vld [vmem:[#allocation6 + $0xf50] sm:$0xff] }
 0x20e   :  { %3714 = vmatprep.subr.bf16.mxu0 %v15996_v20  ;;  %3878 = vmatprep.subr.bf16.mxu1 %v15998_v21  ;;  %v16052_v20 = vcombine.high %v563_v7, %v567_v8  ;;  %v615_v1 = vld [vmem:[#allocation6 + $0xf70] sm:$0xff] }
 0x210   :  { %3706 = vmatmul.mubr.bf16.vlgmr.msra.gmra.mrb[4].mxu0 %v18186_v37  ;;  %3870 = vmatmul.mubr.bf16.vlgmr.msra.gmra.mrb[4].mxu1 %v18186_v37  ;;  %v16013_v37 = vcombine.low %v524_v32, %v528_v34  ;;  %v583_v32 = vld [vmem:[#allocation6 + $0xe70] sm:$0xff]  ;;  %v580_v34 = vld [vmem:[#allocation6 + $0xe58] sm:$0xff] }
 0x211   :  { %3715 = vmatpush1.bf16.msra.mxu0 %v15995_v27  ;;  %3879 = vmatpush1.bf16.msra.mxu1 %v15997_v13  ;;  %v576_v27 = vld [vmem:[#allocation6 + $0xe38] sm:$0xff]  ;;  %v16051_v13 = vcombine.low %v563_v7, %v567_v8  ;;  %v16100_v8 = vcombine.high %v611_v0, %v615_v1 }
 0x212   :  { %3716 = vmatprep.subr.bf16.mxu0 %v16004_v28  ;;  %3880 = vmatprep.subr.bf16.mxu1 %v16006_v29  ;;  %v16053_v28 = vcombine.low %v564_v11, %v568_v12  ;;  %v16060_v29 = vcombine.high %v571_v58, %v575_v25  ;;  %v16062_v30 = vcombine.high %v572_v26, %v576_v27  ;;  %v619_v12 = vld [vmem:[#allocation6 + $0xf90] sm:$0xff] }
 0x213   :  { %3746 = vmatprep.mubr.bf16.mxu0 %v18188_v47  ;;  %3910 = vmatprep.mubr.bf16.mxu1 %v18188_v47  ;;  %v16030_v47 = vcombine.high %v540_v33, %v544_v48  ;;  %v599_v33 = vld [vmem:[#allocation6 + $0xef0] sm:$0xff]  ;;  %v596_v48 = vld [vmem:[#allocation6 + $0xed8] sm:$0xff] }
 0x215   :  { %3717 = vmatpush1.bf16.msra.mxu0 %v16003_v35  ;;  %3881 = vmatpush1.bf16.msra.mxu1 %v16005_v36  ;;  %v584_v35 = vld [vmem:[#allocation6 + $0xe78] sm:$0xff]  ;;  %v16059_v36 = vcombine.low %v571_v58, %v575_v25  ;;  %v627_v25 = vld [vmem:[#allocation6 + $0xfd0] sm:$0xff] }
 0x216   :  { %3718 = vmatprep.subr.bf16.mxu0 %v16012_v38  ;;  %3882 = vmatprep.subr.bf16.mxu1 %v16014_v22  ;;  %v16061_v38 = vcombine.low %v572_v26, %v576_v27  ;;  %v16068_v22 = vcombine.high %v579_v31, %v583_v32  ;;  %v16070_v23 = vcombine.high %v580_v34, %v584_v35  ;;  %v631_v26 = vld [vmem:[#allocation6 + $0xff0] sm:$0xff] }
 0x219   :  { %3719 = vmatpush1.bf16.msra.mxu0 %v16011_v42  ;;  %3883 = vmatpush1.bf16.msra.mxu1 %v16013_v37  ;;  %v592_v42 = vld [vmem:[#allocation6 + $0xeb8] sm:$0xff]  ;;  %v16067_v37 = vcombine.low %v579_v31, %v583_v32  ;;  %v16116_v31 = vcombine.high %v627_v25, %v631_v26 }
 0x21a   :  { %3720 = vmatprep.subr.bf16.mxu0 %v16020_v43  ;;  %3884 = vmatprep.subr.bf16.mxu1 %v16022_v44  ;;  %v16069_v43 = vcombine.low %v580_v34, %v584_v35  ;;  %v16076_v44 = vcombine.high %v587_v39, %v591_v40  ;;  %v16078_v45 = vcombine.high %v588_v41, %v592_v42  ;;  %v3968_v34 = vld [vmem:[#allocation6 + $0x1000] sm:$0xff] }
 0x21b   :  { %v3972_v35 = vld [vmem:[#allocation6 + $0x1020] sm:$0xff] }
 0x21d   :  { %3721 = vmatpush1.bf16.msra.mxu0 %v16019_v49  ;;  %3885 = vmatpush1.bf16.msra.mxu1 %v16021_v50  ;;  %v600_v49 = vld [vmem:[#allocation6 + $0xef8] sm:$0xff]  ;;  %v16075_v50 = vcombine.low %v587_v39, %v591_v40  ;;  %v16132_v40 = vcombine.high %v3968_v34, %v3972_v35 }
 0x21e   :  { %3722 = vmatprep.subr.bf16.mxu0 %v16028_v51  ;;  %3886 = vmatprep.subr.bf16.mxu1 %v16030_v47  ;;  %v16077_v51 = vcombine.low %v588_v41, %v592_v42  ;;  %v16084_v47 = vcombine.high %v595_v46, %v599_v33  ;;  %v16086_v52 = vcombine.high %v596_v48, %v600_v49 }
 0x221   :  { %3723 = vmatpush1.bf16.msra.mxu0 %v16027_v57  ;;  %3887 = vmatpush1.bf16.msra.mxu1 %v16029_v59  ;;  %v604_v57 = vld [vmem:[#allocation6 + $0xf18] sm:$0xff] }
 0x222   :  { %3724 = vmatprep.subr.bf16.mxu0 %v16036_v60  ;;  %3888 = vmatprep.subr.bf16.mxu1 %v16038_v61  ;;  %v608_v59 = vld [vmem:[#allocation6 + $0xf38] sm:$0xff]  ;;  %v16083_v60 = vcombine.low %v595_v46, %v599_v33  ;;  %v16085_v61 = vcombine.low %v596_v48, %v600_v49  ;;  %v3981_v46 = vld [vmem:[#allocation6 + $0x1068] sm:$0xff]  ;;  %v3984_v48 = vld [vmem:[#allocation6 + $0x1080] sm:$0xff] }
 0x223   :  { %v18212_v5 = vpop.f32.mrb[0].mxu0  ;;  %v18214_v9 = vpop.f32.mrb[0].mxu1  ;;  %v16094_v63 = vcombine.high %v604_v57, %v608_v59  ;;  %v16093_v7 = vcombine.low %v604_v57, %v608_v59  ;;  %v3988_v49 = vld [vmem:[#allocation6 + $0x10a0] sm:$0xff] }
 0x224   :  { %v18216_v10 = vpop.f32.mrb[1].mxu0  ;;  %v18218_v14 = vpop.f32.mrb[1].mxu1  ;;  %v3992_v59 = vld [vmem:[#allocation6 + $0x10c0] sm:$0xff] }
 0x225   :  { %v3424_v15 = vpop.f32.mrb[2].mxu0  ;;  %3725 = vmatpush1.bf16.msra.mxu0 %v16035_v2  ;;  %v3588_v17 = vpop.f32.mrb[2].mxu1  ;;  %3889 = vmatpush1.bf16.msra.mxu1 %v16037_v3  ;;  %v18220_v2 = vshrl.u32 %v635_v56, 7  ;;  %v612_v3 = vld [vmem:[#allocation6 + $0xf58] sm:$0xff]  ;;  %v16148_v56 = vcombine.high %v3984_v48, %v3988_v49 }
 0x226   :  { %v3425_v18 = vpop.f32.mrb[3].mxu0  ;;  %3726 = vmatprep.subr.bf16.mxu0 %v16044_v4  ;;  %v3589_v21 = vpop.f32.mrb[3].mxu1  ;;  %3890 = vmatprep.subr.bf16.mxu1 %v16046_v6  ;;  %v616_v4 = vld [vmem:[#allocation6 + $0xf78] sm:$0xff]  ;;  %v16091_v6 = vcombine.low %v603_v53, %v607_v54  ;;  %v623_v15 = vld [vmem:[#allocation6 + $0xfb0] sm:$0xff] }
 0x227   :  { %v16102_v11 = vcombine.high %v612_v3, %v616_v4  ;;  %v620_v17 = vld [vmem:[#allocation6 + $0xf98] sm:$0xff]  ;;  %v16101_v21 = vcombine.low %v612_v3, %v616_v4  ;;  %v4000_v3 = vld [vmem:[#allocation6 + $0x1100] sm:$0xff] }
 0x228   :  { %v624_v18 = vld [vmem:[#allocation6 + $0xfb8] sm:$0xff]  ;;  %v4004_v4 = vld [vmem:[#allocation6 + $0x1120] sm:$0xff] }
 0x229   :  { %3727 = vmatpush1.bf16.msra.mxu0 %v16043_v16  ;;  %3891 = vmatpush1.bf16.msra.mxu1 %v16045_v19  ;;  %v18223_v16 = vsub.s32 1, %v18220_v2  ;;  %v18225_v19 = vld [vmem:[#allocation8] sm:$0xff]  ;;  %v16110_v58 = vcombine.high %v620_v17, %v624_v18 }
 0x22a   :  { %3728 = vmatprep.subr.bf16.mxu0 %v16052_v20  ;;  %3892 = vmatprep.subr.bf16.mxu1 %v16054_v24  ;;  %v16099_v20 = vcombine.low %v611_v0, %v615_v1  ;;  %v16108_v24 = vcombine.high %v619_v12, %v623_v15 }
 0x22b   :  { %v642_v27 = vrot.slane %v18225_v19, %v18223_v16 }
 0x22d   :  { %3729 = vmatpush1.bf16.msra.mxu0 %v16051_v13  ;;  %3893 = vmatpush1.bf16.msra.mxu1 %v16053_v28  ;;  %v628_v13 = vld [vmem:[#allocation6 + $0xfd8] sm:$0xff] }
 0x22e   :  { %3730 = vmatprep.subr.bf16.mxu0 %v16060_v29  ;;  %3894 = vmatprep.subr.bf16.mxu1 %v16062_v30  ;;  %v632_v28 = vld [vmem:[#allocation6 + $0xff8] sm:$0xff]  ;;  %v16107_v29 = vcombine.low %v619_v12, %v623_v15  ;;  %v16109_v30 = vcombine.low %v620_v17, %v624_v18  ;;  %v16164_v12 = vcombine.high %v4000_v3, %v4004_v4  ;;  %v4008_v17 = vld [vmem:[#allocation6 + $0x1140] sm:$0xff] }
 0x22f   :  { %v16118_v32 = vcombine.high %v628_v13, %v632_v28  ;;  %v16117_v39 = vcombine.low %v628_v13, %v632_v28  ;;  %v4012_v18 = vld [vmem:[#allocation6 + $0x1160] sm:$0xff]  ;;  %v4017_v28 = vld [vmem:[#allocation6 + $0x1188] sm:$0xff] }
 0x230   :  { %v4020_v13 = vld [vmem:[#allocation6 + $0x11a0] sm:$0xff] }
 0x231   :  { %3731 = vmatpush1.bf16.msra.mxu0 %v16059_v36  ;;  %3895 = vmatpush1.bf16.msra.mxu1 %v16061_v38  ;;  %v17749_v36 = vadd.f32 %v18216_v10, %v642_v27  ;;  %v3969_v38 = vld [vmem:[#allocation6 + $0x1008] sm:$0xff]  ;;  %v4016_v27 = vld [vmem:[#allocation6 + $0x1180] sm:$0xff] }
 0x232   :  { %3732 = vmatprep.subr.bf16.mxu0 %v16068_v22  ;;  %3896 = vmatprep.subr.bf16.mxu1 %v16070_v23  ;;  %v3973_v22 = vld [vmem:[#allocation6 + $0x1028] sm:$0xff]  ;;  %v16115_v23 = vcombine.low %v627_v25, %v631_v26  ;;  %v16172_v25 = vcombine.high %v4008_v17, %v4012_v18 }
 0x233   :  { %v16134_v41 = vcombine.high %v3969_v38, %v3973_v22  ;;  %v3920_v42 = vmax.f32 %v17749_v36, 0.0  ;;  %v16133_v10 = vcombine.low %v3969_v38, %v3973_v22  ;;  %v4028_v36 = vld [vmem:[#allocation6 + $0x11e0] sm:$0xff]  ;;  %v4025_v38 = vld [vmem:[#allocation6 + $0x11c8] sm:$0xff] }
 0x234   :  { %v4029_v22 = vld [vmem:[#allocation6 + $0x11e8] sm:$0xff] }
 0x235   :  { %3733 = vmatpush1.bf16.msra.mxu0 %v16067_v37  ;;  %3897 = vmatpush1.bf16.msra.mxu1 %v16069_v43  ;;  %v3976_v37 = vld [vmem:[#allocation6 + $0x1040] sm:$0xff] }
 0x236   :  { %3734 = vmatprep.subr.bf16.mxu0 %v16076_v44  ;;  %3898 = vmatprep.subr.bf16.mxu1 %v16078_v45  ;;  %v3980_v43 = vld [vmem:[#allocation6 + $0x1060] sm:$0xff]  ;;  %v16131_v44 = vcombine.low %v3968_v34, %v3972_v35  ;;  %v3977_v45 = vld [vmem:[#allocation6 + $0x1048] sm:$0xff] }
 0x237   :  { %v16140_v33 = vcombine.high %v3976_v37, %v3980_v43  ;;  %v16139_v53 = vcombine.low %v3976_v37, %v3980_v43  ;;  %v16141_v54 = vcombine.low %v3977_v45, %v3981_v46  ;;  %v4024_v35 = vld [vmem:[#allocation6 + $0x11c0] sm:$0xff]  ;;  %v4033_v43 = vld [vmem:[#allocation6 + $0x1208] sm:$0xff] }
 0x238   :  { %v4036_v37 = vld [vmem:[#allocation6 + $0x1220] sm:$0xff] }
 0x239   :  { %3735 = vmatpush1.bf16.msra.mxu0 %v16075_v50  ;;  %3899 = vmatpush1.bf16.msra.mxu1 %v16077_v51  ;;  %v18230_v50 = vpack.c.bf16 %v3920_v42, %v3920_v42  ;;  %v16142_v51 = vcombine.high %v3977_v45, %v3981_v46  ;;  %v4032_v42 = vld [vmem:[#allocation6 + $0x1200] sm:$0xff]  ;;  %v16187_v45 = vcombine.low %v4024_v35, %v4028_v36 }
 0x23a   :  { %3736 = vmatprep.subr.bf16.mxu0 %v16084_v47  ;;  %3900 = vmatprep.subr.bf16.mxu1 %v16086_v52  ;;  %v3985_v47 = vld [vmem:[#allocation6 + $0x1088] sm:$0xff]  ;;  %v16189_v46 = vcombine.low %v4025_v38, %v4029_v22 }
 0x23b   :  { %v3989_v52 = vld [vmem:[#allocation6 + $0x10a8] sm:$0xff] }
 0x23c   :  { %v16150_v57 = vcombine.high %v3985_v47, %v3989_v52 }
 0x23d   :  { %3737 = vmatpush1.bf16.msra.mxu0 %v16083_v60  ;;  %3901 = vmatpush1.bf16.msra.mxu1 %v16085_v61  ;;  %v3996_v60 = vld [vmem:[#allocation6 + $0x10e0] sm:$0xff]  ;;  %v3993_v61 = vld [vmem:[#allocation6 + $0x10c8] sm:$0xff] }
 0x23e   :  { %3738 = vmatprep.subr.bf16.mxu0 %v16092_v62  ;;  %3902 = vmatprep.subr.bf16.mxu1 %v16094_v63  ;;  %v3997_v62 = vld [vmem:[#allocation6 + $0x10e8] sm:$0xff]  ;;  %v16147_v63 = vcombine.low %v3984_v48, %v3988_v49  ;;  %v16156_v0 = vcombine.high %v3992_v59, %v3996_v60  ;;  %v4040_v48 = vld [vmem:[#allocation6 + $0x1240] sm:$0xff] }
 0x23f   :  { %v16158_v1 = vcombine.high %v3993_v61, %v3997_v62  ;;  %v4044_v49 = vld [vmem:[#allocation6 + $0x1260] sm:$0xff] }
 0x241   :  { %3739 = vmatpush1.bf16.msra.mxu0 %v16091_v6  ;;  %3903 = vmatpush1.bf16.msra.mxu1 %v16093_v7  ;;  %v4001_v6 = vld [vmem:[#allocation6 + $0x1108] sm:$0xff] }
 0x242   :  { %3740 = vmatprep.subr.bf16.mxu0 %v16100_v8  ;;  %3904 = vmatprep.subr.bf16.mxu1 %v16102_v11  ;;  %v4005_v7 = vld [vmem:[#allocation6 + $0x1128] sm:$0xff]  ;;  %v16155_v8 = vcombine.low %v3992_v59, %v3996_v60  ;;  %v16157_v11 = vcombine.low %v3993_v61, %v3997_v62  ;;  %v4052_v59 = vld [vmem:[#allocation6 + $0x12a0] sm:$0xff]  ;;  %v16203_v62 = vcombine.low %v4040_v48, %v4044_v49 }
 0x243   :  { %v16166_v15 = vcombine.high %v4001_v6, %v4005_v7  ;;  %v4049_v60 = vld [vmem:[#allocation6 + $0x1288] sm:$0xff] }
 0x244   :  { %v4053_v61 = vld [vmem:[#allocation6 + $0x12a8] sm:$0xff] }
 0x245   :  { %3741 = vmatpush1.bf16.msra.mxu0 %v16099_v20  ;;  %3905 = vmatpush1.bf16.msra.mxu1 %v16101_v21  ;;  %v4009_v20 = vld [vmem:[#allocation6 + $0x1148] sm:$0xff] }
 0x246   :  { %3742 = vmatprep.subr.bf16.mxu0 %v16108_v24  ;;  %3906 = vmatprep.subr.bf16.mxu1 %v16110_v58  ;;  %v4013_v21 = vld [vmem:[#allocation6 + $0x1168] sm:$0xff]  ;;  %v16163_v24 = vcombine.low %v4000_v3, %v4004_v4  ;;  %v16165_v58 = vcombine.low %v4001_v6, %v4005_v7  ;;  %v4060_v3 = vld [vmem:[#allocation6 + $0x12e0] sm:$0xff] }
 0x247   :  { %v16174_v26 = vcombine.high %v4009_v20, %v4013_v21  ;;  %v4057_v4 = vld [vmem:[#allocation6 + $0x12c8] sm:$0xff] }
 0x248   :  { %v4061_v6 = vld [vmem:[#allocation6 + $0x12e8] sm:$0xff] }
 0x249   :  { %3743 = vmatpush1.bf16.msra.mxu0 %v16107_v29  ;;  %3907 = vmatpush1.bf16.msra.mxu1 %v16109_v30  ;;  %v4021_v29 = vld [vmem:[#allocation6 + $0x11a8] sm:$0xff]  ;;  %v16171_v30 = vcombine.low %v4008_v17, %v4012_v18  ;;  %v4068_v17 = vld [vmem:[#allocation6 + $0x1320] sm:$0xff] }
 0x24a   :  { %3744 = vmatprep.subr.bf16.mxu0 %v16116_v31  ;;  %3908 = vmatprep.subr.bf16.mxu1 %v16118_v32  ;;  %v16173_v31 = vcombine.low %v4009_v20, %v4013_v21  ;;  %v16180_v32 = vcombine.high %v4016_v27, %v4020_v13  ;;  %v16182_v34 = vcombine.high %v4017_v28, %v4021_v29  ;;  %v4065_v18 = vld [vmem:[#allocation6 + $0x1308] sm:$0xff] }
 0x24b   :  { %v4069_v20 = vld [vmem:[#allocation6 + $0x1328] sm:$0xff] }
 0x24d   :  { %3745 = vmatpush1.bf16.msra.mxu0 %v16115_v23  ;;  %3909 = vmatpush1.bf16.msra.mxu1 %v16117_v39  ;;  %v16179_v23 = vcombine.low %v4016_v27, %v4020_v13  ;;  %v16181_v39 = vcombine.low %v4017_v28, %v4021_v29  ;;  %v4076_v27 = vld [vmem:[#allocation6 + $0x1360] sm:$0xff]  ;;  %v4073_v13 = vld [vmem:[#allocation6 + $0x1348] sm:$0xff] }
 0x24e   :  { %7111 = vmatprep.subr.bf16.mxu0 %v16132_v40  ;;  %7275 = vmatprep.subr.bf16.mxu1 %v16134_v41  ;;  %v16188_v40 = vcombine.high %v4024_v35, %v4028_v36  ;;  %v16190_v41 = vcombine.high %v4025_v38, %v4029_v22  ;;  %v4077_v28 = vld [vmem:[#allocation6 + $0x1368] sm:$0xff]  ;;  %v4080_v35 = vld [vmem:[#allocation6 + $0x1380] sm:$0xff]  ;;  %v18240_v38 = vsub.s32 3, %v18220_v2 }
 0x24f   :  { %v4084_v36 = vld [vmem:[#allocation6 + $0x13a0] sm:$0xff]  ;;  %v4081_v22 = vld [vmem:[#allocation6 + $0x1388] sm:$0xff] }
 0x250   :  { %3747 = vmatmul.mubr.bf16.vlgmr.msra.gmra.mrb[4].mxu0 %v18194_v55  ;;  %3911 = vmatmul.mubr.bf16.vlgmr.msra.gmra.mrb[4].mxu1 %v18194_v55  ;;  %v16149_v55 = vcombine.low %v3985_v47, %v3989_v52  ;;  %v4045_v47 = vld [vmem:[#allocation6 + $0x1268] sm:$0xff]  ;;  %v16195_v52 = vcombine.low %v4032_v42, %v4036_v37 }
 0x251   :  { %7112 = vmatpush1.bf16.msra.mxu0 %v16131_v44  ;;  %7143 = vmatprep.mubr.bf16.mxu0 %v18230_v50  ;;  %v4037_v44 = vld [vmem:[#allocation6 + $0x1228] sm:$0xff] }
 0x252   :  { %7276 = vmatpush1.bf16.msra.mxu1 %v16133_v10  ;;  %7307 = vmatprep.mubr.bf16.mxu1 %v18230_v50  ;;  %v16196_v10 = vcombine.high %v4032_v42, %v4036_v37  ;;  %v16244_v42 = vcombine.high %v4080_v35, %v4084_v36 }
 0x253   :  { %7113 = vmatprep.subr.bf16.mxu0 %v16140_v33  ;;  %7277 = vmatprep.subr.bf16.mxu1 %v16142_v51  ;;  %v16198_v33 = vcombine.high %v4033_v43, %v4037_v44  ;;  %v4041_v51 = vld [vmem:[#allocation6 + $0x1248] sm:$0xff] }
 0x255   :  { %7114 = vmatpush1.bf16.msra.mxu0 %v16139_v53  ;;  %v16197_v53 = vcombine.low %v4033_v43, %v4037_v44  ;;  %v4088_v43 = vld [vmem:[#allocation6 + $0x13c0] sm:$0xff] }
 0x256   :  { %7278 = vmatpush1.bf16.msra.mxu1 %v16141_v54  ;;  %7115 = vmatprep.subr.bf16.mxu0 %v16148_v56  ;;  %v16204_v54 = vcombine.high %v4040_v48, %v4044_v49  ;;  %v16206_v56 = vcombine.high %v4041_v51, %v4045_v47  ;;  %v4092_v44 = vld [vmem:[#allocation6 + $0x13e0] sm:$0xff] }
 0x257   :  { %7279 = vmatprep.subr.bf16.mxu1 %v16150_v57  ;;  %v4048_v57 = vld [vmem:[#allocation6 + $0x1280] sm:$0xff] }
 0x258   :  { %v16211_v7 = vcombine.low %v4048_v57, %v4052_v59 }
 0x259   :  { %7116 = vmatpush1.bf16.msra.mxu0 %v16147_v63  ;;  %v16205_v63 = vcombine.low %v4041_v51, %v4045_v47  ;;  %v16252_v51 = vcombine.high %v4088_v43, %v4092_v44 }
 0x25a   :  { %7280 = vmatpush1.bf16.msra.mxu1 %v16149_v55  ;;  %7117 = vmatprep.subr.bf16.mxu0 %v16156_v0  ;;  %v16212_v55 = vcombine.high %v4048_v57, %v4052_v59  ;;  %v16214_v0 = vcombine.high %v4049_v60, %v4053_v61  ;;  %v4101_v57 = vld [vmem:[#allocation6 + $0x1428] sm:$0xff]  ;;  %v16251_v59 = vcombine.low %v4088_v43, %v4092_v44 }
 0x25b   :  { %7281 = vmatprep.subr.bf16.mxu1 %v16158_v1  ;;  %v4056_v1 = vld [vmem:[#allocation6 + $0x12c0] sm:$0xff]  ;;  %v4137_v43 = vld [vmem:[#allocation6 + $0x1548] sm:$0xff] }
 0x25c   :  { %v16219_v21 = vcombine.low %v4056_v1, %v4060_v3  ;;  %v4141_v44 = vld [vmem:[#allocation6 + $0x1568] sm:$0xff] }
 0x25d   :  { %7118 = vmatpush1.bf16.msra.mxu0 %v16155_v8  ;;  %v16213_v8 = vcombine.low %v4049_v60, %v4053_v61 }
 0x25e   :  { %7282 = vmatpush1.bf16.msra.mxu1 %v16157_v11  ;;  %7119 = vmatprep.subr.bf16.mxu0 %v16164_v12  ;;  %v16220_v11 = vcombine.high %v4056_v1, %v4060_v3  ;;  %v16222_v12 = vcombine.high %v4057_v4, %v4061_v6  ;;  %v4105_v3 = vld [vmem:[#allocation6 + $0x1448] sm:$0xff] }
 0x25f   :  { %7283 = vmatprep.subr.bf16.mxu1 %v16166_v15  ;;  %v4064_v15 = vld [vmem:[#allocation6 + $0x1300] sm:$0xff] }
 0x260   :  { %v16227_v29 = vcombine.low %v4064_v15, %v4068_v17 }
 0x261   :  { %7120 = vmatpush1.bf16.msra.mxu0 %v16163_v24  ;;  %v16221_v24 = vcombine.low %v4057_v4, %v4061_v6  ;;  %v4109_v4 = vld [vmem:[#allocation6 + $0x1468] sm:$0xff] }
 0x262   :  { %7284 = vmatpush1.bf16.msra.mxu1 %v16165_v58  ;;  %7121 = vmatprep.subr.bf16.mxu0 %v16172_v25  ;;  %v16228_v58 = vcombine.high %v4064_v15, %v4068_v17  ;;  %v16230_v25 = vcombine.high %v4065_v18, %v4069_v20  ;;  %v16270_v15 = vcombine.high %v4105_v3, %v4109_v4  ;;  %v4113_v17 = vld [vmem:[#allocation6 + $0x1488] sm:$0xff] }
 0x263   :  { %7285 = vmatprep.subr.bf16.mxu1 %v16174_v26  ;;  %v4072_v26 = vld [vmem:[#allocation6 + $0x1340] sm:$0xff] }
 0x265   :  { %7122 = vmatpush1.bf16.msra.mxu0 %v16171_v30  ;;  %v18237_v30 = vsub.s32 0, %v18220_v2 }
 0x266   :  { %7286 = vmatpush1.bf16.msra.mxu1 %v16173_v31  ;;  %7123 = vmatprep.subr.bf16.mxu0 %v16180_v32  ;;  %v16229_v31 = vcombine.low %v4065_v18, %v4069_v20  ;;  %v16236_v32 = vcombine.high %v4072_v26, %v4076_v27  ;;  %v4117_v18 = vld [vmem:[#allocation6 + $0x14a8] sm:$0xff] }
 0x267   :  { %7287 = vmatprep.subr.bf16.mxu1 %v16182_v34  ;;  %v16238_v34 = vcombine.high %v4073_v13, %v4077_v28 }
 0x269   :  { %7124 = vmatpush1.bf16.msra.mxu0 %v16179_v23  ;;  %v4085_v23 = vld [vmem:[#allocation6 + $0x13a8] sm:$0xff] }
 0x26a   :  { %7288 = vmatpush1.bf16.msra.mxu1 %v16181_v39  ;;  %7125 = vmatprep.subr.bf16.mxu0 %v16188_v40  ;;  %v16235_v39 = vcombine.low %v4072_v26, %v4076_v27  ;;  %v638_v40 = vrot.slane %v18225_v19, %v18237_v30  ;;  %v16246_v37 = vcombine.high %v4081_v22, %v4085_v23  ;;  %v4124_v26 = vld [vmem:[#allocation6 + $0x14e0] sm:$0xff]  ;;  %v4121_v27 = vld [vmem:[#allocation6 + $0x14c8] sm:$0xff] }
 0x26b   :  { %7289 = vmatprep.subr.bf16.mxu1 %v16190_v41  ;;  %v16237_v41 = vcombine.low %v4073_v13, %v4077_v28  ;;  %v16245_v49 = vcombine.low %v4081_v22, %v4085_v23  ;;  %v4125_v13 = vld [vmem:[#allocation6 + $0x14e8] sm:$0xff] }
 0x26c   :  { %v17748_v48 = vadd.f32 %v18212_v5, %v638_v40  ;;  %v4133_v22 = vld [vmem:[#allocation6 + $0x1528] sm:$0xff] }
 0x26d   :  { %7126 = vmatpush1.bf16.msra.mxu0 %v16187_v45  ;;  %v650_v45 = vrot.slane %v18225_v19, %v18240_v38 }
 0x26e   :  { %7290 = vmatpush1.bf16.msra.mxu1 %v16189_v46  ;;  %7127 = vmatprep.subr.bf16.mxu0 %v16196_v10  ;;  %v4089_v46 = vld [vmem:[#allocation6 + $0x13c8] sm:$0xff]  ;;  %v3919_v60 = vmax.f32 %v17748_v48, 0.0  ;;  %v4144_v48 = vld [vmem:[#allocation6 + $0x1580] sm:$0xff] }
 0x26f   :  { %7291 = vmatprep.subr.bf16.mxu1 %v16198_v33  ;;  %v4093_v10 = vld [vmem:[#allocation6 + $0x13e8] sm:$0xff]  ;;  %v16243_v33 = vcombine.low %v4080_v35, %v4084_v36  ;;  %v4132_v35 = vld [vmem:[#allocation6 + $0x1520] sm:$0xff] }
 0x270   :  { %v16254_v47 = vcombine.high %v4089_v46, %v4093_v10  ;;  %v16253_v61 = vcombine.low %v4089_v46, %v4093_v10  ;;  %v18248_v6 = vpack.c.bf16 %v3919_v60, %v3919_v60  ;;  %v4129_v36 = vld [vmem:[#allocation6 + $0x1508] sm:$0xff] }
 0x271   :  { %7128 = vmatpush1.bf16.msra.mxu0 %v16195_v52  ;;  %v4096_v52 = vld [vmem:[#allocation6 + $0x1400] sm:$0xff]  ;;  %v16293_v46 = vcombine.low %v4129_v36, %v4133_v22  ;;  %v4153_v60 = vld [vmem:[#allocation6 + $0x15c8] sm:$0xff] }
 0x272   :  { %7292 = vmatpush1.bf16.msra.mxu1 %v16197_v53  ;;  %7129 = vmatprep.subr.bf16.mxu0 %v16204_v54  ;;  %v4100_v53 = vld [vmem:[#allocation6 + $0x1420] sm:$0xff]  ;;  %v17751_v54 = vadd.f32 %v18218_v14, %v650_v45 }
 0x273   :  { %7293 = vmatprep.subr.bf16.mxu1 %v16206_v56  ;;  %v4097_v56 = vld [vmem:[#allocation6 + $0x1408] sm:$0xff]  ;;  %v16259_v1 = vcombine.low %v4096_v52, %v4100_v53 }
 0x274   :  { %v16262_v5 = vcombine.high %v4097_v56, %v4101_v57  ;;  %v16261_v14 = vcombine.low %v4097_v56, %v4101_v57  ;;  %v4152_v57 = vld [vmem:[#allocation6 + $0x15c0] sm:$0xff] }
 0x275   :  { %7130 = vmatpush1.bf16.msra.mxu0 %v16203_v62  ;;  %v16260_v62 = vcombine.high %v4096_v52, %v4100_v53  ;;  %v16301_v53 = vcombine.low %v4137_v43, %v4141_v44 }
 0x276   :  { %7294 = vmatpush1.bf16.msra.mxu1 %v16205_v63  ;;  %7131 = vmatprep.subr.bf16.mxu0 %v16212_v55  ;;  %v3922_v63 = vmax.f32 %v17751_v54, 0.0  ;;  %v4104_v55 = vld [vmem:[#allocation6 + $0x1440] sm:$0xff] }
 0x277   :  { %7295 = vmatprep.subr.bf16.mxu1 %v16214_v0  ;;  %v4108_v0 = vld [vmem:[#allocation6 + $0x1460] sm:$0xff] }
 0x278   :  { %v16267_v20 = vcombine.low %v4104_v55, %v4108_v0 }
 0x279   :  { %7132 = vmatpush1.bf16.msra.mxu0 %v16211_v7  ;;  %v16268_v7 = vcombine.high %v4104_v55, %v4108_v0  ;;  %v4160_v0 = vld [vmem:[#allocation6 + $0x1600] sm:$0xff] }
 0x27a   :  { %7296 = vmatpush1.bf16.msra.mxu1 %v16213_v8  ;;  %7133 = vmatprep.subr.bf16.mxu0 %v16220_v11  ;;  %v4112_v8 = vld [vmem:[#allocation6 + $0x1480] sm:$0xff] }
 0x27b   :  { %7297 = vmatprep.subr.bf16.mxu1 %v16222_v12  ;;  %v4116_v11 = vld [vmem:[#allocation6 + $0x14a0] sm:$0xff]  ;;  %v18250_v12 = vpack.c.bf16 %v3922_v63, %v3922_v63 }
 0x27c   :  { %v16275_v28 = vcombine.low %v4112_v8, %v4116_v11 }
 0x27d   :  { %7134 = vmatpush1.bf16.msra.mxu0 %v16219_v21  ;;  %v16269_v21 = vcombine.low %v4105_v3, %v4109_v4  ;;  %v4161_v3 = vld [vmem:[#allocation6 + $0x1608] sm:$0xff] }
 0x27e   :  { %7298 = vmatpush1.bf16.msra.mxu1 %v16221_v24  ;;  %7135 = vmatprep.subr.bf16.mxu0 %v16228_v58  ;;  %v16276_v24 = vcombine.high %v4112_v8, %v4116_v11  ;;  %v16278_v58 = vcombine.high %v4113_v17, %v4117_v18  ;;  %v4165_v4 = vld [vmem:[#allocation6 + $0x1628] sm:$0xff] }
 0x27f   :  { %7299 = vmatprep.subr.bf16.mxu1 %v16230_v25  ;;  %v4120_v25 = vld [vmem:[#allocation6 + $0x14c0] sm:$0xff]  ;;  %v16326_v11 = vcombine.high %v4161_v3, %v4165_v4 }
 0x280   :  { %v16283_v23 = vcombine.low %v4120_v25, %v4124_v26 }
 0x281   :  { %7136 = vmatpush1.bf16.msra.mxu0 %v16227_v29  ;;  %v16277_v29 = vcombine.low %v4113_v17, %v4117_v18  ;;  %v4172_v17 = vld [vmem:[#allocation6 + $0x1660] sm:$0xff]  ;;  %v4169_v18 = vld [vmem:[#allocation6 + $0x1648] sm:$0xff] }
 0x282   :  { %7300 = vmatpush1.bf16.msra.mxu1 %v16229_v31  ;;  %7137 = vmatprep.subr.bf16.mxu0 %v16236_v32  ;;  %v16284_v31 = vcombine.high %v4120_v25, %v4124_v26  ;;  %v16286_v32 = vcombine.high %v4121_v27, %v4125_v13  ;;  %v4176_v26 = vld [vmem:[#allocation6 + $0x1680] sm:$0xff] }
 0x283   :  { %7301 = vmatprep.subr.bf16.mxu1 %v16238_v34  ;;  %v4128_v34 = vld [vmem:[#allocation6 + $0x1500] sm:$0xff] }
 0x284   :  { %v16292_v40 = vcombine.high %v4128_v34, %v4132_v35  ;;  %v16291_v45 = vcombine.low %v4128_v34, %v4132_v35  ;;  %v4184_v35 = vld [vmem:[#allocation6 + $0x16c0] sm:$0xff] }
 0x285   :  { %7138 = vmatpush1.bf16.msra.mxu0 %v16235_v39  ;;  %v16285_v39 = vcombine.low %v4121_v27, %v4125_v13  ;;  %v4180_v27 = vld [vmem:[#allocation6 + $0x16a0] sm:$0xff]  ;;  %v4177_v13 = vld [vmem:[#allocation6 + $0x1688] sm:$0xff] }
 0x286   :  { %7302 = vmatpush1.bf16.msra.mxu1 %v16237_v41  ;;  %7139 = vmatprep.subr.bf16.mxu0 %v16244_v42  ;;  %v16294_v41 = vcombine.high %v4129_v36, %v4133_v22  ;;  %v4136_v42 = vld [vmem:[#allocation6 + $0x1540] sm:$0xff]  ;;  %v4185_v22 = vld [vmem:[#allocation6 + $0x16c8] sm:$0xff] }
 0x287   :  { %7303 = vmatprep.subr.bf16.mxu1 %v16246_v37  ;;  %v4140_v37 = vld [vmem:[#allocation6 + $0x1560] sm:$0xff] }
 0x288   :  { %v16300_v10 = vcombine.high %v4136_v42, %v4140_v37  ;;  %v16299_v52 = vcombine.low %v4136_v42, %v4140_v37  ;;  %v4188_v36 = vld [vmem:[#allocation6 + $0x16e0] sm:$0xff] }
 0x289   :  { %7140 = vmatpush1.bf16.msra.mxu0 %v16243_v33  ;;  %v16302_v33 = vcombine.high %v4137_v43, %v4141_v44  ;;  %v4192_v37 = vld [vmem:[#allocation6 + $0x1700] sm:$0xff]  ;;  %v4193_v44 = vld [vmem:[#allocation6 + $0x1708] sm:$0xff] }
 0x28a   :  { %7304 = vmatpush1.bf16.msra.mxu1 %v16245_v49  ;;  %7141 = vmatprep.subr.bf16.mxu0 %v16252_v51  ;;  %v4148_v49 = vld [vmem:[#allocation6 + $0x15a0] sm:$0xff]  ;;  %v4145_v51 = vld [vmem:[#allocation6 + $0x1588] sm:$0xff] }
 0x28b   :  { %7305 = vmatprep.subr.bf16.mxu1 %v16254_v47  ;;  %v4149_v47 = vld [vmem:[#allocation6 + $0x15a8] sm:$0xff]  ;;  %v16308_v54 = vcombine.high %v4144_v48, %v4148_v49  ;;  %v4196_v43 = vld [vmem:[#allocation6 + $0x1720] sm:$0xff] }
 0x28c   :  { %v16310_v56 = vcombine.high %v4145_v51, %v4149_v47 }
 0x28d   :  { %7142 = vmatpush1.bf16.msra.mxu0 %v16251_v59  ;;  %v4156_v59 = vld [vmem:[#allocation6 + $0x15e0] sm:$0xff] }
 0x28e   :  { %7306 = vmatpush1.bf16.msra.mxu1 %v16253_v61  ;;  %7152 = vmatprep.subr.bf16.mxu0 %v16260_v62  ;;  %v4157_v61 = vld [vmem:[#allocation6 + $0x15e8] sm:$0xff]  ;;  %v16307_v62 = vcombine.low %v4144_v48, %v4148_v49  ;;  %v16316_v63 = vcombine.high %v4152_v57, %v4156_v59  ;;  %v4200_v49 = vld [vmem:[#allocation6 + $0x1740] sm:$0xff] }
 0x28f   :  { %7316 = vmatprep.subr.bf16.mxu1 %v16262_v5  ;;  %v16309_v5 = vcombine.low %v4145_v51, %v4149_v47  ;;  %v16318_v55 = vcombine.high %v4153_v60, %v4157_v61  ;;  %v4204_v51 = vld [vmem:[#allocation6 + $0x1760] sm:$0xff]  ;;  %v4201_v47 = vld [vmem:[#allocation6 + $0x1748] sm:$0xff] }
 0x290   :  { %7144 = vmatmul.mubr.bf16.vlgmr.msra.gmra.mrb[8].mxu0 %v18248_v6 }
 0x291   :  { %7308 = vmatmul.mubr.bf16.vlgmr.msra.gmra.mrb[8].mxu1 %v18248_v6  ;;  %7153 = vmatpush1.bf16.msra.mxu0 %v16259_v1  ;;  %v4164_v1 = vld [vmem:[#allocation6 + $0x1620] sm:$0xff] }
 0x292   :  { %7184 = vmatprep.mubr.bf16.mxu0 %v18250_v12  ;;  %7317 = vmatpush1.bf16.msra.mxu1 %v16261_v14  ;;  %v16315_v14 = vcombine.low %v4152_v57, %v4156_v59  ;;  %v16324_v8 = vcombine.high %v4160_v0, %v4164_v1  ;;  %v16364_v57 = vcombine.high %v4200_v49, %v4204_v51 }
 0x293   :  { %7348 = vmatprep.mubr.bf16.mxu1 %v18250_v12  ;;  %7154 = vmatprep.subr.bf16.mxu0 %v16268_v7  ;;  %v16317_v7 = vcombine.low %v4153_v60, %v4157_v61  ;;  %v4208_v60 = vld [vmem:[#allocation6 + $0x1780] sm:$0xff] }
 0x294   :  { %7318 = vmatprep.subr.bf16.mxu1 %v16270_v15  ;;  %v4168_v15 = vld [vmem:[#allocation6 + $0x1640] sm:$0xff] }
 0x295   :  { %7155 = vmatpush1.bf16.msra.mxu0 %v16267_v20  ;;  %v4173_v20 = vld [vmem:[#allocation6 + $0x1668] sm:$0xff]  ;;  %v4212_v61 = vld [vmem:[#allocation6 + $0x17a0] sm:$0xff] }
 0x296   :  { %7319 = vmatpush1.bf16.msra.mxu1 %v16269_v21  ;;  %7156 = vmatprep.subr.bf16.mxu0 %v16276_v24  ;;  %v16323_v21 = vcombine.low %v4160_v0, %v4164_v1  ;;  %v16325_v24 = vcombine.low %v4161_v3, %v4165_v4  ;;  %v16334_v25 = vcombine.high %v4169_v18, %v4173_v20  ;;  %v4216_v4 = vld [vmem:[#allocation6 + $0x17c0] sm:$0xff] }
 0x297   :  { %7320 = vmatprep.subr.bf16.mxu1 %v16278_v58  ;;  %v16332_v58 = vcombine.high %v4168_v15, %v4172_v17  ;;  %v16372_v1 = vcombine.high %v4208_v60, %v4212_v61 }
 0x299   :  { %7157 = vmatpush1.bf16.msra.mxu0 %v16275_v28  ;;  %v4181_v28 = vld [vmem:[#allocation6 + $0x16a8] sm:$0xff] }
 0x29a   :  { %7321 = vmatpush1.bf16.msra.mxu1 %v16277_v29  ;;  %7158 = vmatprep.subr.bf16.mxu0 %v16284_v31  ;;  %v16331_v29 = vcombine.low %v4168_v15, %v4172_v17  ;;  %v16333_v31 = vcombine.low %v4169_v18, %v4173_v20  ;;  %v16342_v34 = vcombine.high %v4177_v13, %v4181_v28  ;;  %v4224_v20 = vld [vmem:[#allocation6 + $0x1800] sm:$0xff] }
 0x29b   :  { %7322 = vmatprep.subr.bf16.mxu1 %v16286_v32  ;;  %v16340_v32 = vcombine.high %v4176_v26, %v4180_v27 }
 0x29d   :  { %7159 = vmatpush1.bf16.msra.mxu0 %v16283_v23  ;;  %v4189_v23 = vld [vmem:[#allocation6 + $0x16e8] sm:$0xff] }
 0x29e   :  { %7323 = vmatpush1.bf16.msra.mxu1 %v16285_v39  ;;  %7160 = vmatprep.subr.bf16.mxu0 %v16292_v40  ;;  %v16339_v39 = vcombine.low %v4176_v26, %v4180_v27  ;;  %v16341_v40 = vcombine.low %v4177_v13, %v4181_v28  ;;  %v16350_v42 = vcombine.high %v4185_v22, %v4189_v23 }
 0x29f   :  { %7324 = vmatprep.subr.bf16.mxu1 %v16294_v41  ;;  %v16348_v41 = vcombine.high %v4184_v35, %v4188_v36 }
 0x2a1   :  { %7161 = vmatpush1.bf16.msra.mxu0 %v16291_v45  ;;  %v4197_v45 = vld [vmem:[#allocation6 + $0x1728] sm:$0xff] }
 0x2a2   :  { %7325 = vmatpush1.bf16.msra.mxu1 %v16293_v46  ;;  %7162 = vmatprep.subr.bf16.mxu0 %v16300_v10  ;;  %v16347_v46 = vcombine.low %v4184_v35, %v4188_v36  ;;  %v16349_v10 = vcombine.low %v4185_v22, %v4189_v23  ;;  %v16358_v48 = vcombine.high %v4193_v44, %v4197_v45 }
 0x2a3   :  { %7326 = vmatprep.subr.bf16.mxu1 %v16302_v33  ;;  %v16356_v33 = vcombine.high %v4192_v37, %v4196_v43 }
 0x2a5   :  { %7163 = vmatpush1.bf16.msra.mxu0 %v16299_v52  ;;  %v4205_v52 = vld [vmem:[#allocation6 + $0x1768] sm:$0xff] }
 0x2a6   :  { %7327 = vmatpush1.bf16.msra.mxu1 %v16301_v53  ;;  %7164 = vmatprep.subr.bf16.mxu0 %v16308_v54  ;;  %v16355_v53 = vcombine.low %v4192_v37, %v4196_v43  ;;  %v18257_v54 = vsub.s32 2, %v18220_v2  ;;  %v16366_v59 = vcombine.high %v4201_v47, %v4205_v52  ;;  %v16365_v0 = vcombine.low %v4201_v47, %v4205_v52 }
 0x2a7   :  { %7328 = vmatprep.subr.bf16.mxu1 %v16310_v56  ;;  %v16357_v56 = vcombine.low %v4193_v44, %v4197_v45 }
 0x2a9   :  { %7165 = vmatpush1.bf16.msra.mxu0 %v16307_v62  ;;  %v4209_v62 = vld [vmem:[#allocation6 + $0x1788] sm:$0xff] }
 0x2aa   :  { %7329 = vmatpush1.bf16.msra.mxu1 %v16309_v5  ;;  %7166 = vmatprep.subr.bf16.mxu0 %v16316_v63  ;;  %v4213_v5 = vld [vmem:[#allocation6 + $0x17a8] sm:$0xff]  ;;  %v16363_v63 = vcombine.low %v4200_v49, %v4204_v51 }
 0x2ab   :  { %7330 = vmatprep.subr.bf16.mxu1 %v16318_v55  ;;  %v646_v55 = vrot.slane %v18225_v19, %v18257_v54  ;;  %v16374_v3 = vcombine.high %v4209_v62, %v4213_v5  ;;  %v16373_v17 = vcombine.low %v4209_v62, %v4213_v5 }
 0x2ad   :  { %7167 = vmatpush1.bf16.msra.mxu0 %v16315_v14  ;;  %v4220_v14 = vld [vmem:[#allocation6 + $0x17e0] sm:$0xff]  ;;  %v17750_v15 = vadd.f32 %v18214_v9, %v646_v55 }
 0x2ae   :  { %7331 = vmatpush1.bf16.msra.mxu1 %v16317_v7  ;;  %7168 = vmatprep.subr.bf16.mxu0 %v16324_v8  ;;  %v4217_v7 = vld [vmem:[#allocation6 + $0x17c8] sm:$0xff]  ;;  %v16380_v18 = vcombine.high %v4216_v4, %v4220_v14  ;;  %v4232_v9 = vld [vmem:[#allocation6 + $0x1840] sm:$0xff] }
 0x2af   :  { %7332 = vmatprep.subr.bf16.mxu1 %v16326_v11  ;;  %v4221_v8 = vld [vmem:[#allocation6 + $0x17e8] sm:$0xff]  ;;  %v16371_v11 = vcombine.low %v4208_v60, %v4212_v61  ;;  %v3921_v26 = vmax.f32 %v17750_v15, 0.0  ;;  %v4268_v55 = vld [vmem:[#allocation6 + $0x1960] sm:$0xff] }
 0x2b0   :  { %v16382_v19 = vcombine.high %v4217_v7, %v4221_v8  ;;  %v16381_v27 = vcombine.low %v4217_v7, %v4221_v8  ;;  %v4272_v8 = vld [vmem:[#allocation6 + $0x1980] sm:$0xff]  ;;  %v4273_v15 = vld [vmem:[#allocation6 + $0x1988] sm:$0xff] }
 0x2b1   :  { %7169 = vmatpush1.bf16.msra.mxu0 %v16323_v21  ;;  %v4228_v21 = vld [vmem:[#allocation6 + $0x1820] sm:$0xff]  ;;  %v18262_v35 = vpack.c.bf16 %v3921_v26, %v3921_v26  ;;  %v4285_v26 = vld [vmem:[#allocation6 + $0x19e8] sm:$0xff] }
 0x2b2   :  { %7333 = vmatpush1.bf16.msra.mxu1 %v16325_v24  ;;  %7170 = vmatprep.subr.bf16.mxu0 %v16332_v58  ;;  %v4225_v24 = vld [vmem:[#allocation6 + $0x1808] sm:$0xff]  ;;  %v16388_v13 = vcombine.high %v4224_v20, %v4228_v21 }
 0x2b3   :  { %7334 = vmatprep.subr.bf16.mxu1 %v16334_v25  ;;  %v4229_v58 = vld [vmem:[#allocation6 + $0x1828] sm:$0xff]  ;;  %v16379_v25 = vcombine.low %v4216_v4, %v4220_v14 }
 0x2b4   :  { %v16390_v28 = vcombine.high %v4225_v24, %v4229_v58  ;;  %v16389_v36 = vcombine.low %v4225_v24, %v4229_v58  ;;  %v4280_v24 = vld [vmem:[#allocation6 + $0x19c0] sm:$0xff] }
 0x2b5   :  { %7171 = vmatpush1.bf16.msra.mxu0 %v16331_v29  ;;  %v4236_v29 = vld [vmem:[#allocation6 + $0x1860] sm:$0xff] }
 0x2b6   :  { %7335 = vmatpush1.bf16.msra.mxu1 %v16333_v31  ;;  %7172 = vmatprep.subr.bf16.mxu0 %v16340_v32  ;;  %v4233_v31 = vld [vmem:[#allocation6 + $0x1848] sm:$0xff]  ;;  %v16396_v22 = vcombine.high %v4232_v9, %v4236_v29  ;;  %v16395_v37 = vcombine.low %v4232_v9, %v4236_v29  ;;  %v4284_v58 = vld [vmem:[#allocation6 + $0x19e0] sm:$0xff] }
 0x2b7   :  { %7336 = vmatprep.subr.bf16.mxu1 %v16342_v34  ;;  %v4237_v32 = vld [vmem:[#allocation6 + $0x1868] sm:$0xff]  ;;  %v16387_v34 = vcombine.low %v4224_v20, %v4228_v21  ;;  %v4288_v29 = vld [vmem:[#allocation6 + $0x1a00] sm:$0xff] }
 0x2b8   :  { %v16398_v23 = vcombine.high %v4233_v31, %v4237_v32  ;;  %v16397_v43 = vcombine.low %v4233_v31, %v4237_v32  ;;  %v4292_v31 = vld [vmem:[#allocation6 + $0x1a20] sm:$0xff]  ;;  %v4289_v32 = vld [vmem:[#allocation6 + $0x1a08] sm:$0xff] }
 0x2b9   :  { %7173 = vmatpush1.bf16.msra.mxu0 %v16339_v39  ;;  %v4240_v39 = vld [vmem:[#allocation6 + $0x1880] sm:$0xff] }
 0x2ba   :  { %7337 = vmatpush1.bf16.msra.mxu1 %v16341_v40  ;;  %7174 = vmatprep.subr.bf16.mxu0 %v16348_v41  ;;  %v4244_v40 = vld [vmem:[#allocation6 + $0x18a0] sm:$0xff]  ;;  %v4241_v41 = vld [vmem:[#allocation6 + $0x1888] sm:$0xff] }
 0x2bb   :  { %7338 = vmatprep.subr.bf16.mxu1 %v16350_v42  ;;  %v4245_v42 = vld [vmem:[#allocation6 + $0x18a8] sm:$0xff]  ;;  %v16404_v44 = vcombine.high %v4240_v39, %v4244_v40  ;;  %v16403_v49 = vcombine.low %v4240_v39, %v4244_v40  ;;  %v4296_v40 = vld [vmem:[#allocation6 + $0x1a40] sm:$0xff] }
 0x2bc   :  { %v16406_v45 = vcombine.high %v4241_v41, %v4245_v42  ;;  %v16405_v51 = vcombine.low %v4241_v41, %v4245_v42  ;;  %v4300_v41 = vld [vmem:[#allocation6 + $0x1a60] sm:$0xff]  ;;  %v4297_v42 = vld [vmem:[#allocation6 + $0x1a48] sm:$0xff] }
 0x2bd   :  { %7175 = vmatpush1.bf16.msra.mxu0 %v16347_v46  ;;  %v4248_v46 = vld [vmem:[#allocation6 + $0x18c0] sm:$0xff] }
 0x2be   :  { %7339 = vmatpush1.bf16.msra.mxu1 %v16349_v10  ;;  %7176 = vmatprep.subr.bf16.mxu0 %v16356_v33  ;;  %v4252_v10 = vld [vmem:[#allocation6 + $0x18e0] sm:$0xff]  ;;  %v4249_v33 = vld [vmem:[#allocation6 + $0x18c8] sm:$0xff] }
 0x2bf   :  { %7340 = vmatprep.subr.bf16.mxu1 %v16358_v48  ;;  %v4253_v48 = vld [vmem:[#allocation6 + $0x18e8] sm:$0xff]  ;;  %v16412_v47 = vcombine.high %v4248_v46, %v4252_v10  ;;  %v16411_v60 = vcombine.low %v4248_v46, %v4252_v10  ;;  %v4304_v10 = vld [vmem:[#allocation6 + $0x1a80] sm:$0xff] }
 0x2c0   :  { %v16414_v52 = vcombine.high %v4249_v33, %v4253_v48  ;;  %v16413_v61 = vcombine.low %v4249_v33, %v4253_v48  ;;  %v4308_v33 = vld [vmem:[#allocation6 + $0x1aa0] sm:$0xff]  ;;  %v4305_v48 = vld [vmem:[#allocation6 + $0x1a88] sm:$0xff] }
 0x2c1   :  { %7177 = vmatpush1.bf16.msra.mxu0 %v16355_v53  ;;  %v4256_v53 = vld [vmem:[#allocation6 + $0x1900] sm:$0xff] }
 0x2c2   :  { %7341 = vmatpush1.bf16.msra.mxu1 %v16357_v56  ;;  %7178 = vmatprep.subr.bf16.mxu0 %v16364_v57  ;;  %v4260_v56 = vld [vmem:[#allocation6 + $0x1920] sm:$0xff]  ;;  %v4257_v57 = vld [vmem:[#allocation6 + $0x1908] sm:$0xff] }
 0x2c3   :  { %7342 = vmatprep.subr.bf16.mxu1 %v16366_v59  ;;  %v4261_v59 = vld [vmem:[#allocation6 + $0x1928] sm:$0xff]  ;;  %v16420_v62 = vcombine.high %v4256_v53, %v4260_v56 }
 0x2c4   :  { %v16422_v5 = vcombine.high %v4257_v57, %v4261_v59  ;;  %v16421_v4 = vcombine.low %v4257_v57, %v4261_v59  ;;  %v4316_v57 = vld [vmem:[#allocation6 + $0x1ae0] sm:$0xff]  ;;  %v4313_v59 = vld [vmem:[#allocation6 + $0x1ac8] sm:$0xff] }
 0x2c5   :  { %7179 = vmatpush1.bf16.msra.mxu0 %v16363_v63  ;;  %v4264_v63 = vld [vmem:[#allocation6 + $0x1940] sm:$0xff] }
 0x2c6   :  { %7343 = vmatpush1.bf16.msra.mxu1 %v16365_v0  ;;  %7180 = vmatprep.subr.bf16.mxu0 %v16372_v1  ;;  %v4265_v0 = vld [vmem:[#allocation6 + $0x1948] sm:$0xff]  ;;  %v16428_v14 = vcombine.high %v4264_v63, %v4268_v55 }
 0x2c7   :  { %7344 = vmatprep.subr.bf16.mxu1 %v16374_v3  ;;  %v4269_v1 = vld [vmem:[#allocation6 + $0x1968] sm:$0xff]  ;;  %v16419_v3 = vcombine.low %v4256_v53, %v4260_v56  ;;  %v4312_v56 = vld [vmem:[#allocation6 + $0x1ac0] sm:$0xff] }
 0x2c8   :  { %v16430_v7 = vcombine.high %v4265_v0, %v4269_v1 }
 0x2c9   :  { %7181 = vmatpush1.bf16.msra.mxu0 %v16371_v11  ;;  %v4276_v11 = vld [vmem:[#allocation6 + $0x19a0] sm:$0xff] }
 0x2ca   :  { %7345 = vmatpush1.bf16.msra.mxu1 %v16373_v17  ;;  %7182 = vmatprep.subr.bf16.mxu0 %v16380_v18  ;;  %v4277_v17 = vld [vmem:[#allocation6 + $0x19a8] sm:$0xff]  ;;  %v16427_v18 = vcombine.low %v4264_v63, %v4268_v55  ;;  %v16436_v20 = vcombine.high %v4272_v8, %v4276_v11  ;;  %v4320_v55 = vld [vmem:[#allocation6 + $0x1b00] sm:$0xff] }
 0x2cb   :  { %7346 = vmatprep.subr.bf16.mxu1 %v16382_v19  ;;  %v16429_v19 = vcombine.low %v4265_v0, %v4269_v1  ;;  %v16438_v21 = vcombine.high %v4273_v15, %v4277_v17  ;;  %v4324_v0 = vld [vmem:[#allocation6 + $0x1b20] sm:$0xff]  ;;  %v4321_v1 = vld [vmem:[#allocation6 + $0x1b08] sm:$0xff] }
 0x2cd   :  { %7183 = vmatpush1.bf16.msra.mxu0 %v16379_v25  ;;  %v4281_v25 = vld [vmem:[#allocation6 + $0x19c8] sm:$0xff] }
 0x2ce   :  { %7347 = vmatpush1.bf16.msra.mxu1 %v16381_v27  ;;  %7193 = vmatprep.subr.bf16.mxu0 %v16388_v13  ;;  %v16435_v27 = vcombine.low %v4272_v8, %v4276_v11  ;;  %v16437_v13 = vcombine.low %v4273_v15, %v4277_v17  ;;  %v16446_v9 = vcombine.high %v4281_v25, %v4285_v26  ;;  %v4328_v11 = vld [vmem:[#allocation6 + $0x1b40] sm:$0xff]  ;;  %v4329_v17 = vld [vmem:[#allocation6 + $0x1b48] sm:$0xff] }
 0x2cf   :  { %7357 = vmatprep.subr.bf16.mxu1 %v16390_v28  ;;  %v16444_v28 = vcombine.high %v4280_v24, %v4284_v58  ;;  %v4332_v15 = vld [vmem:[#allocation6 + $0x1b60] sm:$0xff] }
 0x2d0   :  { %7185 = vmatmul.mubr.bf16.vlgmr.msra.gmra.mrb[8].mxu0 %v18262_v35 }
 0x2d1   :  { %7349 = vmatmul.mubr.bf16.vlgmr.msra.gmra.mrb[8].mxu1 %v18262_v35  ;;  %7194 = vmatpush1.bf16.msra.mxu0 %v16387_v34  ;;  %v4293_v34 = vld [vmem:[#allocation6 + $0x1a28] sm:$0xff] }
 0x2d2   :  { %7358 = vmatpush1.bf16.msra.mxu1 %v16389_v36  ;;  %7195 = vmatprep.subr.bf16.mxu0 %v16396_v22  ;;  %v16443_v36 = vcombine.low %v4280_v24, %v4284_v58  ;;  %v16445_v22 = vcombine.low %v4281_v25, %v4285_v26  ;;  %v16454_v39 = vcombine.high %v4289_v32, %v4293_v34  ;;  %v4336_v58 = vld [vmem:[#allocation6 + $0x1b80] sm:$0xff]  ;;  %v4337_v26 = vld [vmem:[#allocation6 + $0x1b88] sm:$0xff] }
 0x2d3   :  { %7359 = vmatprep.subr.bf16.mxu1 %v16398_v23  ;;  %v16452_v23 = vcombine.high %v4288_v29, %v4292_v31  ;;  %v4340_v25 = vld [vmem:[#allocation6 + $0x1ba0] sm:$0xff] }
 0x2d5   :  { %7196 = vmatpush1.bf16.msra.mxu0 %v16395_v37  ;;  %v4301_v37 = vld [vmem:[#allocation6 + $0x1a68] sm:$0xff] }
 0x2d6   :  { %7360 = vmatpush1.bf16.msra.mxu1 %v16397_v43  ;;  %7197 = vmatprep.subr.bf16.mxu0 %v16404_v44  ;;  %v16451_v43 = vcombine.low %v4288_v29, %v4292_v31  ;;  %v16453_v44 = vcombine.low %v4289_v32, %v4293_v34  ;;  %v16462_v46 = vcombine.high %v4297_v42, %v4301_v37  ;;  %v4344_v31 = vld [vmem:[#allocation6 + $0x1bc0] sm:$0xff]  ;;  %v4345_v34 = vld [vmem:[#allocation6 + $0x1bc8] sm:$0xff] }
 0x2d7   :  { %7361 = vmatprep.subr.bf16.mxu1 %v16406_v45  ;;  %v16460_v45 = vcombine.high %v4296_v40, %v4300_v41  ;;  %v4348_v32 = vld [vmem:[#allocation6 + $0x1be0] sm:$0xff] }
 0x2d9   :  { %7198 = vmatpush1.bf16.msra.mxu0 %v16403_v49  ;;  %v4309_v49 = vld [vmem:[#allocation6 + $0x1aa8] sm:$0xff] }
 0x2da   :  { %7362 = vmatpush1.bf16.msra.mxu1 %v16405_v51  ;;  %7199 = vmatprep.subr.bf16.mxu0 %v16412_v47  ;;  %v16459_v51 = vcombine.low %v4296_v40, %v4300_v41  ;;  %v16461_v47 = vcombine.low %v4297_v42, %v4301_v37  ;;  %v16470_v53 = vcombine.high %v4305_v48, %v4309_v49  ;;  %v4352_v41 = vld [vmem:[#allocation6 + $0x1c00] sm:$0xff]  ;;  %v4353_v37 = vld [vmem:[#allocation6 + $0x1c08] sm:$0xff] }
 0x2db   :  { %7363 = vmatprep.subr.bf16.mxu1 %v16414_v52  ;;  %v16468_v52 = vcombine.high %v4304_v10, %v4308_v33  ;;  %v4356_v42 = vld [vmem:[#allocation6 + $0x1c20] sm:$0xff] }
 0x2dd   :  { %7200 = vmatpush1.bf16.msra.mxu0 %v16411_v60  ;;  %v4317_v60 = vld [vmem:[#allocation6 + $0x1ae8] sm:$0xff] }
 0x2de   :  { %7364 = vmatpush1.bf16.msra.mxu1 %v16413_v61  ;;  %7201 = vmatprep.subr.bf16.mxu0 %v16420_v62  ;;  %v16467_v61 = vcombine.low %v4304_v10, %v4308_v33  ;;  %v16469_v62 = vcombine.low %v4305_v48, %v4309_v49  ;;  %v16478_v63 = vcombine.high %v4313_v59, %v4317_v60  ;;  %v18267_v33 = vsub.s32 4, %v18220_v2 }
 0x2df   :  { %7365 = vmatprep.subr.bf16.mxu1 %v16422_v5  ;;  %v16476_v5 = vcombine.high %v4312_v56, %v4316_v57  ;;  %v18270_v48 = vsub.s32 5, %v18220_v2  ;;  %v18273_v49 = vsub.s32 7, %v18220_v2 }
 0x2e1   :  { %7202 = vmatpush1.bf16.msra.mxu0 %v16419_v3  ;;  %v4325_v3 = vld [vmem:[#allocation6 + $0x1b28] sm:$0xff] }
 0x2e2   :  { %7366 = vmatpush1.bf16.msra.mxu1 %v16421_v4  ;;  %7203 = vmatprep.subr.bf16.mxu0 %v16428_v14  ;;  %v16475_v4 = vcombine.low %v4312_v56, %v4316_v57  ;;  %v16477_v14 = vcombine.low %v4313_v59, %v4317_v60  ;;  %v16486_v8 = vcombine.high %v4321_v1, %v4325_v3 }
 0x2e3   :  { %7367 = vmatprep.subr.bf16.mxu1 %v16430_v7  ;;  %v16484_v7 = vcombine.high %v4320_v55, %v4324_v0 }
 0x2e5   :  { %7204 = vmatpush1.bf16.msra.mxu0 %v16427_v18  ;;  %v4333_v18 = vld [vmem:[#allocation6 + $0x1b68] sm:$0xff] }
 0x2e6   :  { %7368 = vmatpush1.bf16.msra.mxu1 %v16429_v19  ;;  %7205 = vmatprep.subr.bf16.mxu0 %v16436_v20  ;;  %v16483_v19 = vcombine.low %v4320_v55, %v4324_v0  ;;  %v16485_v20 = vcombine.low %v4321_v1, %v4325_v3  ;;  %v16494_v24 = vcombine.high %v4329_v17, %v4333_v18 }
 0x2e7   :  { %7369 = vmatprep.subr.bf16.mxu1 %v16438_v21  ;;  %v16492_v21 = vcombine.high %v4328_v11, %v4332_v15 }
 0x2e9   :  { %7206 = vmatpush1.bf16.msra.mxu0 %v16435_v27  ;;  %v4341_v27 = vld [vmem:[#allocation6 + $0x1ba8] sm:$0xff] }
 0x2ea   :  { %7370 = vmatpush1.bf16.msra.mxu1 %v16437_v13  ;;  %7207 = vmatprep.subr.bf16.mxu0 %v16444_v28  ;;  %v16491_v13 = vcombine.low %v4328_v11, %v4332_v15  ;;  %v16493_v28 = vcombine.low %v4329_v17, %v4333_v18  ;;  %v16502_v29 = vcombine.high %v4337_v26, %v4341_v27  ;;  %v4361_v11 = vld [vmem:[#allocation6 + $0x1c48] sm:$0xff] }
 0x2eb   :  { %7371 = vmatprep.subr.bf16.mxu1 %v16446_v9  ;;  %v16500_v9 = vcombine.high %v4336_v58, %v4340_v25  ;;  %v4365_v15 = vld [vmem:[#allocation6 + $0x1c68] sm:$0xff]  ;;  %v16515_v18 = vcombine.low %v4352_v41, %v4356_v42 }
 0x2ed   :  { %7208 = vmatpush1.bf16.msra.mxu0 %v16443_v36  ;;  %v4349_v36 = vld [vmem:[#allocation6 + $0x1be8] sm:$0xff] }
 0x2ee   :  { %7372 = vmatpush1.bf16.msra.mxu1 %v16445_v22  ;;  %7209 = vmatprep.subr.bf16.mxu0 %v16452_v23  ;;  %v16499_v22 = vcombine.low %v4336_v58, %v4340_v25  ;;  %v16501_v23 = vcombine.low %v4337_v26, %v4341_v27  ;;  %v16510_v40 = vcombine.high %v4345_v34, %v4349_v36  ;;  %v4372_v25 = vld [vmem:[#allocation6 + $0x1ca0] sm:$0xff]  ;;  %v4369_v26 = vld [vmem:[#allocation6 + $0x1c88] sm:$0xff] }
 0x2ef   :  { %7373 = vmatprep.subr.bf16.mxu1 %v16454_v39  ;;  %v16508_v39 = vcombine.high %v4344_v31, %v4348_v32  ;;  %v16526_v58 = vcombine.high %v4361_v11, %v4365_v15  ;;  %v4373_v27 = vld [vmem:[#allocation6 + $0x1ca8] sm:$0xff] }
 0x2f1   :  { %7210 = vmatpush1.bf16.msra.mxu0 %v16451_v43  ;;  %v4357_v43 = vld [vmem:[#allocation6 + $0x1c28] sm:$0xff] }
 0x2f2   :  { %7374 = vmatpush1.bf16.msra.mxu1 %v16453_v44  ;;  %7211 = vmatprep.subr.bf16.mxu0 %v16460_v45  ;;  %v16507_v44 = vcombine.low %v4344_v31, %v4348_v32  ;;  %v16509_v45 = vcombine.low %v4345_v34, %v4349_v36  ;;  %v16518_v10 = vcombine.high %v4353_v37, %v4357_v43  ;;  %v4376_v32 = vld [vmem:[#allocation6 + $0x1cc0] sm:$0xff]  ;;  %v4377_v36 = vld [vmem:[#allocation6 + $0x1cc8] sm:$0xff] }
 0x2f3   :  { %7375 = vmatprep.subr.bf16.mxu1 %v16462_v46  ;;  %v16516_v46 = vcombine.high %v4352_v41, %v4356_v42  ;;  %v16534_v31 = vcombine.high %v4369_v26, %v4373_v27  ;;  %v4380_v34 = vld [vmem:[#allocation6 + $0x1ce0] sm:$0xff] }
 0x2f4   :  { %v4384_v42 = vld [vmem:[#allocation6 + $0x1d00] sm:$0xff] }
 0x2f5   :  { %7212 = vmatpush1.bf16.msra.mxu0 %v16459_v51  ;;  %v18275_v51 = vld [vmem:[#allocation8] sm:$0xff] }
 0x2f6   :  { %7376 = vmatpush1.bf16.msra.mxu1 %v16461_v47  ;;  %7213 = vmatprep.subr.bf16.mxu0 %v16468_v52  ;;  %v654_v47 = vrot.slane %v18275_v51, %v18267_v33  ;;  %v658_v52 = vrot.slane %v18275_v51, %v18270_v48 }
 0x2f7   :  { %7377 = vmatprep.subr.bf16.mxu1 %v16470_v53  ;;  %v666_v53 = vrot.slane %v18275_v51, %v18273_v49 }
 0x2f9   :  { %7214 = vmatpush1.bf16.msra.mxu0 %v16467_v61 }
 0x2fa   :  { %7378 = vmatpush1.bf16.msra.mxu1 %v16469_v62  ;;  %7215 = vmatprep.subr.bf16.mxu0 %v16476_v5 }
 0x2fb   :  { %7379 = vmatprep.subr.bf16.mxu1 %v16478_v63 }
 0x2fd   :  { %7216 = vmatpush1.bf16.msra.mxu0 %v16475_v4 }
 0x2fe   :  { %7380 = vmatpush1.bf16.msra.mxu1 %v16477_v14  ;;  %7217 = vmatprep.subr.bf16.mxu0 %v16484_v7  ;;  %v4360_v14 = vld [vmem:[#allocation6 + $0x1c40] sm:$0xff] }
 0x2ff   :  { %7381 = vmatprep.subr.bf16.mxu1 %v16486_v8  ;;  %v4364_v8 = vld [vmem:[#allocation6 + $0x1c60] sm:$0xff] }
 0x301   :  { %7218 = vmatpush1.bf16.msra.mxu0 %v16483_v19  ;;  %v16517_v19 = vcombine.low %v4353_v37, %v4357_v43  ;;  %v4388_v37 = vld [vmem:[#allocation6 + $0x1d20] sm:$0xff]  ;;  %v4385_v43 = vld [vmem:[#allocation6 + $0x1d08] sm:$0xff] }
 0x302   :  { %7382 = vmatpush1.bf16.msra.mxu1 %v16485_v20  ;;  %7219 = vmatprep.subr.bf16.mxu0 %v16492_v21  ;;  %v4368_v21 = vld [vmem:[#allocation6 + $0x1c80] sm:$0xff] }
 0x303   :  { %7383 = vmatprep.subr.bf16.mxu1 %v16494_v24  ;;  %v16524_v24 = vcombine.high %v4360_v14, %v4364_v8 }
 0x305   :  { %7220 = vmatpush1.bf16.msra.mxu0 %v16491_v13 }
 0x306   :  { %7384 = vmatpush1.bf16.msra.mxu1 %v16493_v28  ;;  %7221 = vmatprep.subr.bf16.mxu0 %v16500_v9  ;;  %v16523_v28 = vcombine.low %v4360_v14, %v4364_v8  ;;  %v16525_v9 = vcombine.low %v4361_v11, %v4365_v15  ;;  %v4408_v8 = vld [vmem:[#allocation6 + $0x1dc0] sm:$0xff]  ;;  %v4409_v15 = vld [vmem:[#allocation6 + $0x1dc8] sm:$0xff] }
 0x307   :  { %7385 = vmatprep.subr.bf16.mxu1 %v16502_v29  ;;  %v16532_v29 = vcombine.high %v4368_v21, %v4372_v25  ;;  %v4412_v11 = vld [vmem:[#allocation6 + $0x1de0] sm:$0xff] }
 0x309   :  { %7222 = vmatpush1.bf16.msra.mxu0 %v16499_v22  ;;  %v4381_v22 = vld [vmem:[#allocation6 + $0x1ce8] sm:$0xff] }
 0x30a   :  { %7386 = vmatpush1.bf16.msra.mxu1 %v16501_v23  ;;  %7223 = vmatprep.subr.bf16.mxu0 %v16508_v39  ;;  %v16531_v23 = vcombine.low %v4368_v21, %v4372_v25  ;;  %v16533_v39 = vcombine.low %v4369_v26, %v4373_v27  ;;  %v16542_v41 = vcombine.high %v4377_v36, %v4381_v22  ;;  %v4416_v25 = vld [vmem:[#allocation6 + $0x1e00] sm:$0xff]  ;;  %v4417_v27 = vld [vmem:[#allocation6 + $0x1e08] sm:$0xff] }
 0x30b   :  { %7387 = vmatprep.subr.bf16.mxu1 %v16510_v40  ;;  %v16540_v40 = vcombine.high %v4376_v32, %v4380_v34  ;;  %v4420_v26 = vld [vmem:[#allocation6 + $0x1e20] sm:$0xff] }
 0x30d   :  { %7224 = vmatpush1.bf16.msra.mxu0 %v16507_v44  ;;  %v4389_v44 = vld [vmem:[#allocation6 + $0x1d28] sm:$0xff] }
 0x30e   :  { %7388 = vmatpush1.bf16.msra.mxu1 %v16509_v45  ;;  %7234 = vmatprep.subr.bf16.mxu0 %v16516_v46  ;;  %v16539_v45 = vcombine.low %v4376_v32, %v4380_v34  ;;  %v16541_v46 = vcombine.low %v4377_v36, %v4381_v22  ;;  %v4424_v34 = vld [vmem:[#allocation6 + $0x1e40] sm:$0xff]  ;;  %v4425_v22 = vld [vmem:[#allocation6 + $0x1e48] sm:$0xff] }
 0x30f   :  { %7398 = vmatprep.subr.bf16.mxu1 %v16518_v10  ;;  %v16548_v10 = vcombine.high %v4384_v42, %v4388_v37  ;;  %v4428_v36 = vld [vmem:[#allocation6 + $0x1e60] sm:$0xff] }
 0x323   :  { %v3748_v56 = vpop.f32.mrb[4].mxu0  ;;  %v18283_v59 = vpop.f32.mrb[4].mxu1 }
 0x324   :  { %v17752_v57 = vadd.f32 %v3748_v56, %v654_v47  ;;  %v3750_v60 = vpop.f32.mrb[5].mxu0  ;;  %v3914_v62 = vpop.f32.mrb[5].mxu1  ;;  %v16550_v47 = vcombine.high %v4385_v43, %v4389_v44  ;;  %v4393_v56 = vld [vmem:[#allocation6 + $0x1d48] sm:$0xff] }
 0x325   :  { %v17753_v61 = vadd.f32 %v3750_v60, %v658_v52  ;;  %v3752_v5 = vpop.f32.mrb[6].mxu0  ;;  %v17755_v55 = vadd.f32 %v3914_v62, %v666_v53  ;;  %v3916_v0 = vpop.f32.mrb[6].mxu1  ;;  %v4392_v52 = vld [vmem:[#allocation6 + $0x1d40] sm:$0xff]  ;;  %v16547_v60 = vcombine.low %v4384_v42, %v4388_v37 }
 0x326   :  { %v3923_v63 = vmax.f32 %v17752_v57, 0.0  ;;  %v3753_v1 = vpop.f32.mrb[7].mxu0  ;;  %v3917_v4 = vpop.f32.mrb[7].mxu1  ;;  %v4396_v53 = vld [vmem:[#allocation6 + $0x1d60] sm:$0xff]  ;;  %v4397_v57 = vld [vmem:[#allocation6 + $0x1d68] sm:$0xff] }
 0x327   :  { %v3924_v3 = vmax.f32 %v17753_v61, 0.0  ;;  %v3926_v7 = vmax.f32 %v17755_v55, 0.0  ;;  %v16549_v61 = vcombine.low %v4385_v43, %v4389_v44  ;;  %v16556_v62 = vcombine.high %v4392_v52, %v4396_v53  ;;  %v4404_v55 = vld [vmem:[#allocation6 + $0x1da0] sm:$0xff]  ;;  %v4401_v0 = vld [vmem:[#allocation6 + $0x1d88] sm:$0xff] }
 0x328   :  { %v18287_v20 = vpack.c.bf16 %v3923_v63, %v3923_v63  ;;  %v16558_v5 = vcombine.high %v4393_v56, %v4397_v57  ;;  %v4400_v63 = vld [vmem:[#allocation6 + $0x1d80] sm:$0xff]  ;;  %v4405_v1 = vld [vmem:[#allocation6 + $0x1da8] sm:$0xff]  ;;  %v16557_v4 = vcombine.low %v4393_v56, %v4397_v57 }
 0x329   :  { %v18285_v17 = vpack.c.bf16 %v3924_v3, %v3924_v3  ;;  %v18291_v13 = vpack.c.bf16 %v3926_v7, %v3926_v7  ;;  %v16555_v3 = vcombine.low %v4392_v52, %v4396_v53  ;;  %v16564_v14 = vcombine.high %v4400_v63, %v4404_v55  ;;  %v4432_v37 = vld [vmem:[#allocation6 + $0x1e80] sm:$0xff]  ;;  %v4433_v44 = vld [vmem:[#allocation6 + $0x1e88] sm:$0xff] }
 0x32a   :  { %v16566_v7 = vcombine.high %v4401_v0, %v4405_v1  ;;  %v16565_v21 = vcombine.low %v4401_v0, %v4405_v1  ;;  %v4436_v43 = vld [vmem:[#allocation6 + $0x1ea0] sm:$0xff]  ;;  %v4441_v57 = vld [vmem:[#allocation6 + $0x1ec8] sm:$0xff] }
 0x32b   :  { %7225 = vmatprep.mubr.bf16.mxu0 %v18285_v17  ;;  %7389 = vmatprep.mubr.bf16.mxu1 %v18285_v17  ;;  %v4440_v53 = vld [vmem:[#allocation6 + $0x1ec0] sm:$0xff]  ;;  %v4449_v1 = vld [vmem:[#allocation6 + $0x1f08] sm:$0xff] }
 0x32c   :  { %7226 = vmatmul.mubr.bf16.vlgmr.msra.gmra.mrb[8].mxu0 %v18287_v20  ;;  %7390 = vmatmul.mubr.bf16.vlgmr.msra.gmra.mrb[8].mxu1 %v18287_v20  ;;  %v4444_v56 = vld [vmem:[#allocation6 + $0x1ee0] sm:$0xff] }
 0x32d   :  { %7235 = vmatpush1.bf16.msra.mxu0 %v16515_v18  ;;  %7399 = vmatpush1.bf16.msra.mxu1 %v16517_v19  ;;  %v4413_v18 = vld [vmem:[#allocation6 + $0x1de8] sm:$0xff]  ;;  %v16563_v19 = vcombine.low %v4400_v63, %v4404_v55  ;;  %v4448_v55 = vld [vmem:[#allocation6 + $0x1f00] sm:$0xff] }
 0x32e   :  { %7266 = vmatprep.mubr.bf16.mxu0 %v18291_v13  ;;  %7430 = vmatprep.mubr.bf16.mxu1 %v18291_v13  ;;  %v4452_v0 = vld [vmem:[#allocation6 + $0x1f20] sm:$0xff] }
 0x32f   :  { %7236 = vmatprep.subr.bf16.mxu0 %v16524_v24  ;;  %7400 = vmatprep.subr.bf16.mxu1 %v16526_v58  ;;  %v16572_v24 = vcombine.high %v4408_v8, %v4412_v11  ;;  %v16574_v58 = vcombine.high %v4409_v15, %v4413_v18 }
 0x331   :  { %7237 = vmatpush1.bf16.msra.mxu0 %v16523_v28  ;;  %7401 = vmatpush1.bf16.msra.mxu1 %v16525_v9  ;;  %v4421_v28 = vld [vmem:[#allocation6 + $0x1e28] sm:$0xff]  ;;  %v16571_v9 = vcombine.low %v4408_v8, %v4412_v11  ;;  %v4456_v11 = vld [vmem:[#allocation6 + $0x1f40] sm:$0xff] }
 0x332   :  { %7238 = vmatprep.subr.bf16.mxu0 %v16532_v29  ;;  %7402 = vmatprep.subr.bf16.mxu1 %v16534_v31  ;;  %v16573_v29 = vcombine.low %v4409_v15, %v4413_v18  ;;  %v16580_v31 = vcombine.high %v4416_v25, %v4420_v26  ;;  %v16582_v32 = vcombine.high %v4417_v27, %v4421_v28  ;;  %v4460_v15 = vld [vmem:[#allocation6 + $0x1f60] sm:$0xff]  ;;  %v4457_v18 = vld [vmem:[#allocation6 + $0x1f48] sm:$0xff] }
 0x335   :  { %7239 = vmatpush1.bf16.msra.mxu0 %v16531_v23  ;;  %7403 = vmatpush1.bf16.msra.mxu1 %v16533_v39  ;;  %v4429_v23 = vld [vmem:[#allocation6 + $0x1e68] sm:$0xff]  ;;  %v16579_v39 = vcombine.low %v4416_v25, %v4420_v26  ;;  %v16620_v25 = vcombine.high %v4456_v11, %v4460_v15 }
 0x336   :  { %7240 = vmatprep.subr.bf16.mxu0 %v16540_v40  ;;  %7404 = vmatprep.subr.bf16.mxu1 %v16542_v41  ;;  %v16581_v40 = vcombine.low %v4417_v27, %v4421_v28  ;;  %v16588_v41 = vcombine.high %v4424_v34, %v4428_v36  ;;  %v16590_v42 = vcombine.high %v4425_v22, %v4429_v23  ;;  %v4464_v27 = vld [vmem:[#allocation6 + $0x1f80] sm:$0xff] }
 0x337   :  { %v4468_v28 = vld [vmem:[#allocation6 + $0x1fa0] sm:$0xff] }
 0x339   :  { %7241 = vmatpush1.bf16.msra.mxu0 %v16539_v45  ;;  %7405 = vmatpush1.bf16.msra.mxu1 %v16541_v46  ;;  %v4437_v45 = vld [vmem:[#allocation6 + $0x1ea8] sm:$0xff]  ;;  %v16587_v46 = vcombine.low %v4424_v34, %v4428_v36  ;;  %v16628_v36 = vcombine.high %v4464_v27, %v4468_v28 }
 0x33a   :  { %7242 = vmatprep.subr.bf16.mxu0 %v16548_v10  ;;  %7406 = vmatprep.subr.bf16.mxu1 %v16550_v47  ;;  %v16589_v10 = vcombine.low %v4425_v22, %v4429_v23  ;;  %v16596_v47 = vcombine.high %v4432_v37, %v4436_v43  ;;  %v16598_v52 = vcombine.high %v4433_v44, %v4437_v45  ;;  %v4472_v22 = vld [vmem:[#allocation6 + $0x1fc0] sm:$0xff] }
 0x33b   :  { %v4476_v23 = vld [vmem:[#allocation6 + $0x1fe0] sm:$0xff] }
 0x33d   :  { %7243 = vmatpush1.bf16.msra.mxu0 %v16547_v60  ;;  %7407 = vmatpush1.bf16.msra.mxu1 %v16549_v61  ;;  %v4445_v60 = vld [vmem:[#allocation6 + $0x1ee8] sm:$0xff]  ;;  %v16595_v61 = vcombine.low %v4432_v37, %v4436_v43  ;;  %v16636_v43 = vcombine.high %v4472_v22, %v4476_v23 }
 0x33e   :  { %7244 = vmatprep.subr.bf16.mxu0 %v16556_v62  ;;  %7408 = vmatprep.subr.bf16.mxu1 %v16558_v5  ;;  %v16597_v62 = vcombine.low %v4433_v44, %v4437_v45  ;;  %v16604_v5 = vcombine.high %v4440_v53, %v4444_v56  ;;  %v16606_v63 = vcombine.high %v4441_v57, %v4445_v60  ;;  %v3970_v45 = vld [vmem:[#allocation6 + $0x1010] sm:$0xff] }
 0x341   :  { %7245 = vmatpush1.bf16.msra.mxu0 %v16555_v3  ;;  %7409 = vmatpush1.bf16.msra.mxu1 %v16557_v4  ;;  %v4453_v3 = vld [vmem:[#allocation6 + $0x1f28] sm:$0xff]  ;;  %v16603_v4 = vcombine.low %v4440_v53, %v4444_v56 }
 0x342   :  { %7246 = vmatprep.subr.bf16.mxu0 %v16564_v14  ;;  %7410 = vmatprep.subr.bf16.mxu1 %v16566_v7  ;;  %v16605_v14 = vcombine.low %v4441_v57, %v4445_v60  ;;  %v16612_v7 = vcombine.high %v4448_v55, %v4452_v0  ;;  %v16614_v8 = vcombine.high %v4449_v1, %v4453_v3  ;;  %v3978_v60 = vld [vmem:[#allocation6 + $0x1050] sm:$0xff] }
 0x345   :  { %7247 = vmatpush1.bf16.msra.mxu0 %v16563_v19  ;;  %7411 = vmatpush1.bf16.msra.mxu1 %v16565_v21  ;;  %v4461_v19 = vld [vmem:[#allocation6 + $0x1f68] sm:$0xff]  ;;  %v16611_v21 = vcombine.low %v4448_v55, %v4452_v0 }
 0x346   :  { %7248 = vmatprep.subr.bf16.mxu0 %v16572_v24  ;;  %7412 = vmatprep.subr.bf16.mxu1 %v16574_v58  ;;  %v16613_v24 = vcombine.low %v4449_v1, %v4453_v3  ;;  %v18298_v58 = vsub.s32 6, %v18220_v2  ;;  %v16622_v26 = vcombine.high %v4457_v18, %v4461_v19  ;;  %v3986_v3 = vld [vmem:[#allocation6 + $0x1090] sm:$0xff] }
 0x348   :  { %v662_v34 = vrot.slane %v18275_v51, %v18298_v58  ;;  %v3974_v51 = vld [vmem:[#allocation6 + $0x1030] sm:$0xff] }
 0x349   :  { %7249 = vmatpush1.bf16.msra.mxu0 %v16571_v9  ;;  %7413 = vmatpush1.bf16.msra.mxu1 %v16573_v29  ;;  %v4465_v9 = vld [vmem:[#allocation6 + $0x1f88] sm:$0xff]  ;;  %v16136_v56 = vcombine.high %v3970_v45, %v3974_v51 }
 0x34a   :  { %7250 = vmatprep.subr.bf16.mxu0 %v16580_v31  ;;  %7414 = vmatprep.subr.bf16.mxu1 %v16582_v32  ;;  %v4469_v29 = vld [vmem:[#allocation6 + $0x1fa8] sm:$0xff]  ;;  %v16619_v31 = vcombine.low %v4456_v11, %v4460_v15  ;;  %v16621_v32 = vcombine.low %v4457_v18, %v4461_v19  ;;  %v17754_v37 = vadd.f32 %v18283_v59, %v662_v34  ;;  %v3979_v59 = vld [vmem:[#allocation6 + $0x1058] sm:$0xff]  ;;  %v3994_v19 = vld [vmem:[#allocation6 + $0x10d0] sm:$0xff] }
 0x34b   :  { %v16630_v2 = vcombine.high %v4465_v9, %v4469_v29 }
 0x34c   :  { %v3925_v53 = vmax.f32 %v17754_v37, 0.0 }
 0x34d   :  { %7251 = vmatpush1.bf16.msra.mxu0 %v16579_v39  ;;  %7415 = vmatpush1.bf16.msra.mxu1 %v16581_v40  ;;  %v4473_v39 = vld [vmem:[#allocation6 + $0x1fc8] sm:$0xff] }
 0x34e   :  { %7252 = vmatprep.subr.bf16.mxu0 %v16588_v41  ;;  %7416 = vmatprep.subr.bf16.mxu1 %v16590_v42  ;;  %v4477_v40 = vld [vmem:[#allocation6 + $0x1fe8] sm:$0xff]  ;;  %v16627_v41 = vcombine.low %v4464_v27, %v4468_v28  ;;  %v16629_v42 = vcombine.low %v4465_v9, %v4469_v29  ;;  %v4002_v29 = vld [vmem:[#allocation6 + $0x1110] sm:$0xff] }
 0x34f   :  { %v16638_v44 = vcombine.high %v4473_v39, %v4477_v40 }
 0x351   :  { %7253 = vmatpush1.bf16.msra.mxu0 %v16587_v46  ;;  %7417 = vmatpush1.bf16.msra.mxu1 %v16589_v10  ;;  %v3971_v46 = vld [vmem:[#allocation6 + $0x1018] sm:$0xff] }
 0x352   :  { %7254 = vmatprep.subr.bf16.mxu0 %v16596_v47  ;;  %7418 = vmatprep.subr.bf16.mxu1 %v16598_v52  ;;  %v3975_v10 = vld [vmem:[#allocation6 + $0x1038] sm:$0xff]  ;;  %v16635_v47 = vcombine.low %v4472_v22, %v4476_v23  ;;  %v16637_v52 = vcombine.low %v4473_v39, %v4477_v40  ;;  %v4010_v23 = vld [vmem:[#allocation6 + $0x1150] sm:$0xff] }
 0x353   :  { %v16138_v57 = vcombine.high %v3971_v46, %v3975_v10  ;;  %v16137_v55 = vcombine.low %v3971_v46, %v3975_v10  ;;  %v4014_v39 = vld [vmem:[#allocation6 + $0x1170] sm:$0xff]  ;;  %v4011_v40 = vld [vmem:[#allocation6 + $0x1158] sm:$0xff] }
 0x354   :  { %v4019_v46 = vld [vmem:[#allocation6 + $0x1198] sm:$0xff] }
 0x355   :  { %7255 = vmatpush1.bf16.msra.mxu0 %v16595_v61  ;;  %7419 = vmatpush1.bf16.msra.mxu1 %v16597_v62  ;;  %v3982_v61 = vld [vmem:[#allocation6 + $0x1070] sm:$0xff]  ;;  %v3983_v62 = vld [vmem:[#allocation6 + $0x1078] sm:$0xff] }
 0x356   :  { %7256 = vmatprep.subr.bf16.mxu0 %v16604_v5  ;;  %7420 = vmatprep.subr.bf16.mxu1 %v16606_v63  ;;  %v16135_v5 = vcombine.low %v3970_v45, %v3974_v51  ;;  %v18303_v63 = vpack.c.bf16 %v3925_v53, %v3925_v53  ;;  %v16144_v0 = vcombine.high %v3978_v60, %v3982_v61  ;;  %v4018_v45 = vld [vmem:[#allocation6 + $0x1190] sm:$0xff]  ;;  %v4023_v10 = vld [vmem:[#allocation6 + $0x11b8] sm:$0xff] }
 0x357   :  { %v16146_v1 = vcombine.high %v3979_v59, %v3983_v62  ;;  %v16145_v11 = vcombine.low %v3979_v59, %v3983_v62  ;;  %v4022_v51 = vld [vmem:[#allocation6 + $0x11b0] sm:$0xff]  ;;  %v4031_v59 = vld [vmem:[#allocation6 + $0x11f8] sm:$0xff] }
 0x358   :  { %v16184_v53 = vcombine.high %v4018_v45, %v4022_v51  ;;  %v16183_v62 = vcombine.low %v4018_v45, %v4022_v51  ;;  %v4070_v45 = vld [vmem:[#allocation6 + $0x1330] sm:$0xff]  ;;  %v4067_v51 = vld [vmem:[#allocation6 + $0x1318] sm:$0xff] }
 0x359   :  { %7257 = vmatpush1.bf16.msra.mxu0 %v16603_v4  ;;  %7421 = vmatpush1.bf16.msra.mxu1 %v16605_v14  ;;  %v3990_v4 = vld [vmem:[#allocation6 + $0x10b0] sm:$0xff]  ;;  %v3987_v14 = vld [vmem:[#allocation6 + $0x1098] sm:$0xff] }
 0x35a   :  { %7258 = vmatprep.subr.bf16.mxu0 %v16612_v7  ;;  %7422 = vmatprep.subr.bf16.mxu1 %v16614_v8  ;;  %v3991_v7 = vld [vmem:[#allocation6 + $0x10b8] sm:$0xff]  ;;  %v16143_v8 = vcombine.low %v3978_v60, %v3982_v61  ;;  %v16152_v15 = vcombine.high %v3986_v3, %v3990_v4  ;;  %v4030_v60 = vld [vmem:[#allocation6 + $0x11f0] sm:$0xff] }
 0x35b   :  { %v16154_v18 = vcombine.high %v3987_v14, %v3991_v7  ;;  %v16153_v27 = vcombine.low %v3987_v14, %v3991_v7  ;;  %v4027_v61 = vld [vmem:[#allocation6 + $0x11d8] sm:$0xff] }
 0x35c   :  { %v4039_v14 = vld [vmem:[#allocation6 + $0x1238] sm:$0xff] }
 0x35d   :  { %7259 = vmatpush1.bf16.msra.mxu0 %v16611_v21  ;;  %7423 = vmatpush1.bf16.msra.mxu1 %v16613_v24  ;;  %v3998_v21 = vld [vmem:[#allocation6 + $0x10f0] sm:$0xff]  ;;  %v3995_v24 = vld [vmem:[#allocation6 + $0x10d8] sm:$0xff] }
 0x35e   :  { %7260 = vmatprep.subr.bf16.mxu0 %v16620_v25  ;;  %7424 = vmatprep.subr.bf16.mxu1 %v16622_v26  ;;  %v3999_v25 = vld [vmem:[#allocation6 + $0x10f8] sm:$0xff]  ;;  %v16151_v26 = vcombine.low %v3986_v3, %v3990_v4  ;;  %v16160_v28 = vcombine.high %v3994_v19, %v3998_v21  ;;  %v16159_v34 = vcombine.low %v3994_v19, %v3998_v21  ;;  %v4038_v3 = vld [vmem:[#allocation6 + $0x1230] sm:$0xff] }
 0x35f   :  { %v16162_v9 = vcombine.high %v3995_v24, %v3999_v25  ;;  %v4035_v4 = vld [vmem:[#allocation6 + $0x1218] sm:$0xff]  ;;  %v4046_v19 = vld [vmem:[#allocation6 + $0x1270] sm:$0xff] }
 0x360   :  { %v4043_v21 = vld [vmem:[#allocation6 + $0x1258] sm:$0xff] }
 0x361   :  { %7261 = vmatpush1.bf16.msra.mxu0 %v16619_v31  ;;  %7425 = vmatpush1.bf16.msra.mxu1 %v16621_v32  ;;  %v4006_v31 = vld [vmem:[#allocation6 + $0x1130] sm:$0xff]  ;;  %v4007_v32 = vld [vmem:[#allocation6 + $0x1138] sm:$0xff] }
 0x362   :  { %7262 = vmatprep.subr.bf16.mxu0 %v16628_v36  ;;  %7426 = vmatprep.subr.bf16.mxu1 %v16630_v2  ;;  %v16161_v36 = vcombine.low %v3995_v24, %v3999_v25  ;;  %v16168_v2 = vcombine.high %v4002_v29, %v4006_v31  ;;  %v4047_v24 = vld [vmem:[#allocation6 + $0x1278] sm:$0xff] }
 0x365   :  { %7263 = vmatpush1.bf16.msra.mxu0 %v16627_v41  ;;  %7427 = vmatpush1.bf16.msra.mxu1 %v16629_v42  ;;  %v4015_v41 = vld [vmem:[#allocation6 + $0x1178] sm:$0xff]  ;;  %v16167_v42 = vcombine.low %v4002_v29, %v4006_v31  ;;  %v4054_v29 = vld [vmem:[#allocation6 + $0x12b0] sm:$0xff] }
 0x366   :  { %7264 = vmatprep.subr.bf16.mxu0 %v16636_v43  ;;  %7428 = vmatprep.subr.bf16.mxu1 %v16638_v44  ;;  %v16176_v43 = vcombine.high %v4010_v23, %v4014_v39  ;;  %v16178_v44 = vcombine.high %v4011_v40, %v4015_v41  ;;  %v4051_v31 = vld [vmem:[#allocation6 + $0x1298] sm:$0xff] }
 0x369   :  { %7265 = vmatpush1.bf16.msra.mxu0 %v16635_v47  ;;  %7429 = vmatpush1.bf16.msra.mxu1 %v16637_v52  ;;  %v16175_v47 = vcombine.low %v4010_v23, %v4014_v39  ;;  %v16177_v52 = vcombine.low %v4011_v40, %v4015_v41  ;;  %v4062_v23 = vld [vmem:[#allocation6 + $0x12f0] sm:$0xff]  ;;  %v4059_v39 = vld [vmem:[#allocation6 + $0x12d8] sm:$0xff] }
 0x36a   :  { %7439 = vmatprep.subr.bf16.mxu0 %v16136_v56  ;;  %7603 = vmatprep.subr.bf16.mxu1 %v16138_v57  ;;  %v16186_v56 = vcombine.high %v4019_v46, %v4023_v10  ;;  %v4026_v57 = vld [vmem:[#allocation6 + $0x11d0] sm:$0xff]  ;;  %v4063_v40 = vld [vmem:[#allocation6 + $0x12f8] sm:$0xff] }
 0x36b   :  { %v16191_v7 = vcombine.low %v4026_v57, %v4030_v60 }
 0x36c   :  { %7267 = vmatmul.mubr.bf16.vlgmr.msra.gmra.mrb[8].mxu0 %v18303_v63  ;;  %7431 = vmatmul.mubr.bf16.vlgmr.msra.gmra.mrb[8].mxu1 %v18303_v63 }
 0x36d   :  { %7440 = vmatpush1.bf16.msra.mxu0 %v16135_v5  ;;  %7471 = vmatprep.mubr.bf16.mxu0 %v18230_v50  ;;  %v16185_v5 = vcombine.low %v4019_v46, %v4023_v10  ;;  %v4071_v46 = vld [vmem:[#allocation6 + $0x1338] sm:$0xff] }
 0x36e   :  { %7604 = vmatpush1.bf16.msra.mxu1 %v16137_v55  ;;  %7635 = vmatprep.mubr.bf16.mxu1 %v18230_v50  ;;  %v4003_v50 = vld [vmem:[#allocation6 + $0x1118] sm:$0xff]  ;;  %v16192_v55 = vcombine.high %v4026_v57, %v4030_v60  ;;  %v4078_v57 = vld [vmem:[#allocation6 + $0x1370] sm:$0xff] }
 0x36f   :  { %7441 = vmatprep.subr.bf16.mxu0 %v16144_v0  ;;  %7605 = vmatprep.subr.bf16.mxu1 %v16146_v1  ;;  %v16170_v22 = vcombine.high %v4003_v50, %v4007_v32  ;;  %v16169_v37 = vcombine.low %v4003_v50, %v4007_v32  ;;  %v16194_v0 = vcombine.high %v4027_v61, %v4031_v59  ;;  %v4034_v1 = vld [vmem:[#allocation6 + $0x1210] sm:$0xff]  ;;  %v4055_v50 = vld [vmem:[#allocation6 + $0x12b8] sm:$0xff] }
 0x370   :  { %v16199_v25 = vcombine.low %v4034_v1, %v4038_v3  ;;  %v4075_v60 = vld [vmem:[#allocation6 + $0x1358] sm:$0xff] }
 0x371   :  { %7442 = vmatpush1.bf16.msra.mxu0 %v16143_v8  ;;  %v16193_v8 = vcombine.low %v4027_v61, %v4031_v59  ;;  %v4079_v61 = vld [vmem:[#allocation6 + $0x1378] sm:$0xff] }
 0x372   :  { %7606 = vmatpush1.bf16.msra.mxu1 %v16145_v11  ;;  %7443 = vmatprep.subr.bf16.mxu0 %v16152_v15  ;;  %v16200_v11 = vcombine.high %v4034_v1, %v4038_v3  ;;  %v16202_v15 = vcombine.high %v4035_v4, %v4039_v14  ;;  %v4086_v1 = vld [vmem:[#allocation6 + $0x13b0] sm:$0xff]  ;;  %v4083_v3 = vld [vmem:[#allocation6 + $0x1398] sm:$0xff] }
 0x373   :  { %7607 = vmatprep.subr.bf16.mxu1 %v16154_v18  ;;  %v4042_v18 = vld [vmem:[#allocation6 + $0x1250] sm:$0xff] }
 0x374   :  { %v16207_v32 = vcombine.low %v4042_v18, %v4046_v19 }
 0x375   :  { %7444 = vmatpush1.bf16.msra.mxu0 %v16151_v26  ;;  %v16201_v26 = vcombine.low %v4035_v4, %v4039_v14  ;;  %v4087_v4 = vld [vmem:[#allocation6 + $0x13b8] sm:$0xff] }
 0x376   :  { %7608 = vmatpush1.bf16.msra.mxu1 %v16153_v27  ;;  %7445 = vmatprep.subr.bf16.mxu0 %v16160_v28  ;;  %v16208_v27 = vcombine.high %v4042_v18, %v4046_v19  ;;  %v16210_v28 = vcombine.high %v4043_v21, %v4047_v24  ;;  %v4094_v18 = vld [vmem:[#allocation6 + $0x13f0] sm:$0xff]  ;;  %v4091_v19 = vld [vmem:[#allocation6 + $0x13d8] sm:$0xff] }
 0x377   :  { %7609 = vmatprep.subr.bf16.mxu1 %v16162_v9  ;;  %v4050_v9 = vld [vmem:[#allocation6 + $0x1290] sm:$0xff] }
 0x378   :  { %v16215_v41 = vcombine.low %v4050_v9, %v4054_v29 }
 0x379   :  { %7446 = vmatpush1.bf16.msra.mxu0 %v16159_v34  ;;  %v16209_v34 = vcombine.low %v4043_v21, %v4047_v24  ;;  %v4095_v21 = vld [vmem:[#allocation6 + $0x13f8] sm:$0xff] }
 0x37a   :  { %7610 = vmatpush1.bf16.msra.mxu1 %v16161_v36  ;;  %7447 = vmatprep.subr.bf16.mxu0 %v16168_v2  ;;  %v16216_v36 = vcombine.high %v4050_v9, %v4054_v29  ;;  %v16218_v2 = vcombine.high %v4051_v31, %v4055_v50  ;;  %v4102_v9 = vld [vmem:[#allocation6 + $0x1430] sm:$0xff]  ;;  %v4099_v29 = vld [vmem:[#allocation6 + $0x1418] sm:$0xff] }
 0x37b   :  { %7611 = vmatprep.subr.bf16.mxu1 %v16170_v22  ;;  %v4058_v22 = vld [vmem:[#allocation6 + $0x12d0] sm:$0xff] }
 0x37c   :  { %v16223_v10 = vcombine.low %v4058_v22, %v4062_v23 }
 0x37d   :  { %7448 = vmatpush1.bf16.msra.mxu0 %v16167_v42  ;;  %v16217_v42 = vcombine.low %v4051_v31, %v4055_v50  ;;  %v4103_v31 = vld [vmem:[#allocation6 + $0x1438] sm:$0xff] }
 0x37e   :  { %7612 = vmatpush1.bf16.msra.mxu1 %v16169_v37  ;;  %7449 = vmatprep.subr.bf16.mxu0 %v16176_v43  ;;  %v16224_v37 = vcombine.high %v4058_v22, %v4062_v23  ;;  %v16226_v43 = vcombine.high %v4059_v39, %v4063_v40  ;;  %v4110_v22 = vld [vmem:[#allocation6 + $0x1470] sm:$0xff] }
 0x37f   :  { %7613 = vmatprep.subr.bf16.mxu1 %v16178_v44  ;;  %v4066_v44 = vld [vmem:[#allocation6 + $0x1310] sm:$0xff] }
 0x380   :  { %v16231_v59 = vcombine.low %v4066_v44, %v4070_v45 }
 0x381   :  { %7450 = vmatpush1.bf16.msra.mxu0 %v16175_v47  ;;  %v16225_v47 = vcombine.low %v4059_v39, %v4063_v40  ;;  %v4107_v39 = vld [vmem:[#allocation6 + $0x1458] sm:$0xff] }
 0x382   :  { %7614 = vmatpush1.bf16.msra.mxu1 %v16177_v52  ;;  %7451 = vmatprep.subr.bf16.mxu0 %v16184_v53  ;;  %v16232_v52 = vcombine.high %v4066_v44, %v4070_v45  ;;  %v16234_v53 = vcombine.high %v4067_v51, %v4071_v46  ;;  %v4111_v40 = vld [vmem:[#allocation6 + $0x1478] sm:$0xff] }
 0x383   :  { %7615 = vmatprep.subr.bf16.mxu1 %v16186_v56  ;;  %v4074_v56 = vld [vmem:[#allocation6 + $0x1350] sm:$0xff]  ;;  %v16274_v44 = vcombine.high %v4107_v39, %v4111_v40  ;;  %v4115_v45 = vld [vmem:[#allocation6 + $0x1498] sm:$0xff] }
 0x384   :  { %v16239_v14 = vcombine.low %v4074_v56, %v4078_v57 }
 0x385   :  { %7452 = vmatpush1.bf16.msra.mxu0 %v16183_v62  ;;  %v16233_v62 = vcombine.low %v4067_v51, %v4071_v46  ;;  %v4119_v51 = vld [vmem:[#allocation6 + $0x14b8] sm:$0xff] }
 0x386   :  { %7616 = vmatpush1.bf16.msra.mxu1 %v16185_v5  ;;  %7453 = vmatprep.subr.bf16.mxu0 %v16192_v55  ;;  %v16240_v5 = vcombine.high %v4074_v56, %v4078_v57  ;;  %v16242_v55 = vcombine.high %v4075_v60, %v4079_v61  ;;  %v4126_v56 = vld [vmem:[#allocation6 + $0x14f0] sm:$0xff]  ;;  %v4123_v57 = vld [vmem:[#allocation6 + $0x14d8] sm:$0xff] }
 0x387   :  { %7617 = vmatprep.subr.bf16.mxu1 %v16194_v0  ;;  %v4082_v0 = vld [vmem:[#allocation6 + $0x1390] sm:$0xff] }
 0x388   :  { %v16247_v24 = vcombine.low %v4082_v0, %v4086_v1 }
 0x389   :  { %7454 = vmatpush1.bf16.msra.mxu0 %v16191_v7  ;;  %v16241_v7 = vcombine.low %v4075_v60, %v4079_v61  ;;  %v4127_v60 = vld [vmem:[#allocation6 + $0x14f8] sm:$0xff] }
 0x38a   :  { %7618 = vmatpush1.bf16.msra.mxu1 %v16193_v8  ;;  %7455 = vmatprep.subr.bf16.mxu0 %v16200_v11  ;;  %v16248_v8 = vcombine.high %v4082_v0, %v4086_v1  ;;  %v16250_v11 = vcombine.high %v4083_v3, %v4087_v4  ;;  %v4131_v0 = vld [vmem:[#allocation6 + $0x1518] sm:$0xff] }
 0x38b   :  { %7619 = vmatprep.subr.bf16.mxu1 %v16202_v15  ;;  %v4090_v15 = vld [vmem:[#allocation6 + $0x13d0] sm:$0xff]  ;;  %v4135_v1 = vld [vmem:[#allocation6 + $0x1538] sm:$0xff] }
 0x38c   :  { %v16255_v50 = vcombine.low %v4090_v15, %v4094_v18 }
 0x38d   :  { %7456 = vmatpush1.bf16.msra.mxu0 %v16199_v25  ;;  %v16249_v25 = vcombine.low %v4083_v3, %v4087_v4  ;;  %v16289_v3 = vcombine.low %v4123_v57, %v4127_v60 }
 0x38e   :  { %7620 = vmatpush1.bf16.msra.mxu1 %v16201_v26  ;;  %7457 = vmatprep.subr.bf16.mxu0 %v16208_v27  ;;  %v16256_v26 = vcombine.high %v4090_v15, %v4094_v18  ;;  %v16258_v27 = vcombine.high %v4091_v19, %v4095_v21  ;;  %v4143_v15 = vld [vmem:[#allocation6 + $0x1578] sm:$0xff] }
 0x38f   :  { %7621 = vmatprep.subr.bf16.mxu1 %v16210_v28  ;;  %v4098_v28 = vld [vmem:[#allocation6 + $0x1410] sm:$0xff] }
 0x390   :  { %v16263_v23 = vcombine.low %v4098_v28, %v4102_v9 }
 0x391   :  { %7458 = vmatpush1.bf16.msra.mxu0 %v16207_v32  ;;  %v16257_v32 = vcombine.low %v4091_v19, %v4095_v21  ;;  %v16297_v19 = vcombine.low %v4131_v0, %v4135_v1 }
 0x392   :  { %7622 = vmatpush1.bf16.msra.mxu1 %v16209_v34  ;;  %7459 = vmatprep.subr.bf16.mxu0 %v16216_v36  ;;  %v16264_v34 = vcombine.high %v4098_v28, %v4102_v9  ;;  %v16266_v36 = vcombine.high %v4099_v29, %v4103_v31  ;;  %v4151_v28 = vld [vmem:[#allocation6 + $0x15b8] sm:$0xff] }
 0x393   :  { %7623 = vmatprep.subr.bf16.mxu1 %v16218_v2  ;;  %v4106_v2 = vld [vmem:[#allocation6 + $0x1450] sm:$0xff] }
 0x394   :  { %v16271_v46 = vcombine.low %v4106_v2, %v4110_v22 }
 0x395   :  { %7460 = vmatpush1.bf16.msra.mxu0 %v16215_v41  ;;  %v16265_v41 = vcombine.low %v4099_v29, %v4103_v31 }
 0x396   :  { %7624 = vmatpush1.bf16.msra.mxu1 %v16217_v42  ;;  %7461 = vmatprep.subr.bf16.mxu0 %v16224_v37  ;;  %v16272_v42 = vcombine.high %v4106_v2, %v4110_v22  ;;  %v4114_v37 = vld [vmem:[#allocation6 + $0x1490] sm:$0xff]  ;;  %v4159_v2 = vld [vmem:[#allocation6 + $0x15f8] sm:$0xff] }
 0x397   :  { %7625 = vmatprep.subr.bf16.mxu1 %v16226_v43  ;;  %v4118_v43 = vld [vmem:[#allocation6 + $0x14b0] sm:$0xff] }
 0x398   :  { %v16279_v61 = vcombine.low %v4114_v37, %v4118_v43 }
 0x399   :  { %7462 = vmatpush1.bf16.msra.mxu0 %v16223_v10  ;;  %v16273_v10 = vcombine.low %v4107_v39, %v4111_v40 }
 0x39a   :  { %7626 = vmatpush1.bf16.msra.mxu1 %v16225_v47  ;;  %7463 = vmatprep.subr.bf16.mxu0 %v16232_v52  ;;  %v16280_v47 = vcombine.high %v4114_v37, %v4118_v43  ;;  %v16282_v52 = vcombine.high %v4115_v45, %v4119_v51  ;;  %v4163_v37 = vld [vmem:[#allocation6 + $0x1618] sm:$0xff] }
 0x39b   :  { %7627 = vmatprep.subr.bf16.mxu1 %v16234_v53  ;;  %v4122_v53 = vld [vmem:[#allocation6 + $0x14d0] sm:$0xff]  ;;  %v4167_v43 = vld [vmem:[#allocation6 + $0x1638] sm:$0xff] }
 0x39d   :  { %7464 = vmatpush1.bf16.msra.mxu0 %v16231_v59  ;;  %v16288_v59 = vcombine.high %v4122_v53, %v4126_v56 }
 0x39e   :  { %7628 = vmatpush1.bf16.msra.mxu1 %v16233_v62  ;;  %7465 = vmatprep.subr.bf16.mxu0 %v16240_v5  ;;  %v16290_v62 = vcombine.high %v4123_v57, %v4127_v60  ;;  %v4130_v5 = vld [vmem:[#allocation6 + $0x1510] sm:$0xff]  ;;  %v16329_v57 = vcombine.low %v4163_v37, %v4167_v43 }
 0x39f   :  { %7629 = vmatprep.subr.bf16.mxu1 %v16242_v55  ;;  %v4134_v55 = vld [vmem:[#allocation6 + $0x1530] sm:$0xff] }
 0x3a0   :  { %v16296_v4 = vcombine.high %v4130_v5, %v4134_v55  ;;  %v16295_v18 = vcombine.low %v4130_v5, %v4134_v55  ;;  %v4183_v5 = vld [vmem:[#allocation6 + $0x16b8] sm:$0xff] }
 0x3a1   :  { %7466 = vmatpush1.bf16.msra.mxu0 %v16239_v14  ;;  %v16298_v14 = vcombine.high %v4131_v0, %v4135_v1 }
 0x3a2   :  { %7630 = vmatpush1.bf16.msra.mxu1 %v16241_v7  ;;  %7467 = vmatprep.subr.bf16.mxu0 %v16248_v8  ;;  %v4138_v7 = vld [vmem:[#allocation6 + $0x1550] sm:$0xff] }
 0x3a3   :  { %7631 = vmatprep.subr.bf16.mxu1 %v16250_v11  ;;  %v4142_v8 = vld [vmem:[#allocation6 + $0x1570] sm:$0xff]  ;;  %v4139_v11 = vld [vmem:[#allocation6 + $0x1558] sm:$0xff] }
 0x3a4   :  { %v16304_v21 = vcombine.high %v4138_v7, %v4142_v8  ;;  %v16303_v9 = vcombine.low %v4138_v7, %v4142_v8  ;;  %v16305_v29 = vcombine.low %v4139_v11, %v4143_v15  ;;  %v4191_v7 = vld [vmem:[#allocation6 + $0x16f8] sm:$0xff] }
 0x3a5   :  { %7468 = vmatpush1.bf16.msra.mxu0 %v16247_v24  ;;  %v16306_v24 = vcombine.high %v4139_v11, %v4143_v15 }
 0x3a6   :  { %7632 = vmatpush1.bf16.msra.mxu1 %v16249_v25  ;;  %7469 = vmatprep.subr.bf16.mxu0 %v16256_v26  ;;  %v4146_v25 = vld [vmem:[#allocation6 + $0x1590] sm:$0xff] }
 0x3a7   :  { %7633 = vmatprep.subr.bf16.mxu1 %v16258_v27  ;;  %v4150_v26 = vld [vmem:[#allocation6 + $0x15b0] sm:$0xff]  ;;  %v4147_v27 = vld [vmem:[#allocation6 + $0x1598] sm:$0xff] }
 0x3a8   :  { %v16312_v31 = vcombine.high %v4146_v25, %v4150_v26  ;;  %v16311_v22 = vcombine.low %v4146_v25, %v4150_v26  ;;  %v4199_v25 = vld [vmem:[#allocation6 + $0x1738] sm:$0xff] }
 0x3a9   :  { %7470 = vmatpush1.bf16.msra.mxu0 %v16255_v50  ;;  %v16314_v50 = vcombine.high %v4147_v27, %v4151_v28 }
 0x3aa   :  { %7634 = vmatpush1.bf16.msra.mxu1 %v16257_v32  ;;  %7480 = vmatprep.subr.bf16.mxu0 %v16264_v34  ;;  %v4154_v32 = vld [vmem:[#allocation6 + $0x15d0] sm:$0xff] }
 0x3ab   :  { %7644 = vmatprep.subr.bf16.mxu1 %v16266_v36  ;;  %v4158_v34 = vld [vmem:[#allocation6 + $0x15f0] sm:$0xff]  ;;  %v4155_v36 = vld [vmem:[#allocation6 + $0x15d8] sm:$0xff] }
 0x3ac   :  { %7472 = vmatmul.mubr.bf16.vlgmr.msra.gmra.mrb[12].mxu0 %v18248_v6  ;;  %v16320_v39 = vcombine.high %v4154_v32, %v4158_v34  ;;  %v16322_v40 = vcombine.high %v4155_v36, %v4159_v2 }
 0x3ad   :  { %7636 = vmatmul.mubr.bf16.vlgmr.msra.gmra.mrb[12].mxu1 %v18248_v6  ;;  %7481 = vmatpush1.bf16.msra.mxu0 %v16263_v23  ;;  %v16281_v6 = vcombine.low %v4115_v45, %v4119_v51  ;;  %v16313_v23 = vcombine.low %v4147_v27, %v4151_v28  ;;  %v16321_v45 = vcombine.low %v4155_v36, %v4159_v2 }
 0x3ae   :  { %7512 = vmatprep.mubr.bf16.mxu0 %v18250_v12  ;;  %7645 = vmatpush1.bf16.msra.mxu1 %v16265_v41  ;;  %v4162_v41 = vld [vmem:[#allocation6 + $0x1610] sm:$0xff] }
 0x3af   :  { %7676 = vmatprep.mubr.bf16.mxu1 %v18250_v12  ;;  %7482 = vmatprep.subr.bf16.mxu0 %v16272_v42  ;;  %v16287_v12 = vcombine.low %v4122_v53, %v4126_v56  ;;  %v4166_v42 = vld [vmem:[#allocation6 + $0x1630] sm:$0xff]  ;;  %v4175_v53 = vld [vmem:[#allocation6 + $0x1678] sm:$0xff] }
 0x3b0   :  { %7646 = vmatprep.subr.bf16.mxu1 %v16274_v44  ;;  %v16319_v44 = vcombine.low %v4154_v32, %v4158_v34  ;;  %v16328_v51 = vcombine.high %v4162_v41, %v4166_v42  ;;  %v16327_v56 = vcombine.low %v4162_v41, %v4166_v42  ;;  %v4207_v32 = vld [vmem:[#allocation6 + $0x1778] sm:$0xff] }
 0x3b1   :  { %7483 = vmatpush1.bf16.msra.mxu0 %v16271_v46  ;;  %v16330_v46 = vcombine.high %v4163_v37, %v4167_v43  ;;  %v4215_v41 = vld [vmem:[#allocation6 + $0x17b8] sm:$0xff] }
 0x3b2   :  { %7647 = vmatpush1.bf16.msra.mxu1 %v16273_v10  ;;  %7484 = vmatprep.subr.bf16.mxu0 %v16280_v47  ;;  %v4170_v10 = vld [vmem:[#allocation6 + $0x1650] sm:$0xff] }
 0x3b3   :  { %7648 = vmatprep.subr.bf16.mxu1 %v16282_v52  ;;  %v4174_v47 = vld [vmem:[#allocation6 + $0x1670] sm:$0xff]  ;;  %v4171_v52 = vld [vmem:[#allocation6 + $0x1658] sm:$0xff] }
 0x3b4   :  { %v16336_v60 = vcombine.high %v4170_v10, %v4174_v47  ;;  %v16335_v55 = vcombine.low %v4170_v10, %v4174_v47  ;;  %v16337_v0 = vcombine.low %v4171_v52, %v4175_v53  ;;  %v4223_v10 = vld [vmem:[#allocation6 + $0x17f8] sm:$0xff] }
 0x3b5   :  { %7485 = vmatpush1.bf16.msra.mxu0 %v16279_v61  ;;  %v16338_v61 = vcombine.high %v4171_v52, %v4175_v53 }
 0x3b6   :  { %7649 = vmatpush1.bf16.msra.mxu1 %v16281_v6  ;;  %7486 = vmatprep.subr.bf16.mxu0 %v16288_v59  ;;  %v4178_v6 = vld [vmem:[#allocation6 + $0x1690] sm:$0xff] }
 0x3b7   :  { %7650 = vmatprep.subr.bf16.mxu1 %v16290_v62  ;;  %v4182_v59 = vld [vmem:[#allocation6 + $0x16b0] sm:$0xff]  ;;  %v4179_v62 = vld [vmem:[#allocation6 + $0x1698] sm:$0xff] }
 0x3b8   :  { %v16344_v1 = vcombine.high %v4178_v6, %v4182_v59  ;;  %v16343_v8 = vcombine.low %v4178_v6, %v4182_v59  ;;  %v16345_v11 = vcombine.low %v4179_v62, %v4183_v5  ;;  %v4231_v6 = vld [vmem:[#allocation6 + $0x1838] sm:$0xff] }
 0x3b9   :  { %7487 = vmatpush1.bf16.msra.mxu0 %v16287_v12  ;;  %v16346_v12 = vcombine.high %v4179_v62, %v4183_v5 }
 0x3ba   :  { %7651 = vmatpush1.bf16.msra.mxu1 %v16289_v3  ;;  %7488 = vmatprep.subr.bf16.mxu0 %v16296_v4  ;;  %v4186_v3 = vld [vmem:[#allocation6 + $0x16d0] sm:$0xff] }
 0x3bb   :  { %7652 = vmatprep.subr.bf16.mxu1 %v16298_v14  ;;  %v4190_v4 = vld [vmem:[#allocation6 + $0x16f0] sm:$0xff]  ;;  %v4187_v14 = vld [vmem:[#allocation6 + $0x16d8] sm:$0xff] }
 0x3bc   :  { %v16352_v15 = vcombine.high %v4186_v3, %v4190_v4  ;;  %v16351_v26 = vcombine.low %v4186_v3, %v4190_v4  ;;  %v16353_v27 = vcombine.low %v4187_v14, %v4191_v7  ;;  %v4235_v3 = vld [vmem:[#allocation6 + $0x1858] sm:$0xff] }
 0x3bd   :  { %7489 = vmatpush1.bf16.msra.mxu0 %v16295_v18  ;;  %v16354_v18 = vcombine.high %v4187_v14, %v4191_v7  ;;  %v4239_v4 = vld [vmem:[#allocation6 + $0x1878] sm:$0xff] }
 0x3be   :  { %7653 = vmatpush1.bf16.msra.mxu1 %v16297_v19  ;;  %7490 = vmatprep.subr.bf16.mxu0 %v16304_v21  ;;  %v4194_v19 = vld [vmem:[#allocation6 + $0x1710] sm:$0xff] }
 0x3bf   :  { %7654 = vmatprep.subr.bf16.mxu1 %v16306_v24  ;;  %v4198_v21 = vld [vmem:[#allocation6 + $0x1730] sm:$0xff]  ;;  %v4195_v24 = vld [vmem:[#allocation6 + $0x1718] sm:$0xff] }
 0x3c0   :  { %v16360_v28 = vcombine.high %v4194_v19, %v4198_v21  ;;  %v16359_v34 = vcombine.low %v4194_v19, %v4198_v21  ;;  %v16361_v36 = vcombine.low %v4195_v24, %v4199_v25  ;;  %v4247_v19 = vld [vmem:[#allocation6 + $0x18b8] sm:$0xff] }
 0x3c1   :  { %7491 = vmatpush1.bf16.msra.mxu0 %v16303_v9  ;;  %v16362_v9 = vcombine.high %v4195_v24, %v4199_v25  ;;  %v16401_v24 = vcombine.low %v4235_v3, %v4239_v4 }
 0x3c2   :  { %7655 = vmatpush1.bf16.msra.mxu1 %v16305_v29  ;;  %7492 = vmatprep.subr.bf16.mxu0 %v16312_v31  ;;  %v4202_v29 = vld [vmem:[#allocation6 + $0x1750] sm:$0xff] }
 0x3c3   :  { %7656 = vmatprep.subr.bf16.mxu1 %v16314_v50  ;;  %v4206_v31 = vld [vmem:[#allocation6 + $0x1770] sm:$0xff]  ;;  %v4203_v50 = vld [vmem:[#allocation6 + $0x1758] sm:$0xff] }
 0x3c4   :  { %v16368_v2 = vcombine.high %v4202_v29, %v4206_v31  ;;  %v16367_v42 = vcombine.low %v4202_v29, %v4206_v31  ;;  %v16369_v37 = vcombine.low %v4203_v50, %v4207_v32  ;;  %v4255_v29 = vld [vmem:[#allocation6 + $0x18f8] sm:$0xff] }
 0x3c5   :  { %7493 = vmatpush1.bf16.msra.mxu0 %v16311_v22  ;;  %v16370_v22 = vcombine.high %v4203_v50, %v4207_v32 }
 0x3c6   :  { %7657 = vmatpush1.bf16.msra.mxu1 %v16313_v23  ;;  %7494 = vmatprep.subr.bf16.mxu0 %v16320_v39  ;;  %v4210_v23 = vld [vmem:[#allocation6 + $0x1790] sm:$0xff] }
 0x3c7   :  { %7658 = vmatprep.subr.bf16.mxu1 %v16322_v40  ;;  %v4214_v39 = vld [vmem:[#allocation6 + $0x17b0] sm:$0xff]  ;;  %v4211_v40 = vld [vmem:[#allocation6 + $0x1798] sm:$0xff] }
 0x3c8   :  { %v16376_v43 = vcombine.high %v4210_v23, %v4214_v39  ;;  %v16375_v47 = vcombine.low %v4210_v23, %v4214_v39  ;;  %v16377_v52 = vcombine.low %v4211_v40, %v4215_v41 }
 0x3c9   :  { %7495 = vmatpush1.bf16.msra.mxu0 %v16319_v44  ;;  %v16378_v44 = vcombine.high %v4211_v40, %v4215_v41  ;;  %v4266_v41 = vld [vmem:[#allocation6 + $0x1950] sm:$0xff] }
 0x3ca   :  { %7659 = vmatpush1.bf16.msra.mxu1 %v16321_v45  ;;  %7496 = vmatprep.subr.bf16.mxu0 %v16328_v51  ;;  %v4218_v45 = vld [vmem:[#allocation6 + $0x17d0] sm:$0xff] }
 0x3cb   :  { %7660 = vmatprep.subr.bf16.mxu1 %v16330_v46  ;;  %v4222_v51 = vld [vmem:[#allocation6 + $0x17f0] sm:$0xff]  ;;  %v4219_v46 = vld [vmem:[#allocation6 + $0x17d8] sm:$0xff] }
 0x3cc   :  { %v16384_v53 = vcombine.high %v4218_v45, %v4222_v51  ;;  %v16383_v59 = vcombine.low %v4218_v45, %v4222_v51  ;;  %v16385_v62 = vcombine.low %v4219_v46, %v4223_v10 }
 0x3cd   :  { %7497 = vmatpush1.bf16.msra.mxu0 %v16327_v56  ;;  %v16386_v56 = vcombine.high %v4219_v46, %v4223_v10  ;;  %v4274_v10 = vld [vmem:[#allocation6 + $0x1990] sm:$0xff] }
 0x3ce   :  { %7661 = vmatpush1.bf16.msra.mxu1 %v16329_v57  ;;  %7498 = vmatprep.subr.bf16.mxu0 %v16336_v60  ;;  %v4226_v57 = vld [vmem:[#allocation6 + $0x1810] sm:$0xff] }
 0x3cf   :  { %7662 = vmatprep.subr.bf16.mxu1 %v16338_v61  ;;  %v4230_v60 = vld [vmem:[#allocation6 + $0x1830] sm:$0xff]  ;;  %v4227_v61 = vld [vmem:[#allocation6 + $0x1818] sm:$0xff] }
 0x3d0   :  { %v16392_v5 = vcombine.high %v4226_v57, %v4230_v60  ;;  %v16393_v14 = vcombine.low %v4227_v61, %v4231_v6 }
 0x3d1   :  { %7499 = vmatpush1.bf16.msra.mxu0 %v16335_v55  ;;  %v16394_v55 = vcombine.high %v4227_v61, %v4231_v6  ;;  %v4282_v6 = vld [vmem:[#allocation6 + $0x19d0] sm:$0xff] }
 0x3d2   :  { %7663 = vmatpush1.bf16.msra.mxu1 %v16337_v0  ;;  %7500 = vmatprep.subr.bf16.mxu0 %v16344_v1  ;;  %v4234_v0 = vld [vmem:[#allocation6 + $0x1850] sm:$0xff] }
 0x3d3   :  { %7664 = vmatprep.subr.bf16.mxu1 %v16346_v12  ;;  %v4238_v1 = vld [vmem:[#allocation6 + $0x1870] sm:$0xff]  ;;  %v16391_v12 = vcombine.low %v4226_v57, %v4230_v60 }
 0x3d4   :  { %v16400_v7 = vcombine.high %v4234_v0, %v4238_v1  ;;  %v16399_v21 = vcombine.low %v4234_v0, %v4238_v1 }
 0x3d5   :  { %7501 = vmatpush1.bf16.msra.mxu0 %v16343_v8  ;;  %v4242_v8 = vld [vmem:[#allocation6 + $0x1890] sm:$0xff] }
 0x3d6   :  { %7665 = vmatpush1.bf16.msra.mxu1 %v16345_v11  ;;  %7502 = vmatprep.subr.bf16.mxu0 %v16352_v15  ;;  %v4246_v11 = vld [vmem:[#allocation6 + $0x18b0] sm:$0xff]  ;;  %v16402_v15 = vcombine.high %v4235_v3, %v4239_v4 }
 0x3d7   :  { %7666 = vmatprep.subr.bf16.mxu1 %v16354_v18  ;;  %v4243_v18 = vld [vmem:[#allocation6 + $0x1898] sm:$0xff]  ;;  %v16408_v25 = vcombine.high %v4242_v8, %v4246_v11  ;;  %v16407_v31 = vcombine.low %v4242_v8, %v4246_v11  ;;  %v4290_v3 = vld [vmem:[#allocation6 + $0x1a10] sm:$0xff] }
 0x3d8   :  { %v4294_v4 = vld [vmem:[#allocation6 + $0x1a30] sm:$0xff] }
 0x3d9   :  { %7503 = vmatpush1.bf16.msra.mxu0 %v16351_v26  ;;  %v16410_v26 = vcombine.high %v4243_v18, %v4247_v19 }
 0x3da   :  { %7667 = vmatpush1.bf16.msra.mxu1 %v16353_v27  ;;  %7504 = vmatprep.subr.bf16.mxu0 %v16360_v28  ;;  %v4250_v27 = vld [vmem:[#allocation6 + $0x18d0] sm:$0xff] }
 0x3db   :  { %7668 = vmatprep.subr.bf16.mxu1 %v16362_v9  ;;  %v4254_v28 = vld [vmem:[#allocation6 + $0x18f0] sm:$0xff]  ;;  %v4251_v9 = vld [vmem:[#allocation6 + $0x18d8] sm:$0xff] }
 0x3dc   :  { %v16416_v50 = vcombine.high %v4250_v27, %v4254_v28  ;;  %v16418_v32 = vcombine.high %v4251_v9, %v4255_v29  ;;  %v16417_v23 = vcombine.low %v4251_v9, %v4255_v29  ;;  %v4306_v29 = vld [vmem:[#allocation6 + $0x1a90] sm:$0xff] }
 0x3dd   :  { %7505 = vmatpush1.bf16.msra.mxu0 %v16359_v34  ;;  %v4258_v34 = vld [vmem:[#allocation6 + $0x1910] sm:$0xff] }
 0x3de   :  { %7669 = vmatpush1.bf16.msra.mxu1 %v16361_v36  ;;  %7506 = vmatprep.subr.bf16.mxu0 %v16368_v2  ;;  %v4262_v36 = vld [vmem:[#allocation6 + $0x1930] sm:$0xff]  ;;  %v4259_v2 = vld [vmem:[#allocation6 + $0x1918] sm:$0xff] }
 0x3df   :  { %7670 = vmatprep.subr.bf16.mxu1 %v16370_v22  ;;  %v4263_v22 = vld [vmem:[#allocation6 + $0x1938] sm:$0xff]  ;;  %v16424_v39 = vcombine.high %v4258_v34, %v4262_v36 }
 0x3e0   :  { %v16426_v40 = vcombine.high %v4259_v2, %v4263_v22  ;;  %v16425_v45 = vcombine.low %v4259_v2, %v4263_v22  ;;  %v4314_v22 = vld [vmem:[#allocation6 + $0x1ad0] sm:$0xff] }
 0x3e1   :  { %7507 = vmatpush1.bf16.msra.mxu0 %v16367_v42  ;;  %v4270_v42 = vld [vmem:[#allocation6 + $0x1970] sm:$0xff] }
 0x3e2   :  { %7671 = vmatpush1.bf16.msra.mxu1 %v16369_v37  ;;  %7508 = vmatprep.subr.bf16.mxu0 %v16376_v43  ;;  %v4267_v37 = vld [vmem:[#allocation6 + $0x1958] sm:$0xff]  ;;  %v16432_v51 = vcombine.high %v4266_v41, %v4270_v42 }
 0x3e3   :  { %7672 = vmatprep.subr.bf16.mxu1 %v16378_v44  ;;  %v4271_v43 = vld [vmem:[#allocation6 + $0x1978] sm:$0xff]  ;;  %v16423_v44 = vcombine.low %v4258_v34, %v4262_v36 }
 0x3e4   :  { %v16434_v46 = vcombine.high %v4267_v37, %v4271_v43  ;;  %v16433_v57 = vcombine.low %v4267_v37, %v4271_v43  ;;  %v4322_v43 = vld [vmem:[#allocation6 + $0x1b10] sm:$0xff] }
 0x3e5   :  { %7509 = vmatpush1.bf16.msra.mxu0 %v16375_v47  ;;  %v4278_v47 = vld [vmem:[#allocation6 + $0x19b0] sm:$0xff] }
 0x3e6   :  { %7673 = vmatpush1.bf16.msra.mxu1 %v16377_v52  ;;  %7510 = vmatprep.subr.bf16.mxu0 %v16384_v53  ;;  %v4275_v52 = vld [vmem:[#allocation6 + $0x1998] sm:$0xff]  ;;  %v16440_v60 = vcombine.high %v4274_v10, %v4278_v47 }
 0x3e7   :  { %7674 = vmatprep.subr.bf16.mxu1 %v16386_v56  ;;  %v4279_v53 = vld [vmem:[#allocation6 + $0x19b8] sm:$0xff]  ;;  %v16431_v56 = vcombine.low %v4266_v41, %v4270_v42 }
 0x3e8   :  { %v16442_v61 = vcombine.high %v4275_v52, %v4279_v53  ;;  %v16441_v0 = vcombine.low %v4275_v52, %v4279_v53  ;;  %v4330_v53 = vld [vmem:[#allocation6 + $0x1b50] sm:$0xff] }
 0x3e9   :  { %7511 = vmatpush1.bf16.msra.mxu0 %v16383_v59  ;;  %v4286_v59 = vld [vmem:[#allocation6 + $0x19f0] sm:$0xff] }
 0x3ea   :  { %7675 = vmatpush1.bf16.msra.mxu1 %v16385_v62  ;;  %7521 = vmatprep.subr.bf16.mxu0 %v16392_v5  ;;  %v4283_v62 = vld [vmem:[#allocation6 + $0x19d8] sm:$0xff]  ;;  %v16448_v1 = vcombine.high %v4282_v6, %v4286_v59  ;;  %v16447_v8 = vcombine.low %v4282_v6, %v4286_v59 }
 0x3eb   :  { %7685 = vmatprep.subr.bf16.mxu1 %v16394_v55  ;;  %v4287_v5 = vld [vmem:[#allocation6 + $0x19f8] sm:$0xff]  ;;  %v16439_v55 = vcombine.low %v4274_v10, %v4278_v47 }
 0x3ec   :  { %7513 = vmatmul.mubr.bf16.vlgmr.msra.gmra.mrb[12].mxu0 %v18262_v35  ;;  %v16449_v11 = vcombine.low %v4283_v62, %v4287_v5 }
 0x3ed   :  { %7677 = vmatmul.mubr.bf16.vlgmr.msra.gmra.mrb[12].mxu1 %v18262_v35  ;;  %7522 = vmatpush1.bf16.msra.mxu0 %v16391_v12  ;;  %v16409_v35 = vcombine.low %v4243_v18, %v4247_v19  ;;  %v16450_v12 = vcombine.high %v4283_v62, %v4287_v5  ;;  %v4298_v19 = vld [vmem:[#allocation6 + $0x1a50] sm:$0xff] }
 0x3ee   :  { %7553 = vmatprep.mubr.bf16.mxu0 %v18285_v17  ;;  %7686 = vmatpush1.bf16.msra.mxu1 %v16393_v14  ;;  %v4291_v14 = vld [vmem:[#allocation6 + $0x1a18] sm:$0xff]  ;;  %v4338_v5 = vld [vmem:[#allocation6 + $0x1b90] sm:$0xff] }
 0x3ef   :  { %7717 = vmatprep.mubr.bf16.mxu1 %v18285_v17  ;;  %7523 = vmatprep.subr.bf16.mxu0 %v16400_v7  ;;  %v16415_v17 = vcombine.low %v4250_v27, %v4254_v28  ;;  %v4295_v7 = vld [vmem:[#allocation6 + $0x1a38] sm:$0xff] }
 0x3f0   :  { %7687 = vmatprep.subr.bf16.mxu1 %v16402_v15  ;;  %v16456_v15 = vcombine.high %v4290_v3, %v4294_v4  ;;  %v16458_v18 = vcombine.high %v4291_v14, %v4295_v7  ;;  %v16457_v27 = vcombine.low %v4291_v14, %v4295_v7  ;;  %v4346_v7 = vld [vmem:[#allocation6 + $0x1bd0] sm:$0xff] }
 0x3f1   :  { %7524 = vmatpush1.bf16.msra.mxu0 %v16399_v21  ;;  %v4302_v21 = vld [vmem:[#allocation6 + $0x1a70] sm:$0xff] }
 0x3f2   :  { %7688 = vmatpush1.bf16.msra.mxu1 %v16401_v24  ;;  %7525 = vmatprep.subr.bf16.mxu0 %v16408_v25  ;;  %v4299_v24 = vld [vmem:[#allocation6 + $0x1a58] sm:$0xff]  ;;  %v16464_v28 = vcombine.high %v4298_v19, %v4302_v21 }
 0x3f3   :  { %7689 = vmatprep.subr.bf16.mxu1 %v16410_v26  ;;  %v4303_v25 = vld [vmem:[#allocation6 + $0x1a78] sm:$0xff]  ;;  %v16455_v26 = vcombine.low %v4290_v3, %v4294_v4 }
 0x3f4   :  { %v16466_v9 = vcombine.high %v4299_v24, %v4303_v25  ;;  %v16465_v34 = vcombine.low %v4299_v24, %v4303_v25  ;;  %v4354_v25 = vld [vmem:[#allocation6 + $0x1c10] sm:$0xff] }
 0x3f5   :  { %7526 = vmatpush1.bf16.msra.mxu0 %v16407_v31  ;;  %v4310_v31 = vld [vmem:[#allocation6 + $0x1ab0] sm:$0xff] }
 0x3f6   :  { %7690 = vmatpush1.bf16.msra.mxu1 %v16409_v35  ;;  %7527 = vmatprep.subr.bf16.mxu0 %v16416_v50  ;;  %v4307_v35 = vld [vmem:[#allocation6 + $0x1a98] sm:$0xff]  ;;  %v16472_v36 = vcombine.high %v4306_v29, %v4310_v31 }
 0x3f7   :  { %7691 = vmatprep.subr.bf16.mxu1 %v16418_v32  ;;  %v4311_v50 = vld [vmem:[#allocation6 + $0x1ab8] sm:$0xff]  ;;  %v16463_v32 = vcombine.low %v4298_v19, %v4302_v21 }
 0x3f8   :  { %v16474_v2 = vcombine.high %v4307_v35, %v4311_v50  ;;  %v16473_v41 = vcombine.low %v4307_v35, %v4311_v50  ;;  %v4362_v50 = vld [vmem:[#allocation6 + $0x1c50] sm:$0xff] }
 0x3f9   :  { %7528 = vmatpush1.bf16.msra.mxu0 %v16415_v17  ;;  %v4318_v17 = vld [vmem:[#allocation6 + $0x1af0] sm:$0xff] }
 0x3fa   :  { %7692 = vmatpush1.bf16.msra.mxu1 %v16417_v23  ;;  %7529 = vmatprep.subr.bf16.mxu0 %v16424_v39  ;;  %v4315_v23 = vld [vmem:[#allocation6 + $0x1ad8] sm:$0xff]  ;;  %v16480_v42 = vcombine.high %v4314_v22, %v4318_v17 }
 0x3fb   :  { %7693 = vmatprep.subr.bf16.mxu1 %v16426_v40  ;;  %v4319_v39 = vld [vmem:[#allocation6 + $0x1af8] sm:$0xff]  ;;  %v16471_v40 = vcombine.low %v4306_v29, %v4310_v31 }
 0x3fc   :  { %v16482_v37 = vcombine.high %v4315_v23, %v4319_v39  ;;  %v16481_v10 = vcombine.low %v4315_v23, %v4319_v39  ;;  %v4370_v23 = vld [vmem:[#allocation6 + $0x1c90] sm:$0xff] }
 0x3fd   :  { %7530 = vmatpush1.bf16.msra.mxu0 %v16423_v44  ;;  %v4326_v44 = vld [vmem:[#allocation6 + $0x1b30] sm:$0xff] }
 0x3fe   :  { %7694 = vmatpush1.bf16.msra.mxu1 %v16425_v45  ;;  %7531 = vmatprep.subr.bf16.mxu0 %v16432_v51  ;;  %v4323_v45 = vld [vmem:[#allocation6 + $0x1b18] sm:$0xff]  ;;  %v16488_v47 = vcombine.high %v4322_v43, %v4326_v44  ;;  %v4374_v39 = vld [vmem:[#allocation6 + $0x1cb0] sm:$0xff] }
 0x3ff   :  { %7695 = vmatprep.subr.bf16.mxu1 %v16434_v46  ;;  %v4327_v51 = vld [vmem:[#allocation6 + $0x1b38] sm:$0xff]  ;;  %v16479_v46 = vcombine.low %v4314_v22, %v4318_v17 }
 0x400   :  { %v16490_v52 = vcombine.high %v4323_v45, %v4327_v51  ;;  %v16489_v6 = vcombine.low %v4323_v45, %v4327_v51  ;;  %v4378_v51 = vld [vmem:[#allocation6 + $0x1cd0] sm:$0xff] }
 0x401   :  { %7532 = vmatpush1.bf16.msra.mxu0 %v16431_v56  ;;  %v4334_v56 = vld [vmem:[#allocation6 + $0x1b70] sm:$0xff] }
 0x402   :  { %7696 = vmatpush1.bf16.msra.mxu1 %v16433_v57  ;;  %7533 = vmatprep.subr.bf16.mxu0 %v16440_v60  ;;  %v4331_v57 = vld [vmem:[#allocation6 + $0x1b58] sm:$0xff]  ;;  %v16496_v59 = vcombine.high %v4330_v53, %v4334_v56 }
 0x403   :  { %7697 = vmatprep.subr.bf16.mxu1 %v16442_v61  ;;  %v4335_v60 = vld [vmem:[#allocation6 + $0x1b78] sm:$0xff]  ;;  %v16487_v61 = vcombine.low %v4322_v43, %v4326_v44  ;;  %v16536_v44 = vcombine.high %v4370_v23, %v4374_v39 }
 0x404   :  { %v16498_v62 = vcombine.high %v4331_v57, %v4335_v60  ;;  %v16497_v3 = vcombine.low %v4331_v57, %v4335_v60  ;;  %v4386_v57 = vld [vmem:[#allocation6 + $0x1d10] sm:$0xff] }
 0x405   :  { %7534 = vmatpush1.bf16.msra.mxu0 %v16439_v55  ;;  %v4342_v55 = vld [vmem:[#allocation6 + $0x1bb0] sm:$0xff] }
 0x406   :  { %7698 = vmatpush1.bf16.msra.mxu1 %v16441_v0  ;;  %7535 = vmatprep.subr.bf16.mxu0 %v16448_v1  ;;  %v4339_v0 = vld [vmem:[#allocation6 + $0x1b98] sm:$0xff]  ;;  %v16504_v4 = vcombine.high %v4338_v5, %v4342_v55  ;;  %v4390_v60 = vld [vmem:[#allocation6 + $0x1d30] sm:$0xff] }
 0x407   :  { %7699 = vmatprep.subr.bf16.mxu1 %v16450_v12  ;;  %v4343_v1 = vld [vmem:[#allocation6 + $0x1bb8] sm:$0xff]  ;;  %v16495_v12 = vcombine.low %v4330_v53, %v4334_v56 }
 0x408   :  { %v16506_v14 = vcombine.high %v4339_v0, %v4343_v1  ;;  %v16505_v19 = vcombine.low %v4339_v0, %v4343_v1  ;;  %v4398_v0 = vld [vmem:[#allocation6 + $0x1d70] sm:$0xff]  ;;  %v4395_v1 = vld [vmem:[#allocation6 + $0x1d58] sm:$0xff] }
 0x409   :  { %7536 = vmatpush1.bf16.msra.mxu0 %v16447_v8  ;;  %v4350_v8 = vld [vmem:[#allocation6 + $0x1bf0] sm:$0xff] }
 0x40a   :  { %7700 = vmatpush1.bf16.msra.mxu1 %v16449_v11  ;;  %7537 = vmatprep.subr.bf16.mxu0 %v16456_v15  ;;  %v4347_v11 = vld [vmem:[#allocation6 + $0x1bd8] sm:$0xff]  ;;  %v16512_v21 = vcombine.high %v4346_v7, %v4350_v8 }
 0x40b   :  { %7701 = vmatprep.subr.bf16.mxu1 %v16458_v18  ;;  %v4351_v15 = vld [vmem:[#allocation6 + $0x1bf8] sm:$0xff]  ;;  %v16503_v18 = vcombine.low %v4338_v5, %v4342_v55  ;;  %v4394_v55 = vld [vmem:[#allocation6 + $0x1d50] sm:$0xff] }
 0x40c   :  { %v16514_v24 = vcombine.high %v4347_v11, %v4351_v15  ;;  %v16513_v29 = vcombine.low %v4347_v11, %v4351_v15  ;;  %v4406_v11 = vld [vmem:[#allocation6 + $0x1db0] sm:$0xff]  ;;  %v4403_v15 = vld [vmem:[#allocation6 + $0x1d98] sm:$0xff] }
 0x40d   :  { %7538 = vmatpush1.bf16.msra.mxu0 %v16455_v26  ;;  %v4358_v26 = vld [vmem:[#allocation6 + $0x1c30] sm:$0xff] }
 0x40e   :  { %7702 = vmatpush1.bf16.msra.mxu1 %v16457_v27  ;;  %7539 = vmatprep.subr.bf16.mxu0 %v16464_v28  ;;  %v4355_v27 = vld [vmem:[#allocation6 + $0x1c18] sm:$0xff]  ;;  %v16520_v31 = vcombine.high %v4354_v25, %v4358_v26 }
 0x40f   :  { %7703 = vmatprep.subr.bf16.mxu1 %v16466_v9  ;;  %v4359_v28 = vld [vmem:[#allocation6 + $0x1c38] sm:$0xff]  ;;  %v16511_v9 = vcombine.low %v4346_v7, %v4350_v8  ;;  %v4402_v8 = vld [vmem:[#allocation6 + $0x1d90] sm:$0xff] }
 0x410   :  { %v16522_v35 = vcombine.high %v4355_v27, %v4359_v28  ;;  %v16521_v22 = vcombine.low %v4355_v27, %v4359_v28  ;;  %v4410_v28 = vld [vmem:[#allocation6 + $0x1dd0] sm:$0xff] }
 0x411   :  { %7540 = vmatpush1.bf16.msra.mxu0 %v16463_v32  ;;  %v4366_v32 = vld [vmem:[#allocation6 + $0x1c70] sm:$0xff] }
 0x412   :  { %7704 = vmatpush1.bf16.msra.mxu1 %v16465_v34  ;;  %7541 = vmatprep.subr.bf16.mxu0 %v16472_v36  ;;  %v16519_v34 = vcombine.low %v4354_v25, %v4358_v26  ;;  %v4363_v36 = vld [vmem:[#allocation6 + $0x1c58] sm:$0xff]  ;;  %v16528_v17 = vcombine.high %v4362_v50, %v4366_v32 }
 0x413   :  { %7705 = vmatprep.subr.bf16.mxu1 %v16474_v2  ;;  %v4367_v2 = vld [vmem:[#allocation6 + $0x1c78] sm:$0xff] }
 0x414   :  { %v16529_v43 = vcombine.low %v4363_v36, %v4367_v2 }
 0x415   :  { %7542 = vmatpush1.bf16.msra.mxu0 %v16471_v40  ;;  %v16530_v40 = vcombine.high %v4363_v36, %v4367_v2  ;;  %v16567_v36 = vcombine.low %v4402_v8, %v4406_v11 }
 0x416   :  { %7706 = vmatpush1.bf16.msra.mxu1 %v16473_v41  ;;  %7543 = vmatprep.subr.bf16.mxu0 %v16480_v42  ;;  %v4371_v41 = vld [vmem:[#allocation6 + $0x1c98] sm:$0xff] }
 0x417   :  { %7707 = vmatprep.subr.bf16.mxu1 %v16482_v37  ;;  %v4375_v42 = vld [vmem:[#allocation6 + $0x1cb8] sm:$0xff]  ;;  %v16527_v37 = vcombine.low %v4362_v50, %v4366_v32 }
 0x418   :  { %v16538_v45 = vcombine.high %v4371_v41, %v4375_v42  ;;  %v4415_v50 = vld [vmem:[#allocation6 + $0x1df8] sm:$0xff] }
 0x419   :  { %7544 = vmatpush1.bf16.msra.mxu0 %v16479_v46  ;;  %v4382_v46 = vld [vmem:[#allocation6 + $0x1cf0] sm:$0xff] }
 0x41a   :  { %7708 = vmatpush1.bf16.msra.mxu1 %v16481_v10  ;;  %7545 = vmatprep.subr.bf16.mxu0 %v16488_v47  ;;  %v4379_v10 = vld [vmem:[#allocation6 + $0x1cd8] sm:$0xff]  ;;  %v16544_v53 = vcombine.high %v4378_v51, %v4382_v46 }
 0x41b   :  { %7709 = vmatprep.subr.bf16.mxu1 %v16490_v52  ;;  %v4383_v47 = vld [vmem:[#allocation6 + $0x1cf8] sm:$0xff]  ;;  %v16535_v52 = vcombine.low %v4370_v23, %v4374_v39 }
 0x41c   :  { %v16546_v56 = vcombine.high %v4379_v10, %v4383_v47 }
 0x41d   :  { %7546 = vmatpush1.bf16.msra.mxu0 %v16487_v61  ;;  %v4387_v61 = vld [vmem:[#allocation6 + $0x1d18] sm:$0xff] }
 0x41e   :  { %7710 = vmatpush1.bf16.msra.mxu1 %v16489_v6  ;;  %7547 = vmatprep.subr.bf16.mxu0 %v16496_v59  ;;  %v4391_v6 = vld [vmem:[#allocation6 + $0x1d38] sm:$0xff]  ;;  %v16545_v59 = vcombine.low %v4379_v10, %v4383_v47  ;;  %v4430_v10 = vld [vmem:[#allocation6 + $0x1e70] sm:$0xff] }
 0x41f   :  { %7711 = vmatprep.subr.bf16.mxu1 %v16498_v62  ;;  %v16552_v62 = vcombine.high %v4386_v57, %v4390_v60  ;;  %v16554_v5 = vcombine.high %v4387_v61, %v4391_v6  ;;  %v4427_v47 = vld [vmem:[#allocation6 + $0x1e58] sm:$0xff] }
 0x421   :  { %7548 = vmatpush1.bf16.msra.mxu0 %v16495_v12  ;;  %v4399_v12 = vld [vmem:[#allocation6 + $0x1d78] sm:$0xff] }
 0x422   :  { %7712 = vmatpush1.bf16.msra.mxu1 %v16497_v3  ;;  %7549 = vmatprep.subr.bf16.mxu0 %v16504_v4  ;;  %v16551_v3 = vcombine.low %v4386_v57, %v4390_v60  ;;  %v16553_v4 = vcombine.low %v4387_v61, %v4391_v6  ;;  %v16562_v7 = vcombine.high %v4395_v1, %v4399_v12  ;;  %v4434_v60 = vld [vmem:[#allocation6 + $0x1e90] sm:$0xff]  ;;  %v4435_v6 = vld [vmem:[#allocation6 + $0x1e98] sm:$0xff] }
 0x423   :  { %7713 = vmatprep.subr.bf16.mxu1 %v16506_v14  ;;  %v16560_v14 = vcombine.high %v4394_v55, %v4398_v0  ;;  %v4438_v61 = vld [vmem:[#allocation6 + $0x1eb0] sm:$0xff] }
 0x425   :  { %7550 = vmatpush1.bf16.msra.mxu0 %v16503_v18  ;;  %v4407_v18 = vld [vmem:[#allocation6 + $0x1db8] sm:$0xff] }
 0x426   :  { %7714 = vmatpush1.bf16.msra.mxu1 %v16505_v19  ;;  %7551 = vmatprep.subr.bf16.mxu0 %v16512_v21  ;;  %v16559_v19 = vcombine.low %v4394_v55, %v4398_v0  ;;  %v16561_v21 = vcombine.low %v4395_v1, %v4399_v12  ;;  %v16570_v27 = vcombine.high %v4403_v15, %v4407_v18  ;;  %v4442_v0 = vld [vmem:[#allocation6 + $0x1ed0] sm:$0xff]  ;;  %v4443_v12 = vld [vmem:[#allocation6 + $0x1ed8] sm:$0xff] }
 0x427   :  { %7715 = vmatprep.subr.bf16.mxu1 %v16514_v24  ;;  %v16568_v24 = vcombine.high %v4402_v8, %v4406_v11  ;;  %v4446_v1 = vld [vmem:[#allocation6 + $0x1ef0] sm:$0xff] }
 0x428   :  { %v4450_v11 = vld [vmem:[#allocation6 + $0x1f10] sm:$0xff] }
 0x429   :  { %7552 = vmatpush1.bf16.msra.mxu0 %v16511_v9  ;;  %v4414_v9 = vld [vmem:[#allocation6 + $0x1df0] sm:$0xff] }
 0x42a   :  { %7716 = vmatpush1.bf16.msra.mxu1 %v16513_v29  ;;  %7562 = vmatprep.subr.bf16.mxu0 %v16520_v31  ;;  %v16576_v23 = vcombine.high %v4410_v28, %v4414_v9 }
 0x42b   :  { %7726 = vmatprep.subr.bf16.mxu1 %v16522_v35  ;;  %v4411_v35 = vld [vmem:[#allocation6 + $0x1dd8] sm:$0xff] }
 0x42c   :  { %7554 = vmatmul.mubr.bf16.vlgmr.msra.gmra.mrb[12].mxu0 %v18287_v20  ;;  %v16578_v39 = vcombine.high %v4411_v35, %v4415_v50 }
 0x42d   :  { %7718 = vmatmul.mubr.bf16.vlgmr.msra.gmra.mrb[12].mxu1 %v18287_v20  ;;  %7563 = vmatpush1.bf16.msra.mxu0 %v16519_v34  ;;  %v16537_v20 = vcombine.low %v4371_v41, %v4375_v42  ;;  %v4422_v41 = vld [vmem:[#allocation6 + $0x1e30] sm:$0xff]  ;;  %v4419_v42 = vld [vmem:[#allocation6 + $0x1e18] sm:$0xff] }
 0x42e   :  { %7594 = vmatprep.mubr.bf16.mxu0 %v18291_v13  ;;  %7727 = vmatpush1.bf16.msra.mxu1 %v16521_v22 }
 0x42f   :  { %7758 = vmatprep.mubr.bf16.mxu1 %v18291_v13  ;;  %7564 = vmatprep.subr.bf16.mxu0 %v16528_v17  ;;  %v16543_v13 = vcombine.low %v4378_v51, %v4382_v46  ;;  %v16569_v17 = vcombine.low %v4403_v15, %v4407_v18  ;;  %v4426_v46 = vld [vmem:[#allocation6 + $0x1e50] sm:$0xff]  ;;  %v4451_v18 = vld [vmem:[#allocation6 + $0x1f18] sm:$0xff] }
 0x430   :  { %7728 = vmatprep.subr.bf16.mxu1 %v16530_v40  ;;  %v4418_v40 = vld [vmem:[#allocation6 + $0x1e10] sm:$0xff] }
 0x431   :  { %7565 = vmatpush1.bf16.msra.mxu0 %v16527_v37  ;;  %v4423_v37 = vld [vmem:[#allocation6 + $0x1e38] sm:$0xff]  ;;  %v4454_v15 = vld [vmem:[#allocation6 + $0x1f30] sm:$0xff] }
 0x432   :  { %7729 = vmatpush1.bf16.msra.mxu1 %v16529_v43  ;;  %7566 = vmatprep.subr.bf16.mxu0 %v16536_v44  ;;  %v16575_v43 = vcombine.low %v4410_v28, %v4414_v9  ;;  %v16577_v44 = vcombine.low %v4411_v35, %v4415_v50  ;;  %v16586_v51 = vcombine.high %v4419_v42, %v4423_v37  ;;  %v4458_v9 = vld [vmem:[#allocation6 + $0x1f50] sm:$0xff]  ;;  %v4459_v50 = vld [vmem:[#allocation6 + $0x1f58] sm:$0xff] }
 0x433   :  { %7730 = vmatprep.subr.bf16.mxu1 %v16538_v45  ;;  %v16584_v45 = vcombine.high %v4418_v40, %v4422_v41  ;;  %v4462_v35 = vld [vmem:[#allocation6 + $0x1f70] sm:$0xff] }
 0x435   :  { %7567 = vmatpush1.bf16.msra.mxu0 %v16535_v52  ;;  %v4431_v52 = vld [vmem:[#allocation6 + $0x1e78] sm:$0xff] }
 0x436   :  { %7731 = vmatpush1.bf16.msra.mxu1 %v16537_v20  ;;  %7568 = vmatprep.subr.bf16.mxu0 %v16544_v53  ;;  %v16583_v20 = vcombine.low %v4418_v40, %v4422_v41  ;;  %v16585_v53 = vcombine.low %v4419_v42, %v4423_v37  ;;  %v16594_v57 = vcombine.high %v4427_v47, %v4431_v52  ;;  %v4471_v40 = vld [vmem:[#allocation6 + $0x1fb8] sm:$0xff]  ;;  %v18329_v41 = vld [vmem:[#allocation8 + $0x8] sm:$0xff] }
 0x437   :  { %7732 = vmatprep.subr.bf16.mxu1 %v16546_v56  ;;  %v16592_v56 = vcombine.high %v4426_v46, %v4430_v10  ;;  %v16623_v42 = vcombine.low %v4458_v9, %v4462_v35 }
 0x439   :  { %7569 = vmatpush1.bf16.msra.mxu0 %v16543_v13  ;;  %v4439_v13 = vld [vmem:[#allocation6 + $0x1eb8] sm:$0xff] }
 0x43a   :  { %7733 = vmatpush1.bf16.msra.mxu1 %v16545_v59  ;;  %7570 = vmatprep.subr.bf16.mxu0 %v16552_v62  ;;  %v16591_v59 = vcombine.low %v4426_v46, %v4430_v10  ;;  %v16593_v62 = vcombine.low %v4427_v47, %v4431_v52  ;;  %v16602_v55 = vcombine.high %v4435_v6, %v4439_v13  ;;  %v4475_v10 = vld [vmem:[#allocation6 + $0x1fd8] sm:$0xff] }
 0x43b   :  { %7734 = vmatprep.subr.bf16.mxu1 %v16554_v5  ;;  %v16600_v5 = vcombine.high %v4434_v60, %v4438_v61  ;;  %v4490_v46 = vrot.slane %v18329_v41, %v18223_v16  ;;  %v4479_v47 = vld [vmem:[#allocation6 + $0x1ff8] sm:$0xff] }
 0x43d   :  { %7571 = vmatpush1.bf16.msra.mxu0 %v16551_v3  ;;  %v4447_v3 = vld [vmem:[#allocation6 + $0x1ef8] sm:$0xff] }
 0x43e   :  { %7735 = vmatpush1.bf16.msra.mxu1 %v16553_v4  ;;  %7572 = vmatprep.subr.bf16.mxu0 %v16560_v14  ;;  %v16599_v4 = vcombine.low %v4434_v60, %v4438_v61  ;;  %v16601_v14 = vcombine.low %v4435_v6, %v4439_v13  ;;  %v16610_v8 = vcombine.high %v4443_v12, %v4447_v3  ;;  %v7820_v60 = vld [vmem:[#allocation6 + $0x2020] sm:$0xff]  ;;  %v7817_v6 = vld [vmem:[#allocation6 + $0x2008] sm:$0xff] }
 0x43f   :  { %v18321_v25 = vpop.f32.mrb[8].mxu0  ;;  %v18323_v26 = vpop.f32.mrb[8].mxu1  ;;  %7736 = vmatprep.subr.bf16.mxu1 %v16562_v7  ;;  %v16608_v7 = vcombine.high %v4442_v0, %v4446_v1  ;;  %v7821_v13 = vld [vmem:[#allocation6 + $0x2028] sm:$0xff] }
 0x440   :  { %v18325_v29 = vpop.f32.mrb[9].mxu0  ;;  %v18327_v31 = vpop.f32.mrb[9].mxu1 }
 0x441   :  { %v7272_v32 = vpop.f32.mrb[10].mxu0  ;;  %v7436_v34 = vpop.f32.mrb[10].mxu1  ;;  %7573 = vmatpush1.bf16.msra.mxu0 %v16559_v19  ;;  %v4455_v19 = vld [vmem:[#allocation6 + $0x1f38] sm:$0xff]  ;;  %v17757_v61 = vadd.f32 %v18325_v29, %v4490_v46  ;;  %v16657_v29 = vcombine.low %v7817_v6, %v7821_v13  ;;  %v7857_v46 = vld [vmem:[#allocation6 + $0x2148] sm:$0xff] }
 0x442   :  { %7737 = vmatpush1.bf16.msra.mxu1 %v16561_v21  ;;  %v7273_v2 = vpop.f32.mrb[11].mxu0  ;;  %v7437_v22 = vpop.f32.mrb[11].mxu1  ;;  %7574 = vmatprep.subr.bf16.mxu0 %v16568_v24  ;;  %v16607_v21 = vcombine.low %v4442_v0, %v4446_v1  ;;  %v16609_v24 = vcombine.low %v4443_v12, %v4447_v3  ;;  %v16618_v28 = vcombine.high %v4451_v18, %v4455_v19  ;;  %v4463_v32 = vld [vmem:[#allocation6 + $0x1f78] sm:$0xff]  ;;  %v7824_v1 = vld [vmem:[#allocation6 + $0x2040] sm:$0xff] }
 0x443   :  { %7738 = vmatprep.subr.bf16.mxu1 %v16570_v27  ;;  %v16616_v27 = vcombine.high %v4450_v11, %v4454_v15  ;;  %v16615_v34 = vcombine.low %v4450_v11, %v4454_v15  ;;  %v16624_v2 = vcombine.high %v4458_v9, %v4462_v35  ;;  %v16626_v22 = vcombine.high %v4459_v50, %v4463_v32  ;;  %v7828_v12 = vld [vmem:[#allocation6 + $0x2060] sm:$0xff] }
 0x444   :  { %v16625_v37 = vcombine.low %v4459_v50, %v4463_v32  ;;  %v7768_v0 = vmax.f32 %v17757_v61, 0.0  ;;  %v7836_v11 = vld [vmem:[#allocation6 + $0x20a0] sm:$0xff]  ;;  %v7841_v32 = vld [vmem:[#allocation6 + $0x20c8] sm:$0xff] }
 0x445   :  { %7575 = vmatpush1.bf16.msra.mxu0 %v16567_v36  ;;  %v16617_v36 = vcombine.low %v4451_v18, %v4455_v19  ;;  %v7833_v19 = vld [vmem:[#allocation6 + $0x2088] sm:$0xff]  ;;  %v7840_v35 = vld [vmem:[#allocation6 + $0x20c0] sm:$0xff] }
 0x446   :  { %7739 = vmatpush1.bf16.msra.mxu1 %v16569_v17  ;;  %7576 = vmatprep.subr.bf16.mxu0 %v16576_v23  ;;  %v4466_v17 = vld [vmem:[#allocation6 + $0x1f90] sm:$0xff]  ;;  %v18334_v15 = vpack.c.bf16 %v7768_v0, %v7768_v0  ;;  %v7844_v50 = vld [vmem:[#allocation6 + $0x20e0] sm:$0xff]  ;;  %v7869_v61 = vld [vmem:[#allocation6 + $0x21a8] sm:$0xff] }
 0x447   :  { %7740 = vmatprep.subr.bf16.mxu1 %v16578_v39  ;;  %v4470_v23 = vld [vmem:[#allocation6 + $0x1fb0] sm:$0xff]  ;;  %v4467_v39 = vld [vmem:[#allocation6 + $0x1f98] sm:$0xff]  ;;  %v7873_v0 = vld [vmem:[#allocation6 + $0x21c8] sm:$0xff] }
 0x448   :  { %v16631_v52 = vcombine.low %v4466_v17, %v4470_v23 }
 0x449   :  { %7577 = vmatpush1.bf16.msra.mxu0 %v16575_v43  ;;  %v16632_v43 = vcombine.high %v4466_v17, %v4470_v23  ;;  %v7848_v17 = vld [vmem:[#allocation6 + $0x2100] sm:$0xff] }
 0x44a   :  { %7741 = vmatpush1.bf16.msra.mxu1 %v16577_v44  ;;  %7578 = vmatprep.subr.bf16.mxu0 %v16584_v45  ;;  %v16634_v44 = vcombine.high %v4467_v39, %v4471_v40  ;;  %v4474_v45 = vld [vmem:[#allocation6 + $0x1fd0] sm:$0xff]  ;;  %v7852_v23 = vld [vmem:[#allocation6 + $0x2120] sm:$0xff] }
 0x44b   :  { %7742 = vmatprep.subr.bf16.mxu1 %v16586_v51  ;;  %v4478_v51 = vld [vmem:[#allocation6 + $0x1ff0] sm:$0xff] }
 0x44d   :  { %7579 = vmatpush1.bf16.msra.mxu0 %v16583_v20  ;;  %v16633_v20 = vcombine.low %v4467_v39, %v4471_v40  ;;  %v7849_v39 = vld [vmem:[#allocation6 + $0x2108] sm:$0xff] }
 0x44e   :  { %7743 = vmatpush1.bf16.msra.mxu1 %v16585_v53  ;;  %7580 = vmatprep.subr.bf16.mxu0 %v16592_v56  ;;  %v16640_v53 = vcombine.high %v4474_v45, %v4478_v51  ;;  %v16642_v56 = vcombine.high %v4475_v10, %v4479_v47  ;;  %v7853_v40 = vld [vmem:[#allocation6 + $0x2128] sm:$0xff] }
 0x44f   :  { %7744 = vmatprep.subr.bf16.mxu1 %v16594_v57  ;;  %v7816_v57 = vld [vmem:[#allocation6 + $0x2000] sm:$0xff] }
 0x450   :  { %v16655_v3 = vcombine.low %v7816_v57, %v7820_v60 }
 0x451   :  { %7581 = vmatpush1.bf16.msra.mxu0 %v16591_v59  ;;  %v16639_v59 = vcombine.low %v4474_v45, %v4478_v51  ;;  %v7856_v45 = vld [vmem:[#allocation6 + $0x2140] sm:$0xff] }
 0x452   :  { %7745 = vmatpush1.bf16.msra.mxu1 %v16593_v62  ;;  %7582 = vmatprep.subr.bf16.mxu0 %v16600_v5  ;;  %v16641_v62 = vcombine.low %v4475_v10, %v4479_v47  ;;  %v16656_v5 = vcombine.high %v7816_v57, %v7820_v60  ;;  %v7860_v51 = vld [vmem:[#allocation6 + $0x2160] sm:$0xff]  ;;  %v7861_v10 = vld [vmem:[#allocation6 + $0x2168] sm:$0xff]  ;;  %v16687_v47 = vcombine.low %v7848_v17, %v7852_v23 }
 0x453   :  { %7746 = vmatprep.subr.bf16.mxu1 %v16602_v55  ;;  %v16658_v55 = vcombine.high %v7817_v6, %v7821_v13  ;;  %v7868_v57 = vld [vmem:[#allocation6 + $0x21a0] sm:$0xff]  ;;  %v7865_v60 = vld [vmem:[#allocation6 + $0x2188] sm:$0xff]  ;;  %v16695_v6 = vcombine.low %v7856_v45, %v7860_v51  ;;  %v16697_v13 = vcombine.low %v7857_v46, %v7861_v10 }
 0x455   :  { %7583 = vmatpush1.bf16.msra.mxu0 %v16599_v4  ;;  %v7825_v4 = vld [vmem:[#allocation6 + $0x2048] sm:$0xff] }
 0x456   :  { %7747 = vmatpush1.bf16.msra.mxu1 %v16601_v14  ;;  %7584 = vmatprep.subr.bf16.mxu0 %v16608_v7  ;;  %v7829_v14 = vld [vmem:[#allocation6 + $0x2068] sm:$0xff]  ;;  %v16664_v7 = vcombine.high %v7824_v1, %v7828_v12 }
 0x457   :  { %7748 = vmatprep.subr.bf16.mxu1 %v16610_v8  ;;  %v7832_v8 = vld [vmem:[#allocation6 + $0x2080] sm:$0xff]  ;;  %v16666_v18 = vcombine.high %v7825_v4, %v7829_v14 }
 0x459   :  { %7585 = vmatpush1.bf16.msra.mxu0 %v16607_v21  ;;  %v7837_v21 = vld [vmem:[#allocation6 + $0x20a8] sm:$0xff] }
 0x45a   :  { %7749 = vmatpush1.bf16.msra.mxu1 %v16609_v24  ;;  %7586 = vmatprep.subr.bf16.mxu0 %v16616_v27  ;;  %v16663_v24 = vcombine.low %v7824_v1, %v7828_v12  ;;  %v16665_v27 = vcombine.low %v7825_v4, %v7829_v14  ;;  %v16674_v9 = vcombine.high %v7833_v19, %v7837_v21  ;;  %v7877_v1 = vld [vmem:[#allocation6 + $0x21e8] sm:$0xff] }
 0x45b   :  { %7750 = vmatprep.subr.bf16.mxu1 %v16618_v28  ;;  %v16672_v28 = vcombine.high %v7832_v8, %v7836_v11  ;;  %v16714_v14 = vcombine.high %v7873_v0, %v7877_v1 }
 0x45d   :  { %7587 = vmatpush1.bf16.msra.mxu0 %v16615_v34  ;;  %v7845_v34 = vld [vmem:[#allocation6 + $0x20e8] sm:$0xff] }
 0x45e   :  { %7751 = vmatpush1.bf16.msra.mxu1 %v16617_v36  ;;  %7588 = vmatprep.subr.bf16.mxu0 %v16624_v2  ;;  %v16671_v36 = vcombine.low %v7832_v8, %v7836_v11  ;;  %v16680_v2 = vcombine.high %v7840_v35, %v7844_v50  ;;  %v7881_v8 = vld [vmem:[#allocation6 + $0x2208] sm:$0xff] }
 0x45f   :  { %7752 = vmatprep.subr.bf16.mxu1 %v16626_v22  ;;  %v16682_v22 = vcombine.high %v7841_v32, %v7845_v34  ;;  %v7885_v11 = vld [vmem:[#allocation6 + $0x2228] sm:$0xff] }
 0x461   :  { %7589 = vmatpush1.bf16.msra.mxu0 %v16623_v42  ;;  %v16679_v42 = vcombine.low %v7840_v35, %v7844_v50  ;;  %v7893_v35 = vld [vmem:[#allocation6 + $0x2268] sm:$0xff] }
 0x462   :  { %7753 = vmatpush1.bf16.msra.mxu1 %v16625_v37  ;;  %7590 = vmatprep.subr.bf16.mxu0 %v16632_v43  ;;  %v16681_v37 = vcombine.low %v7841_v32, %v7845_v34  ;;  %v16688_v43 = vcombine.high %v7848_v17, %v7852_v23  ;;  %v16721_v32 = vcombine.low %v7881_v8, %v7885_v11  ;;  %v7901_v17 = vld [vmem:[#allocation6 + $0x22a8] sm:$0xff] }
 0x463   :  { %7754 = vmatprep.subr.bf16.mxu1 %v16634_v44  ;;  %v16690_v44 = vcombine.high %v7849_v39, %v7853_v40 }
 0x465   :  { %7591 = vmatpush1.bf16.msra.mxu0 %v16631_v52  ;;  %v16689_v52 = vcombine.low %v7849_v39, %v7853_v40 }
 0x466   :  { %7755 = vmatpush1.bf16.msra.mxu1 %v16633_v20  ;;  %7592 = vmatprep.subr.bf16.mxu0 %v16640_v53  ;;  %v16696_v20 = vcombine.high %v7856_v45, %v7860_v51  ;;  %v16698_v53 = vcombine.high %v7857_v46, %v7861_v10  ;;  %v7909_v45 = vld [vmem:[#allocation6 + $0x22e8] sm:$0xff] }
 0x467   :  { %7756 = vmatprep.subr.bf16.mxu1 %v16642_v56  ;;  %v7864_v56 = vld [vmem:[#allocation6 + $0x2180] sm:$0xff] }
 0x468   :  { %v16703_v12 = vcombine.low %v7864_v56, %v7868_v57 }
 0x469   :  { %7593 = vmatpush1.bf16.msra.mxu0 %v16639_v59  ;;  %v16704_v59 = vcombine.high %v7864_v56, %v7868_v57  ;;  %v7917_v56 = vld [vmem:[#allocation6 + $0x2328] sm:$0xff] }
 0x46a   :  { %7757 = vmatpush1.bf16.msra.mxu1 %v16641_v62  ;;  %10959 = vmatprep.subr.bf16.mxu0 %v16656_v5  ;;  %v16706_v62 = vcombine.high %v7865_v60, %v7869_v61  ;;  %v7872_v5 = vld [vmem:[#allocation6 + $0x21c0] sm:$0xff] }
 0x46b   :  { %11123 = vmatprep.subr.bf16.mxu1 %v16658_v55  ;;  %v7876_v55 = vld [vmem:[#allocation6 + $0x21e0] sm:$0xff] }
 0x46c   :  { %7595 = vmatmul.mubr.bf16.vlgmr.msra.gmra.mrb[12].mxu0 %v18303_v63  ;;  %v16712_v4 = vcombine.high %v7872_v5, %v7876_v55 }
 0x46d   :  { %7759 = vmatmul.mubr.bf16.vlgmr.msra.gmra.mrb[12].mxu1 %v18303_v63  ;;  %10960 = vmatpush1.bf16.msra.mxu0 %v16655_v3  ;;  %v16673_v63 = vcombine.low %v7833_v19, %v7837_v21  ;;  %v16705_v3 = vcombine.low %v7865_v60, %v7869_v61  ;;  %v16713_v19 = vcombine.low %v7873_v0, %v7877_v1 }
 0x46e   :  { %10991 = vmatprep.mubr.bf16.mxu0 %v18334_v15  ;;  %11124 = vmatpush1.bf16.msra.mxu1 %v16657_v29  ;;  %v7880_v29 = vld [vmem:[#allocation6 + $0x2200] sm:$0xff] }
 0x46f   :  { %11155 = vmatprep.mubr.bf16.mxu1 %v18334_v15  ;;  %10961 = vmatprep.subr.bf16.mxu0 %v16664_v7  ;;  %v7884_v7 = vld [vmem:[#allocation6 + $0x2220] sm:$0xff] }
 0x470   :  { %11125 = vmatprep.subr.bf16.mxu1 %v16666_v18  ;;  %v16711_v18 = vcombine.low %v7872_v5, %v7876_v55  ;;  %v16720_v21 = vcombine.high %v7880_v29, %v7884_v7  ;;  %v16719_v50 = vcombine.low %v7880_v29, %v7884_v7  ;;  %v7925_v5 = vld [vmem:[#allocation6 + $0x2368] sm:$0xff] }
 0x471   :  { %10962 = vmatpush1.bf16.msra.mxu0 %v16663_v24  ;;  %v16722_v24 = vcombine.high %v7881_v8, %v7885_v11  ;;  %v7933_v29 = vld [vmem:[#allocation6 + $0x23a8] sm:$0xff]  ;;  %v4486_v8 = vrot.slane %v18329_v41, %v18237_v30 }
 0x472   :  { %11126 = vmatpush1.bf16.msra.mxu1 %v16665_v27  ;;  %10963 = vmatprep.subr.bf16.mxu0 %v16672_v28  ;;  %v7888_v27 = vld [vmem:[#allocation6 + $0x2240] sm:$0xff] }
 0x473   :  { %11127 = vmatprep.subr.bf16.mxu1 %v16674_v9  ;;  %v7892_v28 = vld [vmem:[#allocation6 + $0x2260] sm:$0xff]  ;;  %v7889_v9 = vld [vmem:[#allocation6 + $0x2248] sm:$0xff] }
 0x474   :  { %v16728_v34 = vcombine.high %v7888_v27, %v7892_v28  ;;  %v16727_v23 = vcombine.low %v7888_v27, %v7892_v28  ;;  %v16729_v39 = vcombine.low %v7889_v9, %v7893_v35  ;;  %v4498_v27 = vrot.slane %v18329_v41, %v18240_v38  ;;  %v7937_v28 = vld [vmem:[#allocation6 + $0x23c8] sm:$0xff] }
 0x475   :  { %10964 = vmatpush1.bf16.msra.mxu0 %v16671_v36  ;;  %v16730_v36 = vcombine.high %v7889_v9, %v7893_v35  ;;  %v7941_v9 = vld [vmem:[#allocation6 + $0x23e8] sm:$0xff] }
 0x476   :  { %11128 = vmatpush1.bf16.msra.mxu1 %v16673_v63  ;;  %10965 = vmatprep.subr.bf16.mxu0 %v16680_v2  ;;  %v7896_v63 = vld [vmem:[#allocation6 + $0x2280] sm:$0xff] }
 0x477   :  { %11129 = vmatprep.subr.bf16.mxu1 %v16682_v22  ;;  %v7900_v2 = vld [vmem:[#allocation6 + $0x22a0] sm:$0xff]  ;;  %v7897_v22 = vld [vmem:[#allocation6 + $0x2288] sm:$0xff] }
 0x478   :  { %v16736_v40 = vcombine.high %v7896_v63, %v7900_v2  ;;  %v16735_v51 = vcombine.low %v7896_v63, %v7900_v2  ;;  %v16737_v46 = vcombine.low %v7897_v22, %v7901_v17  ;;  %v7944_v63 = vld [vmem:[#allocation6 + $0x2400] sm:$0xff] }
 0x479   :  { %10966 = vmatpush1.bf16.msra.mxu0 %v16679_v42  ;;  %v16738_v42 = vcombine.high %v7897_v22, %v7901_v17  ;;  %v7948_v2 = vld [vmem:[#allocation6 + $0x2420] sm:$0xff]  ;;  %v17759_v22 = vadd.f32 %v18327_v31, %v4498_v27  ;;  %v7945_v17 = vld [vmem:[#allocation6 + $0x2408] sm:$0xff] }
 0x47a   :  { %11130 = vmatpush1.bf16.msra.mxu1 %v16681_v37  ;;  %10967 = vmatprep.subr.bf16.mxu0 %v16688_v43  ;;  %v7904_v37 = vld [vmem:[#allocation6 + $0x22c0] sm:$0xff] }
 0x47b   :  { %11131 = vmatprep.subr.bf16.mxu1 %v16690_v44  ;;  %v7908_v43 = vld [vmem:[#allocation6 + $0x22e0] sm:$0xff]  ;;  %v7905_v44 = vld [vmem:[#allocation6 + $0x22c8] sm:$0xff] }
 0x47c   :  { %v16744_v10 = vcombine.high %v7904_v37, %v7908_v43  ;;  %v16743_v57 = vcombine.low %v7904_v37, %v7908_v43  ;;  %v16745_v60 = vcombine.low %v7905_v44, %v7909_v45  ;;  %v16784_v37 = vcombine.high %v7944_v63, %v7948_v2  ;;  %v7984_v27 = vld [vmem:[#allocation6 + $0x2540] sm:$0xff] }
 0x47d   :  { %10968 = vmatpush1.bf16.msra.mxu0 %v16687_v47  ;;  %v16746_v47 = vcombine.high %v7905_v44, %v7909_v45  ;;  %v7770_v43 = vmax.f32 %v17759_v22, 0.0  ;;  %v7952_v44 = vld [vmem:[#allocation6 + $0x2440] sm:$0xff]  ;;  %v7993_v22 = vld [vmem:[#allocation6 + $0x2588] sm:$0xff] }
 0x47e   :  { %11132 = vmatpush1.bf16.msra.mxu1 %v16689_v52  ;;  %10969 = vmatprep.subr.bf16.mxu0 %v16696_v20  ;;  %v7912_v52 = vld [vmem:[#allocation6 + $0x2300] sm:$0xff] }
 0x47f   :  { %11133 = vmatprep.subr.bf16.mxu1 %v16698_v53  ;;  %v7916_v20 = vld [vmem:[#allocation6 + $0x2320] sm:$0xff]  ;;  %v7913_v53 = vld [vmem:[#allocation6 + $0x2308] sm:$0xff] }
 0x480   :  { %v16752_v61 = vcombine.high %v7912_v52, %v7916_v20  ;;  %v16751_v55 = vcombine.low %v7912_v52, %v7916_v20  ;;  %v16753_v0 = vcombine.low %v7913_v53, %v7917_v56  ;;  %v7956_v45 = vld [vmem:[#allocation6 + $0x2460] sm:$0xff] }
 0x481   :  { %10970 = vmatpush1.bf16.msra.mxu0 %v16695_v6  ;;  %v16754_v6 = vcombine.high %v7913_v53, %v7917_v56  ;;  %v16792_v52 = vcombine.high %v7952_v44, %v7956_v45  ;;  %v7960_v20 = vld [vmem:[#allocation6 + $0x2480] sm:$0xff]  ;;  %v18348_v56 = vpack.c.bf16 %v7770_v43, %v7770_v43  ;;  %v8001_v43 = vld [vmem:[#allocation6 + $0x25c8] sm:$0xff] }
 0x482   :  { %11134 = vmatpush1.bf16.msra.mxu1 %v16697_v13  ;;  %10971 = vmatprep.subr.bf16.mxu0 %v16704_v59  ;;  %v7920_v13 = vld [vmem:[#allocation6 + $0x2340] sm:$0xff] }
 0x483   :  { %11135 = vmatprep.subr.bf16.mxu1 %v16706_v62  ;;  %v7924_v59 = vld [vmem:[#allocation6 + $0x2360] sm:$0xff]  ;;  %v7921_v62 = vld [vmem:[#allocation6 + $0x2348] sm:$0xff] }
 0x484   :  { %v16760_v1 = vcombine.high %v7920_v13, %v7924_v59  ;;  %v16759_v7 = vcombine.low %v7920_v13, %v7924_v59  ;;  %v16761_v11 = vcombine.low %v7921_v62, %v7925_v5  ;;  %v7964_v53 = vld [vmem:[#allocation6 + $0x24a0] sm:$0xff] }
 0x485   :  { %10972 = vmatpush1.bf16.msra.mxu0 %v16703_v12  ;;  %v16762_v12 = vcombine.high %v7921_v62, %v7925_v5  ;;  %v16800_v59 = vcombine.high %v7960_v20, %v7964_v53  ;;  %v7968_v5 = vld [vmem:[#allocation6 + $0x24c0] sm:$0xff] }
 0x486   :  { %11136 = vmatpush1.bf16.msra.mxu1 %v16705_v3  ;;  %10973 = vmatprep.subr.bf16.mxu0 %v16712_v4  ;;  %v7928_v3 = vld [vmem:[#allocation6 + $0x2380] sm:$0xff] }
 0x487   :  { %11137 = vmatprep.subr.bf16.mxu1 %v16714_v14  ;;  %v7932_v4 = vld [vmem:[#allocation6 + $0x23a0] sm:$0xff]  ;;  %v7929_v14 = vld [vmem:[#allocation6 + $0x2388] sm:$0xff] }
 0x488   :  { %v16767_v35 = vcombine.low %v7928_v3, %v7932_v4 }
 0x489   :  { %10974 = vmatpush1.bf16.msra.mxu0 %v16711_v18  ;;  %v16768_v18 = vcombine.high %v7928_v3, %v7932_v4 }
 0x48a   :  { %11138 = vmatpush1.bf16.msra.mxu1 %v16713_v19  ;;  %10975 = vmatprep.subr.bf16.mxu0 %v16720_v21  ;;  %v16770_v19 = vcombine.high %v7929_v14, %v7933_v29  ;;  %v7936_v21 = vld [vmem:[#allocation6 + $0x23c0] sm:$0xff] }
 0x48b   :  { %11139 = vmatprep.subr.bf16.mxu1 %v16722_v24  ;;  %v7940_v24 = vld [vmem:[#allocation6 + $0x23e0] sm:$0xff] }
 0x48d   :  { %10976 = vmatpush1.bf16.msra.mxu0 %v16719_v50  ;;  %v17756_v50 = vadd.f32 %v18321_v25, %v4486_v8  ;;  %v7977_v8 = vld [vmem:[#allocation6 + $0x2508] sm:$0xff] }
 0x48e   :  { %11140 = vmatpush1.bf16.msra.mxu1 %v16721_v32  ;;  %10977 = vmatprep.subr.bf16.mxu0 %v16728_v34  ;;  %v16769_v32 = vcombine.low %v7929_v14, %v7933_v29  ;;  %v16776_v34 = vcombine.high %v7936_v21, %v7940_v24  ;;  %v7976_v29 = vld [vmem:[#allocation6 + $0x2500] sm:$0xff] }
 0x48f   :  { %11141 = vmatprep.subr.bf16.mxu1 %v16730_v36  ;;  %v16778_v36 = vcombine.high %v7937_v28, %v7941_v9 }
 0x491   :  { %10978 = vmatpush1.bf16.msra.mxu0 %v16727_v23  ;;  %v7949_v23 = vld [vmem:[#allocation6 + $0x2428] sm:$0xff] }
 0x492   :  { %11142 = vmatpush1.bf16.msra.mxu1 %v16729_v39  ;;  %10979 = vmatprep.subr.bf16.mxu0 %v16736_v40  ;;  %v16775_v39 = vcombine.low %v7936_v21, %v7940_v24  ;;  %v7767_v40 = vmax.f32 %v17756_v50, 0.0  ;;  %v16786_v25 = vcombine.high %v7945_v17, %v7949_v23  ;;  %v16785_v31 = vcombine.low %v7945_v17, %v7949_v23  ;;  %v7997_v17 = vld [vmem:[#allocation6 + $0x25a8] sm:$0xff] }
 0x493   :  { %11143 = vmatprep.subr.bf16.mxu1 %v16738_v42  ;;  %v16777_v42 = vcombine.low %v7937_v28, %v7941_v9  ;;  %v7988_v28 = vld [vmem:[#allocation6 + $0x2560] sm:$0xff]  ;;  %v7985_v9 = vld [vmem:[#allocation6 + $0x2548] sm:$0xff] }
 0x494   :  { %v16823_v23 = vcombine.low %v7984_v27, %v7988_v28 }
 0x495   :  { %10980 = vmatpush1.bf16.msra.mxu0 %v16735_v51  ;;  %v16783_v51 = vcombine.low %v7944_v63, %v7948_v2  ;;  %v7992_v63 = vld [vmem:[#allocation6 + $0x2580] sm:$0xff] }
 0x496   :  { %11144 = vmatpush1.bf16.msra.mxu1 %v16737_v46  ;;  %10981 = vmatprep.subr.bf16.mxu0 %v16744_v10  ;;  %v7953_v46 = vld [vmem:[#allocation6 + $0x2448] sm:$0xff]  ;;  %v7996_v2 = vld [vmem:[#allocation6 + $0x25a0] sm:$0xff] }
 0x497   :  { %11145 = vmatprep.subr.bf16.mxu1 %v16746_v47  ;;  %v7957_v10 = vld [vmem:[#allocation6 + $0x2468] sm:$0xff]  ;;  %v18346_v47 = vpack.c.bf16 %v7767_v40, %v7767_v40  ;;  %v16832_v40 = vcombine.high %v7992_v63, %v7996_v2 }
 0x498   :  { %v16793_v13 = vcombine.low %v7953_v46, %v7957_v10 }
 0x499   :  { %10982 = vmatpush1.bf16.msra.mxu0 %v16743_v57  ;;  %v16794_v57 = vcombine.high %v7953_v46, %v7957_v10 }
 0x49a   :  { %11146 = vmatpush1.bf16.msra.mxu1 %v16745_v60  ;;  %10983 = vmatprep.subr.bf16.mxu0 %v16752_v61  ;;  %v7961_v60 = vld [vmem:[#allocation6 + $0x2488] sm:$0xff] }
 0x49b   :  { %11147 = vmatprep.subr.bf16.mxu1 %v16754_v6  ;;  %v7965_v61 = vld [vmem:[#allocation6 + $0x24a8] sm:$0xff]  ;;  %v16791_v6 = vcombine.low %v7952_v44, %v7956_v45  ;;  %v16831_v45 = vcombine.low %v7992_v63, %v7996_v2 }
 0x49c   :  { %v16802_v62 = vcombine.high %v7961_v60, %v7965_v61  ;;  %v16801_v3 = vcombine.low %v7961_v60, %v7965_v61  ;;  %v8005_v44 = vld [vmem:[#allocation6 + $0x25e8] sm:$0xff] }
 0x49d   :  { %10984 = vmatpush1.bf16.msra.mxu0 %v16751_v55  ;;  %v7972_v55 = vld [vmem:[#allocation6 + $0x24e0] sm:$0xff]  ;;  %v16842_v10 = vcombine.high %v8001_v43, %v8005_v44  ;;  %v16841_v60 = vcombine.low %v8001_v43, %v8005_v44  ;;  %v8045_v63 = vld [vmem:[#allocation6 + $0x2728] sm:$0xff] }
 0x49e   :  { %11148 = vmatpush1.bf16.msra.mxu1 %v16753_v0  ;;  %10985 = vmatprep.subr.bf16.mxu0 %v16760_v1  ;;  %v7969_v0 = vld [vmem:[#allocation6 + $0x24c8] sm:$0xff]  ;;  %v16808_v4 = vcombine.high %v7968_v5, %v7972_v55 }
 0x49f   :  { %11149 = vmatprep.subr.bf16.mxu1 %v16762_v12  ;;  %v7973_v1 = vld [vmem:[#allocation6 + $0x24e8] sm:$0xff]  ;;  %v16799_v12 = vcombine.low %v7960_v20, %v7964_v53 }
 0x4a0   :  { %v16810_v14 = vcombine.high %v7969_v0, %v7973_v1  ;;  %v8009_v20 = vld [vmem:[#allocation6 + $0x2608] sm:$0xff] }
 0x4a1   :  { %10986 = vmatpush1.bf16.msra.mxu0 %v16759_v7  ;;  %v7980_v7 = vld [vmem:[#allocation6 + $0x2520] sm:$0xff]  ;;  %v8013_v53 = vld [vmem:[#allocation6 + $0x2628] sm:$0xff] }
 0x4a2   :  { %11150 = vmatpush1.bf16.msra.mxu1 %v16761_v11  ;;  %10987 = vmatprep.subr.bf16.mxu0 %v16768_v18  ;;  %v7981_v11 = vld [vmem:[#allocation6 + $0x2528] sm:$0xff]  ;;  %v16807_v18 = vcombine.low %v7968_v5, %v7972_v55  ;;  %v16816_v21 = vcombine.high %v7976_v29, %v7980_v7  ;;  %v16815_v50 = vcombine.low %v7976_v29, %v7980_v7 }
 0x4a3   :  { %11151 = vmatprep.subr.bf16.mxu1 %v16770_v19  ;;  %v16809_v19 = vcombine.low %v7969_v0, %v7973_v1  ;;  %v16818_v24 = vcombine.high %v7977_v8, %v7981_v11  ;;  %v8021_v5 = vld [vmem:[#allocation6 + $0x2668] sm:$0xff]  ;;  %v16849_v0 = vcombine.low %v8009_v20, %v8013_v53 }
 0x4a4   :  { %v8029_v29 = vld [vmem:[#allocation6 + $0x26a8] sm:$0xff] }
 0x4a5   :  { %10988 = vmatpush1.bf16.msra.mxu0 %v16767_v35  ;;  %v7989_v35 = vld [vmem:[#allocation6 + $0x2568] sm:$0xff] }
 0x4a6   :  { %11152 = vmatpush1.bf16.msra.mxu1 %v16769_v32  ;;  %10989 = vmatprep.subr.bf16.mxu0 %v16776_v34  ;;  %v16817_v32 = vcombine.low %v7977_v8, %v7981_v11  ;;  %v16824_v34 = vcombine.high %v7984_v27, %v7988_v28  ;;  %v8037_v27 = vld [vmem:[#allocation6 + $0x26e8] sm:$0xff] }
 0x4a7   :  { %11153 = vmatprep.subr.bf16.mxu1 %v16778_v36  ;;  %v16826_v36 = vcombine.high %v7985_v9, %v7989_v35 }
 0x4a9   :  { %10990 = vmatpush1.bf16.msra.mxu0 %v16775_v39  ;;  %v16825_v39 = vcombine.low %v7985_v9, %v7989_v35 }
 0x4aa   :  { %11154 = vmatpush1.bf16.msra.mxu1 %v16777_v42  ;;  %11000 = vmatprep.subr.bf16.mxu0 %v16784_v37  ;;  %v16834_v42 = vcombine.high %v7993_v22, %v7997_v17  ;;  %v8000_v37 = vld [vmem:[#allocation6 + $0x25c0] sm:$0xff] }
 0x4ab   :  { %11164 = vmatprep.subr.bf16.mxu1 %v16786_v25  ;;  %v8004_v25 = vld [vmem:[#allocation6 + $0x25e0] sm:$0xff] }
 0x4ac   :  { %10992 = vmatmul.mubr.bf16.vlgmr.msra.gmra.mrb[16].mxu0 %v18346_v47  ;;  %v16840_v46 = vcombine.high %v8000_v37, %v8004_v25 }
 0x4ad   :  { %11156 = vmatmul.mubr.bf16.vlgmr.msra.gmra.mrb[16].mxu1 %v18346_v47  ;;  %11001 = vmatpush1.bf16.msra.mxu0 %v16783_v51  ;;  %v16833_v51 = vcombine.low %v7993_v22, %v7997_v17 }
 0x4ae   :  { %11032 = vmatprep.mubr.bf16.mxu0 %v18348_v56  ;;  %11165 = vmatpush1.bf16.msra.mxu1 %v16785_v31  ;;  %v8008_v31 = vld [vmem:[#allocation6 + $0x2600] sm:$0xff] }
 0x4af   :  { %11196 = vmatprep.mubr.bf16.mxu1 %v18348_v56  ;;  %11002 = vmatprep.subr.bf16.mxu0 %v16792_v52  ;;  %v8012_v52 = vld [vmem:[#allocation6 + $0x2620] sm:$0xff] }
 0x4b0   :  { %11166 = vmatprep.subr.bf16.mxu1 %v16794_v57  ;;  %v16839_v57 = vcombine.low %v8000_v37, %v8004_v25  ;;  %v16848_v61 = vcombine.high %v8008_v31, %v8012_v52  ;;  %v16847_v55 = vcombine.low %v8008_v31, %v8012_v52  ;;  %v8053_v37 = vld [vmem:[#allocation6 + $0x2768] sm:$0xff] }
 0x4b1   :  { %11003 = vmatpush1.bf16.msra.mxu0 %v16791_v6  ;;  %v16850_v6 = vcombine.high %v8009_v20, %v8013_v53  ;;  %v8061_v31 = vld [vmem:[#allocation6 + $0x27a8] sm:$0xff]  ;;  %v4494_v20 = vrot.slane %v18329_v41, %v18257_v54 }
 0x4b2   :  { %11167 = vmatpush1.bf16.msra.mxu1 %v16793_v13  ;;  %11004 = vmatprep.subr.bf16.mxu0 %v16800_v59  ;;  %v8016_v13 = vld [vmem:[#allocation6 + $0x2640] sm:$0xff] }
 0x4b3   :  { %11168 = vmatprep.subr.bf16.mxu1 %v16802_v62  ;;  %v8020_v59 = vld [vmem:[#allocation6 + $0x2660] sm:$0xff]  ;;  %v8017_v62 = vld [vmem:[#allocation6 + $0x2648] sm:$0xff] }
 0x4b4   :  { %v16856_v1 = vcombine.high %v8016_v13, %v8020_v59  ;;  %v16855_v7 = vcombine.low %v8016_v13, %v8020_v59  ;;  %v16857_v8 = vcombine.low %v8017_v62, %v8021_v5  ;;  %v8065_v13 = vld [vmem:[#allocation6 + $0x27c8] sm:$0xff] }
 0x4b5   :  { %11005 = vmatpush1.bf16.msra.mxu0 %v16799_v12  ;;  %v16858_v12 = vcombine.high %v8017_v62, %v8021_v5  ;;  %v8069_v59 = vld [vmem:[#allocation6 + $0x27e8] sm:$0xff]  ;;  %v17758_v5 = vadd.f32 %v18323_v26, %v4494_v20  ;;  %v8080_v26 = vld [vmem:[#allocation6 + $0x2840] sm:$0xff] }
 0x4b6   :  { %11169 = vmatpush1.bf16.msra.mxu1 %v16801_v3  ;;  %11006 = vmatprep.subr.bf16.mxu0 %v16808_v4  ;;  %v8024_v3 = vld [vmem:[#allocation6 + $0x2680] sm:$0xff]  ;;  %v16906_v41 = vcombine.high %v8065_v13, %v8069_v59 }
 0x4b7   :  { %11170 = vmatprep.subr.bf16.mxu1 %v16810_v14  ;;  %v8028_v4 = vld [vmem:[#allocation6 + $0x26a0] sm:$0xff]  ;;  %v8025_v14 = vld [vmem:[#allocation6 + $0x2688] sm:$0xff] }
 0x4b8   :  { %v16864_v11 = vcombine.high %v8024_v3, %v8028_v4  ;;  %v16863_v28 = vcombine.low %v8024_v3, %v8028_v4  ;;  %v16865_v9 = vcombine.low %v8025_v14, %v8029_v29  ;;  %v8073_v3 = vld [vmem:[#allocation6 + $0x2808] sm:$0xff] }
 0x4b9   :  { %11007 = vmatpush1.bf16.msra.mxu0 %v16807_v18  ;;  %v16866_v18 = vcombine.high %v8025_v14, %v8029_v29  ;;  %v8077_v4 = vld [vmem:[#allocation6 + $0x2828] sm:$0xff]  ;;  %v7769_v29 = vmax.f32 %v17758_v5, 0.0 }
 0x4ba   :  { %11171 = vmatpush1.bf16.msra.mxu1 %v16809_v19  ;;  %11008 = vmatprep.subr.bf16.mxu0 %v16816_v21  ;;  %v8032_v19 = vld [vmem:[#allocation6 + $0x26c0] sm:$0xff] }
 0x4bb   :  { %11172 = vmatprep.subr.bf16.mxu1 %v16818_v24  ;;  %v8036_v21 = vld [vmem:[#allocation6 + $0x26e0] sm:$0xff]  ;;  %v8033_v24 = vld [vmem:[#allocation6 + $0x26c8] sm:$0xff] }
 0x4bc   :  { %v16872_v35 = vcombine.high %v8032_v19, %v8036_v21  ;;  %v16871_v2 = vcombine.low %v8032_v19, %v8036_v21  ;;  %v16873_v22 = vcombine.low %v8033_v24, %v8037_v27  ;;  %v8081_v19 = vld [vmem:[#allocation6 + $0x2848] sm:$0xff] }
 0x4bd   :  { %11009 = vmatpush1.bf16.msra.mxu0 %v16815_v50  ;;  %v16874_v50 = vcombine.high %v8033_v24, %v8037_v27  ;;  %v8085_v21 = vld [vmem:[#allocation6 + $0x2868] sm:$0xff]  ;;  %v18357_v27 = vpack.c.bf16 %v7769_v29, %v7769_v29  ;;  %v8128_v29 = vld [vmem:[#allocation6 + $0x29c0] sm:$0xff] }
 0x4be   :  { %11173 = vmatpush1.bf16.msra.mxu1 %v16817_v32  ;;  %11010 = vmatprep.subr.bf16.mxu0 %v16824_v34  ;;  %v8040_v32 = vld [vmem:[#allocation6 + $0x2700] sm:$0xff] }
 0x4bf   :  { %11174 = vmatprep.subr.bf16.mxu1 %v16826_v36  ;;  %v8044_v34 = vld [vmem:[#allocation6 + $0x2720] sm:$0xff]  ;;  %v8041_v36 = vld [vmem:[#allocation6 + $0x2708] sm:$0xff] }
 0x4c0   :  { %v16880_v17 = vcombine.high %v8040_v32, %v8044_v34  ;;  %v16879_v25 = vcombine.low %v8040_v32, %v8044_v34  ;;  %v16881_v43 = vcombine.low %v8041_v36, %v8045_v63  ;;  %v8092_v32 = vld [vmem:[#allocation6 + $0x28a0] sm:$0xff]  ;;  %v8089_v34 = vld [vmem:[#allocation6 + $0x2888] sm:$0xff] }
 0x4c1   :  { %11011 = vmatpush1.bf16.msra.mxu0 %v16823_v23  ;;  %v16882_v23 = vcombine.high %v8041_v36, %v8045_v63  ;;  %v8093_v36 = vld [vmem:[#allocation6 + $0x28a8] sm:$0xff] }
 0x4c2   :  { %11175 = vmatpush1.bf16.msra.mxu1 %v16825_v39  ;;  %11012 = vmatprep.subr.bf16.mxu0 %v16832_v40  ;;  %v8048_v39 = vld [vmem:[#allocation6 + $0x2740] sm:$0xff] }
 0x4c3   :  { %11176 = vmatprep.subr.bf16.mxu1 %v16834_v42  ;;  %v8052_v40 = vld [vmem:[#allocation6 + $0x2760] sm:$0xff]  ;;  %v8049_v42 = vld [vmem:[#allocation6 + $0x2748] sm:$0xff] }
 0x4c4   :  { %v16888_v44 = vcombine.high %v8048_v39, %v8052_v40  ;;  %v16887_v52 = vcombine.low %v8048_v39, %v8052_v40  ;;  %v16889_v53 = vcombine.low %v8049_v42, %v8053_v37  ;;  %v8100_v39 = vld [vmem:[#allocation6 + $0x28e0] sm:$0xff]  ;;  %v8097_v40 = vld [vmem:[#allocation6 + $0x28c8] sm:$0xff] }
 0x4c5   :  { %11013 = vmatpush1.bf16.msra.mxu0 %v16831_v45  ;;  %v16890_v45 = vcombine.high %v8049_v42, %v8053_v37  ;;  %v8101_v42 = vld [vmem:[#allocation6 + $0x28e8] sm:$0xff] }
 0x4c6   :  { %11177 = vmatpush1.bf16.msra.mxu1 %v16833_v51  ;;  %11014 = vmatprep.subr.bf16.mxu0 %v16840_v46  ;;  %v8056_v51 = vld [vmem:[#allocation6 + $0x2780] sm:$0xff] }
 0x4c7   :  { %11178 = vmatprep.subr.bf16.mxu1 %v16842_v10  ;;  %v8060_v46 = vld [vmem:[#allocation6 + $0x27a0] sm:$0xff]  ;;  %v8057_v10 = vld [vmem:[#allocation6 + $0x2788] sm:$0xff] }
 0x4c8   :  { %v16895_v62 = vcombine.low %v8056_v51, %v8060_v46 }
 0x4c9   :  { %11015 = vmatpush1.bf16.msra.mxu0 %v16839_v57  ;;  %v16896_v57 = vcombine.high %v8056_v51, %v8060_v46  ;;  %v8108_v51 = vld [vmem:[#allocation6 + $0x2920] sm:$0xff]  ;;  %v8105_v46 = vld [vmem:[#allocation6 + $0x2908] sm:$0xff] }
 0x4ca   :  { %11179 = vmatpush1.bf16.msra.mxu1 %v16841_v60  ;;  %11016 = vmatprep.subr.bf16.mxu0 %v16848_v61  ;;  %v16898_v60 = vcombine.high %v8057_v10, %v8061_v31  ;;  %v8064_v61 = vld [vmem:[#allocation6 + $0x27c0] sm:$0xff] }
 0x4cb   :  { %11180 = vmatprep.subr.bf16.mxu1 %v16850_v6  ;;  %v8068_v6 = vld [vmem:[#allocation6 + $0x27e0] sm:$0xff] }
 0x4cc   :  { %v16903_v14 = vcombine.low %v8064_v61, %v8068_v6 }
 0x4cd   :  { %11017 = vmatpush1.bf16.msra.mxu0 %v16847_v55  ;;  %v16897_v55 = vcombine.low %v8057_v10, %v8061_v31  ;;  %v8109_v10 = vld [vmem:[#allocation6 + $0x2928] sm:$0xff] }
 0x4ce   :  { %11181 = vmatpush1.bf16.msra.mxu1 %v16849_v0  ;;  %11018 = vmatprep.subr.bf16.mxu0 %v16856_v1  ;;  %v16904_v0 = vcombine.high %v8064_v61, %v8068_v6  ;;  %v8072_v1 = vld [vmem:[#allocation6 + $0x2800] sm:$0xff]  ;;  %v8113_v61 = vld [vmem:[#allocation6 + $0x2948] sm:$0xff] }
 0x4cf   :  { %11182 = vmatprep.subr.bf16.mxu1 %v16858_v12  ;;  %v8076_v12 = vld [vmem:[#allocation6 + $0x2820] sm:$0xff]  ;;  %v8117_v6 = vld [vmem:[#allocation6 + $0x2968] sm:$0xff] }
 0x4d0   :  { %v16911_v24 = vcombine.low %v8072_v1, %v8076_v12  ;;  %v16954_v5 = vcombine.high %v8113_v61, %v8117_v6 }
 0x4d1   :  { %11019 = vmatpush1.bf16.msra.mxu0 %v16855_v7  ;;  %v16905_v7 = vcombine.low %v8065_v13, %v8069_v59  ;;  %v16945_v59 = vcombine.low %v8105_v46, %v8109_v10 }
 0x4d2   :  { %11183 = vmatpush1.bf16.msra.mxu1 %v16857_v8  ;;  %11020 = vmatprep.subr.bf16.mxu0 %v16864_v11  ;;  %v16912_v8 = vcombine.high %v8072_v1, %v8076_v12  ;;  %v16914_v11 = vcombine.high %v8073_v3, %v8077_v4  ;;  %v8125_v1 = vld [vmem:[#allocation6 + $0x29a8] sm:$0xff] }
 0x4d3   :  { %11184 = vmatprep.subr.bf16.mxu1 %v16866_v18  ;;  %v8084_v18 = vld [vmem:[#allocation6 + $0x2860] sm:$0xff] }
 0x4d4   :  { %v16919_v63 = vcombine.low %v8080_v26, %v8084_v18 }
 0x4d5   :  { %11021 = vmatpush1.bf16.msra.mxu0 %v16863_v28  ;;  %v16913_v28 = vcombine.low %v8073_v3, %v8077_v4  ;;  %v16953_v3 = vcombine.low %v8113_v61, %v8117_v6 }
 0x4d6   :  { %11185 = vmatpush1.bf16.msra.mxu1 %v16865_v9  ;;  %11022 = vmatprep.subr.bf16.mxu0 %v16872_v35  ;;  %v16920_v9 = vcombine.high %v8080_v26, %v8084_v18  ;;  %v16922_v35 = vcombine.high %v8081_v19, %v8085_v21 }
 0x4d7   :  { %11186 = vmatprep.subr.bf16.mxu1 %v16874_v50  ;;  %v8088_v50 = vld [vmem:[#allocation6 + $0x2880] sm:$0xff] }
 0x4d8   :  { %v16927_v37 = vcombine.low %v8088_v50, %v8092_v32 }
 0x4d9   :  { %11023 = vmatpush1.bf16.msra.mxu0 %v16871_v2  ;;  %v16921_v2 = vcombine.low %v8081_v19, %v8085_v21 }
 0x4da   :  { %11187 = vmatpush1.bf16.msra.mxu1 %v16873_v22  ;;  %11024 = vmatprep.subr.bf16.mxu0 %v16880_v17  ;;  %v16928_v22 = vcombine.high %v8088_v50, %v8092_v32  ;;  %v16930_v17 = vcombine.high %v8089_v34, %v8093_v36 }
 0x4db   :  { %11188 = vmatprep.subr.bf16.mxu1 %v16882_v23  ;;  %v8096_v23 = vld [vmem:[#allocation6 + $0x28c0] sm:$0xff] }
 0x4dc   :  { %v16935_v31 = vcombine.low %v8096_v23, %v8100_v39 }
 0x4dd   :  { %11025 = vmatpush1.bf16.msra.mxu0 %v16879_v25  ;;  %v16929_v25 = vcombine.low %v8089_v34, %v8093_v36 }
 0x4de   :  { %11189 = vmatpush1.bf16.msra.mxu1 %v16881_v43  ;;  %11026 = vmatprep.subr.bf16.mxu0 %v16888_v44  ;;  %v16936_v43 = vcombine.high %v8096_v23, %v8100_v39  ;;  %v16938_v44 = vcombine.high %v8097_v40, %v8101_v42 }
 0x4df   :  { %11190 = vmatprep.subr.bf16.mxu1 %v16890_v45  ;;  %v8104_v45 = vld [vmem:[#allocation6 + $0x2900] sm:$0xff] }
 0x4e0   :  { %v16944_v20 = vcombine.high %v8104_v45, %v8108_v51  ;;  %v16943_v13 = vcombine.low %v8104_v45, %v8108_v51 }
 0x4e1   :  { %11027 = vmatpush1.bf16.msra.mxu0 %v16887_v52  ;;  %v16937_v52 = vcombine.low %v8097_v40, %v8101_v42 }
 0x4e2   :  { %11191 = vmatpush1.bf16.msra.mxu1 %v16889_v53  ;;  %11028 = vmatprep.subr.bf16.mxu0 %v16896_v57  ;;  %v16946_v53 = vcombine.high %v8105_v46, %v8109_v10  ;;  %v8112_v57 = vld [vmem:[#allocation6 + $0x2940] sm:$0xff] }
 0x4e3   :  { %11192 = vmatprep.subr.bf16.mxu1 %v16898_v60  ;;  %v8116_v60 = vld [vmem:[#allocation6 + $0x2960] sm:$0xff] }
 0x4e4   :  { %v16951_v12 = vcombine.low %v8112_v57, %v8116_v60 }
 0x4e5   :  { %11029 = vmatpush1.bf16.msra.mxu0 %v16895_v62  ;;  %v16952_v62 = vcombine.high %v8112_v57, %v8116_v60 }
 0x4e6   :  { %11193 = vmatpush1.bf16.msra.mxu1 %v16897_v55  ;;  %11030 = vmatprep.subr.bf16.mxu0 %v16904_v0  ;;  %v8120_v55 = vld [vmem:[#allocation6 + $0x2980] sm:$0xff] }
 0x4e7   :  { %11194 = vmatprep.subr.bf16.mxu1 %v16906_v41  ;;  %v8124_v0 = vld [vmem:[#allocation6 + $0x29a0] sm:$0xff]  ;;  %v8121_v41 = vld [vmem:[#allocation6 + $0x2988] sm:$0xff] }
 0x4e8   :  { %v16960_v4 = vcombine.high %v8120_v55, %v8124_v0  ;;  %v16959_v26 = vcombine.low %v8120_v55, %v8124_v0  ;;  %v16961_v18 = vcombine.low %v8121_v41, %v8125_v1 }
 0x4e9   :  { %11031 = vmatpush1.bf16.msra.mxu0 %v16903_v14  ;;  %v16962_v14 = vcombine.high %v8121_v41, %v8125_v1 }
 0x4ea   :  { %11195 = vmatpush1.bf16.msra.mxu1 %v16905_v7  ;;  %11041 = vmatprep.subr.bf16.mxu0 %v16912_v8  ;;  %v8132_v7 = vld [vmem:[#allocation6 + $0x29e0] sm:$0xff]  ;;  %v8129_v8 = vld [vmem:[#allocation6 + $0x29c8] sm:$0xff] }
 0x4eb   :  { %11205 = vmatprep.subr.bf16.mxu1 %v16914_v11  ;;  %v8133_v11 = vld [vmem:[#allocation6 + $0x29e8] sm:$0xff]  ;;  %v16968_v19 = vcombine.high %v8128_v29, %v8132_v7  ;;  %v16967_v50 = vcombine.low %v8128_v29, %v8132_v7 }
 0x4ec   :  { %11033 = vmatmul.mubr.bf16.vlgmr.msra.gmra.mrb[16].mxu0 %v18357_v27  ;;  %v16970_v21 = vcombine.high %v8129_v8, %v8133_v11  ;;  %v16969_v32 = vcombine.low %v8129_v8, %v8133_v11 }
 0x4ed   :  { %11197 = vmatmul.mubr.bf16.vlgmr.msra.gmra.mrb[16].mxu1 %v18357_v27  ;;  %11042 = vmatpush1.bf16.msra.mxu0 %v16911_v24  ;;  %v8136_v24 = vld [vmem:[#allocation6 + $0x2a00] sm:$0xff] }
 0x4ee   :  { %11206 = vmatpush1.bf16.msra.mxu1 %v16913_v28  ;;  %11043 = vmatprep.subr.bf16.mxu0 %v16920_v9  ;;  %v8140_v28 = vld [vmem:[#allocation6 + $0x2a20] sm:$0xff]  ;;  %v8137_v9 = vld [vmem:[#allocation6 + $0x2a08] sm:$0xff] }
 0x4ef   :  { %11207 = vmatprep.subr.bf16.mxu1 %v16922_v35  ;;  %v8141_v35 = vld [vmem:[#allocation6 + $0x2a28] sm:$0xff]  ;;  %v16976_v34 = vcombine.high %v8136_v24, %v8140_v28  ;;  %v16975_v23 = vcombine.low %v8136_v24, %v8140_v28 }
 0x4f0   :  { %v16978_v36 = vcombine.high %v8137_v9, %v8141_v35  ;;  %v16977_v39 = vcombine.low %v8137_v9, %v8141_v35 }
 0x4f1   :  { %11044 = vmatpush1.bf16.msra.mxu0 %v16919_v63  ;;  %v8144_v63 = vld [vmem:[#allocation6 + $0x2a40] sm:$0xff] }
 0x4f2   :  { %11208 = vmatpush1.bf16.msra.mxu1 %v16921_v2  ;;  %11045 = vmatprep.subr.bf16.mxu0 %v16928_v22  ;;  %v8148_v2 = vld [vmem:[#allocation6 + $0x2a60] sm:$0xff]  ;;  %v8145_v22 = vld [vmem:[#allocation6 + $0x2a48] sm:$0xff] }
 0x4f3   :  { %11209 = vmatprep.subr.bf16.mxu1 %v16930_v17  ;;  %v8149_v17 = vld [vmem:[#allocation6 + $0x2a68] sm:$0xff]  ;;  %v16984_v40 = vcombine.high %v8144_v63, %v8148_v2  ;;  %v16983_v45 = vcombine.low %v8144_v63, %v8148_v2 }
 0x4f4   :  { %v16986_v42 = vcombine.high %v8145_v22, %v8149_v17  ;;  %v16985_v51 = vcombine.low %v8145_v22, %v8149_v17 }
 0x4f5   :  { %11046 = vmatpush1.bf16.msra.mxu0 %v16927_v37  ;;  %v8152_v37 = vld [vmem:[#allocation6 + $0x2a80] sm:$0xff] }
 0x4f6   :  { %11210 = vmatpush1.bf16.msra.mxu1 %v16929_v25  ;;  %11047 = vmatprep.subr.bf16.mxu0 %v16936_v43  ;;  %v8156_v25 = vld [vmem:[#allocation6 + $0x2aa0] sm:$0xff]  ;;  %v8153_v43 = vld [vmem:[#allocation6 + $0x2a88] sm:$0xff] }
 0x4f7   :  { %11211 = vmatprep.subr.bf16.mxu1 %v16938_v44  ;;  %v8157_v44 = vld [vmem:[#allocation6 + $0x2aa8] sm:$0xff]  ;;  %v16992_v46 = vcombine.high %v8152_v37, %v8156_v25  ;;  %v16991_v57 = vcombine.low %v8152_v37, %v8156_v25 }
 0x4f8   :  { %v16994_v10 = vcombine.high %v8153_v43, %v8157_v44  ;;  %v16993_v60 = vcombine.low %v8153_v43, %v8157_v44 }
 0x4f9   :  { %11048 = vmatpush1.bf16.msra.mxu0 %v16935_v31  ;;  %v8160_v31 = vld [vmem:[#allocation6 + $0x2ac0] sm:$0xff] }
 0x4fa   :  { %11212 = vmatpush1.bf16.msra.mxu1 %v16937_v52  ;;  %11049 = vmatprep.subr.bf16.mxu0 %v16944_v20  ;;  %v8164_v52 = vld [vmem:[#allocation6 + $0x2ae0] sm:$0xff]  ;;  %v8161_v20 = vld [vmem:[#allocation6 + $0x2ac8] sm:$0xff] }
 0x4fb   :  { %11213 = vmatprep.subr.bf16.mxu1 %v16946_v53  ;;  %v8165_v53 = vld [vmem:[#allocation6 + $0x2ae8] sm:$0xff]  ;;  %v17000_v61 = vcombine.high %v8160_v31, %v8164_v52  ;;  %v16999_v55 = vcombine.low %v8160_v31, %v8164_v52 }
 0x4fc   :  { %v17002_v6 = vcombine.high %v8161_v20, %v8165_v53  ;;  %v17001_v0 = vcombine.low %v8161_v20, %v8165_v53 }
 0x4fd   :  { %11050 = vmatpush1.bf16.msra.mxu0 %v16943_v13  ;;  %v8168_v13 = vld [vmem:[#allocation6 + $0x2b00] sm:$0xff] }
 0x4fe   :  { %11214 = vmatpush1.bf16.msra.mxu1 %v16945_v59  ;;  %11051 = vmatprep.subr.bf16.mxu0 %v16952_v62  ;;  %v8172_v59 = vld [vmem:[#allocation6 + $0x2b20] sm:$0xff]  ;;  %v8169_v62 = vld [vmem:[#allocation6 + $0x2b08] sm:$0xff] }
 0x4ff   :  { %11215 = vmatprep.subr.bf16.mxu1 %v16954_v5  ;;  %v8173_v5 = vld [vmem:[#allocation6 + $0x2b28] sm:$0xff]  ;;  %v17008_v41 = vcombine.high %v8168_v13, %v8172_v59  ;;  %v17007_v29 = vcombine.low %v8168_v13, %v8172_v59 }
 0x500   :  { %v17010_v1 = vcombine.high %v8169_v62, %v8173_v5  ;;  %v17009_v7 = vcombine.low %v8169_v62, %v8173_v5 }
 0x501   :  { %11052 = vmatpush1.bf16.msra.mxu0 %v16951_v12  ;;  %v8176_v12 = vld [vmem:[#allocation6 + $0x2b40] sm:$0xff] }
 0x502   :  { %11216 = vmatpush1.bf16.msra.mxu1 %v16953_v3  ;;  %11053 = vmatprep.subr.bf16.mxu0 %v16960_v4  ;;  %v8180_v3 = vld [vmem:[#allocation6 + $0x2b60] sm:$0xff]  ;;  %v8177_v4 = vld [vmem:[#allocation6 + $0x2b48] sm:$0xff] }
 0x503   :  { %11217 = vmatprep.subr.bf16.mxu1 %v16962_v14  ;;  %v8181_v14 = vld [vmem:[#allocation6 + $0x2b68] sm:$0xff]  ;;  %v17016_v8 = vcombine.high %v8176_v12, %v8180_v3  ;;  %v17015_v24 = vcombine.low %v8176_v12, %v8180_v3 }
 0x504   :  { %v17018_v11 = vcombine.high %v8177_v4, %v8181_v14  ;;  %v17017_v28 = vcombine.low %v8177_v4, %v8181_v14  ;;  %v8209_v12 = vld [vmem:[#allocation6 + $0x2c48] sm:$0xff] }
 0x505   :  { %11054 = vmatpush1.bf16.msra.mxu0 %v16959_v26  ;;  %v8184_v26 = vld [vmem:[#allocation6 + $0x2b80] sm:$0xff]  ;;  %v8213_v3 = vld [vmem:[#allocation6 + $0x2c68] sm:$0xff] }
 0x506   :  { %11218 = vmatpush1.bf16.msra.mxu1 %v16961_v18  ;;  %11055 = vmatprep.subr.bf16.mxu0 %v16968_v19  ;;  %v8188_v18 = vld [vmem:[#allocation6 + $0x2ba0] sm:$0xff]  ;;  %v8185_v19 = vld [vmem:[#allocation6 + $0x2b88] sm:$0xff] }
 0x507   :  { %11219 = vmatprep.subr.bf16.mxu1 %v16970_v21  ;;  %v8189_v21 = vld [vmem:[#allocation6 + $0x2ba8] sm:$0xff]  ;;  %v17024_v9 = vcombine.high %v8184_v26, %v8188_v18  ;;  %v17023_v63 = vcombine.low %v8184_v26, %v8188_v18  ;;  %v17050_v26 = vcombine.high %v8209_v12, %v8213_v3  ;;  %v8220_v18 = vld [vmem:[#allocation6 + $0x2ca0] sm:$0xff] }
 0x508   :  { %v17026_v35 = vcombine.high %v8185_v19, %v8189_v21  ;;  %v17025_v2 = vcombine.low %v8185_v19, %v8189_v21  ;;  %v8217_v19 = vld [vmem:[#allocation6 + $0x2c88] sm:$0xff] }
 0x509   :  { %11056 = vmatpush1.bf16.msra.mxu0 %v16967_v50  ;;  %v8192_v50 = vld [vmem:[#allocation6 + $0x2bc0] sm:$0xff]  ;;  %v8221_v21 = vld [vmem:[#allocation6 + $0x2ca8] sm:$0xff] }
 0x50a   :  { %11220 = vmatpush1.bf16.msra.mxu1 %v16969_v32  ;;  %11057 = vmatprep.subr.bf16.mxu0 %v16976_v34  ;;  %v8196_v32 = vld [vmem:[#allocation6 + $0x2be0] sm:$0xff]  ;;  %v8193_v34 = vld [vmem:[#allocation6 + $0x2bc8] sm:$0xff] }
 0x50b   :  { %11221 = vmatprep.subr.bf16.mxu1 %v16978_v36  ;;  %v8197_v36 = vld [vmem:[#allocation6 + $0x2be8] sm:$0xff]  ;;  %v17032_v22 = vcombine.high %v8192_v50, %v8196_v32  ;;  %v17031_v37 = vcombine.low %v8192_v50, %v8196_v32  ;;  %v17058_v50 = vcombine.high %v8217_v19, %v8221_v21  ;;  %v8224_v32 = vld [vmem:[#allocation6 + $0x2cc0] sm:$0xff] }
 0x50c   :  { %v17034_v17 = vcombine.high %v8193_v34, %v8197_v36  ;;  %v17033_v25 = vcombine.low %v8193_v34, %v8197_v36  ;;  %v8228_v34 = vld [vmem:[#allocation6 + $0x2ce0] sm:$0xff]  ;;  %v8225_v36 = vld [vmem:[#allocation6 + $0x2cc8] sm:$0xff] }
 0x50d   :  { %11058 = vmatpush1.bf16.msra.mxu0 %v16975_v23  ;;  %v8200_v23 = vld [vmem:[#allocation6 + $0x2c00] sm:$0xff] }
 0x50e   :  { %11222 = vmatpush1.bf16.msra.mxu1 %v16977_v39  ;;  %11059 = vmatprep.subr.bf16.mxu0 %v16984_v40  ;;  %v8204_v39 = vld [vmem:[#allocation6 + $0x2c20] sm:$0xff]  ;;  %v8201_v40 = vld [vmem:[#allocation6 + $0x2c08] sm:$0xff] }
 0x50f   :  { %11223 = vmatprep.subr.bf16.mxu1 %v16986_v42  ;;  %v8205_v42 = vld [vmem:[#allocation6 + $0x2c28] sm:$0xff]  ;;  %v17040_v43 = vcombine.high %v8200_v23, %v8204_v39  ;;  %v17039_v14 = vcombine.low %v8200_v23, %v8204_v39  ;;  %v8232_v39 = vld [vmem:[#allocation6 + $0x2d00] sm:$0xff] }
 0x510   :  { %v17042_v44 = vcombine.high %v8201_v40, %v8205_v42 }
 0x511   :  { %11060 = vmatpush1.bf16.msra.mxu0 %v16983_v45  ;;  %v18361_v45 = vld [vmem:[#allocation8 + $0x8] sm:$0xff] }
 0x512   :  { %11224 = vmatpush1.bf16.msra.mxu1 %v16985_v51  ;;  %11061 = vmatprep.subr.bf16.mxu0 %v16992_v46  ;;  %v4502_v51 = vrot.slane %v18361_v45, %v18267_v33  ;;  %v4506_v46 = vrot.slane %v18361_v45, %v18270_v48 }
 0x513   :  { %11225 = vmatprep.subr.bf16.mxu1 %v16994_v10  ;;  %v4514_v10 = vrot.slane %v18361_v45, %v18273_v49 }
 0x515   :  { %11062 = vmatpush1.bf16.msra.mxu0 %v16991_v57 }
 0x516   :  { %11226 = vmatpush1.bf16.msra.mxu1 %v16993_v60  ;;  %11063 = vmatprep.subr.bf16.mxu0 %v17000_v61 }
 0x517   :  { %11227 = vmatprep.subr.bf16.mxu1 %v17002_v6 }
 0x519   :  { %11064 = vmatpush1.bf16.msra.mxu0 %v16999_v55 }
 0x51a   :  { %11228 = vmatpush1.bf16.msra.mxu1 %v17001_v0  ;;  %11065 = vmatprep.subr.bf16.mxu0 %v17008_v41  ;;  %v8208_v0 = vld [vmem:[#allocation6 + $0x2c40] sm:$0xff] }
 0x51b   :  { %11229 = vmatprep.subr.bf16.mxu1 %v17010_v1  ;;  %v8212_v1 = vld [vmem:[#allocation6 + $0x2c60] sm:$0xff] }
 0x51d   :  { %11066 = vmatpush1.bf16.msra.mxu0 %v17007_v29  ;;  %v17041_v29 = vcombine.low %v8201_v40, %v8205_v42  ;;  %v8236_v40 = vld [vmem:[#allocation6 + $0x2d20] sm:$0xff]  ;;  %v8233_v42 = vld [vmem:[#allocation6 + $0x2d08] sm:$0xff] }
 0x51e   :  { %11230 = vmatpush1.bf16.msra.mxu1 %v17009_v7  ;;  %11067 = vmatprep.subr.bf16.mxu0 %v17016_v8  ;;  %v8216_v8 = vld [vmem:[#allocation6 + $0x2c80] sm:$0xff] }
 0x51f   :  { %11231 = vmatprep.subr.bf16.mxu1 %v17018_v11  ;;  %v17048_v11 = vcombine.high %v8208_v0, %v8212_v1 }
 0x521   :  { %11068 = vmatpush1.bf16.msra.mxu0 %v17015_v24 }
 0x522   :  { %11232 = vmatpush1.bf16.msra.mxu1 %v17017_v28  ;;  %11069 = vmatprep.subr.bf16.mxu0 %v17024_v9  ;;  %v17047_v28 = vcombine.low %v8208_v0, %v8212_v1  ;;  %v17049_v9 = vcombine.low %v8209_v12, %v8213_v3  ;;  %v8256_v1 = vld [vmem:[#allocation6 + $0x2dc0] sm:$0xff]  ;;  %v8257_v3 = vld [vmem:[#allocation6 + $0x2dc8] sm:$0xff] }
 0x523   :  { %11233 = vmatprep.subr.bf16.mxu1 %v17026_v35  ;;  %v17056_v35 = vcombine.high %v8216_v8, %v8220_v18  ;;  %v8260_v12 = vld [vmem:[#allocation6 + $0x2de0] sm:$0xff] }
 0x525   :  { %11070 = vmatpush1.bf16.msra.mxu0 %v17023_v63  ;;  %v8229_v63 = vld [vmem:[#allocation6 + $0x2ce8] sm:$0xff] }
 0x526   :  { %11234 = vmatpush1.bf16.msra.mxu1 %v17025_v2  ;;  %11071 = vmatprep.subr.bf16.mxu0 %v17032_v22  ;;  %v17055_v2 = vcombine.low %v8216_v8, %v8220_v18  ;;  %v17057_v22 = vcombine.low %v8217_v19, %v8221_v21  ;;  %v17066_v23 = vcombine.high %v8225_v36, %v8229_v63  ;;  %v8264_v18 = vld [vmem:[#allocation6 + $0x2e00] sm:$0xff]  ;;  %v8265_v21 = vld [vmem:[#allocation6 + $0x2e08] sm:$0xff] }
 0x527   :  { %11235 = vmatprep.subr.bf16.mxu1 %v17034_v17  ;;  %v17064_v17 = vcombine.high %v8224_v32, %v8228_v34  ;;  %v8268_v19 = vld [vmem:[#allocation6 + $0x2e20] sm:$0xff] }
 0x529   :  { %11072 = vmatpush1.bf16.msra.mxu0 %v17031_v37  ;;  %v8237_v37 = vld [vmem:[#allocation6 + $0x2d28] sm:$0xff] }
 0x52a   :  { %11236 = vmatpush1.bf16.msra.mxu1 %v17033_v25  ;;  %11082 = vmatprep.subr.bf16.mxu0 %v17040_v43  ;;  %v17063_v25 = vcombine.low %v8224_v32, %v8228_v34  ;;  %v17065_v43 = vcombine.low %v8225_v36, %v8229_v63  ;;  %v8272_v34 = vld [vmem:[#allocation6 + $0x2e40] sm:$0xff]  ;;  %v8273_v63 = vld [vmem:[#allocation6 + $0x2e48] sm:$0xff] }
 0x52b   :  { %11246 = vmatprep.subr.bf16.mxu1 %v17042_v44  ;;  %v17072_v44 = vcombine.high %v8232_v39, %v8236_v40  ;;  %v8276_v36 = vld [vmem:[#allocation6 + $0x2e60] sm:$0xff] }
 0x53f   :  { %v7596_v31 = vpop.f32.mrb[12].mxu0 }
 0x540   :  { %v17760_v52 = vadd.f32 %v7596_v31, %v4502_v51  ;;  %v18369_v20 = vpop.f32.mrb[12].mxu1  ;;  %v7598_v53 = vpop.f32.mrb[13].mxu0  ;;  %v17074_v51 = vcombine.high %v8233_v42, %v8237_v37  ;;  %v8241_v31 = vld [vmem:[#allocation6 + $0x2d48] sm:$0xff] }
 0x541   :  { %v17761_v57 = vadd.f32 %v7598_v53, %v4506_v46  ;;  %v7762_v60 = vpop.f32.mrb[13].mxu1  ;;  %v7600_v61 = vpop.f32.mrb[14].mxu0  ;;  %v8240_v46 = vld [vmem:[#allocation6 + $0x2d40] sm:$0xff]  ;;  %v17071_v53 = vcombine.low %v8232_v39, %v8236_v40 }
 0x542   :  { %v7771_v6 = vmax.f32 %v17760_v52, 0.0  ;;  %v17763_v13 = vadd.f32 %v7762_v60, %v4514_v10  ;;  %v7764_v59 = vpop.f32.mrb[14].mxu1  ;;  %v7601_v62 = vpop.f32.mrb[15].mxu0  ;;  %v8244_v10 = vld [vmem:[#allocation6 + $0x2d60] sm:$0xff]  ;;  %v8245_v52 = vld [vmem:[#allocation6 + $0x2d68] sm:$0xff] }
 0x543   :  { %v7772_v5 = vmax.f32 %v17761_v57, 0.0  ;;  %v7765_v55 = vpop.f32.mrb[15].mxu1  ;;  %v17073_v57 = vcombine.low %v8233_v42, %v8237_v37  ;;  %v17080_v60 = vcombine.high %v8240_v46, %v8244_v10  ;;  %v17082_v61 = vcombine.high %v8241_v31, %v8245_v52  ;;  %v8249_v59 = vld [vmem:[#allocation6 + $0x2d88] sm:$0xff]  ;;  %v8280_v40 = vld [vmem:[#allocation6 + $0x2e80] sm:$0xff] }
 0x544   :  { %v7774_v41 = vmax.f32 %v17763_v13, 0.0  ;;  %v18373_v7 = vpack.c.bf16 %v7771_v6, %v7771_v6  ;;  %v8248_v6 = vld [vmem:[#allocation6 + $0x2d80] sm:$0xff]  ;;  %v8253_v62 = vld [vmem:[#allocation6 + $0x2da8] sm:$0xff]  ;;  %v17081_v55 = vcombine.low %v8241_v31, %v8245_v52 }
 0x545   :  { %v18371_v4 = vpack.c.bf16 %v7772_v5, %v7772_v5  ;;  %v8252_v13 = vld [vmem:[#allocation6 + $0x2da0] sm:$0xff]  ;;  %v17079_v5 = vcombine.low %v8240_v46, %v8244_v10  ;;  %v17089_v8 = vcombine.low %v8249_v59, %v8253_v62  ;;  %v8281_v37 = vld [vmem:[#allocation6 + $0x2e88] sm:$0xff] }
 0x546   :  { %v18377_v24 = vpack.c.bf16 %v7774_v41, %v7774_v41  ;;  %v17088_v0 = vcombine.high %v8248_v6, %v8252_v13  ;;  %v17090_v41 = vcombine.high %v8249_v59, %v8253_v62  ;;  %v8284_v42 = vld [vmem:[#allocation6 + $0x2ea0] sm:$0xff]  ;;  %v8289_v52 = vld [vmem:[#allocation6 + $0x2ec8] sm:$0xff] }
 0x547   :  { %11073 = vmatprep.mubr.bf16.mxu0 %v18371_v4  ;;  %11237 = vmatprep.mubr.bf16.mxu1 %v18371_v4  ;;  %v8288_v10 = vld [vmem:[#allocation6 + $0x2ec0] sm:$0xff]  ;;  %v8297_v62 = vld [vmem:[#allocation6 + $0x2f08] sm:$0xff] }
 0x548   :  { %11074 = vmatmul.mubr.bf16.vlgmr.msra.gmra.mrb[16].mxu0 %v18373_v7  ;;  %11238 = vmatmul.mubr.bf16.vlgmr.msra.gmra.mrb[16].mxu1 %v18373_v7  ;;  %v8292_v31 = vld [vmem:[#allocation6 + $0x2ee0] sm:$0xff] }
 0x549   :  { %11083 = vmatpush1.bf16.msra.mxu0 %v17039_v14  ;;  %11247 = vmatpush1.bf16.msra.mxu1 %v17041_v29  ;;  %v8261_v14 = vld [vmem:[#allocation6 + $0x2de8] sm:$0xff]  ;;  %v17087_v29 = vcombine.low %v8248_v6, %v8252_v13  ;;  %v8296_v13 = vld [vmem:[#allocation6 + $0x2f00] sm:$0xff] }
 0x54a   :  { %11114 = vmatprep.mubr.bf16.mxu0 %v18377_v24  ;;  %11278 = vmatprep.mubr.bf16.mxu1 %v18377_v24  ;;  %v8300_v59 = vld [vmem:[#allocation6 + $0x2f20] sm:$0xff] }
 0x54b   :  { %11084 = vmatprep.subr.bf16.mxu0 %v17048_v11  ;;  %11248 = vmatprep.subr.bf16.mxu1 %v17050_v26  ;;  %v17096_v11 = vcombine.high %v8256_v1, %v8260_v12  ;;  %v17098_v26 = vcombine.high %v8257_v3, %v8261_v14 }
 0x54d   :  { %11085 = vmatpush1.bf16.msra.mxu0 %v17047_v28  ;;  %11249 = vmatpush1.bf16.msra.mxu1 %v17049_v9  ;;  %v8269_v28 = vld [vmem:[#allocation6 + $0x2e28] sm:$0xff]  ;;  %v17095_v9 = vcombine.low %v8256_v1, %v8260_v12  ;;  %v8304_v12 = vld [vmem:[#allocation6 + $0x2f40] sm:$0xff] }
 0x54e   :  { %11086 = vmatprep.subr.bf16.mxu0 %v17056_v35  ;;  %11250 = vmatprep.subr.bf16.mxu1 %v17058_v50  ;;  %v17097_v35 = vcombine.low %v8257_v3, %v8261_v14  ;;  %v17104_v50 = vcombine.high %v8264_v18, %v8268_v19  ;;  %v17106_v32 = vcombine.high %v8265_v21, %v8269_v28  ;;  %v8308_v3 = vld [vmem:[#allocation6 + $0x2f60] sm:$0xff]  ;;  %v8305_v14 = vld [vmem:[#allocation6 + $0x2f48] sm:$0xff] }
 0x551   :  { %11087 = vmatpush1.bf16.msra.mxu0 %v17055_v2  ;;  %11251 = vmatpush1.bf16.msra.mxu1 %v17057_v22  ;;  %v8277_v2 = vld [vmem:[#allocation6 + $0x2e68] sm:$0xff]  ;;  %v17103_v22 = vcombine.low %v8264_v18, %v8268_v19  ;;  %v8312_v19 = vld [vmem:[#allocation6 + $0x2f80] sm:$0xff] }
 0x552   :  { %11088 = vmatprep.subr.bf16.mxu0 %v17064_v17  ;;  %11252 = vmatprep.subr.bf16.mxu1 %v17066_v23  ;;  %v17105_v17 = vcombine.low %v8265_v21, %v8269_v28  ;;  %v17112_v23 = vcombine.high %v8272_v34, %v8276_v36  ;;  %v17114_v39 = vcombine.high %v8273_v63, %v8277_v2  ;;  %v8316_v21 = vld [vmem:[#allocation6 + $0x2fa0] sm:$0xff]  ;;  %v8313_v28 = vld [vmem:[#allocation6 + $0x2f88] sm:$0xff] }
 0x555   :  { %11089 = vmatpush1.bf16.msra.mxu0 %v17063_v25  ;;  %11253 = vmatpush1.bf16.msra.mxu1 %v17065_v43  ;;  %v8285_v25 = vld [vmem:[#allocation6 + $0x2ea8] sm:$0xff]  ;;  %v17111_v43 = vcombine.low %v8272_v34, %v8276_v36  ;;  %v17152_v34 = vcombine.high %v8312_v19, %v8316_v21 }
 0x556   :  { %11090 = vmatprep.subr.bf16.mxu0 %v17072_v44  ;;  %11254 = vmatprep.subr.bf16.mxu1 %v17074_v51  ;;  %v17113_v44 = vcombine.low %v8273_v63, %v8277_v2  ;;  %v17120_v51 = vcombine.high %v8280_v40, %v8284_v42  ;;  %v17122_v46 = vcombine.high %v8281_v37, %v8285_v25  ;;  %v8320_v63 = vld [vmem:[#allocation6 + $0x2fc0] sm:$0xff] }
 0x557   :  { %v8324_v2 = vld [vmem:[#allocation6 + $0x2fe0] sm:$0xff] }
 0x559   :  { %11091 = vmatpush1.bf16.msra.mxu0 %v17071_v53  ;;  %11255 = vmatpush1.bf16.msra.mxu1 %v17073_v57  ;;  %v8293_v53 = vld [vmem:[#allocation6 + $0x2ee8] sm:$0xff]  ;;  %v17119_v57 = vcombine.low %v8280_v40, %v8284_v42  ;;  %v17160_v42 = vcombine.high %v8320_v63, %v8324_v2 }
 0x55a   :  { %11092 = vmatprep.subr.bf16.mxu0 %v17080_v60  ;;  %11256 = vmatprep.subr.bf16.mxu1 %v17082_v61  ;;  %v17121_v60 = vcombine.low %v8281_v37, %v8285_v25  ;;  %v17128_v61 = vcombine.high %v8288_v10, %v8292_v31  ;;  %v17130_v6 = vcombine.high %v8289_v52, %v8293_v53  ;;  %v7818_v25 = vld [vmem:[#allocation6 + $0x2010] sm:$0xff] }
 0x55d   :  { %11093 = vmatpush1.bf16.msra.mxu0 %v17079_v5  ;;  %11257 = vmatpush1.bf16.msra.mxu1 %v17081_v55  ;;  %v8301_v5 = vld [vmem:[#allocation6 + $0x2f28] sm:$0xff]  ;;  %v17127_v55 = vcombine.low %v8288_v10, %v8292_v31 }
 0x55e   :  { %11094 = vmatprep.subr.bf16.mxu0 %v17088_v0  ;;  %11258 = vmatprep.subr.bf16.mxu1 %v17090_v41  ;;  %v17129_v0 = vcombine.low %v8289_v52, %v8293_v53  ;;  %v17136_v41 = vcombine.high %v8296_v13, %v8300_v59  ;;  %v17138_v1 = vcombine.high %v8297_v62, %v8301_v5  ;;  %v7826_v53 = vld [vmem:[#allocation6 + $0x2050] sm:$0xff] }
 0x561   :  { %11095 = vmatpush1.bf16.msra.mxu0 %v17087_v29  ;;  %11259 = vmatpush1.bf16.msra.mxu1 %v17089_v8  ;;  %v8309_v29 = vld [vmem:[#allocation6 + $0x2f68] sm:$0xff]  ;;  %v17135_v8 = vcombine.low %v8296_v13, %v8300_v59 }
 0x562   :  { %11096 = vmatprep.subr.bf16.mxu0 %v17096_v11  ;;  %11260 = vmatprep.subr.bf16.mxu1 %v17098_v26  ;;  %v17137_v11 = vcombine.low %v8297_v62, %v8301_v5  ;;  %v17144_v26 = vcombine.high %v8304_v12, %v8308_v3  ;;  %v17146_v18 = vcombine.high %v8305_v14, %v8309_v29  ;;  %v7834_v5 = vld [vmem:[#allocation6 + $0x2090] sm:$0xff] }
 0x565   :  { %11097 = vmatpush1.bf16.msra.mxu0 %v17095_v9  ;;  %11261 = vmatpush1.bf16.msra.mxu1 %v17097_v35  ;;  %v8317_v9 = vld [vmem:[#allocation6 + $0x2fa8] sm:$0xff]  ;;  %v17143_v35 = vcombine.low %v8304_v12, %v8308_v3 }
 0x566   :  { %11098 = vmatprep.subr.bf16.mxu0 %v17104_v50  ;;  %11262 = vmatprep.subr.bf16.mxu1 %v17106_v32  ;;  %v17145_v50 = vcombine.low %v8305_v14, %v8309_v29  ;;  %v4510_v32 = vrot.slane %v18361_v45, %v18298_v58  ;;  %v17154_v36 = vcombine.high %v8313_v28, %v8317_v9  ;;  %v7822_v45 = vld [vmem:[#allocation6 + $0x2030] sm:$0xff] }
 0x567   :  { %v16660_v31 = vcombine.high %v7818_v25, %v7822_v45  ;;  %v7842_v29 = vld [vmem:[#allocation6 + $0x20d0] sm:$0xff] }
 0x568   :  { %v17762_v40 = vadd.f32 %v18369_v20, %v4510_v32  ;;  %v7827_v20 = vld [vmem:[#allocation6 + $0x2058] sm:$0xff] }
 0x569   :  { %11099 = vmatpush1.bf16.msra.mxu0 %v17103_v22  ;;  %11263 = vmatpush1.bf16.msra.mxu1 %v17105_v17  ;;  %v8321_v22 = vld [vmem:[#allocation6 + $0x2fc8] sm:$0xff] }
 0x56a   :  { %11100 = vmatprep.subr.bf16.mxu0 %v17112_v23  ;;  %11264 = vmatprep.subr.bf16.mxu1 %v17114_v39  ;;  %v8325_v17 = vld [vmem:[#allocation6 + $0x2fe8] sm:$0xff]  ;;  %v17151_v23 = vcombine.low %v8312_v19, %v8316_v21  ;;  %v17153_v39 = vcombine.low %v8313_v28, %v8317_v9  ;;  %v7773_v10 = vmax.f32 %v17762_v40, 0.0  ;;  %v7850_v9 = vld [vmem:[#allocation6 + $0x2110] sm:$0xff] }
 0x56b   :  { %v17162_v37 = vcombine.high %v8321_v22, %v8325_v17 }
 0x56d   :  { %11101 = vmatpush1.bf16.msra.mxu0 %v17111_v43  ;;  %11265 = vmatpush1.bf16.msra.mxu1 %v17113_v44  ;;  %v7819_v43 = vld [vmem:[#allocation6 + $0x2018] sm:$0xff] }
 0x56e   :  { %11102 = vmatprep.subr.bf16.mxu0 %v17120_v51  ;;  %11266 = vmatprep.subr.bf16.mxu1 %v17122_v46  ;;  %v7823_v44 = vld [vmem:[#allocation6 + $0x2038] sm:$0xff]  ;;  %v17159_v51 = vcombine.low %v8320_v63, %v8324_v2  ;;  %v17161_v46 = vcombine.low %v8321_v22, %v8325_v17  ;;  %v7858_v2 = vld [vmem:[#allocation6 + $0x2150] sm:$0xff] }
 0x56f   :  { %v16662_v52 = vcombine.high %v7819_v43, %v7823_v44  ;;  %v16661_v13 = vcombine.low %v7819_v43, %v7823_v44  ;;  %v7862_v22 = vld [vmem:[#allocation6 + $0x2170] sm:$0xff]  ;;  %v7859_v17 = vld [vmem:[#allocation6 + $0x2158] sm:$0xff] }
 0x570   :  { %v7867_v43 = vld [vmem:[#allocation6 + $0x2198] sm:$0xff] }
 0x571   :  { %11103 = vmatpush1.bf16.msra.mxu0 %v17119_v57  ;;  %11267 = vmatpush1.bf16.msra.mxu1 %v17121_v60  ;;  %v7830_v57 = vld [vmem:[#allocation6 + $0x2070] sm:$0xff]  ;;  %v7831_v60 = vld [vmem:[#allocation6 + $0x2078] sm:$0xff] }
 0x572   :  { %11104 = vmatprep.subr.bf16.mxu0 %v17128_v61  ;;  %11268 = vmatprep.subr.bf16.mxu1 %v17130_v6  ;;  %v16659_v61 = vcombine.low %v7818_v25, %v7822_v45  ;;  %v18386_v6 = vpack.c.bf16 %v7773_v10, %v7773_v10  ;;  %v16668_v59 = vcombine.high %v7826_v53, %v7830_v57  ;;  %v7866_v25 = vld [vmem:[#allocation6 + $0x2190] sm:$0xff]  ;;  %v7871_v44 = vld [vmem:[#allocation6 + $0x21b8] sm:$0xff] }
 0x573   :  { %v16670_v62 = vcombine.high %v7827_v20, %v7831_v60  ;;  %v16669_v12 = vcombine.low %v7827_v20, %v7831_v60  ;;  %v7870_v45 = vld [vmem:[#allocation6 + $0x21b0] sm:$0xff]  ;;  %v7879_v20 = vld [vmem:[#allocation6 + $0x21f8] sm:$0xff] }
 0x574   :  { %v16708_v10 = vcombine.high %v7866_v25, %v7870_v45  ;;  %v16707_v60 = vcombine.low %v7866_v25, %v7870_v45  ;;  %v7918_v25 = vld [vmem:[#allocation6 + $0x2330] sm:$0xff]  ;;  %v7915_v45 = vld [vmem:[#allocation6 + $0x2318] sm:$0xff] }
 0x575   :  { %11105 = vmatpush1.bf16.msra.mxu0 %v17127_v55  ;;  %11269 = vmatpush1.bf16.msra.mxu1 %v17129_v0  ;;  %v7838_v55 = vld [vmem:[#allocation6 + $0x20b0] sm:$0xff]  ;;  %v7835_v0 = vld [vmem:[#allocation6 + $0x2098] sm:$0xff] }
 0x576   :  { %11106 = vmatprep.subr.bf16.mxu0 %v17136_v41  ;;  %11270 = vmatprep.subr.bf16.mxu1 %v17138_v1  ;;  %v7839_v41 = vld [vmem:[#allocation6 + $0x20b8] sm:$0xff]  ;;  %v16667_v1 = vcombine.low %v7826_v53, %v7830_v57  ;;  %v16676_v3 = vcombine.high %v7834_v5, %v7838_v55  ;;  %v7878_v53 = vld [vmem:[#allocation6 + $0x21f0] sm:$0xff] }
 0x577   :  { %v16678_v14 = vcombine.high %v7835_v0, %v7839_v41  ;;  %v16677_v19 = vcombine.low %v7835_v0, %v7839_v41  ;;  %v7875_v57 = vld [vmem:[#allocation6 + $0x21d8] sm:$0xff] }
 0x578   :  { %v7887_v0 = vld [vmem:[#allocation6 + $0x2238] sm:$0xff] }
 0x579   :  { %11107 = vmatpush1.bf16.msra.mxu0 %v17135_v8  ;;  %11271 = vmatpush1.bf16.msra.mxu1 %v17137_v11  ;;  %v7846_v8 = vld [vmem:[#allocation6 + $0x20f0] sm:$0xff]  ;;  %v7843_v11 = vld [vmem:[#allocation6 + $0x20d8] sm:$0xff] }
 0x57a   :  { %11108 = vmatprep.subr.bf16.mxu0 %v17144_v26  ;;  %11272 = vmatprep.subr.bf16.mxu1 %v17146_v18  ;;  %v7847_v26 = vld [vmem:[#allocation6 + $0x20f8] sm:$0xff]  ;;  %v16675_v18 = vcombine.low %v7834_v5, %v7838_v55  ;;  %v16684_v21 = vcombine.high %v7842_v29, %v7846_v8  ;;  %v16683_v32 = vcombine.low %v7842_v29, %v7846_v8  ;;  %v7886_v5 = vld [vmem:[#allocation6 + $0x2230] sm:$0xff] }
 0x57b   :  { %v16686_v28 = vcombine.high %v7843_v11, %v7847_v26  ;;  %v7883_v55 = vld [vmem:[#allocation6 + $0x2218] sm:$0xff]  ;;  %v7894_v29 = vld [vmem:[#allocation6 + $0x2270] sm:$0xff] }
 0x57c   :  { %v7891_v8 = vld [vmem:[#allocation6 + $0x2258] sm:$0xff] }
 0x57d   :  { %11109 = vmatpush1.bf16.msra.mxu0 %v17143_v35  ;;  %11273 = vmatpush1.bf16.msra.mxu1 %v17145_v50  ;;  %v7854_v35 = vld [vmem:[#allocation6 + $0x2130] sm:$0xff]  ;;  %v7855_v50 = vld [vmem:[#allocation6 + $0x2138] sm:$0xff] }
 0x57e   :  { %11110 = vmatprep.subr.bf16.mxu0 %v17152_v34  ;;  %11274 = vmatprep.subr.bf16.mxu1 %v17154_v36  ;;  %v16685_v34 = vcombine.low %v7843_v11, %v7847_v26  ;;  %v16692_v36 = vcombine.high %v7850_v9, %v7854_v35  ;;  %v7895_v11 = vld [vmem:[#allocation6 + $0x2278] sm:$0xff] }
 0x581   :  { %11111 = vmatpush1.bf16.msra.mxu0 %v17151_v23  ;;  %11275 = vmatpush1.bf16.msra.mxu1 %v17153_v39  ;;  %v7863_v23 = vld [vmem:[#allocation6 + $0x2178] sm:$0xff]  ;;  %v16691_v39 = vcombine.low %v7850_v9, %v7854_v35  ;;  %v7902_v9 = vld [vmem:[#allocation6 + $0x22b0] sm:$0xff] }
 0x582   :  { %11112 = vmatprep.subr.bf16.mxu0 %v17160_v42  ;;  %11276 = vmatprep.subr.bf16.mxu1 %v17162_v37  ;;  %v16700_v42 = vcombine.high %v7858_v2, %v7862_v22  ;;  %v16702_v37 = vcombine.high %v7859_v17, %v7863_v23  ;;  %v7899_v35 = vld [vmem:[#allocation6 + $0x2298] sm:$0xff] }
 0x585   :  { %11113 = vmatpush1.bf16.msra.mxu0 %v17159_v51  ;;  %11277 = vmatpush1.bf16.msra.mxu1 %v17161_v46  ;;  %v16699_v51 = vcombine.low %v7858_v2, %v7862_v22  ;;  %v16701_v46 = vcombine.low %v7859_v17, %v7863_v23  ;;  %v7910_v2 = vld [vmem:[#allocation6 + $0x22f0] sm:$0xff]  ;;  %v7907_v22 = vld [vmem:[#allocation6 + $0x22d8] sm:$0xff] }
 0x586   :  { %11287 = vmatprep.subr.bf16.mxu0 %v16660_v31  ;;  %11451 = vmatprep.subr.bf16.mxu1 %v16662_v52  ;;  %v16710_v31 = vcombine.high %v7867_v43, %v7871_v44  ;;  %v7874_v52 = vld [vmem:[#allocation6 + $0x21d0] sm:$0xff]  ;;  %v7911_v17 = vld [vmem:[#allocation6 + $0x22f8] sm:$0xff] }
 0x587   :  { %v16715_v41 = vcombine.low %v7874_v52, %v7878_v53 }
 0x588   :  { %11115 = vmatmul.mubr.bf16.vlgmr.msra.gmra.mrb[16].mxu0 %v18386_v6  ;;  %11279 = vmatmul.mubr.bf16.vlgmr.msra.gmra.mrb[16].mxu1 %v18386_v6 }
 0x589   :  { %11288 = vmatpush1.bf16.msra.mxu0 %v16659_v61  ;;  %11319 = vmatprep.mubr.bf16.mxu0 %v18334_v15  ;;  %v16709_v61 = vcombine.low %v7867_v43, %v7871_v44  ;;  %v7919_v43 = vld [vmem:[#allocation6 + $0x2338] sm:$0xff] }
 0x58a   :  { %11452 = vmatpush1.bf16.msra.mxu1 %v16661_v13  ;;  %11483 = vmatprep.mubr.bf16.mxu1 %v18334_v15  ;;  %v7851_v15 = vld [vmem:[#allocation6 + $0x2118] sm:$0xff]  ;;  %v16716_v13 = vcombine.high %v7874_v52, %v7878_v53  ;;  %v7926_v52 = vld [vmem:[#allocation6 + $0x2370] sm:$0xff] }
 0x58b   :  { %11289 = vmatprep.subr.bf16.mxu0 %v16668_v59  ;;  %11453 = vmatprep.subr.bf16.mxu1 %v16670_v62  ;;  %v16694_v63 = vcombine.high %v7851_v15, %v7855_v50  ;;  %v16693_v40 = vcombine.low %v7851_v15, %v7855_v50  ;;  %v16718_v59 = vcombine.high %v7875_v57, %v7879_v20  ;;  %v7882_v62 = vld [vmem:[#allocation6 + $0x2210] sm:$0xff]  ;;  %v7903_v15 = vld [vmem:[#allocation6 + $0x22b8] sm:$0xff] }
 0x58c   :  { %v16723_v26 = vcombine.low %v7882_v62, %v7886_v5  ;;  %v7923_v53 = vld [vmem:[#allocation6 + $0x2358] sm:$0xff] }
 0x58d   :  { %11290 = vmatpush1.bf16.msra.mxu0 %v16667_v1  ;;  %v16717_v1 = vcombine.low %v7875_v57, %v7879_v20  ;;  %v7927_v57 = vld [vmem:[#allocation6 + $0x2378] sm:$0xff] }
 0x58e   :  { %11454 = vmatpush1.bf16.msra.mxu1 %v16669_v12  ;;  %11291 = vmatprep.subr.bf16.mxu0 %v16676_v3  ;;  %v16724_v12 = vcombine.high %v7882_v62, %v7886_v5  ;;  %v16726_v3 = vcombine.high %v7883_v55, %v7887_v0  ;;  %v7934_v62 = vld [vmem:[#allocation6 + $0x23b0] sm:$0xff]  ;;  %v7931_v5 = vld [vmem:[#allocation6 + $0x2398] sm:$0xff] }
 0x58f   :  { %11455 = vmatprep.subr.bf16.mxu1 %v16678_v14  ;;  %v7890_v14 = vld [vmem:[#allocation6 + $0x2250] sm:$0xff] }
 0x590   :  { %v16731_v50 = vcombine.low %v7890_v14, %v7894_v29 }
 0x591   :  { %11292 = vmatpush1.bf16.msra.mxu0 %v16675_v18  ;;  %v16725_v18 = vcombine.low %v7883_v55, %v7887_v0  ;;  %v7935_v55 = vld [vmem:[#allocation6 + $0x23b8] sm:$0xff] }
 0x592   :  { %11456 = vmatpush1.bf16.msra.mxu1 %v16677_v19  ;;  %11293 = vmatprep.subr.bf16.mxu0 %v16684_v21  ;;  %v16732_v19 = vcombine.high %v7890_v14, %v7894_v29  ;;  %v16734_v21 = vcombine.high %v7891_v8, %v7895_v11  ;;  %v7942_v14 = vld [vmem:[#allocation6 + $0x23f0] sm:$0xff]  ;;  %v7939_v29 = vld [vmem:[#allocation6 + $0x23d8] sm:$0xff] }
 0x593   :  { %11457 = vmatprep.subr.bf16.mxu1 %v16686_v28  ;;  %v7898_v28 = vld [vmem:[#allocation6 + $0x2290] sm:$0xff] }
 0x594   :  { %v16739_v23 = vcombine.low %v7898_v28, %v7902_v9 }
 0x595   :  { %11294 = vmatpush1.bf16.msra.mxu0 %v16683_v32  ;;  %v16733_v32 = vcombine.low %v7891_v8, %v7895_v11  ;;  %v7943_v8 = vld [vmem:[#allocation6 + $0x23f8] sm:$0xff] }
 0x596   :  { %11458 = vmatpush1.bf16.msra.mxu1 %v16685_v34  ;;  %11295 = vmatprep.subr.bf16.mxu0 %v16692_v36  ;;  %v16740_v34 = vcombine.high %v7898_v28, %v7902_v9  ;;  %v16742_v36 = vcombine.high %v7899_v35, %v7903_v15  ;;  %v7950_v28 = vld [vmem:[#allocation6 + $0x2430] sm:$0xff]  ;;  %v7947_v9 = vld [vmem:[#allocation6 + $0x2418] sm:$0xff] }
 0x597   :  { %11459 = vmatprep.subr.bf16.mxu1 %v16694_v63  ;;  %v7906_v63 = vld [vmem:[#allocation6 + $0x22d0] sm:$0xff] }
 0x598   :  { %v16747_v44 = vcombine.low %v7906_v63, %v7910_v2 }
 0x599   :  { %11296 = vmatpush1.bf16.msra.mxu0 %v16691_v39  ;;  %v16741_v39 = vcombine.low %v7899_v35, %v7903_v15  ;;  %v7951_v35 = vld [vmem:[#allocation6 + $0x2438] sm:$0xff] }
 0x59a   :  { %11460 = vmatpush1.bf16.msra.mxu1 %v16693_v40  ;;  %11297 = vmatprep.subr.bf16.mxu0 %v16700_v42  ;;  %v16748_v40 = vcombine.high %v7906_v63, %v7910_v2  ;;  %v16750_v42 = vcombine.high %v7907_v22, %v7911_v17  ;;  %v7958_v63 = vld [vmem:[#allocation6 + $0x2470] sm:$0xff] }
 0x59b   :  { %11461 = vmatprep.subr.bf16.mxu1 %v16702_v37  ;;  %v7914_v37 = vld [vmem:[#allocation6 + $0x2310] sm:$0xff] }
 0x59c   :  { %v16755_v20 = vcombine.low %v7914_v37, %v7918_v25 }
 0x59d   :  { %11298 = vmatpush1.bf16.msra.mxu0 %v16699_v51  ;;  %v16749_v51 = vcombine.low %v7907_v22, %v7911_v17  ;;  %v7955_v22 = vld [vmem:[#allocation6 + $0x2458] sm:$0xff] }
 0x59e   :  { %11462 = vmatpush1.bf16.msra.mxu1 %v16701_v46  ;;  %11299 = vmatprep.subr.bf16.mxu0 %v16708_v10  ;;  %v16756_v46 = vcombine.high %v7914_v37, %v7918_v25  ;;  %v16758_v10 = vcombine.high %v7915_v45, %v7919_v43  ;;  %v7959_v17 = vld [vmem:[#allocation6 + $0x2478] sm:$0xff] }
 0x59f   :  { %11463 = vmatprep.subr.bf16.mxu1 %v16710_v31  ;;  %v7922_v31 = vld [vmem:[#allocation6 + $0x2350] sm:$0xff]  ;;  %v16798_v37 = vcombine.high %v7955_v22, %v7959_v17  ;;  %v7963_v25 = vld [vmem:[#allocation6 + $0x2498] sm:$0xff] }
 0x5a0   :  { %v16763_v0 = vcombine.low %v7922_v31, %v7926_v52 }
 0x5a1   :  { %11300 = vmatpush1.bf16.msra.mxu0 %v16707_v60  ;;  %v16757_v60 = vcombine.low %v7915_v45, %v7919_v43  ;;  %v7967_v45 = vld [vmem:[#allocation6 + $0x24b8] sm:$0xff] }
 0x5a2   :  { %11464 = vmatpush1.bf16.msra.mxu1 %v16709_v61  ;;  %11301 = vmatprep.subr.bf16.mxu0 %v16716_v13  ;;  %v16764_v61 = vcombine.high %v7922_v31, %v7926_v52  ;;  %v16766_v13 = vcombine.high %v7923_v53, %v7927_v57  ;;  %v7974_v31 = vld [vmem:[#allocation6 + $0x24f0] sm:$0xff]  ;;  %v7971_v52 = vld [vmem:[#allocation6 + $0x24d8] sm:$0xff] }
 0x5a3   :  { %11465 = vmatprep.subr.bf16.mxu1 %v16718_v59  ;;  %v7930_v59 = vld [vmem:[#allocation6 + $0x2390] sm:$0xff] }
 0x5a4   :  { %v16771_v11 = vcombine.low %v7930_v59, %v7934_v62 }
 0x5a5   :  { %11302 = vmatpush1.bf16.msra.mxu0 %v16715_v41  ;;  %v16765_v41 = vcombine.low %v7923_v53, %v7927_v57  ;;  %v7975_v53 = vld [vmem:[#allocation6 + $0x24f8] sm:$0xff] }
 0x5a6   :  { %11466 = vmatpush1.bf16.msra.mxu1 %v16717_v1  ;;  %11303 = vmatprep.subr.bf16.mxu0 %v16724_v12  ;;  %v16772_v1 = vcombine.high %v7930_v59, %v7934_v62  ;;  %v16774_v12 = vcombine.high %v7931_v5, %v7935_v55  ;;  %v7979_v59 = vld [vmem:[#allocation6 + $0x2518] sm:$0xff] }
 0x5a7   :  { %11467 = vmatprep.subr.bf16.mxu1 %v16726_v3  ;;  %v7938_v3 = vld [vmem:[#allocation6 + $0x23d0] sm:$0xff]  ;;  %v7983_v62 = vld [vmem:[#allocation6 + $0x2538] sm:$0xff] }
 0x5a8   :  { %v16779_v15 = vcombine.low %v7938_v3, %v7942_v14 }
 0x5a9   :  { %11304 = vmatpush1.bf16.msra.mxu0 %v16723_v26  ;;  %v16773_v26 = vcombine.low %v7931_v5, %v7935_v55  ;;  %v16813_v5 = vcombine.low %v7971_v52, %v7975_v53 }
 0x5aa   :  { %11468 = vmatpush1.bf16.msra.mxu1 %v16725_v18  ;;  %11305 = vmatprep.subr.bf16.mxu0 %v16732_v19  ;;  %v16780_v18 = vcombine.high %v7938_v3, %v7942_v14  ;;  %v16782_v19 = vcombine.high %v7939_v29, %v7943_v8  ;;  %v7991_v3 = vld [vmem:[#allocation6 + $0x2578] sm:$0xff] }
 0x5ab   :  { %11469 = vmatprep.subr.bf16.mxu1 %v16734_v21  ;;  %v7946_v21 = vld [vmem:[#allocation6 + $0x2410] sm:$0xff] }
 0x5ac   :  { %v16787_v2 = vcombine.low %v7946_v21, %v7950_v28 }
 0x5ad   :  { %11306 = vmatpush1.bf16.msra.mxu0 %v16731_v50  ;;  %v16781_v50 = vcombine.low %v7939_v29, %v7943_v8  ;;  %v16821_v29 = vcombine.low %v7979_v59, %v7983_v62 }
 0x5ae   :  { %11470 = vmatpush1.bf16.msra.mxu1 %v16733_v32  ;;  %11307 = vmatprep.subr.bf16.mxu0 %v16740_v34  ;;  %v16788_v32 = vcombine.high %v7946_v21, %v7950_v28  ;;  %v16790_v34 = vcombine.high %v7947_v9, %v7951_v35  ;;  %v7999_v21 = vld [vmem:[#allocation6 + $0x25b8] sm:$0xff] }
 0x5af   :  { %11471 = vmatprep.subr.bf16.mxu1 %v16742_v36  ;;  %v7954_v36 = vld [vmem:[#allocation6 + $0x2450] sm:$0xff] }
 0x5b0   :  { %v16795_v43 = vcombine.low %v7954_v36, %v7958_v63 }
 0x5b1   :  { %11308 = vmatpush1.bf16.msra.mxu0 %v16739_v23  ;;  %v16789_v23 = vcombine.low %v7947_v9, %v7951_v35 }
 0x5b2   :  { %11472 = vmatpush1.bf16.msra.mxu1 %v16741_v39  ;;  %11309 = vmatprep.subr.bf16.mxu0 %v16748_v40  ;;  %v16796_v39 = vcombine.high %v7954_v36, %v7958_v63  ;;  %v7962_v40 = vld [vmem:[#allocation6 + $0x2490] sm:$0xff]  ;;  %v8007_v36 = vld [vmem:[#allocation6 + $0x25f8] sm:$0xff] }
 0x5b3   :  { %11473 = vmatprep.subr.bf16.mxu1 %v16750_v42  ;;  %v7966_v42 = vld [vmem:[#allocation6 + $0x24b0] sm:$0xff] }
 0x5b4   :  { %v16803_v57 = vcombine.low %v7962_v40, %v7966_v42 }
 0x5b5   :  { %11310 = vmatpush1.bf16.msra.mxu0 %v16747_v44  ;;  %v16797_v44 = vcombine.low %v7955_v22, %v7959_v17 }
 0x5b6   :  { %11474 = vmatpush1.bf16.msra.mxu1 %v16749_v51  ;;  %11311 = vmatprep.subr.bf16.mxu0 %v16756_v46  ;;  %v16804_v51 = vcombine.high %v7962_v40, %v7966_v42  ;;  %v16806_v46 = vcombine.high %v7963_v25, %v7967_v45  ;;  %v8011_v40 = vld [vmem:[#allocation6 + $0x2618] sm:$0xff] }
 0x5b7   :  { %11475 = vmatprep.subr.bf16.mxu1 %v16758_v10  ;;  %v7970_v10 = vld [vmem:[#allocation6 + $0x24d0] sm:$0xff]  ;;  %v8015_v42 = vld [vmem:[#allocation6 + $0x2638] sm:$0xff] }
 0x5b9   :  { %11312 = vmatpush1.bf16.msra.mxu0 %v16755_v20  ;;  %v16812_v20 = vcombine.high %v7970_v10, %v7974_v31 }
 0x5ba   :  { %11476 = vmatpush1.bf16.msra.mxu1 %v16757_v60  ;;  %11313 = vmatprep.subr.bf16.mxu0 %v16764_v61  ;;  %v16814_v60 = vcombine.high %v7971_v52, %v7975_v53  ;;  %v7978_v61 = vld [vmem:[#allocation6 + $0x2510] sm:$0xff]  ;;  %v16853_v52 = vcombine.low %v8011_v40, %v8015_v42 }
 0x5bb   :  { %11477 = vmatprep.subr.bf16.mxu1 %v16766_v13  ;;  %v7982_v13 = vld [vmem:[#allocation6 + $0x2530] sm:$0xff] }
 0x5bc   :  { %v16820_v55 = vcombine.high %v7978_v61, %v7982_v13  ;;  %v16819_v14 = vcombine.low %v7978_v61, %v7982_v13  ;;  %v8031_v61 = vld [vmem:[#allocation6 + $0x26b8] sm:$0xff] }
 0x5bd   :  { %11314 = vmatpush1.bf16.msra.mxu0 %v16763_v0  ;;  %v16822_v0 = vcombine.high %v7979_v59, %v7983_v62 }
 0x5be   :  { %11478 = vmatpush1.bf16.msra.mxu1 %v16765_v41  ;;  %11315 = vmatprep.subr.bf16.mxu0 %v16772_v1  ;;  %v7986_v41 = vld [vmem:[#allocation6 + $0x2550] sm:$0xff] }
 0x5bf   :  { %11479 = vmatprep.subr.bf16.mxu1 %v16774_v12  ;;  %v7990_v1 = vld [vmem:[#allocation6 + $0x2570] sm:$0xff]  ;;  %v7987_v12 = vld [vmem:[#allocation6 + $0x2558] sm:$0xff] }
 0x5c0   :  { %v16828_v8 = vcombine.high %v7986_v41, %v7990_v1  ;;  %v16827_v28 = vcombine.low %v7986_v41, %v7990_v1  ;;  %v16829_v9 = vcombine.low %v7987_v12, %v7991_v3  ;;  %v8039_v41 = vld [vmem:[#allocation6 + $0x26f8] sm:$0xff] }
 0x5c1   :  { %11316 = vmatpush1.bf16.msra.mxu0 %v16771_v11  ;;  %v16830_v11 = vcombine.high %v7987_v12, %v7991_v3 }
 0x5c2   :  { %11480 = vmatpush1.bf16.msra.mxu1 %v16773_v26  ;;  %11317 = vmatprep.subr.bf16.mxu0 %v16780_v18  ;;  %v7994_v26 = vld [vmem:[#allocation6 + $0x2590] sm:$0xff] }
 0x5c3   :  { %11481 = vmatprep.subr.bf16.mxu1 %v16782_v19  ;;  %v7998_v18 = vld [vmem:[#allocation6 + $0x25b0] sm:$0xff]  ;;  %v7995_v19 = vld [vmem:[#allocation6 + $0x2598] sm:$0xff] }
 0x5c4   :  { %v16836_v35 = vcombine.high %v7994_v26, %v7998_v18  ;;  %v16835_v63 = vcombine.low %v7994_v26, %v7998_v18  ;;  %v8047_v26 = vld [vmem:[#allocation6 + $0x2738] sm:$0xff] }
 0x5c5   :  { %11318 = vmatpush1.bf16.msra.mxu0 %v16779_v15  ;;  %v16838_v15 = vcombine.high %v7995_v19, %v7999_v21 }
 0x5c6   :  { %11482 = vmatpush1.bf16.msra.mxu1 %v16781_v50  ;;  %11328 = vmatprep.subr.bf16.mxu0 %v16788_v32  ;;  %v8002_v50 = vld [vmem:[#allocation6 + $0x25d0] sm:$0xff] }
 0x5c7   :  { %11492 = vmatprep.subr.bf16.mxu1 %v16790_v34  ;;  %v8006_v32 = vld [vmem:[#allocation6 + $0x25f0] sm:$0xff]  ;;  %v8003_v34 = vld [vmem:[#allocation6 + $0x25d8] sm:$0xff] }
 0x5c8   :  { %11320 = vmatmul.mubr.bf16.vlgmr.msra.gmra.mrb[20].mxu0 %v18346_v47  ;;  %v16844_v22 = vcombine.high %v8002_v50, %v8006_v32  ;;  %v16846_v17 = vcombine.high %v8003_v34, %v8007_v36 }
 0x5c9   :  { %11484 = vmatmul.mubr.bf16.vlgmr.msra.gmra.mrb[20].mxu1 %v18346_v47  ;;  %11329 = vmatpush1.bf16.msra.mxu0 %v16787_v2  ;;  %v16805_v47 = vcombine.low %v7963_v25, %v7967_v45  ;;  %v16837_v2 = vcombine.low %v7995_v19, %v7999_v21  ;;  %v16845_v25 = vcombine.low %v8003_v34, %v8007_v36 }
 0x5ca   :  { %11360 = vmatprep.mubr.bf16.mxu0 %v18348_v56  ;;  %11493 = vmatpush1.bf16.msra.mxu1 %v16789_v23  ;;  %v8010_v23 = vld [vmem:[#allocation6 + $0x2610] sm:$0xff] }
 0x5cb   :  { %11524 = vmatprep.mubr.bf16.mxu1 %v18348_v56  ;;  %11330 = vmatprep.subr.bf16.mxu0 %v16796_v39  ;;  %v16811_v56 = vcombine.low %v7970_v10, %v7974_v31  ;;  %v8014_v39 = vld [vmem:[#allocation6 + $0x2630] sm:$0xff]  ;;  %v8023_v10 = vld [vmem:[#allocation6 + $0x2678] sm:$0xff] }
 0x5cc   :  { %11494 = vmatprep.subr.bf16.mxu1 %v16798_v37  ;;  %v16843_v37 = vcombine.low %v8002_v50, %v8006_v32  ;;  %v16852_v45 = vcombine.high %v8010_v23, %v8014_v39  ;;  %v16851_v31 = vcombine.low %v8010_v23, %v8014_v39  ;;  %v8055_v50 = vld [vmem:[#allocation6 + $0x2778] sm:$0xff] }
 0x5cd   :  { %11331 = vmatpush1.bf16.msra.mxu0 %v16795_v43  ;;  %v16854_v43 = vcombine.high %v8011_v40, %v8015_v42  ;;  %v8063_v23 = vld [vmem:[#allocation6 + $0x27b8] sm:$0xff] }
 0x5ce   :  { %11495 = vmatpush1.bf16.msra.mxu1 %v16797_v44  ;;  %11332 = vmatprep.subr.bf16.mxu0 %v16804_v51  ;;  %v8018_v44 = vld [vmem:[#allocation6 + $0x2650] sm:$0xff] }
 0x5cf   :  { %11496 = vmatprep.subr.bf16.mxu1 %v16806_v46  ;;  %v8022_v51 = vld [vmem:[#allocation6 + $0x2670] sm:$0xff]  ;;  %v8019_v46 = vld [vmem:[#allocation6 + $0x2658] sm:$0xff] }
 0x5d0   :  { %v16860_v53 = vcombine.high %v8018_v44, %v8022_v51  ;;  %v16859_v13 = vcombine.low %v8018_v44, %v8022_v51  ;;  %v16861_v59 = vcombine.low %v8019_v46, %v8023_v10  ;;  %v8071_v44 = vld [vmem:[#allocation6 + $0x27f8] sm:$0xff] }
 0x5d1   :  { %11333 = vmatpush1.bf16.msra.mxu0 %v16803_v57  ;;  %v16862_v57 = vcombine.high %v8019_v46, %v8023_v10 }
 0x5d2   :  { %11497 = vmatpush1.bf16.msra.mxu1 %v16805_v47  ;;  %11334 = vmatprep.subr.bf16.mxu0 %v16812_v20  ;;  %v8026_v47 = vld [vmem:[#allocation6 + $0x2690] sm:$0xff] }
 0x5d3   :  { %11498 = vmatprep.subr.bf16.mxu1 %v16814_v60  ;;  %v8030_v20 = vld [vmem:[#allocation6 + $0x26b0] sm:$0xff]  ;;  %v8027_v60 = vld [vmem:[#allocation6 + $0x2698] sm:$0xff] }
 0x5d4   :  { %v16868_v62 = vcombine.high %v8026_v47, %v8030_v20  ;;  %v16867_v1 = vcombine.low %v8026_v47, %v8030_v20  ;;  %v16869_v12 = vcombine.low %v8027_v60, %v8031_v61  ;;  %v8079_v47 = vld [vmem:[#allocation6 + $0x2838] sm:$0xff] }
 0x5d5   :  { %11335 = vmatpush1.bf16.msra.mxu0 %v16811_v56  ;;  %v16870_v56 = vcombine.high %v8027_v60, %v8031_v61 }
 0x5d6   :  { %11499 = vmatpush1.bf16.msra.mxu1 %v16813_v5  ;;  %11336 = vmatprep.subr.bf16.mxu0 %v16820_v55  ;;  %v8034_v5 = vld [vmem:[#allocation6 + $0x26d0] sm:$0xff] }
 0x5d7   :  { %11500 = vmatprep.subr.bf16.mxu1 %v16822_v0  ;;  %v8038_v55 = vld [vmem:[#allocation6 + $0x26f0] sm:$0xff]  ;;  %v8035_v0 = vld [vmem:[#allocation6 + $0x26d8] sm:$0xff] }
 0x5d8   :  { %v16876_v3 = vcombine.high %v8034_v5, %v8038_v55  ;;  %v16875_v18 = vcombine.low %v8034_v5, %v8038_v55  ;;  %v16877_v19 = vcombine.low %v8035_v0, %v8039_v41  ;;  %v8083_v5 = vld [vmem:[#allocation6 + $0x2858] sm:$0xff] }
 0x5d9   :  { %11337 = vmatpush1.bf16.msra.mxu0 %v16819_v14  ;;  %v16878_v14 = vcombine.high %v8035_v0, %v8039_v41  ;;  %v8087_v55 = vld [vmem:[#allocation6 + $0x2878] sm:$0xff] }
 0x5da   :  { %11501 = vmatpush1.bf16.msra.mxu1 %v16821_v29  ;;  %11338 = vmatprep.subr.bf16.mxu0 %v16828_v8  ;;  %v8042_v29 = vld [vmem:[#allocation6 + $0x2710] sm:$0xff] }
 0x5db   :  { %11502 = vmatprep.subr.bf16.mxu1 %v16830_v11  ;;  %v8046_v8 = vld [vmem:[#allocation6 + $0x2730] sm:$0xff]  ;;  %v8043_v11 = vld [vmem:[#allocation6 + $0x2718] sm:$0xff] }
 0x5dc   :  { %v16884_v21 = vcombine.high %v8042_v29, %v8046_v8  ;;  %v16883_v32 = vcombine.low %v8042_v29, %v8046_v8  ;;  %v16885_v34 = vcombine.low %v8043_v11, %v8047_v26  ;;  %v8095_v29 = vld [vmem:[#allocation6 + $0x28b8] sm:$0xff] }
 0x5dd   :  { %11339 = vmatpush1.bf16.msra.mxu0 %v16827_v28  ;;  %v16886_v28 = vcombine.high %v8043_v11, %v8047_v26  ;;  %v16925_v11 = vcombine.low %v8083_v5, %v8087_v55 }
 0x5de   :  { %11503 = vmatpush1.bf16.msra.mxu1 %v16829_v9  ;;  %11340 = vmatprep.subr.bf16.mxu0 %v16836_v35  ;;  %v8050_v9 = vld [vmem:[#allocation6 + $0x2750] sm:$0xff] }
 0x5df   :  { %11504 = vmatprep.subr.bf16.mxu1 %v16838_v15  ;;  %v8054_v35 = vld [vmem:[#allocation6 + $0x2770] sm:$0xff]  ;;  %v8051_v15 = vld [vmem:[#allocation6 + $0x2758] sm:$0xff] }
 0x5e0   :  { %v16892_v36 = vcombine.high %v8050_v9, %v8054_v35  ;;  %v16891_v39 = vcombine.low %v8050_v9, %v8054_v35  ;;  %v16893_v40 = vcombine.low %v8051_v15, %v8055_v50  ;;  %v8103_v9 = vld [vmem:[#allocation6 + $0x28f8] sm:$0xff] }
 0x5e1   :  { %11341 = vmatpush1.bf16.msra.mxu0 %v16835_v63  ;;  %v16894_v63 = vcombine.high %v8051_v15, %v8055_v50 }
 0x5e2   :  { %11505 = vmatpush1.bf16.msra.mxu1 %v16837_v2  ;;  %11342 = vmatprep.subr.bf16.mxu0 %v16844_v22  ;;  %v8058_v2 = vld [vmem:[#allocation6 + $0x2790] sm:$0xff] }
 0x5e3   :  { %11506 = vmatprep.subr.bf16.mxu1 %v16846_v17  ;;  %v8062_v22 = vld [vmem:[#allocation6 + $0x27b0] sm:$0xff]  ;;  %v8059_v17 = vld [vmem:[#allocation6 + $0x2798] sm:$0xff] }
 0x5e4   :  { %v16900_v42 = vcombine.high %v8058_v2, %v8062_v22  ;;  %v16899_v51 = vcombine.low %v8058_v2, %v8062_v22  ;;  %v16901_v46 = vcombine.low %v8059_v17, %v8063_v23 }
 0x5e5   :  { %11343 = vmatpush1.bf16.msra.mxu0 %v16843_v37  ;;  %v16902_v37 = vcombine.high %v8059_v17, %v8063_v23  ;;  %v8114_v23 = vld [vmem:[#allocation6 + $0x2950] sm:$0xff] }
 0x5e6   :  { %11507 = vmatpush1.bf16.msra.mxu1 %v16845_v25  ;;  %11344 = vmatprep.subr.bf16.mxu0 %v16852_v45  ;;  %v8066_v25 = vld [vmem:[#allocation6 + $0x27d0] sm:$0xff] }
 0x5e7   :  { %11508 = vmatprep.subr.bf16.mxu1 %v16854_v43  ;;  %v8070_v45 = vld [vmem:[#allocation6 + $0x27f0] sm:$0xff]  ;;  %v8067_v43 = vld [vmem:[#allocation6 + $0x27d8] sm:$0xff] }
 0x5e8   :  { %v16908_v10 = vcombine.high %v8066_v25, %v8070_v45  ;;  %v16907_v20 = vcombine.low %v8066_v25, %v8070_v45  ;;  %v16909_v60 = vcombine.low %v8067_v43, %v8071_v44 }
 0x5e9   :  { %11345 = vmatpush1.bf16.msra.mxu0 %v16851_v31  ;;  %v16910_v31 = vcombine.high %v8067_v43, %v8071_v44  ;;  %v8122_v44 = vld [vmem:[#allocation6 + $0x2990] sm:$0xff] }
 0x5ea   :  { %11509 = vmatpush1.bf16.msra.mxu1 %v16853_v52  ;;  %11346 = vmatprep.subr.bf16.mxu0 %v16860_v53  ;;  %v8074_v52 = vld [vmem:[#allocation6 + $0x2810] sm:$0xff] }
 0x5eb   :  { %11510 = vmatprep.subr.bf16.mxu1 %v16862_v57  ;;  %v8078_v53 = vld [vmem:[#allocation6 + $0x2830] sm:$0xff]  ;;  %v8075_v57 = vld [vmem:[#allocation6 + $0x2818] sm:$0xff] }
 0x5ec   :  { %v16916_v61 = vcombine.high %v8074_v52, %v8078_v53  ;;  %v16917_v0 = vcombine.low %v8075_v57, %v8079_v47 }
 0x5ed   :  { %11347 = vmatpush1.bf16.msra.mxu0 %v16859_v13  ;;  %v16918_v13 = vcombine.high %v8075_v57, %v8079_v47  ;;  %v8130_v47 = vld [vmem:[#allocation6 + $0x29d0] sm:$0xff] }
 0x5ee   :  { %11511 = vmatpush1.bf16.msra.mxu1 %v16861_v59  ;;  %11348 = vmatprep.subr.bf16.mxu0 %v16868_v62  ;;  %v8082_v59 = vld [vmem:[#allocation6 + $0x2850] sm:$0xff] }
 0x5ef   :  { %11512 = vmatprep.subr.bf16.mxu1 %v16870_v56  ;;  %v8086_v62 = vld [vmem:[#allocation6 + $0x2870] sm:$0xff]  ;;  %v16915_v56 = vcombine.low %v8074_v52, %v8078_v53 }
 0x5f0   :  { %v16924_v41 = vcombine.high %v8082_v59, %v8086_v62  ;;  %v16923_v8 = vcombine.low %v8082_v59, %v8086_v62 }
 0x5f1   :  { %11349 = vmatpush1.bf16.msra.mxu0 %v16867_v1  ;;  %v8090_v1 = vld [vmem:[#allocation6 + $0x2890] sm:$0xff] }
 0x5f2   :  { %11513 = vmatpush1.bf16.msra.mxu1 %v16869_v12  ;;  %11350 = vmatprep.subr.bf16.mxu0 %v16876_v3  ;;  %v8094_v12 = vld [vmem:[#allocation6 + $0x28b0] sm:$0xff]  ;;  %v16926_v3 = vcombine.high %v8083_v5, %v8087_v55 }
 0x5f3   :  { %11514 = vmatprep.subr.bf16.mxu1 %v16878_v14  ;;  %v8091_v14 = vld [vmem:[#allocation6 + $0x2898] sm:$0xff]  ;;  %v16932_v26 = vcombine.high %v8090_v1, %v8094_v12  ;;  %v16931_v35 = vcombine.low %v8090_v1, %v8094_v12  ;;  %v8138_v5 = vld [vmem:[#allocation6 + $0x2a10] sm:$0xff] }
 0x5f4   :  { %v8142_v55 = vld [vmem:[#allocation6 + $0x2a30] sm:$0xff] }
 0x5f5   :  { %11351 = vmatpush1.bf16.msra.mxu0 %v16875_v18  ;;  %v16934_v18 = vcombine.high %v8091_v14, %v8095_v29 }
 0x5f6   :  { %11515 = vmatpush1.bf16.msra.mxu1 %v16877_v19  ;;  %11352 = vmatprep.subr.bf16.mxu0 %v16884_v21  ;;  %v8098_v19 = vld [vmem:[#allocation6 + $0x28d0] sm:$0xff] }
 0x5f7   :  { %11516 = vmatprep.subr.bf16.mxu1 %v16886_v28  ;;  %v8102_v21 = vld [vmem:[#allocation6 + $0x28f0] sm:$0xff]  ;;  %v8099_v28 = vld [vmem:[#allocation6 + $0x28d8] sm:$0xff] }
 0x5f8   :  { %v16940_v15 = vcombine.high %v8098_v19, %v8102_v21  ;;  %v16942_v50 = vcombine.high %v8099_v28, %v8103_v9  ;;  %v16941_v2 = vcombine.low %v8099_v28, %v8103_v9  ;;  %v8154_v9 = vld [vmem:[#allocation6 + $0x2a90] sm:$0xff] }
 0x5f9   :  { %11353 = vmatpush1.bf16.msra.mxu0 %v16883_v32  ;;  %v8106_v32 = vld [vmem:[#allocation6 + $0x2910] sm:$0xff] }
 0x5fa   :  { %11517 = vmatpush1.bf16.msra.mxu1 %v16885_v34  ;;  %11354 = vmatprep.subr.bf16.mxu0 %v16892_v36  ;;  %v8110_v34 = vld [vmem:[#allocation6 + $0x2930] sm:$0xff]  ;;  %v8107_v36 = vld [vmem:[#allocation6 + $0x2918] sm:$0xff] }
 0x5fb   :  { %11518 = vmatprep.subr.bf16.mxu1 %v16894_v63  ;;  %v8111_v63 = vld [vmem:[#allocation6 + $0x2938] sm:$0xff]  ;;  %v16948_v22 = vcombine.high %v8106_v32, %v8110_v34 }
 0x5fc   :  { %v16950_v17 = vcombine.high %v8107_v36, %v8111_v63  ;;  %v16949_v25 = vcombine.low %v8107_v36, %v8111_v63  ;;  %v8162_v63 = vld [vmem:[#allocation6 + $0x2ad0] sm:$0xff] }
 0x5fd   :  { %11355 = vmatpush1.bf16.msra.mxu0 %v16891_v39  ;;  %v8118_v39 = vld [vmem:[#allocation6 + $0x2970] sm:$0xff] }
 0x5fe   :  { %11519 = vmatpush1.bf16.msra.mxu1 %v16893_v40  ;;  %11356 = vmatprep.subr.bf16.mxu0 %v16900_v42  ;;  %v8115_v40 = vld [vmem:[#allocation6 + $0x2958] sm:$0xff]  ;;  %v16956_v45 = vcombine.high %v8114_v23, %v8118_v39 }
 0x5ff   :  { %11520 = vmatprep.subr.bf16.mxu1 %v16902_v37  ;;  %v8119_v42 = vld [vmem:[#allocation6 + $0x2978] sm:$0xff]  ;;  %v16947_v37 = vcombine.low %v8106_v32, %v8110_v34 }
 0x600   :  { %v16958_v43 = vcombine.high %v8115_v40, %v8119_v42  ;;  %v16957_v52 = vcombine.low %v8115_v40, %v8119_v42  ;;  %v8170_v42 = vld [vmem:[#allocation6 + $0x2b10] sm:$0xff] }
 0x601   :  { %11357 = vmatpush1.bf16.msra.mxu0 %v16899_v51  ;;  %v8126_v51 = vld [vmem:[#allocation6 + $0x29b0] sm:$0xff] }
 0x602   :  { %11521 = vmatpush1.bf16.msra.mxu1 %v16901_v46  ;;  %11358 = vmatprep.subr.bf16.mxu0 %v16908_v10  ;;  %v8123_v46 = vld [vmem:[#allocation6 + $0x2998] sm:$0xff]  ;;  %v16964_v53 = vcombine.high %v8122_v44, %v8126_v51 }
 0x603   :  { %11522 = vmatprep.subr.bf16.mxu1 %v16910_v31  ;;  %v8127_v10 = vld [vmem:[#allocation6 + $0x29b8] sm:$0xff]  ;;  %v16955_v31 = vcombine.low %v8114_v23, %v8118_v39 }
 0x604   :  { %v16966_v57 = vcombine.high %v8123_v46, %v8127_v10  ;;  %v16965_v59 = vcombine.low %v8123_v46, %v8127_v10  ;;  %v8178_v10 = vld [vmem:[#allocation6 + $0x2b50] sm:$0xff] }
 0x605   :  { %11359 = vmatpush1.bf16.msra.mxu0 %v16907_v20  ;;  %v8134_v20 = vld [vmem:[#allocation6 + $0x29f0] sm:$0xff] }
 0x606   :  { %11523 = vmatpush1.bf16.msra.mxu1 %v16909_v60  ;;  %11369 = vmatprep.subr.bf16.mxu0 %v16916_v61  ;;  %v8131_v60 = vld [vmem:[#allocation6 + $0x29d8] sm:$0xff]  ;;  %v16972_v62 = vcombine.high %v8130_v47, %v8134_v20  ;;  %v16971_v1 = vcombine.low %v8130_v47, %v8134_v20 }
 0x607   :  { %11533 = vmatprep.subr.bf16.mxu1 %v16918_v13  ;;  %v8135_v61 = vld [vmem:[#allocation6 + $0x29f8] sm:$0xff]  ;;  %v16963_v13 = vcombine.low %v8122_v44, %v8126_v51 }
 0x608   :  { %11361 = vmatmul.mubr.bf16.vlgmr.msra.gmra.mrb[20].mxu0 %v18357_v27  ;;  %v16973_v12 = vcombine.low %v8131_v60, %v8135_v61 }
 0x609   :  { %11525 = vmatmul.mubr.bf16.vlgmr.msra.gmra.mrb[20].mxu1 %v18357_v27  ;;  %11370 = vmatpush1.bf16.msra.mxu0 %v16915_v56  ;;  %v16933_v27 = vcombine.low %v8091_v14, %v8095_v29  ;;  %v16974_v56 = vcombine.high %v8131_v60, %v8135_v61  ;;  %v8146_v29 = vld [vmem:[#allocation6 + $0x2a50] sm:$0xff] }
 0x60a   :  { %11401 = vmatprep.mubr.bf16.mxu0 %v18371_v4  ;;  %11534 = vmatpush1.bf16.msra.mxu1 %v16917_v0  ;;  %v8139_v0 = vld [vmem:[#allocation6 + $0x2a18] sm:$0xff]  ;;  %v8186_v61 = vld [vmem:[#allocation6 + $0x2b90] sm:$0xff] }
 0x60b   :  { %11565 = vmatprep.mubr.bf16.mxu1 %v18371_v4  ;;  %11371 = vmatprep.subr.bf16.mxu0 %v16924_v41  ;;  %v16939_v4 = vcombine.low %v8098_v19, %v8102_v21  ;;  %v8143_v41 = vld [vmem:[#allocation6 + $0x2a38] sm:$0xff] }
 0x60c   :  { %11535 = vmatprep.subr.bf16.mxu1 %v16926_v3  ;;  %v16980_v3 = vcombine.high %v8138_v5, %v8142_v55  ;;  %v16982_v14 = vcombine.high %v8139_v0, %v8143_v41  ;;  %v16981_v19 = vcombine.low %v8139_v0, %v8143_v41  ;;  %v8194_v41 = vld [vmem:[#allocation6 + $0x2bd0] sm:$0xff] }
 0x60d   :  { %11372 = vmatpush1.bf16.msra.mxu0 %v16923_v8  ;;  %v8150_v8 = vld [vmem:[#allocation6 + $0x2a70] sm:$0xff] }
 0x60e   :  { %11536 = vmatpush1.bf16.msra.mxu1 %v16925_v11  ;;  %11373 = vmatprep.subr.bf16.mxu0 %v16932_v26  ;;  %v8147_v11 = vld [vmem:[#allocation6 + $0x2a58] sm:$0xff]  ;;  %v16988_v21 = vcombine.high %v8146_v29, %v8150_v8 }
 0x60f   :  { %11537 = vmatprep.subr.bf16.mxu1 %v16934_v18  ;;  %v8151_v26 = vld [vmem:[#allocation6 + $0x2a78] sm:$0xff]  ;;  %v16979_v18 = vcombine.low %v8138_v5, %v8142_v55 }
 0x610   :  { %v16990_v28 = vcombine.high %v8147_v11, %v8151_v26  ;;  %v16989_v32 = vcombine.low %v8147_v11, %v8151_v26  ;;  %v8202_v26 = vld [vmem:[#allocation6 + $0x2c10] sm:$0xff] }
 0x611   :  { %11374 = vmatpush1.bf16.msra.mxu0 %v16931_v35  ;;  %v8158_v35 = vld [vmem:[#allocation6 + $0x2ab0] sm:$0xff] }
 0x612   :  { %11538 = vmatpush1.bf16.msra.mxu1 %v16933_v27  ;;  %11375 = vmatprep.subr.bf16.mxu0 %v16940_v15  ;;  %v8155_v27 = vld [vmem:[#allocation6 + $0x2a98] sm:$0xff]  ;;  %v16996_v34 = vcombine.high %v8154_v9, %v8158_v35 }
 0x613   :  { %11539 = vmatprep.subr.bf16.mxu1 %v16942_v50  ;;  %v8159_v15 = vld [vmem:[#allocation6 + $0x2ab8] sm:$0xff]  ;;  %v16987_v50 = vcombine.low %v8146_v29, %v8150_v8 }
 0x614   :  { %v16998_v36 = vcombine.high %v8155_v27, %v8159_v15  ;;  %v16997_v23 = vcombine.low %v8155_v27, %v8159_v15  ;;  %v8210_v15 = vld [vmem:[#allocation6 + $0x2c50] sm:$0xff] }
 0x615   :  { %11376 = vmatpush1.bf16.msra.mxu0 %v16939_v4  ;;  %v8166_v4 = vld [vmem:[#allocation6 + $0x2af0] sm:$0xff] }
 0x616   :  { %11540 = vmatpush1.bf16.msra.mxu1 %v16941_v2  ;;  %11377 = vmatprep.subr.bf16.mxu0 %v16948_v22  ;;  %v8163_v2 = vld [vmem:[#allocation6 + $0x2ad8] sm:$0xff]  ;;  %v17004_v39 = vcombine.high %v8162_v63, %v8166_v4 }
 0x617   :  { %11541 = vmatprep.subr.bf16.mxu1 %v16950_v17  ;;  %v8167_v22 = vld [vmem:[#allocation6 + $0x2af8] sm:$0xff]  ;;  %v16995_v17 = vcombine.low %v8154_v9, %v8158_v35 }
 0x618   :  { %v17006_v40 = vcombine.high %v8163_v2, %v8167_v22  ;;  %v17005_v44 = vcombine.low %v8163_v2, %v8167_v22  ;;  %v8218_v2 = vld [vmem:[#allocation6 + $0x2c90] sm:$0xff] }
 0x619   :  { %11378 = vmatpush1.bf16.msra.mxu0 %v16947_v37  ;;  %v8174_v37 = vld [vmem:[#allocation6 + $0x2b30] sm:$0xff] }
 0x61a   :  { %11542 = vmatpush1.bf16.msra.mxu1 %v16949_v25  ;;  %11379 = vmatprep.subr.bf16.mxu0 %v16956_v45  ;;  %v8171_v25 = vld [vmem:[#allocation6 + $0x2b18] sm:$0xff]  ;;  %v17012_v51 = vcombine.high %v8170_v42, %v8174_v37  ;;  %v8222_v22 = vld [vmem:[#allocation6 + $0x2cb0] sm:$0xff] }
 0x61b   :  { %11543 = vmatprep.subr.bf16.mxu1 %v16958_v43  ;;  %v8175_v45 = vld [vmem:[#allocation6 + $0x2b38] sm:$0xff]  ;;  %v17003_v43 = vcombine.low %v8162_v63, %v8166_v4 }
 0x61c   :  { %v17014_v46 = vcombine.high %v8171_v25, %v8175_v45  ;;  %v17013_v47 = vcombine.low %v8171_v25, %v8175_v45  ;;  %v8226_v45 = vld [vmem:[#allocation6 + $0x2cd0] sm:$0xff] }
 0x61d   :  { %11380 = vmatpush1.bf16.msra.mxu0 %v16955_v31  ;;  %v8182_v31 = vld [vmem:[#allocation6 + $0x2b70] sm:$0xff] }
 0x61e   :  { %11544 = vmatpush1.bf16.msra.mxu1 %v16957_v52  ;;  %11381 = vmatprep.subr.bf16.mxu0 %v16964_v53  ;;  %v8179_v52 = vld [vmem:[#allocation6 + $0x2b58] sm:$0xff]  ;;  %v17020_v20 = vcombine.high %v8178_v10, %v8182_v31 }
 0x61f   :  { %11545 = vmatprep.subr.bf16.mxu1 %v16966_v57  ;;  %v8183_v53 = vld [vmem:[#allocation6 + $0x2b78] sm:$0xff]  ;;  %v17011_v57 = vcombine.low %v8170_v42, %v8174_v37  ;;  %v17060_v37 = vcombine.high %v8218_v2, %v8222_v22 }
 0x620   :  { %v17022_v60 = vcombine.high %v8179_v52, %v8183_v53  ;;  %v17021_v5 = vcombine.low %v8179_v52, %v8183_v53  ;;  %v8234_v52 = vld [vmem:[#allocation6 + $0x2d10] sm:$0xff] }
 0x621   :  { %11382 = vmatpush1.bf16.msra.mxu0 %v16963_v13  ;;  %v8190_v13 = vld [vmem:[#allocation6 + $0x2bb0] sm:$0xff] }
 0x622   :  { %11546 = vmatpush1.bf16.msra.mxu1 %v16965_v59  ;;  %11383 = vmatprep.subr.bf16.mxu0 %v16972_v62  ;;  %v8187_v59 = vld [vmem:[#allocation6 + $0x2b98] sm:$0xff]  ;;  %v17028_v55 = vcombine.high %v8186_v61, %v8190_v13  ;;  %v8238_v53 = vld [vmem:[#allocation6 + $0x2d30] sm:$0xff] }
 0x623   :  { %11547 = vmatprep.subr.bf16.mxu1 %v16974_v56  ;;  %v8191_v62 = vld [vmem:[#allocation6 + $0x2bb8] sm:$0xff]  ;;  %v17019_v56 = vcombine.low %v8178_v10, %v8182_v31 }
 0x624   :  { %v17030_v0 = vcombine.high %v8187_v59, %v8191_v62  ;;  %v17029_v29 = vcombine.low %v8187_v59, %v8191_v62  ;;  %v8246_v59 = vld [vmem:[#allocation6 + $0x2d70] sm:$0xff]  ;;  %v8243_v62 = vld [vmem:[#allocation6 + $0x2d58] sm:$0xff] }
 0x625   :  { %11384 = vmatpush1.bf16.msra.mxu0 %v16971_v1  ;;  %v8198_v1 = vld [vmem:[#allocation6 + $0x2bf0] sm:$0xff] }
 0x626   :  { %11548 = vmatpush1.bf16.msra.mxu1 %v16973_v12  ;;  %11385 = vmatprep.subr.bf16.mxu0 %v16980_v3  ;;  %v8195_v12 = vld [vmem:[#allocation6 + $0x2bd8] sm:$0xff]  ;;  %v17036_v8 = vcombine.high %v8194_v41, %v8198_v1 }
 0x627   :  { %11549 = vmatprep.subr.bf16.mxu1 %v16982_v14  ;;  %v8199_v3 = vld [vmem:[#allocation6 + $0x2bf8] sm:$0xff]  ;;  %v17027_v14 = vcombine.low %v8186_v61, %v8190_v13  ;;  %v8242_v13 = vld [vmem:[#allocation6 + $0x2d50] sm:$0xff] }
 0x628   :  { %v17038_v11 = vcombine.high %v8195_v12, %v8199_v3  ;;  %v17037_v9 = vcombine.low %v8195_v12, %v8199_v3  ;;  %v8254_v12 = vld [vmem:[#allocation6 + $0x2db0] sm:$0xff]  ;;  %v8251_v3 = vld [vmem:[#allocation6 + $0x2d98] sm:$0xff] }
 0x629   :  { %11386 = vmatpush1.bf16.msra.mxu0 %v16979_v18  ;;  %v8206_v18 = vld [vmem:[#allocation6 + $0x2c30] sm:$0xff] }
 0x62a   :  { %11550 = vmatpush1.bf16.msra.mxu1 %v16981_v19  ;;  %11387 = vmatprep.subr.bf16.mxu0 %v16988_v21  ;;  %v8203_v19 = vld [vmem:[#allocation6 + $0x2c18] sm:$0xff]  ;;  %v17044_v35 = vcombine.high %v8202_v26, %v8206_v18 }
 0x62b   :  { %11551 = vmatprep.subr.bf16.mxu1 %v16990_v28  ;;  %v8207_v21 = vld [vmem:[#allocation6 + $0x2c38] sm:$0xff]  ;;  %v17035_v28 = vcombine.low %v8194_v41, %v8198_v1  ;;  %v8250_v1 = vld [vmem:[#allocation6 + $0x2d90] sm:$0xff] }
 0x62c   :  { %v17046_v27 = vcombine.high %v8203_v19, %v8207_v21  ;;  %v17045_v63 = vcombine.low %v8203_v19, %v8207_v21  ;;  %v8258_v21 = vld [vmem:[#allocation6 + $0x2dd0] sm:$0xff] }
 0x62d   :  { %11388 = vmatpush1.bf16.msra.mxu0 %v16987_v50  ;;  %v8214_v50 = vld [vmem:[#allocation6 + $0x2c70] sm:$0xff] }
 0x62e   :  { %11552 = vmatpush1.bf16.msra.mxu1 %v16989_v32  ;;  %11389 = vmatprep.subr.bf16.mxu0 %v16996_v34  ;;  %v17043_v32 = vcombine.low %v8202_v26, %v8206_v18  ;;  %v8211_v34 = vld [vmem:[#allocation6 + $0x2c58] sm:$0xff]  ;;  %v17052_v4 = vcombine.high %v8210_v15, %v8214_v50 }
 0x62f   :  { %11553 = vmatprep.subr.bf16.mxu1 %v16998_v36  ;;  %v8215_v36 = vld [vmem:[#allocation6 + $0x2c78] sm:$0xff] }
 0x630   :  { %v17053_v42 = vcombine.low %v8211_v34, %v8215_v36 }
 0x631   :  { %11390 = vmatpush1.bf16.msra.mxu0 %v16995_v17  ;;  %v17054_v17 = vcombine.high %v8211_v34, %v8215_v36  ;;  %v17091_v34 = vcombine.low %v8250_v1, %v8254_v12 }
 0x632   :  { %11554 = vmatpush1.bf16.msra.mxu1 %v16997_v23  ;;  %11391 = vmatprep.subr.bf16.mxu0 %v17004_v39  ;;  %v8219_v23 = vld [vmem:[#allocation6 + $0x2c98] sm:$0xff] }
 0x633   :  { %11555 = vmatprep.subr.bf16.mxu1 %v17006_v40  ;;  %v8223_v39 = vld [vmem:[#allocation6 + $0x2cb8] sm:$0xff]  ;;  %v17051_v40 = vcombine.low %v8210_v15, %v8214_v50 }
 0x634   :  { %v17062_v25 = vcombine.high %v8219_v23, %v8223_v39  ;;  %v8263_v15 = vld [vmem:[#allocation6 + $0x2df8] sm:$0xff] }
 0x635   :  { %11392 = vmatpush1.bf16.msra.mxu0 %v17003_v43  ;;  %v8230_v43 = vld [vmem:[#allocation6 + $0x2cf0] sm:$0xff] }
 0x636   :  { %11556 = vmatpush1.bf16.msra.mxu1 %v17005_v44  ;;  %11393 = vmatprep.subr.bf16.mxu0 %v17012_v51  ;;  %v8227_v44 = vld [vmem:[#allocation6 + $0x2cd8] sm:$0xff]  ;;  %v17068_v10 = vcombine.high %v8226_v45, %v8230_v43 }
 0x637   :  { %11557 = vmatprep.subr.bf16.mxu1 %v17014_v46  ;;  %v8231_v51 = vld [vmem:[#allocation6 + $0x2cf8] sm:$0xff]  ;;  %v17059_v46 = vcombine.low %v8218_v2, %v8222_v22 }
 0x638   :  { %v17070_v31 = vcombine.high %v8227_v44, %v8231_v51 }
 0x639   :  { %11394 = vmatpush1.bf16.msra.mxu0 %v17011_v57  ;;  %v8235_v57 = vld [vmem:[#allocation6 + $0x2d18] sm:$0xff] }
 0x63a   :  { %11558 = vmatpush1.bf16.msra.mxu1 %v17013_v47  ;;  %11395 = vmatprep.subr.bf16.mxu0 %v17020_v20  ;;  %v8239_v47 = vld [vmem:[#allocation6 + $0x2d38] sm:$0xff]  ;;  %v17069_v20 = vcombine.low %v8227_v44, %v8231_v51  ;;  %v8278_v44 = vld [vmem:[#allocation6 + $0x2e70] sm:$0xff] }
 0x63b   :  { %11559 = vmatprep.subr.bf16.mxu1 %v17022_v60  ;;  %v17076_v60 = vcombine.high %v8234_v52, %v8238_v53  ;;  %v17078_v61 = vcombine.high %v8235_v57, %v8239_v47  ;;  %v8275_v51 = vld [vmem:[#allocation6 + $0x2e58] sm:$0xff] }
 0x63d   :  { %11396 = vmatpush1.bf16.msra.mxu0 %v17019_v56  ;;  %v8247_v56 = vld [vmem:[#allocation6 + $0x2d78] sm:$0xff] }
 0x63e   :  { %11560 = vmatpush1.bf16.msra.mxu1 %v17021_v5  ;;  %11397 = vmatprep.subr.bf16.mxu0 %v17028_v55  ;;  %v17075_v5 = vcombine.low %v8234_v52, %v8238_v53  ;;  %v17077_v55 = vcombine.low %v8235_v57, %v8239_v47  ;;  %v17086_v41 = vcombine.high %v8243_v62, %v8247_v56  ;;  %v8282_v53 = vld [vmem:[#allocation6 + $0x2e90] sm:$0xff]  ;;  %v8283_v47 = vld [vmem:[#allocation6 + $0x2e98] sm:$0xff] }
 0x63f   :  { %11561 = vmatprep.subr.bf16.mxu1 %v17030_v0  ;;  %v17084_v0 = vcombine.high %v8242_v13, %v8246_v59  ;;  %v8286_v57 = vld [vmem:[#allocation6 + $0x2eb0] sm:$0xff] }
 0x641   :  { %11398 = vmatpush1.bf16.msra.mxu0 %v17027_v14  ;;  %v8255_v14 = vld [vmem:[#allocation6 + $0x2db8] sm:$0xff] }
 0x642   :  { %11562 = vmatpush1.bf16.msra.mxu1 %v17029_v29  ;;  %11399 = vmatprep.subr.bf16.mxu0 %v17036_v8  ;;  %v17083_v29 = vcombine.low %v8242_v13, %v8246_v59  ;;  %v17085_v8 = vcombine.low %v8243_v62, %v8247_v56  ;;  %v17094_v19 = vcombine.high %v8251_v3, %v8255_v14  ;;  %v8290_v59 = vld [vmem:[#allocation6 + $0x2ed0] sm:$0xff]  ;;  %v8291_v56 = vld [vmem:[#allocation6 + $0x2ed8] sm:$0xff] }
 0x643   :  { %11563 = vmatprep.subr.bf16.mxu1 %v17038_v11  ;;  %v17092_v11 = vcombine.high %v8250_v1, %v8254_v12  ;;  %v8294_v62 = vld [vmem:[#allocation6 + $0x2ef0] sm:$0xff] }
 0x644   :  { %v8298_v12 = vld [vmem:[#allocation6 + $0x2f10] sm:$0xff] }
 0x645   :  { %11400 = vmatpush1.bf16.msra.mxu0 %v17035_v28  ;;  %v8262_v28 = vld [vmem:[#allocation6 + $0x2df0] sm:$0xff] }
 0x646   :  { %11564 = vmatpush1.bf16.msra.mxu1 %v17037_v9  ;;  %11410 = vmatprep.subr.bf16.mxu0 %v17044_v35  ;;  %v17100_v2 = vcombine.high %v8258_v21, %v8262_v28 }
 0x647   :  { %11574 = vmatprep.subr.bf16.mxu1 %v17046_v27  ;;  %v8259_v27 = vld [vmem:[#allocation6 + $0x2dd8] sm:$0xff] }
 0x648   :  { %11402 = vmatmul.mubr.bf16.vlgmr.msra.gmra.mrb[20].mxu0 %v18373_v7  ;;  %v17102_v22 = vcombine.high %v8259_v27, %v8263_v15 }
 0x649   :  { %11566 = vmatmul.mubr.bf16.vlgmr.msra.gmra.mrb[20].mxu1 %v18373_v7  ;;  %11411 = vmatpush1.bf16.msra.mxu0 %v17043_v32  ;;  %v17061_v7 = vcombine.low %v8219_v23, %v8223_v39  ;;  %v8270_v23 = vld [vmem:[#allocation6 + $0x2e30] sm:$0xff]  ;;  %v8267_v39 = vld [vmem:[#allocation6 + $0x2e18] sm:$0xff] }
 0x64a   :  { %11442 = vmatprep.mubr.bf16.mxu0 %v18377_v24  ;;  %11575 = vmatpush1.bf16.msra.mxu1 %v17045_v63 }
 0x64b   :  { %11606 = vmatprep.mubr.bf16.mxu1 %v18377_v24  ;;  %11412 = vmatprep.subr.bf16.mxu0 %v17052_v4  ;;  %v17067_v24 = vcombine.low %v8226_v45, %v8230_v43  ;;  %v17093_v4 = vcombine.low %v8251_v3, %v8255_v14  ;;  %v8274_v43 = vld [vmem:[#allocation6 + $0x2e50] sm:$0xff]  ;;  %v8299_v14 = vld [vmem:[#allocation6 + $0x2f18] sm:$0xff] }
 0x64c   :  { %11576 = vmatprep.subr.bf16.mxu1 %v17054_v17  ;;  %v8266_v17 = vld [vmem:[#allocation6 + $0x2e10] sm:$0xff] }
 0x64d   :  { %11413 = vmatpush1.bf16.msra.mxu0 %v17051_v40  ;;  %v8271_v40 = vld [vmem:[#allocation6 + $0x2e38] sm:$0xff]  ;;  %v8302_v3 = vld [vmem:[#allocation6 + $0x2f30] sm:$0xff] }
 0x64e   :  { %11577 = vmatpush1.bf16.msra.mxu1 %v17053_v42  ;;  %11414 = vmatprep.subr.bf16.mxu0 %v17060_v37  ;;  %v17099_v42 = vcombine.low %v8258_v21, %v8262_v28  ;;  %v17101_v37 = vcombine.low %v8259_v27, %v8263_v15  ;;  %v17110_v45 = vcombine.high %v8267_v39, %v8271_v40  ;;  %v8306_v28 = vld [vmem:[#allocation6 + $0x2f50] sm:$0xff]  ;;  %v8307_v15 = vld [vmem:[#allocation6 + $0x2f58] sm:$0xff] }
 0x64f   :  { %11578 = vmatprep.subr.bf16.mxu1 %v17062_v25  ;;  %v17108_v25 = vcombine.high %v8266_v17, %v8270_v23  ;;  %v8310_v27 = vld [vmem:[#allocation6 + $0x2f70] sm:$0xff] }
 0x651   :  { %11415 = vmatpush1.bf16.msra.mxu0 %v17059_v46  ;;  %v8279_v46 = vld [vmem:[#allocation6 + $0x2e78] sm:$0xff] }
 0x652   :  { %11579 = vmatpush1.bf16.msra.mxu1 %v17061_v7  ;;  %11416 = vmatprep.subr.bf16.mxu0 %v17068_v10  ;;  %v17107_v7 = vcombine.low %v8266_v17, %v8270_v23  ;;  %v17109_v10 = vcombine.low %v8267_v39, %v8271_v40  ;;  %v17118_v52 = vcombine.high %v8275_v51, %v8279_v46  ;;  %v8319_v17 = vld [vmem:[#allocation6 + $0x2fb8] sm:$0xff]  ;;  %v18412_v23 = vld [vmem:[#allocation8 + $0x10] sm:$0xff] }
 0x653   :  { %11580 = vmatprep.subr.bf16.mxu1 %v17070_v31  ;;  %v17116_v31 = vcombine.high %v8274_v43, %v8278_v44  ;;  %v17147_v39 = vcombine.low %v8306_v28, %v8310_v27 }
 0x655   :  { %11417 = vmatpush1.bf16.msra.mxu0 %v17067_v24  ;;  %v8287_v24 = vld [vmem:[#allocation6 + $0x2eb8] sm:$0xff] }
 0x656   :  { %11581 = vmatpush1.bf16.msra.mxu1 %v17069_v20  ;;  %11418 = vmatprep.subr.bf16.mxu0 %v17076_v60  ;;  %v17115_v20 = vcombine.low %v8274_v43, %v8278_v44  ;;  %v17117_v60 = vcombine.low %v8275_v51, %v8279_v46  ;;  %v17126_v13 = vcombine.high %v8283_v47, %v8287_v24  ;;  %v8323_v44 = vld [vmem:[#allocation6 + $0x2fd8] sm:$0xff] }
 0x657   :  { %11582 = vmatprep.subr.bf16.mxu1 %v17078_v61  ;;  %v17124_v61 = vcombine.high %v8282_v53, %v8286_v57  ;;  %v8338_v43 = vrot.slane %v18412_v23, %v18223_v16  ;;  %v8327_v51 = vld [vmem:[#allocation6 + $0x2ff8] sm:$0xff] }
 0x659   :  { %11419 = vmatpush1.bf16.msra.mxu0 %v17075_v5  ;;  %v8295_v5 = vld [vmem:[#allocation6 + $0x2ef8] sm:$0xff] }
 0x65a   :  { %11583 = vmatpush1.bf16.msra.mxu1 %v17077_v55  ;;  %11420 = vmatprep.subr.bf16.mxu0 %v17084_v0  ;;  %v17123_v55 = vcombine.low %v8282_v53, %v8286_v57  ;;  %v17125_v0 = vcombine.low %v8283_v47, %v8287_v24  ;;  %v17134_v1 = vcombine.high %v8291_v56, %v8295_v5  ;;  %v11668_v53 = vld [vmem:[#allocation6 + $0x3020] sm:$0xff]  ;;  %v11665_v47 = vld [vmem:[#allocation6 + $0x3008] sm:$0xff] }
 0x65b   :  { %v18404_v26 = vpop.f32.mrb[16].mxu0  ;;  %v18406_v18 = vpop.f32.mrb[16].mxu1  ;;  %11584 = vmatprep.subr.bf16.mxu1 %v17086_v41  ;;  %v17132_v41 = vcombine.high %v8290_v59, %v8294_v62  ;;  %v11669_v24 = vld [vmem:[#allocation6 + $0x3028] sm:$0xff] }
 0x65c   :  { %v18408_v9 = vpop.f32.mrb[17].mxu0  ;;  %v18410_v35 = vpop.f32.mrb[17].mxu1 }
 0x65d   :  { %v11120_v50 = vpop.f32.mrb[18].mxu0  ;;  %v11284_v32 = vpop.f32.mrb[18].mxu1  ;;  %11421 = vmatpush1.bf16.msra.mxu0 %v17083_v29  ;;  %v8303_v29 = vld [vmem:[#allocation6 + $0x2f38] sm:$0xff]  ;;  %v17765_v57 = vadd.f32 %v18408_v9, %v8338_v43  ;;  %v17181_v9 = vcombine.low %v11665_v47, %v11669_v24  ;;  %v11705_v43 = vld [vmem:[#allocation6 + $0x3148] sm:$0xff] }
 0x65e   :  { %11585 = vmatpush1.bf16.msra.mxu1 %v17085_v8  ;;  %v11121_v36 = vpop.f32.mrb[19].mxu0  ;;  %v11285_v63 = vpop.f32.mrb[19].mxu1  ;;  %11422 = vmatprep.subr.bf16.mxu0 %v17092_v11  ;;  %v17131_v8 = vcombine.low %v8290_v59, %v8294_v62  ;;  %v17133_v11 = vcombine.low %v8291_v56, %v8295_v5  ;;  %v17142_v21 = vcombine.high %v8299_v14, %v8303_v29  ;;  %v8311_v50 = vld [vmem:[#allocation6 + $0x2f78] sm:$0xff]  ;;  %v11672_v62 = vld [vmem:[#allocation6 + $0x3040] sm:$0xff] }
 0x65f   :  { %11586 = vmatprep.subr.bf16.mxu1 %v17094_v19  ;;  %v17140_v19 = vcombine.high %v8298_v12, %v8302_v3  ;;  %v17139_v32 = vcombine.low %v8298_v12, %v8302_v3  ;;  %v17148_v36 = vcombine.high %v8306_v28, %v8310_v27  ;;  %v17150_v63 = vcombine.high %v8307_v15, %v8311_v50  ;;  %v11676_v56 = vld [vmem:[#allocation6 + $0x3060] sm:$0xff] }
 0x660   :  { %v17149_v40 = vcombine.low %v8307_v15, %v8311_v50  ;;  %v11616_v59 = vmax.f32 %v17765_v57, 0.0  ;;  %v11684_v12 = vld [vmem:[#allocation6 + $0x30a0] sm:$0xff]  ;;  %v11689_v50 = vld [vmem:[#allocation6 + $0x30c8] sm:$0xff] }
 0x661   :  { %11423 = vmatpush1.bf16.msra.mxu0 %v17091_v34  ;;  %v17141_v34 = vcombine.low %v8299_v14, %v8303_v29  ;;  %v11681_v29 = vld [vmem:[#allocation6 + $0x3088] sm:$0xff]  ;;  %v11688_v27 = vld [vmem:[#allocation6 + $0x30c0] sm:$0xff] }
 0x662   :  { %11587 = vmatpush1.bf16.msra.mxu1 %v17093_v4  ;;  %11424 = vmatprep.subr.bf16.mxu0 %v17100_v2  ;;  %v8314_v4 = vld [vmem:[#allocation6 + $0x2f90] sm:$0xff]  ;;  %v18417_v3 = vpack.c.bf16 %v11616_v59, %v11616_v59  ;;  %v11692_v15 = vld [vmem:[#allocation6 + $0x30e0] sm:$0xff]  ;;  %v11717_v57 = vld [vmem:[#allocation6 + $0x31a8] sm:$0xff] }
 0x663   :  { %11588 = vmatprep.subr.bf16.mxu1 %v17102_v22  ;;  %v8318_v2 = vld [vmem:[#allocation6 + $0x2fb0] sm:$0xff]  ;;  %v8315_v22 = vld [vmem:[#allocation6 + $0x2f98] sm:$0xff]  ;;  %v11721_v59 = vld [vmem:[#allocation6 + $0x31c8] sm:$0xff] }
 0x664   :  { %v17155_v46 = vcombine.low %v8314_v4, %v8318_v2 }
 0x665   :  { %11425 = vmatpush1.bf16.msra.mxu0 %v17099_v42  ;;  %v17156_v42 = vcombine.high %v8314_v4, %v8318_v2  ;;  %v11696_v4 = vld [vmem:[#allocation6 + $0x3100] sm:$0xff] }
 0x666   :  { %11589 = vmatpush1.bf16.msra.mxu1 %v17101_v37  ;;  %11426 = vmatprep.subr.bf16.mxu0 %v17108_v25  ;;  %v17158_v37 = vcombine.high %v8315_v22, %v8319_v17  ;;  %v8322_v25 = vld [vmem:[#allocation6 + $0x2fd0] sm:$0xff]  ;;  %v11700_v2 = vld [vmem:[#allocation6 + $0x3120] sm:$0xff] }
 0x667   :  { %11590 = vmatprep.subr.bf16.mxu1 %v17110_v45  ;;  %v8326_v45 = vld [vmem:[#allocation6 + $0x2ff0] sm:$0xff] }
 0x669   :  { %11427 = vmatpush1.bf16.msra.mxu0 %v17107_v7  ;;  %v17157_v7 = vcombine.low %v8315_v22, %v8319_v17  ;;  %v11697_v22 = vld [vmem:[#allocation6 + $0x3108] sm:$0xff] }
 0x66a   :  { %11591 = vmatpush1.bf16.msra.mxu1 %v17109_v10  ;;  %11428 = vmatprep.subr.bf16.mxu0 %v17116_v31  ;;  %v17164_v10 = vcombine.high %v8322_v25, %v8326_v45  ;;  %v17166_v31 = vcombine.high %v8323_v44, %v8327_v51  ;;  %v11701_v17 = vld [vmem:[#allocation6 + $0x3128] sm:$0xff] }
 0x66b   :  { %11592 = vmatprep.subr.bf16.mxu1 %v17118_v52  ;;  %v11664_v52 = vld [vmem:[#allocation6 + $0x3000] sm:$0xff] }
 0x66c   :  { %v17179_v5 = vcombine.low %v11664_v52, %v11668_v53 }
 0x66d   :  { %11429 = vmatpush1.bf16.msra.mxu0 %v17115_v20  ;;  %v17163_v20 = vcombine.low %v8322_v25, %v8326_v45  ;;  %v11704_v25 = vld [vmem:[#allocation6 + $0x3140] sm:$0xff] }
 0x66e   :  { %11593 = vmatpush1.bf16.msra.mxu1 %v17117_v60  ;;  %11430 = vmatprep.subr.bf16.mxu0 %v17124_v61  ;;  %v17165_v60 = vcombine.low %v8323_v44, %v8327_v51  ;;  %v17180_v61 = vcombine.high %v11664_v52, %v11668_v53  ;;  %v11708_v45 = vld [vmem:[#allocation6 + $0x3160] sm:$0xff]  ;;  %v11709_v44 = vld [vmem:[#allocation6 + $0x3168] sm:$0xff]  ;;  %v17211_v51 = vcombine.low %v11696_v4, %v11700_v2 }
 0x66f   :  { %11594 = vmatprep.subr.bf16.mxu1 %v17126_v13  ;;  %v17182_v13 = vcombine.high %v11665_v47, %v11669_v24  ;;  %v11716_v52 = vld [vmem:[#allocation6 + $0x31a0] sm:$0xff]  ;;  %v11713_v53 = vld [vmem:[#allocation6 + $0x3188] sm:$0xff]  ;;  %v17219_v47 = vcombine.low %v11704_v25, %v11708_v45  ;;  %v17221_v24 = vcombine.low %v11705_v43, %v11709_v44 }
 0x671   :  { %11431 = vmatpush1.bf16.msra.mxu0 %v17123_v55  ;;  %v11673_v55 = vld [vmem:[#allocation6 + $0x3048] sm:$0xff] }
 0x672   :  { %11595 = vmatpush1.bf16.msra.mxu1 %v17125_v0  ;;  %11432 = vmatprep.subr.bf16.mxu0 %v17132_v41  ;;  %v11677_v0 = vld [vmem:[#allocation6 + $0x3068] sm:$0xff]  ;;  %v17188_v41 = vcombine.high %v11672_v62, %v11676_v56 }
 0x673   :  { %11596 = vmatprep.subr.bf16.mxu1 %v17134_v1  ;;  %v11680_v1 = vld [vmem:[#allocation6 + $0x3080] sm:$0xff]  ;;  %v17190_v14 = vcombine.high %v11673_v55, %v11677_v0 }
 0x675   :  { %11433 = vmatpush1.bf16.msra.mxu0 %v17131_v8  ;;  %v11685_v8 = vld [vmem:[#allocation6 + $0x30a8] sm:$0xff] }
 0x676   :  { %11597 = vmatpush1.bf16.msra.mxu1 %v17133_v11  ;;  %11434 = vmatprep.subr.bf16.mxu0 %v17140_v19  ;;  %v17187_v11 = vcombine.low %v11672_v62, %v11676_v56  ;;  %v17189_v19 = vcombine.low %v11673_v55, %v11677_v0  ;;  %v17198_v28 = vcombine.high %v11681_v29, %v11685_v8  ;;  %v11725_v62 = vld [vmem:[#allocation6 + $0x31e8] sm:$0xff] }
 0x677   :  { %11598 = vmatprep.subr.bf16.mxu1 %v17142_v21  ;;  %v17196_v21 = vcombine.high %v11680_v1, %v11684_v12  ;;  %v17238_v0 = vcombine.high %v11721_v59, %v11725_v62 }
 0x679   :  { %11435 = vmatpush1.bf16.msra.mxu0 %v17139_v32  ;;  %v11693_v32 = vld [vmem:[#allocation6 + $0x30e8] sm:$0xff] }
 0x67a   :  { %11599 = vmatpush1.bf16.msra.mxu1 %v17141_v34  ;;  %11436 = vmatprep.subr.bf16.mxu0 %v17148_v36  ;;  %v17195_v34 = vcombine.low %v11680_v1, %v11684_v12  ;;  %v17204_v36 = vcombine.high %v11688_v27, %v11692_v15  ;;  %v11729_v1 = vld [vmem:[#allocation6 + $0x3208] sm:$0xff] }
 0x67b   :  { %11600 = vmatprep.subr.bf16.mxu1 %v17150_v63  ;;  %v17206_v63 = vcombine.high %v11689_v50, %v11693_v32  ;;  %v11733_v12 = vld [vmem:[#allocation6 + $0x3228] sm:$0xff] }
 0x67d   :  { %11437 = vmatpush1.bf16.msra.mxu0 %v17147_v39  ;;  %v17203_v39 = vcombine.low %v11688_v27, %v11692_v15  ;;  %v11741_v27 = vld [vmem:[#allocation6 + $0x3268] sm:$0xff] }
 0x67e   :  { %11601 = vmatpush1.bf16.msra.mxu1 %v17149_v40  ;;  %11438 = vmatprep.subr.bf16.mxu0 %v17156_v42  ;;  %v17205_v40 = vcombine.low %v11689_v50, %v11693_v32  ;;  %v17212_v42 = vcombine.high %v11696_v4, %v11700_v2  ;;  %v17245_v50 = vcombine.low %v11729_v1, %v11733_v12  ;;  %v11749_v4 = vld [vmem:[#allocation6 + $0x32a8] sm:$0xff] }
 0x67f   :  { %11602 = vmatprep.subr.bf16.mxu1 %v17158_v37  ;;  %v17214_v37 = vcombine.high %v11697_v22, %v11701_v17 }
 0x681   :  { %11439 = vmatpush1.bf16.msra.mxu0 %v17155_v46  ;;  %v17213_v46 = vcombine.low %v11697_v22, %v11701_v17 }
 0x682   :  { %11603 = vmatpush1.bf16.msra.mxu1 %v17157_v7  ;;  %11440 = vmatprep.subr.bf16.mxu0 %v17164_v10  ;;  %v17220_v7 = vcombine.high %v11704_v25, %v11708_v45  ;;  %v17222_v10 = vcombine.high %v11705_v43, %v11709_v44  ;;  %v11757_v25 = vld [vmem:[#allocation6 + $0x32e8] sm:$0xff] }
 0x683   :  { %11604 = vmatprep.subr.bf16.mxu1 %v17166_v31  ;;  %v11712_v31 = vld [vmem:[#allocation6 + $0x3180] sm:$0xff] }
 0x684   :  { %v17227_v56 = vcombine.low %v11712_v31, %v11716_v52 }
 0x685   :  { %11441 = vmatpush1.bf16.msra.mxu0 %v17163_v20  ;;  %v17228_v20 = vcombine.high %v11712_v31, %v11716_v52  ;;  %v11765_v31 = vld [vmem:[#allocation6 + $0x3328] sm:$0xff] }
 0x686   :  { %11605 = vmatpush1.bf16.msra.mxu1 %v17165_v60  ;;  %14807 = vmatprep.subr.bf16.mxu0 %v17180_v61  ;;  %v17230_v60 = vcombine.high %v11713_v53, %v11717_v57  ;;  %v11720_v61 = vld [vmem:[#allocation6 + $0x31c0] sm:$0xff] }
 0x687   :  { %14971 = vmatprep.subr.bf16.mxu1 %v17182_v13  ;;  %v11724_v13 = vld [vmem:[#allocation6 + $0x31e0] sm:$0xff] }
 0x688   :  { %11443 = vmatmul.mubr.bf16.vlgmr.msra.gmra.mrb[20].mxu0 %v18386_v6  ;;  %v17236_v55 = vcombine.high %v11720_v61, %v11724_v13 }
 0x689   :  { %11607 = vmatmul.mubr.bf16.vlgmr.msra.gmra.mrb[20].mxu1 %v18386_v6  ;;  %14808 = vmatpush1.bf16.msra.mxu0 %v17179_v5  ;;  %v17197_v6 = vcombine.low %v11681_v29, %v11685_v8  ;;  %v17229_v5 = vcombine.low %v11713_v53, %v11717_v57  ;;  %v17237_v29 = vcombine.low %v11721_v59, %v11725_v62 }
 0x68a   :  { %14839 = vmatprep.mubr.bf16.mxu0 %v18417_v3  ;;  %14972 = vmatpush1.bf16.msra.mxu1 %v17181_v9  ;;  %v11728_v9 = vld [vmem:[#allocation6 + $0x3200] sm:$0xff] }
 0x68b   :  { %15003 = vmatprep.mubr.bf16.mxu1 %v18417_v3  ;;  %14809 = vmatprep.subr.bf16.mxu0 %v17188_v41  ;;  %v11732_v41 = vld [vmem:[#allocation6 + $0x3220] sm:$0xff] }
 0x68c   :  { %14973 = vmatprep.subr.bf16.mxu1 %v17190_v14  ;;  %v17235_v14 = vcombine.low %v11720_v61, %v11724_v13  ;;  %v17244_v8 = vcombine.high %v11728_v9, %v11732_v41  ;;  %v17243_v15 = vcombine.low %v11728_v9, %v11732_v41  ;;  %v11773_v61 = vld [vmem:[#allocation6 + $0x3368] sm:$0xff] }
 0x68d   :  { %14810 = vmatpush1.bf16.msra.mxu0 %v17187_v11  ;;  %v17246_v11 = vcombine.high %v11729_v1, %v11733_v12  ;;  %v11781_v9 = vld [vmem:[#allocation6 + $0x33a8] sm:$0xff]  ;;  %v8334_v1 = vrot.slane %v18412_v23, %v18237_v30 }
 0x68e   :  { %14974 = vmatpush1.bf16.msra.mxu1 %v17189_v19  ;;  %14811 = vmatprep.subr.bf16.mxu0 %v17196_v21  ;;  %v11736_v19 = vld [vmem:[#allocation6 + $0x3240] sm:$0xff] }
 0x68f   :  { %14975 = vmatprep.subr.bf16.mxu1 %v17198_v28  ;;  %v11740_v21 = vld [vmem:[#allocation6 + $0x3260] sm:$0xff]  ;;  %v11737_v28 = vld [vmem:[#allocation6 + $0x3248] sm:$0xff] }
 0x690   :  { %v17252_v32 = vcombine.high %v11736_v19, %v11740_v21  ;;  %v17251_v2 = vcombine.low %v11736_v19, %v11740_v21  ;;  %v17253_v22 = vcombine.low %v11737_v28, %v11741_v27  ;;  %v8346_v19 = vrot.slane %v18412_v23, %v18240_v38  ;;  %v11785_v21 = vld [vmem:[#allocation6 + $0x33c8] sm:$0xff] }
 0x691   :  { %14812 = vmatpush1.bf16.msra.mxu0 %v17195_v34  ;;  %v17254_v34 = vcombine.high %v11737_v28, %v11741_v27  ;;  %v11789_v28 = vld [vmem:[#allocation6 + $0x33e8] sm:$0xff] }
 0x692   :  { %14976 = vmatpush1.bf16.msra.mxu1 %v17197_v6  ;;  %14813 = vmatprep.subr.bf16.mxu0 %v17204_v36  ;;  %v11744_v6 = vld [vmem:[#allocation6 + $0x3280] sm:$0xff] }
 0x693   :  { %14977 = vmatprep.subr.bf16.mxu1 %v17206_v63  ;;  %v11748_v36 = vld [vmem:[#allocation6 + $0x32a0] sm:$0xff]  ;;  %v11745_v63 = vld [vmem:[#allocation6 + $0x3288] sm:$0xff] }
 0x694   :  { %v17260_v17 = vcombine.high %v11744_v6, %v11748_v36  ;;  %v17259_v45 = vcombine.low %v11744_v6, %v11748_v36  ;;  %v17261_v43 = vcombine.low %v11745_v63, %v11749_v4  ;;  %v11792_v6 = vld [vmem:[#allocation6 + $0x3400] sm:$0xff] }
 0x695   :  { %14814 = vmatpush1.bf16.msra.mxu0 %v17203_v39  ;;  %v17262_v39 = vcombine.high %v11745_v63, %v11749_v4  ;;  %v11796_v36 = vld [vmem:[#allocation6 + $0x3420] sm:$0xff]  ;;  %v17767_v63 = vadd.f32 %v18410_v35, %v8346_v19  ;;  %v11793_v4 = vld [vmem:[#allocation6 + $0x3408] sm:$0xff] }
 0x696   :  { %14978 = vmatpush1.bf16.msra.mxu1 %v17205_v40  ;;  %14815 = vmatprep.subr.bf16.mxu0 %v17212_v42  ;;  %v11752_v40 = vld [vmem:[#allocation6 + $0x32c0] sm:$0xff] }
 0x697   :  { %14979 = vmatprep.subr.bf16.mxu1 %v17214_v37  ;;  %v11756_v42 = vld [vmem:[#allocation6 + $0x32e0] sm:$0xff]  ;;  %v11753_v37 = vld [vmem:[#allocation6 + $0x32c8] sm:$0xff] }
 0x698   :  { %v17268_v44 = vcombine.high %v11752_v40, %v11756_v42  ;;  %v17267_v52 = vcombine.low %v11752_v40, %v11756_v42  ;;  %v17269_v53 = vcombine.low %v11753_v37, %v11757_v25  ;;  %v17308_v40 = vcombine.high %v11792_v6, %v11796_v36  ;;  %v11832_v19 = vld [vmem:[#allocation6 + $0x3540] sm:$0xff] }
 0x699   :  { %14816 = vmatpush1.bf16.msra.mxu0 %v17211_v51  ;;  %v17270_v51 = vcombine.high %v11753_v37, %v11757_v25  ;;  %v11618_v42 = vmax.f32 %v17767_v63, 0.0  ;;  %v11800_v37 = vld [vmem:[#allocation6 + $0x3440] sm:$0xff]  ;;  %v11841_v63 = vld [vmem:[#allocation6 + $0x3588] sm:$0xff] }
 0x69a   :  { %14980 = vmatpush1.bf16.msra.mxu1 %v17213_v46  ;;  %14817 = vmatprep.subr.bf16.mxu0 %v17220_v7  ;;  %v11760_v46 = vld [vmem:[#allocation6 + $0x3300] sm:$0xff] }
 0x69b   :  { %14981 = vmatprep.subr.bf16.mxu1 %v17222_v10  ;;  %v11764_v7 = vld [vmem:[#allocation6 + $0x3320] sm:$0xff]  ;;  %v11761_v10 = vld [vmem:[#allocation6 + $0x3308] sm:$0xff] }
 0x69c   :  { %v17276_v57 = vcombine.high %v11760_v46, %v11764_v7  ;;  %v17275_v13 = vcombine.low %v11760_v46, %v11764_v7  ;;  %v17277_v59 = vcombine.low %v11761_v10, %v11765_v31  ;;  %v11804_v25 = vld [vmem:[#allocation6 + $0x3460] sm:$0xff] }
 0x69d   :  { %14818 = vmatpush1.bf16.msra.mxu0 %v17219_v47  ;;  %v17278_v47 = vcombine.high %v11761_v10, %v11765_v31  ;;  %v17316_v46 = vcombine.high %v11800_v37, %v11804_v25  ;;  %v11808_v7 = vld [vmem:[#allocation6 + $0x3480] sm:$0xff]  ;;  %v18431_v31 = vpack.c.bf16 %v11618_v42, %v11618_v42  ;;  %v11849_v42 = vld [vmem:[#allocation6 + $0x35c8] sm:$0xff] }
 0x69e   :  { %14982 = vmatpush1.bf16.msra.mxu1 %v17221_v24  ;;  %14819 = vmatprep.subr.bf16.mxu0 %v17228_v20  ;;  %v11768_v24 = vld [vmem:[#allocation6 + $0x3340] sm:$0xff] }
 0x69f   :  { %14983 = vmatprep.subr.bf16.mxu1 %v17230_v60  ;;  %v11772_v20 = vld [vmem:[#allocation6 + $0x3360] sm:$0xff]  ;;  %v11769_v60 = vld [vmem:[#allocation6 + $0x3348] sm:$0xff] }
 0x6a0   :  { %v17284_v62 = vcombine.high %v11768_v24, %v11772_v20  ;;  %v17283_v41 = vcombine.low %v11768_v24, %v11772_v20  ;;  %v17285_v12 = vcombine.low %v11769_v60, %v11773_v61  ;;  %v11812_v10 = vld [vmem:[#allocation6 + $0x34a0] sm:$0xff] }
 0x6a1   :  { %14820 = vmatpush1.bf16.msra.mxu0 %v17227_v56  ;;  %v17286_v56 = vcombine.high %v11769_v60, %v11773_v61  ;;  %v17324_v20 = vcombine.high %v11808_v7, %v11812_v10  ;;  %v11816_v61 = vld [vmem:[#allocation6 + $0x34c0] sm:$0xff] }
 0x6a2   :  { %14984 = vmatpush1.bf16.msra.mxu1 %v17229_v5  ;;  %14821 = vmatprep.subr.bf16.mxu0 %v17236_v55  ;;  %v11776_v5 = vld [vmem:[#allocation6 + $0x3380] sm:$0xff] }
 0x6a3   :  { %14985 = vmatprep.subr.bf16.mxu1 %v17238_v0  ;;  %v11780_v55 = vld [vmem:[#allocation6 + $0x33a0] sm:$0xff]  ;;  %v11777_v0 = vld [vmem:[#allocation6 + $0x3388] sm:$0xff] }
 0x6a4   :  { %v17291_v27 = vcombine.low %v11776_v5, %v11780_v55 }
 0x6a5   :  { %14822 = vmatpush1.bf16.msra.mxu0 %v17235_v14  ;;  %v17292_v14 = vcombine.high %v11776_v5, %v11780_v55 }
 0x6a6   :  { %14986 = vmatpush1.bf16.msra.mxu1 %v17237_v29  ;;  %14823 = vmatprep.subr.bf16.mxu0 %v17244_v8  ;;  %v17294_v29 = vcombine.high %v11777_v0, %v11781_v9  ;;  %v11784_v8 = vld [vmem:[#allocation6 + $0x33c0] sm:$0xff] }
 0x6a7   :  { %14987 = vmatprep.subr.bf16.mxu1 %v17246_v11  ;;  %v11788_v11 = vld [vmem:[#allocation6 + $0x33e0] sm:$0xff] }
 0x6a9   :  { %14824 = vmatpush1.bf16.msra.mxu0 %v17243_v15  ;;  %v17764_v15 = vadd.f32 %v18404_v26, %v8334_v1  ;;  %v11825_v1 = vld [vmem:[#allocation6 + $0x3508] sm:$0xff] }
 0x6aa   :  { %14988 = vmatpush1.bf16.msra.mxu1 %v17245_v50  ;;  %14825 = vmatprep.subr.bf16.mxu0 %v17252_v32  ;;  %v17293_v50 = vcombine.low %v11777_v0, %v11781_v9  ;;  %v17300_v32 = vcombine.high %v11784_v8, %v11788_v11  ;;  %v11824_v9 = vld [vmem:[#allocation6 + $0x3500] sm:$0xff] }
 0x6ab   :  { %14989 = vmatprep.subr.bf16.mxu1 %v17254_v34  ;;  %v17302_v34 = vcombine.high %v11785_v21, %v11789_v28 }
 0x6ad   :  { %14826 = vmatpush1.bf16.msra.mxu0 %v17251_v2  ;;  %v11797_v2 = vld [vmem:[#allocation6 + $0x3428] sm:$0xff] }
 0x6ae   :  { %14990 = vmatpush1.bf16.msra.mxu1 %v17253_v22  ;;  %14827 = vmatprep.subr.bf16.mxu0 %v17260_v17  ;;  %v17299_v22 = vcombine.low %v11784_v8, %v11788_v11  ;;  %v11615_v17 = vmax.f32 %v17764_v15, 0.0  ;;  %v17310_v26 = vcombine.high %v11793_v4, %v11797_v2  ;;  %v17309_v35 = vcombine.low %v11793_v4, %v11797_v2  ;;  %v11845_v4 = vld [vmem:[#allocation6 + $0x35a8] sm:$0xff] }
 0x6af   :  { %14991 = vmatprep.subr.bf16.mxu1 %v17262_v39  ;;  %v17301_v39 = vcombine.low %v11785_v21, %v11789_v28  ;;  %v11836_v21 = vld [vmem:[#allocation6 + $0x3560] sm:$0xff]  ;;  %v11833_v28 = vld [vmem:[#allocation6 + $0x3548] sm:$0xff] }
 0x6b0   :  { %v17347_v2 = vcombine.low %v11832_v19, %v11836_v21 }
 0x6b1   :  { %14828 = vmatpush1.bf16.msra.mxu0 %v17259_v45  ;;  %v17307_v45 = vcombine.low %v11792_v6, %v11796_v36  ;;  %v11840_v6 = vld [vmem:[#allocation6 + $0x3580] sm:$0xff] }
 0x6b2   :  { %14992 = vmatpush1.bf16.msra.mxu1 %v17261_v43  ;;  %14829 = vmatprep.subr.bf16.mxu0 %v17268_v44  ;;  %v11801_v43 = vld [vmem:[#allocation6 + $0x3448] sm:$0xff]  ;;  %v11844_v36 = vld [vmem:[#allocation6 + $0x35a0] sm:$0xff] }
 0x6b3   :  { %14993 = vmatprep.subr.bf16.mxu1 %v17270_v51  ;;  %v11805_v44 = vld [vmem:[#allocation6 + $0x3468] sm:$0xff]  ;;  %v18429_v51 = vpack.c.bf16 %v11615_v17, %v11615_v17  ;;  %v17356_v17 = vcombine.high %v11840_v6, %v11844_v36 }
 0x6b4   :  { %v17317_v24 = vcombine.low %v11801_v43, %v11805_v44 }
 0x6b5   :  { %14830 = vmatpush1.bf16.msra.mxu0 %v17267_v52  ;;  %v17318_v52 = vcombine.high %v11801_v43, %v11805_v44 }
 0x6b6   :  { %14994 = vmatpush1.bf16.msra.mxu1 %v17269_v53  ;;  %14831 = vmatprep.subr.bf16.mxu0 %v17276_v57  ;;  %v11809_v53 = vld [vmem:[#allocation6 + $0x3488] sm:$0xff] }
 0x6b7   :  { %14995 = vmatprep.subr.bf16.mxu1 %v17278_v47  ;;  %v11813_v57 = vld [vmem:[#allocation6 + $0x34a8] sm:$0xff]  ;;  %v17315_v47 = vcombine.low %v11800_v37, %v11804_v25  ;;  %v17355_v25 = vcombine.low %v11840_v6, %v11844_v36 }
 0x6b8   :  { %v17326_v60 = vcombine.high %v11809_v53, %v11813_v57  ;;  %v17325_v5 = vcombine.low %v11809_v53, %v11813_v57  ;;  %v11853_v37 = vld [vmem:[#allocation6 + $0x35e8] sm:$0xff] }
 0x6b9   :  { %14832 = vmatpush1.bf16.msra.mxu0 %v17275_v13  ;;  %v11820_v13 = vld [vmem:[#allocation6 + $0x34e0] sm:$0xff]  ;;  %v17366_v44 = vcombine.high %v11849_v42, %v11853_v37  ;;  %v17365_v53 = vcombine.low %v11849_v42, %v11853_v37  ;;  %v11893_v6 = vld [vmem:[#allocation6 + $0x3728] sm:$0xff] }
 0x6ba   :  { %14996 = vmatpush1.bf16.msra.mxu1 %v17277_v59  ;;  %14833 = vmatprep.subr.bf16.mxu0 %v17284_v62  ;;  %v11817_v59 = vld [vmem:[#allocation6 + $0x34c8] sm:$0xff]  ;;  %v17332_v55 = vcombine.high %v11816_v61, %v11820_v13 }
 0x6bb   :  { %14997 = vmatprep.subr.bf16.mxu1 %v17286_v56  ;;  %v11821_v62 = vld [vmem:[#allocation6 + $0x34e8] sm:$0xff]  ;;  %v17323_v56 = vcombine.low %v11808_v7, %v11812_v10 }
 0x6bc   :  { %v17334_v0 = vcombine.high %v11817_v59, %v11821_v62  ;;  %v11857_v7 = vld [vmem:[#allocation6 + $0x3608] sm:$0xff] }
 0x6bd   :  { %14834 = vmatpush1.bf16.msra.mxu0 %v17283_v41  ;;  %v11828_v41 = vld [vmem:[#allocation6 + $0x3520] sm:$0xff]  ;;  %v11861_v10 = vld [vmem:[#allocation6 + $0x3628] sm:$0xff] }
 0x6be   :  { %14998 = vmatpush1.bf16.msra.mxu1 %v17285_v12  ;;  %14835 = vmatprep.subr.bf16.mxu0 %v17292_v14  ;;  %v11829_v12 = vld [vmem:[#allocation6 + $0x3528] sm:$0xff]  ;;  %v17331_v14 = vcombine.low %v11816_v61, %v11820_v13  ;;  %v17340_v8 = vcombine.high %v11824_v9, %v11828_v41  ;;  %v17339_v15 = vcombine.low %v11824_v9, %v11828_v41 }
 0x6bf   :  { %14999 = vmatprep.subr.bf16.mxu1 %v17294_v29  ;;  %v17333_v29 = vcombine.low %v11817_v59, %v11821_v62  ;;  %v17342_v11 = vcombine.high %v11825_v1, %v11829_v12  ;;  %v11869_v61 = vld [vmem:[#allocation6 + $0x3668] sm:$0xff]  ;;  %v17373_v59 = vcombine.low %v11857_v7, %v11861_v10 }
 0x6c0   :  { %v11877_v9 = vld [vmem:[#allocation6 + $0x36a8] sm:$0xff] }
 0x6c1   :  { %14836 = vmatpush1.bf16.msra.mxu0 %v17291_v27  ;;  %v11837_v27 = vld [vmem:[#allocation6 + $0x3568] sm:$0xff] }
 0x6c2   :  { %15000 = vmatpush1.bf16.msra.mxu1 %v17293_v50  ;;  %14837 = vmatprep.subr.bf16.mxu0 %v17300_v32  ;;  %v17341_v50 = vcombine.low %v11825_v1, %v11829_v12  ;;  %v17348_v32 = vcombine.high %v11832_v19, %v11836_v21  ;;  %v11885_v19 = vld [vmem:[#allocation6 + $0x36e8] sm:$0xff] }
 0x6c3   :  { %15001 = vmatprep.subr.bf16.mxu1 %v17302_v34  ;;  %v17350_v34 = vcombine.high %v11833_v28, %v11837_v27 }
 0x6c5   :  { %14838 = vmatpush1.bf16.msra.mxu0 %v17299_v22  ;;  %v17349_v22 = vcombine.low %v11833_v28, %v11837_v27 }
 0x6c6   :  { %15002 = vmatpush1.bf16.msra.mxu1 %v17301_v39  ;;  %14848 = vmatprep.subr.bf16.mxu0 %v17308_v40  ;;  %v17358_v39 = vcombine.high %v11841_v63, %v11845_v4  ;;  %v11848_v40 = vld [vmem:[#allocation6 + $0x35c0] sm:$0xff] }
 0x6c7   :  { %15012 = vmatprep.subr.bf16.mxu1 %v17310_v26  ;;  %v11852_v26 = vld [vmem:[#allocation6 + $0x35e0] sm:$0xff] }
 0x6c8   :  { %14840 = vmatmul.mubr.bf16.vlgmr.msra.gmra.mrb[24].mxu0 %v18429_v51  ;;  %v17364_v43 = vcombine.high %v11848_v40, %v11852_v26 }
 0x6c9   :  { %15004 = vmatmul.mubr.bf16.vlgmr.msra.gmra.mrb[24].mxu1 %v18429_v51  ;;  %14849 = vmatpush1.bf16.msra.mxu0 %v17307_v45  ;;  %v17357_v45 = vcombine.low %v11841_v63, %v11845_v4 }
 0x6ca   :  { %14880 = vmatprep.mubr.bf16.mxu0 %v18431_v31  ;;  %15013 = vmatpush1.bf16.msra.mxu1 %v17309_v35  ;;  %v11856_v35 = vld [vmem:[#allocation6 + $0x3600] sm:$0xff] }
 0x6cb   :  { %15044 = vmatprep.mubr.bf16.mxu1 %v18431_v31  ;;  %14850 = vmatprep.subr.bf16.mxu0 %v17316_v46  ;;  %v11860_v46 = vld [vmem:[#allocation6 + $0x3620] sm:$0xff] }
 0x6cc   :  { %15014 = vmatprep.subr.bf16.mxu1 %v17318_v52  ;;  %v17363_v52 = vcombine.low %v11848_v40, %v11852_v26  ;;  %v17372_v57 = vcombine.high %v11856_v35, %v11860_v46  ;;  %v17371_v13 = vcombine.low %v11856_v35, %v11860_v46  ;;  %v11901_v40 = vld [vmem:[#allocation6 + $0x3768] sm:$0xff] }
 0x6cd   :  { %14851 = vmatpush1.bf16.msra.mxu0 %v17315_v47  ;;  %v17374_v47 = vcombine.high %v11857_v7, %v11861_v10  ;;  %v11909_v35 = vld [vmem:[#allocation6 + $0x37a8] sm:$0xff]  ;;  %v8342_v7 = vrot.slane %v18412_v23, %v18257_v54 }
 0x6ce   :  { %15015 = vmatpush1.bf16.msra.mxu1 %v17317_v24  ;;  %14852 = vmatprep.subr.bf16.mxu0 %v17324_v20  ;;  %v11864_v24 = vld [vmem:[#allocation6 + $0x3640] sm:$0xff] }
 0x6cf   :  { %15016 = vmatprep.subr.bf16.mxu1 %v17326_v60  ;;  %v11868_v20 = vld [vmem:[#allocation6 + $0x3660] sm:$0xff]  ;;  %v11865_v60 = vld [vmem:[#allocation6 + $0x3648] sm:$0xff] }
 0x6d0   :  { %v17380_v62 = vcombine.high %v11864_v24, %v11868_v20  ;;  %v17379_v41 = vcombine.low %v11864_v24, %v11868_v20  ;;  %v17381_v1 = vcombine.low %v11865_v60, %v11869_v61  ;;  %v11913_v24 = vld [vmem:[#allocation6 + $0x37c8] sm:$0xff] }
 0x6d1   :  { %14853 = vmatpush1.bf16.msra.mxu0 %v17323_v56  ;;  %v17382_v56 = vcombine.high %v11865_v60, %v11869_v61  ;;  %v11917_v20 = vld [vmem:[#allocation6 + $0x37e8] sm:$0xff]  ;;  %v17766_v61 = vadd.f32 %v18406_v18, %v8342_v7  ;;  %v11928_v18 = vld [vmem:[#allocation6 + $0x3840] sm:$0xff] }
 0x6d2   :  { %15017 = vmatpush1.bf16.msra.mxu1 %v17325_v5  ;;  %14854 = vmatprep.subr.bf16.mxu0 %v17332_v55  ;;  %v11872_v5 = vld [vmem:[#allocation6 + $0x3680] sm:$0xff]  ;;  %v17430_v23 = vcombine.high %v11913_v24, %v11917_v20 }
 0x6d3   :  { %15018 = vmatprep.subr.bf16.mxu1 %v17334_v0  ;;  %v11876_v55 = vld [vmem:[#allocation6 + $0x36a0] sm:$0xff]  ;;  %v11873_v0 = vld [vmem:[#allocation6 + $0x3688] sm:$0xff] }
 0x6d4   :  { %v17388_v12 = vcombine.high %v11872_v5, %v11876_v55  ;;  %v17387_v21 = vcombine.low %v11872_v5, %v11876_v55  ;;  %v17389_v28 = vcombine.low %v11873_v0, %v11877_v9  ;;  %v11921_v5 = vld [vmem:[#allocation6 + $0x3808] sm:$0xff] }
 0x6d5   :  { %14855 = vmatpush1.bf16.msra.mxu0 %v17331_v14  ;;  %v17390_v14 = vcombine.high %v11873_v0, %v11877_v9  ;;  %v11925_v55 = vld [vmem:[#allocation6 + $0x3828] sm:$0xff]  ;;  %v11617_v9 = vmax.f32 %v17766_v61, 0.0 }
 0x6d6   :  { %15019 = vmatpush1.bf16.msra.mxu1 %v17333_v29  ;;  %14856 = vmatprep.subr.bf16.mxu0 %v17340_v8  ;;  %v11880_v29 = vld [vmem:[#allocation6 + $0x36c0] sm:$0xff] }
 0x6d7   :  { %15020 = vmatprep.subr.bf16.mxu1 %v17342_v11  ;;  %v11884_v8 = vld [vmem:[#allocation6 + $0x36e0] sm:$0xff]  ;;  %v11881_v11 = vld [vmem:[#allocation6 + $0x36c8] sm:$0xff] }
 0x6d8   :  { %v17396_v27 = vcombine.high %v11880_v29, %v11884_v8  ;;  %v17395_v36 = vcombine.low %v11880_v29, %v11884_v8  ;;  %v17397_v63 = vcombine.low %v11881_v11, %v11885_v19  ;;  %v11929_v29 = vld [vmem:[#allocation6 + $0x3848] sm:$0xff] }
 0x6d9   :  { %14857 = vmatpush1.bf16.msra.mxu0 %v17339_v15  ;;  %v17398_v15 = vcombine.high %v11881_v11, %v11885_v19  ;;  %v11933_v8 = vld [vmem:[#allocation6 + $0x3868] sm:$0xff]  ;;  %v18440_v19 = vpack.c.bf16 %v11617_v9, %v11617_v9  ;;  %v11976_v9 = vld [vmem:[#allocation6 + $0x39c0] sm:$0xff] }
 0x6da   :  { %15021 = vmatpush1.bf16.msra.mxu1 %v17341_v50  ;;  %14858 = vmatprep.subr.bf16.mxu0 %v17348_v32  ;;  %v11888_v50 = vld [vmem:[#allocation6 + $0x3700] sm:$0xff] }
 0x6db   :  { %15022 = vmatprep.subr.bf16.mxu1 %v17350_v34  ;;  %v11892_v32 = vld [vmem:[#allocation6 + $0x3720] sm:$0xff]  ;;  %v11889_v34 = vld [vmem:[#allocation6 + $0x3708] sm:$0xff] }
 0x6dc   :  { %v17404_v4 = vcombine.high %v11888_v50, %v11892_v32  ;;  %v17403_v26 = vcombine.low %v11888_v50, %v11892_v32  ;;  %v17405_v42 = vcombine.low %v11889_v34, %v11893_v6  ;;  %v11940_v50 = vld [vmem:[#allocation6 + $0x38a0] sm:$0xff]  ;;  %v11937_v32 = vld [vmem:[#allocation6 + $0x3888] sm:$0xff] }
 0x6dd   :  { %14859 = vmatpush1.bf16.msra.mxu0 %v17347_v2  ;;  %v17406_v2 = vcombine.high %v11889_v34, %v11893_v6  ;;  %v11941_v34 = vld [vmem:[#allocation6 + $0x38a8] sm:$0xff] }
 0x6de   :  { %15023 = vmatpush1.bf16.msra.mxu1 %v17349_v22  ;;  %14860 = vmatprep.subr.bf16.mxu0 %v17356_v17  ;;  %v11896_v22 = vld [vmem:[#allocation6 + $0x3740] sm:$0xff] }
 0x6df   :  { %15024 = vmatprep.subr.bf16.mxu1 %v17358_v39  ;;  %v11900_v17 = vld [vmem:[#allocation6 + $0x3760] sm:$0xff]  ;;  %v11897_v39 = vld [vmem:[#allocation6 + $0x3748] sm:$0xff] }
 0x6e0   :  { %v17412_v37 = vcombine.high %v11896_v22, %v11900_v17  ;;  %v17411_v46 = vcombine.low %v11896_v22, %v11900_v17  ;;  %v17413_v10 = vcombine.low %v11897_v39, %v11901_v40  ;;  %v11948_v22 = vld [vmem:[#allocation6 + $0x38e0] sm:$0xff]  ;;  %v11945_v17 = vld [vmem:[#allocation6 + $0x38c8] sm:$0xff] }
 0x6e1   :  { %14861 = vmatpush1.bf16.msra.mxu0 %v17355_v25  ;;  %v17414_v25 = vcombine.high %v11897_v39, %v11901_v40  ;;  %v11949_v39 = vld [vmem:[#allocation6 + $0x38e8] sm:$0xff] }
 0x6e2   :  { %15025 = vmatpush1.bf16.msra.mxu1 %v17357_v45  ;;  %14862 = vmatprep.subr.bf16.mxu0 %v17364_v43  ;;  %v11904_v45 = vld [vmem:[#allocation6 + $0x3780] sm:$0xff] }
 0x6e3   :  { %15026 = vmatprep.subr.bf16.mxu1 %v17366_v44  ;;  %v11908_v43 = vld [vmem:[#allocation6 + $0x37a0] sm:$0xff]  ;;  %v11905_v44 = vld [vmem:[#allocation6 + $0x3788] sm:$0xff] }
 0x6e4   :  { %v17419_v60 = vcombine.low %v11904_v45, %v11908_v43 }
 0x6e5   :  { %14863 = vmatpush1.bf16.msra.mxu0 %v17363_v52  ;;  %v17420_v52 = vcombine.high %v11904_v45, %v11908_v43  ;;  %v11956_v45 = vld [vmem:[#allocation6 + $0x3920] sm:$0xff]  ;;  %v11953_v43 = vld [vmem:[#allocation6 + $0x3908] sm:$0xff] }
 0x6e6   :  { %15027 = vmatpush1.bf16.msra.mxu1 %v17365_v53  ;;  %14864 = vmatprep.subr.bf16.mxu0 %v17372_v57  ;;  %v17422_v53 = vcombine.high %v11905_v44, %v11909_v35  ;;  %v11912_v57 = vld [vmem:[#allocation6 + $0x37c0] sm:$0xff] }
 0x6e7   :  { %15028 = vmatprep.subr.bf16.mxu1 %v17374_v47  ;;  %v11916_v47 = vld [vmem:[#allocation6 + $0x37e0] sm:$0xff] }
 0x6e8   :  { %v17427_v0 = vcombine.low %v11912_v57, %v11916_v47 }
 0x6e9   :  { %14865 = vmatpush1.bf16.msra.mxu0 %v17371_v13  ;;  %v17421_v13 = vcombine.low %v11905_v44, %v11909_v35  ;;  %v11957_v44 = vld [vmem:[#allocation6 + $0x3928] sm:$0xff] }
 0x6ea   :  { %15029 = vmatpush1.bf16.msra.mxu1 %v17373_v59  ;;  %14866 = vmatprep.subr.bf16.mxu0 %v17380_v62  ;;  %v17428_v59 = vcombine.high %v11912_v57, %v11916_v47  ;;  %v11920_v62 = vld [vmem:[#allocation6 + $0x3800] sm:$0xff]  ;;  %v11961_v57 = vld [vmem:[#allocation6 + $0x3948] sm:$0xff] }
 0x6eb   :  { %15030 = vmatprep.subr.bf16.mxu1 %v17382_v56  ;;  %v11924_v56 = vld [vmem:[#allocation6 + $0x3820] sm:$0xff]  ;;  %v11965_v47 = vld [vmem:[#allocation6 + $0x3968] sm:$0xff] }
 0x6ec   :  { %v17435_v11 = vcombine.low %v11920_v62, %v11924_v56  ;;  %v17478_v61 = vcombine.high %v11961_v57, %v11965_v47 }
 0x6ed   :  { %14867 = vmatpush1.bf16.msra.mxu0 %v17379_v41  ;;  %v17429_v41 = vcombine.low %v11913_v24, %v11917_v20  ;;  %v17469_v20 = vcombine.low %v11953_v43, %v11957_v44 }
 0x6ee   :  { %15031 = vmatpush1.bf16.msra.mxu1 %v17381_v1  ;;  %14868 = vmatprep.subr.bf16.mxu0 %v17388_v12  ;;  %v17436_v1 = vcombine.high %v11920_v62, %v11924_v56  ;;  %v17438_v12 = vcombine.high %v11921_v5, %v11925_v55  ;;  %v11973_v62 = vld [vmem:[#allocation6 + $0x39a8] sm:$0xff] }
 0x6ef   :  { %15032 = vmatprep.subr.bf16.mxu1 %v17390_v14  ;;  %v11932_v14 = vld [vmem:[#allocation6 + $0x3860] sm:$0xff] }
 0x6f0   :  { %v17443_v6 = vcombine.low %v11928_v18, %v11932_v14 }
 0x6f1   :  { %14869 = vmatpush1.bf16.msra.mxu0 %v17387_v21  ;;  %v17437_v21 = vcombine.low %v11921_v5, %v11925_v55  ;;  %v17477_v5 = vcombine.low %v11961_v57, %v11965_v47 }
 0x6f2   :  { %15033 = vmatpush1.bf16.msra.mxu1 %v17389_v28  ;;  %14870 = vmatprep.subr.bf16.mxu0 %v17396_v27  ;;  %v17444_v28 = vcombine.high %v11928_v18, %v11932_v14  ;;  %v17446_v27 = vcombine.high %v11929_v29, %v11933_v8 }
 0x6f3   :  { %15034 = vmatprep.subr.bf16.mxu1 %v17398_v15  ;;  %v11936_v15 = vld [vmem:[#allocation6 + $0x3880] sm:$0xff] }
 0x6f4   :  { %v17451_v40 = vcombine.low %v11936_v15, %v11940_v50 }
 0x6f5   :  { %14871 = vmatpush1.bf16.msra.mxu0 %v17395_v36  ;;  %v17445_v36 = vcombine.low %v11929_v29, %v11933_v8 }
 0x6f6   :  { %15035 = vmatpush1.bf16.msra.mxu1 %v17397_v63  ;;  %14872 = vmatprep.subr.bf16.mxu0 %v17404_v4  ;;  %v17452_v63 = vcombine.high %v11936_v15, %v11940_v50  ;;  %v17454_v4 = vcombine.high %v11937_v32, %v11941_v34 }
 0x6f7   :  { %15036 = vmatprep.subr.bf16.mxu1 %v17406_v2  ;;  %v11944_v2 = vld [vmem:[#allocation6 + $0x38c0] sm:$0xff] }
 0x6f8   :  { %v17459_v35 = vcombine.low %v11944_v2, %v11948_v22 }
 0x6f9   :  { %14873 = vmatpush1.bf16.msra.mxu0 %v17403_v26  ;;  %v17453_v26 = vcombine.low %v11937_v32, %v11941_v34 }
 0x6fa   :  { %15037 = vmatpush1.bf16.msra.mxu1 %v17405_v42  ;;  %14874 = vmatprep.subr.bf16.mxu0 %v17412_v37  ;;  %v17460_v42 = vcombine.high %v11944_v2, %v11948_v22  ;;  %v17462_v37 = vcombine.high %v11945_v17, %v11949_v39 }
 0x6fb   :  { %15038 = vmatprep.subr.bf16.mxu1 %v17414_v25  ;;  %v11952_v25 = vld [vmem:[#allocation6 + $0x3900] sm:$0xff] }
 0x6fc   :  { %v17468_v7 = vcombine.high %v11952_v25, %v11956_v45  ;;  %v17467_v24 = vcombine.low %v11952_v25, %v11956_v45 }
 0x6fd   :  { %14875 = vmatpush1.bf16.msra.mxu0 %v17411_v46  ;;  %v17461_v46 = vcombine.low %v11945_v17, %v11949_v39 }
 0x6fe   :  { %15039 = vmatpush1.bf16.msra.mxu1 %v17413_v10  ;;  %14876 = vmatprep.subr.bf16.mxu0 %v17420_v52  ;;  %v17470_v10 = vcombine.high %v11953_v43, %v11957_v44  ;;  %v11960_v52 = vld [vmem:[#allocation6 + $0x3940] sm:$0xff] }
 0x6ff   :  { %15040 = vmatprep.subr.bf16.mxu1 %v17422_v53  ;;  %v11964_v53 = vld [vmem:[#allocation6 + $0x3960] sm:$0xff] }
 0x700   :  { %v17475_v56 = vcombine.low %v11960_v52, %v11964_v53 }
 0x701   :  { %14877 = vmatpush1.bf16.msra.mxu0 %v17419_v60  ;;  %v17476_v60 = vcombine.high %v11960_v52, %v11964_v53 }
 0x702   :  { %15041 = vmatpush1.bf16.msra.mxu1 %v17421_v13  ;;  %14878 = vmatprep.subr.bf16.mxu0 %v17428_v59  ;;  %v11968_v13 = vld [vmem:[#allocation6 + $0x3980] sm:$0xff] }
 0x703   :  { %15042 = vmatprep.subr.bf16.mxu1 %v17430_v23  ;;  %v11972_v59 = vld [vmem:[#allocation6 + $0x39a0] sm:$0xff]  ;;  %v11969_v23 = vld [vmem:[#allocation6 + $0x3988] sm:$0xff] }
 0x704   :  { %v17484_v55 = vcombine.high %v11968_v13, %v11972_v59  ;;  %v17483_v18 = vcombine.low %v11968_v13, %v11972_v59  ;;  %v17485_v14 = vcombine.low %v11969_v23, %v11973_v62 }
 0x705   :  { %14879 = vmatpush1.bf16.msra.mxu0 %v17427_v0  ;;  %v17486_v0 = vcombine.high %v11969_v23, %v11973_v62 }
 0x706   :  { %15043 = vmatpush1.bf16.msra.mxu1 %v17429_v41  ;;  %14889 = vmatprep.subr.bf16.mxu0 %v17436_v1  ;;  %v11980_v41 = vld [vmem:[#allocation6 + $0x39e0] sm:$0xff]  ;;  %v11977_v1 = vld [vmem:[#allocation6 + $0x39c8] sm:$0xff] }
 0x707   :  { %15053 = vmatprep.subr.bf16.mxu1 %v17438_v12  ;;  %v11981_v12 = vld [vmem:[#allocation6 + $0x39e8] sm:$0xff]  ;;  %v17492_v29 = vcombine.high %v11976_v9, %v11980_v41  ;;  %v17491_v15 = vcombine.low %v11976_v9, %v11980_v41 }
 0x708   :  { %14881 = vmatmul.mubr.bf16.vlgmr.msra.gmra.mrb[24].mxu0 %v18440_v19  ;;  %v17494_v8 = vcombine.high %v11977_v1, %v11981_v12  ;;  %v17493_v50 = vcombine.low %v11977_v1, %v11981_v12 }
 0x709   :  { %15045 = vmatmul.mubr.bf16.vlgmr.msra.gmra.mrb[24].mxu1 %v18440_v19  ;;  %14890 = vmatpush1.bf16.msra.mxu0 %v17435_v11  ;;  %v11984_v11 = vld [vmem:[#allocation6 + $0x3a00] sm:$0xff] }
 0x70a   :  { %15054 = vmatpush1.bf16.msra.mxu1 %v17437_v21  ;;  %14891 = vmatprep.subr.bf16.mxu0 %v17444_v28  ;;  %v11988_v21 = vld [vmem:[#allocation6 + $0x3a20] sm:$0xff]  ;;  %v11985_v28 = vld [vmem:[#allocation6 + $0x3a08] sm:$0xff] }
 0x70b   :  { %15055 = vmatprep.subr.bf16.mxu1 %v17446_v27  ;;  %v11989_v27 = vld [vmem:[#allocation6 + $0x3a28] sm:$0xff]  ;;  %v17500_v32 = vcombine.high %v11984_v11, %v11988_v21  ;;  %v17499_v2 = vcombine.low %v11984_v11, %v11988_v21 }
 0x70c   :  { %v17502_v34 = vcombine.high %v11985_v28, %v11989_v27  ;;  %v17501_v22 = vcombine.low %v11985_v28, %v11989_v27 }
 0x70d   :  { %14892 = vmatpush1.bf16.msra.mxu0 %v17443_v6  ;;  %v11992_v6 = vld [vmem:[#allocation6 + $0x3a40] sm:$0xff] }
 0x70e   :  { %15056 = vmatpush1.bf16.msra.mxu1 %v17445_v36  ;;  %14893 = vmatprep.subr.bf16.mxu0 %v17452_v63  ;;  %v11996_v36 = vld [vmem:[#allocation6 + $0x3a60] sm:$0xff]  ;;  %v11993_v63 = vld [vmem:[#allocation6 + $0x3a48] sm:$0xff] }
 0x70f   :  { %15057 = vmatprep.subr.bf16.mxu1 %v17454_v4  ;;  %v11997_v4 = vld [vmem:[#allocation6 + $0x3a68] sm:$0xff]  ;;  %v17508_v17 = vcombine.high %v11992_v6, %v11996_v36  ;;  %v17507_v25 = vcombine.low %v11992_v6, %v11996_v36 }
 0x710   :  { %v17510_v39 = vcombine.high %v11993_v63, %v11997_v4  ;;  %v17509_v45 = vcombine.low %v11993_v63, %v11997_v4 }
 0x711   :  { %14894 = vmatpush1.bf16.msra.mxu0 %v17451_v40  ;;  %v12000_v40 = vld [vmem:[#allocation6 + $0x3a80] sm:$0xff] }
 0x712   :  { %15058 = vmatpush1.bf16.msra.mxu1 %v17453_v26  ;;  %14895 = vmatprep.subr.bf16.mxu0 %v17460_v42  ;;  %v12004_v26 = vld [vmem:[#allocation6 + $0x3aa0] sm:$0xff]  ;;  %v12001_v42 = vld [vmem:[#allocation6 + $0x3a88] sm:$0xff] }
 0x713   :  { %15059 = vmatprep.subr.bf16.mxu1 %v17462_v37  ;;  %v12005_v37 = vld [vmem:[#allocation6 + $0x3aa8] sm:$0xff]  ;;  %v17516_v43 = vcombine.high %v12000_v40, %v12004_v26  ;;  %v17515_v52 = vcombine.low %v12000_v40, %v12004_v26 }
 0x714   :  { %v17518_v44 = vcombine.high %v12001_v42, %v12005_v37  ;;  %v17517_v53 = vcombine.low %v12001_v42, %v12005_v37 }
 0x715   :  { %14896 = vmatpush1.bf16.msra.mxu0 %v17459_v35  ;;  %v12008_v35 = vld [vmem:[#allocation6 + $0x3ac0] sm:$0xff] }
 0x716   :  { %15060 = vmatpush1.bf16.msra.mxu1 %v17461_v46  ;;  %14897 = vmatprep.subr.bf16.mxu0 %v17468_v7  ;;  %v12012_v46 = vld [vmem:[#allocation6 + $0x3ae0] sm:$0xff]  ;;  %v12009_v7 = vld [vmem:[#allocation6 + $0x3ac8] sm:$0xff] }
 0x717   :  { %15061 = vmatprep.subr.bf16.mxu1 %v17470_v10  ;;  %v12013_v10 = vld [vmem:[#allocation6 + $0x3ae8] sm:$0xff]  ;;  %v17524_v57 = vcombine.high %v12008_v35, %v12012_v46  ;;  %v17523_v13 = vcombine.low %v12008_v35, %v12012_v46 }
 0x718   :  { %v17526_v47 = vcombine.high %v12009_v7, %v12013_v10  ;;  %v17525_v59 = vcombine.low %v12009_v7, %v12013_v10 }
 0x719   :  { %14898 = vmatpush1.bf16.msra.mxu0 %v17467_v24  ;;  %v12016_v24 = vld [vmem:[#allocation6 + $0x3b00] sm:$0xff] }
 0x71a   :  { %15062 = vmatpush1.bf16.msra.mxu1 %v17469_v20  ;;  %14899 = vmatprep.subr.bf16.mxu0 %v17476_v60  ;;  %v12020_v20 = vld [vmem:[#allocation6 + $0x3b20] sm:$0xff]  ;;  %v12017_v60 = vld [vmem:[#allocation6 + $0x3b08] sm:$0xff] }
 0x71b   :  { %15063 = vmatprep.subr.bf16.mxu1 %v17478_v61  ;;  %v12021_v61 = vld [vmem:[#allocation6 + $0x3b28] sm:$0xff]  ;;  %v17532_v23 = vcombine.high %v12016_v24, %v12020_v20  ;;  %v17531_v9 = vcombine.low %v12016_v24, %v12020_v20 }
 0x71c   :  { %v17534_v62 = vcombine.high %v12017_v60, %v12021_v61  ;;  %v17533_v41 = vcombine.low %v12017_v60, %v12021_v61 }
 0x71d   :  { %14900 = vmatpush1.bf16.msra.mxu0 %v17475_v56  ;;  %v12024_v56 = vld [vmem:[#allocation6 + $0x3b40] sm:$0xff] }
 0x71e   :  { %15064 = vmatpush1.bf16.msra.mxu1 %v17477_v5  ;;  %14901 = vmatprep.subr.bf16.mxu0 %v17484_v55  ;;  %v12028_v5 = vld [vmem:[#allocation6 + $0x3b60] sm:$0xff]  ;;  %v12025_v55 = vld [vmem:[#allocation6 + $0x3b48] sm:$0xff] }
 0x71f   :  { %15065 = vmatprep.subr.bf16.mxu1 %v17486_v0  ;;  %v12029_v0 = vld [vmem:[#allocation6 + $0x3b68] sm:$0xff]  ;;  %v17540_v1 = vcombine.high %v12024_v56, %v12028_v5  ;;  %v17539_v11 = vcombine.low %v12024_v56, %v12028_v5 }
 0x720   :  { %v17542_v12 = vcombine.high %v12025_v55, %v12029_v0  ;;  %v17541_v21 = vcombine.low %v12025_v55, %v12029_v0  ;;  %v12057_v56 = vld [vmem:[#allocation6 + $0x3c48] sm:$0xff] }
 0x721   :  { %14902 = vmatpush1.bf16.msra.mxu0 %v17483_v18  ;;  %v12032_v18 = vld [vmem:[#allocation6 + $0x3b80] sm:$0xff]  ;;  %v12061_v5 = vld [vmem:[#allocation6 + $0x3c68] sm:$0xff] }
 0x722   :  { %15066 = vmatpush1.bf16.msra.mxu1 %v17485_v14  ;;  %14903 = vmatprep.subr.bf16.mxu0 %v17492_v29  ;;  %v12036_v14 = vld [vmem:[#allocation6 + $0x3ba0] sm:$0xff]  ;;  %v12033_v29 = vld [vmem:[#allocation6 + $0x3b88] sm:$0xff] }
 0x723   :  { %15067 = vmatprep.subr.bf16.mxu1 %v17494_v8  ;;  %v12037_v8 = vld [vmem:[#allocation6 + $0x3ba8] sm:$0xff]  ;;  %v17548_v28 = vcombine.high %v12032_v18, %v12036_v14  ;;  %v17547_v6 = vcombine.low %v12032_v18, %v12036_v14  ;;  %v17574_v18 = vcombine.high %v12057_v56, %v12061_v5  ;;  %v12068_v14 = vld [vmem:[#allocation6 + $0x3ca0] sm:$0xff] }
 0x724   :  { %v17550_v27 = vcombine.high %v12033_v29, %v12037_v8  ;;  %v17549_v36 = vcombine.low %v12033_v29, %v12037_v8  ;;  %v12065_v29 = vld [vmem:[#allocation6 + $0x3c88] sm:$0xff] }
 0x725   :  { %14904 = vmatpush1.bf16.msra.mxu0 %v17491_v15  ;;  %v12040_v15 = vld [vmem:[#allocation6 + $0x3bc0] sm:$0xff]  ;;  %v12069_v8 = vld [vmem:[#allocation6 + $0x3ca8] sm:$0xff] }
 0x726   :  { %15068 = vmatpush1.bf16.msra.mxu1 %v17493_v50  ;;  %14905 = vmatprep.subr.bf16.mxu0 %v17500_v32  ;;  %v12044_v50 = vld [vmem:[#allocation6 + $0x3be0] sm:$0xff]  ;;  %v12041_v32 = vld [vmem:[#allocation6 + $0x3bc8] sm:$0xff] }
 0x727   :  { %15069 = vmatprep.subr.bf16.mxu1 %v17502_v34  ;;  %v12045_v34 = vld [vmem:[#allocation6 + $0x3be8] sm:$0xff]  ;;  %v17556_v63 = vcombine.high %v12040_v15, %v12044_v50  ;;  %v17555_v40 = vcombine.low %v12040_v15, %v12044_v50  ;;  %v17582_v15 = vcombine.high %v12065_v29, %v12069_v8  ;;  %v12072_v50 = vld [vmem:[#allocation6 + $0x3cc0] sm:$0xff] }
 0x728   :  { %v17558_v4 = vcombine.high %v12041_v32, %v12045_v34  ;;  %v17557_v26 = vcombine.low %v12041_v32, %v12045_v34  ;;  %v12076_v32 = vld [vmem:[#allocation6 + $0x3ce0] sm:$0xff]  ;;  %v12073_v34 = vld [vmem:[#allocation6 + $0x3cc8] sm:$0xff] }
 0x729   :  { %14906 = vmatpush1.bf16.msra.mxu0 %v17499_v2  ;;  %v12048_v2 = vld [vmem:[#allocation6 + $0x3c00] sm:$0xff] }
 0x72a   :  { %15070 = vmatpush1.bf16.msra.mxu1 %v17501_v22  ;;  %14907 = vmatprep.subr.bf16.mxu0 %v17508_v17  ;;  %v12052_v22 = vld [vmem:[#allocation6 + $0x3c20] sm:$0xff]  ;;  %v12049_v17 = vld [vmem:[#allocation6 + $0x3c08] sm:$0xff] }
 0x72b   :  { %15071 = vmatprep.subr.bf16.mxu1 %v17510_v39  ;;  %v12053_v39 = vld [vmem:[#allocation6 + $0x3c28] sm:$0xff]  ;;  %v17564_v42 = vcombine.high %v12048_v2, %v12052_v22  ;;  %v17563_v0 = vcombine.low %v12048_v2, %v12052_v22  ;;  %v12080_v22 = vld [vmem:[#allocation6 + $0x3d00] sm:$0xff] }
 0x72c   :  { %v17566_v37 = vcombine.high %v12049_v17, %v12053_v39 }
 0x72d   :  { %14908 = vmatpush1.bf16.msra.mxu0 %v17507_v25  ;;  %v18444_v25 = vld [vmem:[#allocation8 + $0x10] sm:$0xff] }
 0x72e   :  { %15072 = vmatpush1.bf16.msra.mxu1 %v17509_v45  ;;  %14909 = vmatprep.subr.bf16.mxu0 %v17516_v43  ;;  %v8350_v45 = vrot.slane %v18444_v25, %v18267_v33  ;;  %v8354_v43 = vrot.slane %v18444_v25, %v18270_v48 }
 0x72f   :  { %15073 = vmatprep.subr.bf16.mxu1 %v17518_v44  ;;  %v8362_v44 = vrot.slane %v18444_v25, %v18273_v49 }
 0x731   :  { %14910 = vmatpush1.bf16.msra.mxu0 %v17515_v52 }
 0x732   :  { %15074 = vmatpush1.bf16.msra.mxu1 %v17517_v53  ;;  %14911 = vmatprep.subr.bf16.mxu0 %v17524_v57 }
 0x733   :  { %15075 = vmatprep.subr.bf16.mxu1 %v17526_v47 }
 0x735   :  { %14912 = vmatpush1.bf16.msra.mxu0 %v17523_v13 }
 0x736   :  { %15076 = vmatpush1.bf16.msra.mxu1 %v17525_v59  ;;  %14913 = vmatprep.subr.bf16.mxu0 %v17532_v23  ;;  %v12056_v59 = vld [vmem:[#allocation6 + $0x3c40] sm:$0xff] }
 0x737   :  { %15077 = vmatprep.subr.bf16.mxu1 %v17534_v62  ;;  %v12060_v62 = vld [vmem:[#allocation6 + $0x3c60] sm:$0xff] }
 0x739   :  { %14914 = vmatpush1.bf16.msra.mxu0 %v17531_v9  ;;  %v17565_v9 = vcombine.low %v12049_v17, %v12053_v39  ;;  %v12084_v17 = vld [vmem:[#allocation6 + $0x3d20] sm:$0xff]  ;;  %v12081_v39 = vld [vmem:[#allocation6 + $0x3d08] sm:$0xff] }
 0x73a   :  { %15078 = vmatpush1.bf16.msra.mxu1 %v17533_v41  ;;  %14915 = vmatprep.subr.bf16.mxu0 %v17540_v1  ;;  %v12064_v1 = vld [vmem:[#allocation6 + $0x3c80] sm:$0xff] }
 0x73b   :  { %15079 = vmatprep.subr.bf16.mxu1 %v17542_v12  ;;  %v17572_v12 = vcombine.high %v12056_v59, %v12060_v62 }
 0x73d   :  { %14916 = vmatpush1.bf16.msra.mxu0 %v17539_v11 }
 0x73e   :  { %15080 = vmatpush1.bf16.msra.mxu1 %v17541_v21  ;;  %14917 = vmatprep.subr.bf16.mxu0 %v17548_v28  ;;  %v17571_v21 = vcombine.low %v12056_v59, %v12060_v62  ;;  %v17573_v28 = vcombine.low %v12057_v56, %v12061_v5  ;;  %v12104_v62 = vld [vmem:[#allocation6 + $0x3dc0] sm:$0xff]  ;;  %v12105_v5 = vld [vmem:[#allocation6 + $0x3dc8] sm:$0xff] }
 0x73f   :  { %15081 = vmatprep.subr.bf16.mxu1 %v17550_v27  ;;  %v17580_v27 = vcombine.high %v12064_v1, %v12068_v14  ;;  %v12108_v56 = vld [vmem:[#allocation6 + $0x3de0] sm:$0xff] }
 0x741   :  { %14918 = vmatpush1.bf16.msra.mxu0 %v17547_v6  ;;  %v12077_v6 = vld [vmem:[#allocation6 + $0x3ce8] sm:$0xff] }
 0x742   :  { %15082 = vmatpush1.bf16.msra.mxu1 %v17549_v36  ;;  %14919 = vmatprep.subr.bf16.mxu0 %v17556_v63  ;;  %v17579_v36 = vcombine.low %v12064_v1, %v12068_v14  ;;  %v17581_v63 = vcombine.low %v12065_v29, %v12069_v8  ;;  %v17590_v2 = vcombine.high %v12073_v34, %v12077_v6  ;;  %v12112_v14 = vld [vmem:[#allocation6 + $0x3e00] sm:$0xff]  ;;  %v12113_v8 = vld [vmem:[#allocation6 + $0x3e08] sm:$0xff] }
 0x743   :  { %15083 = vmatprep.subr.bf16.mxu1 %v17558_v4  ;;  %v17588_v4 = vcombine.high %v12072_v50, %v12076_v32  ;;  %v12116_v29 = vld [vmem:[#allocation6 + $0x3e20] sm:$0xff] }
 0x745   :  { %14920 = vmatpush1.bf16.msra.mxu0 %v17555_v40  ;;  %v12085_v40 = vld [vmem:[#allocation6 + $0x3d28] sm:$0xff] }
 0x746   :  { %15084 = vmatpush1.bf16.msra.mxu1 %v17557_v26  ;;  %14930 = vmatprep.subr.bf16.mxu0 %v17564_v42  ;;  %v17587_v26 = vcombine.low %v12072_v50, %v12076_v32  ;;  %v17589_v42 = vcombine.low %v12073_v34, %v12077_v6  ;;  %v12120_v32 = vld [vmem:[#allocation6 + $0x3e40] sm:$0xff]  ;;  %v12121_v6 = vld [vmem:[#allocation6 + $0x3e48] sm:$0xff] }
 0x747   :  { %15094 = vmatprep.subr.bf16.mxu1 %v17566_v37  ;;  %v17596_v37 = vcombine.high %v12080_v22, %v12084_v17  ;;  %v12124_v34 = vld [vmem:[#allocation6 + $0x3e60] sm:$0xff] }
 0x75b   :  { %v11444_v35 = vpop.f32.mrb[20].mxu0 }
 0x75c   :  { %v17768_v46 = vadd.f32 %v11444_v35, %v8350_v45  ;;  %v18452_v7 = vpop.f32.mrb[20].mxu1  ;;  %v11446_v10 = vpop.f32.mrb[21].mxu0  ;;  %v17598_v45 = vcombine.high %v12081_v39, %v12085_v40  ;;  %v12089_v35 = vld [vmem:[#allocation6 + $0x3d48] sm:$0xff] }
 0x75d   :  { %v17769_v52 = vadd.f32 %v11446_v10, %v8354_v43  ;;  %v11610_v53 = vpop.f32.mrb[21].mxu1  ;;  %v11448_v57 = vpop.f32.mrb[22].mxu0  ;;  %v12088_v43 = vld [vmem:[#allocation6 + $0x3d40] sm:$0xff]  ;;  %v17595_v10 = vcombine.low %v12080_v22, %v12084_v17 }
 0x75e   :  { %v11619_v47 = vmax.f32 %v17768_v46, 0.0  ;;  %v17771_v24 = vadd.f32 %v11610_v53, %v8362_v44  ;;  %v11612_v20 = vpop.f32.mrb[22].mxu1  ;;  %v11449_v60 = vpop.f32.mrb[23].mxu0  ;;  %v12092_v44 = vld [vmem:[#allocation6 + $0x3d60] sm:$0xff]  ;;  %v12093_v46 = vld [vmem:[#allocation6 + $0x3d68] sm:$0xff] }
 0x75f   :  { %v11620_v61 = vmax.f32 %v17769_v52, 0.0  ;;  %v11613_v13 = vpop.f32.mrb[23].mxu1  ;;  %v17597_v52 = vcombine.low %v12081_v39, %v12085_v40  ;;  %v17604_v53 = vcombine.high %v12088_v43, %v12092_v44  ;;  %v17606_v57 = vcombine.high %v12089_v35, %v12093_v46  ;;  %v12097_v20 = vld [vmem:[#allocation6 + $0x3d88] sm:$0xff]  ;;  %v12128_v17 = vld [vmem:[#allocation6 + $0x3e80] sm:$0xff] }
 0x760   :  { %v11622_v23 = vmax.f32 %v17771_v24, 0.0  ;;  %v18456_v41 = vpack.c.bf16 %v11619_v47, %v11619_v47  ;;  %v12096_v47 = vld [vmem:[#allocation6 + $0x3d80] sm:$0xff]  ;;  %v12101_v60 = vld [vmem:[#allocation6 + $0x3da8] sm:$0xff]  ;;  %v17605_v13 = vcombine.low %v12089_v35, %v12093_v46 }
 0x761   :  { %v18454_v55 = vpack.c.bf16 %v11620_v61, %v11620_v61  ;;  %v12100_v24 = vld [vmem:[#allocation6 + $0x3da0] sm:$0xff]  ;;  %v17603_v61 = vcombine.low %v12088_v43, %v12092_v44  ;;  %v17613_v1 = vcombine.low %v12097_v20, %v12101_v60  ;;  %v12129_v40 = vld [vmem:[#allocation6 + $0x3e88] sm:$0xff] }
 0x762   :  { %v18460_v11 = vpack.c.bf16 %v11622_v23, %v11622_v23  ;;  %v17612_v59 = vcombine.high %v12096_v47, %v12100_v24  ;;  %v17614_v23 = vcombine.high %v12097_v20, %v12101_v60  ;;  %v12132_v39 = vld [vmem:[#allocation6 + $0x3ea0] sm:$0xff]  ;;  %v12137_v46 = vld [vmem:[#allocation6 + $0x3ec8] sm:$0xff] }
 0x763   :  { %14921 = vmatprep.mubr.bf16.mxu0 %v18454_v55  ;;  %15085 = vmatprep.mubr.bf16.mxu1 %v18454_v55  ;;  %v12136_v44 = vld [vmem:[#allocation6 + $0x3ec0] sm:$0xff]  ;;  %v12145_v60 = vld [vmem:[#allocation6 + $0x3f08] sm:$0xff] }
 0x764   :  { %14922 = vmatmul.mubr.bf16.vlgmr.msra.gmra.mrb[24].mxu0 %v18456_v41  ;;  %15086 = vmatmul.mubr.bf16.vlgmr.msra.gmra.mrb[24].mxu1 %v18456_v41  ;;  %v12140_v35 = vld [vmem:[#allocation6 + $0x3ee0] sm:$0xff] }
 0x765   :  { %14931 = vmatpush1.bf16.msra.mxu0 %v17563_v0  ;;  %15095 = vmatpush1.bf16.msra.mxu1 %v17565_v9  ;;  %v12109_v0 = vld [vmem:[#allocation6 + $0x3de8] sm:$0xff]  ;;  %v17611_v9 = vcombine.low %v12096_v47, %v12100_v24  ;;  %v12144_v24 = vld [vmem:[#allocation6 + $0x3f00] sm:$0xff] }
 0x766   :  { %14962 = vmatprep.mubr.bf16.mxu0 %v18460_v11  ;;  %15126 = vmatprep.mubr.bf16.mxu1 %v18460_v11  ;;  %v12148_v20 = vld [vmem:[#allocation6 + $0x3f20] sm:$0xff] }
 0x767   :  { %14932 = vmatprep.subr.bf16.mxu0 %v17572_v12  ;;  %15096 = vmatprep.subr.bf16.mxu1 %v17574_v18  ;;  %v17620_v12 = vcombine.high %v12104_v62, %v12108_v56  ;;  %v17622_v18 = vcombine.high %v12105_v5, %v12109_v0 }
 0x769   :  { %14933 = vmatpush1.bf16.msra.mxu0 %v17571_v21  ;;  %15097 = vmatpush1.bf16.msra.mxu1 %v17573_v28  ;;  %v12117_v21 = vld [vmem:[#allocation6 + $0x3e28] sm:$0xff]  ;;  %v17619_v28 = vcombine.low %v12104_v62, %v12108_v56  ;;  %v12152_v56 = vld [vmem:[#allocation6 + $0x3f40] sm:$0xff] }
 0x76a   :  { %14934 = vmatprep.subr.bf16.mxu0 %v17580_v27  ;;  %15098 = vmatprep.subr.bf16.mxu1 %v17582_v15  ;;  %v17621_v27 = vcombine.low %v12105_v5, %v12109_v0  ;;  %v17628_v15 = vcombine.high %v12112_v14, %v12116_v29  ;;  %v17630_v50 = vcombine.high %v12113_v8, %v12117_v21  ;;  %v12156_v5 = vld [vmem:[#allocation6 + $0x3f60] sm:$0xff]  ;;  %v12153_v0 = vld [vmem:[#allocation6 + $0x3f48] sm:$0xff] }
 0x76d   :  { %14935 = vmatpush1.bf16.msra.mxu0 %v17579_v36  ;;  %15099 = vmatpush1.bf16.msra.mxu1 %v17581_v63  ;;  %v12125_v36 = vld [vmem:[#allocation6 + $0x3e68] sm:$0xff]  ;;  %v17627_v63 = vcombine.low %v12112_v14, %v12116_v29  ;;  %v12160_v29 = vld [vmem:[#allocation6 + $0x3f80] sm:$0xff] }
 0x76e   :  { %14936 = vmatprep.subr.bf16.mxu0 %v17588_v4  ;;  %15100 = vmatprep.subr.bf16.mxu1 %v17590_v2  ;;  %v17629_v4 = vcombine.low %v12113_v8, %v12117_v21  ;;  %v17636_v2 = vcombine.high %v12120_v32, %v12124_v34  ;;  %v17638_v22 = vcombine.high %v12121_v6, %v12125_v36  ;;  %v12164_v8 = vld [vmem:[#allocation6 + $0x3fa0] sm:$0xff]  ;;  %v12161_v21 = vld [vmem:[#allocation6 + $0x3f88] sm:$0xff] }
 0x771   :  { %14937 = vmatpush1.bf16.msra.mxu0 %v17587_v26  ;;  %15101 = vmatpush1.bf16.msra.mxu1 %v17589_v42  ;;  %v12133_v26 = vld [vmem:[#allocation6 + $0x3ea8] sm:$0xff]  ;;  %v17635_v42 = vcombine.low %v12120_v32, %v12124_v34  ;;  %v17676_v32 = vcombine.high %v12160_v29, %v12164_v8 }
 0x772   :  { %14938 = vmatprep.subr.bf16.mxu0 %v17596_v37  ;;  %15102 = vmatprep.subr.bf16.mxu1 %v17598_v45  ;;  %v17637_v37 = vcombine.low %v12121_v6, %v12125_v36  ;;  %v17644_v45 = vcombine.high %v12128_v17, %v12132_v39  ;;  %v17646_v43 = vcombine.high %v12129_v40, %v12133_v26  ;;  %v12168_v6 = vld [vmem:[#allocation6 + $0x3fc0] sm:$0xff] }
 0x773   :  { %v12172_v36 = vld [vmem:[#allocation6 + $0x3fe0] sm:$0xff] }
 0x775   :  { %14939 = vmatpush1.bf16.msra.mxu0 %v17595_v10  ;;  %15103 = vmatpush1.bf16.msra.mxu1 %v17597_v52  ;;  %v12141_v10 = vld [vmem:[#allocation6 + $0x3ee8] sm:$0xff]  ;;  %v17643_v52 = vcombine.low %v12128_v17, %v12132_v39  ;;  %v17684_v39 = vcombine.high %v12168_v6, %v12172_v36 }
 0x776   :  { %14940 = vmatprep.subr.bf16.mxu0 %v17604_v53  ;;  %15104 = vmatprep.subr.bf16.mxu1 %v17606_v57  ;;  %v17645_v53 = vcombine.low %v12129_v40, %v12133_v26  ;;  %v17652_v57 = vcombine.high %v12136_v44, %v12140_v35  ;;  %v17654_v47 = vcombine.high %v12137_v46, %v12141_v10  ;;  %v11666_v26 = vld [vmem:[#allocation6 + $0x3010] sm:$0xff] }
 0x779   :  { %14941 = vmatpush1.bf16.msra.mxu0 %v17603_v61  ;;  %15105 = vmatpush1.bf16.msra.mxu1 %v17605_v13  ;;  %v12149_v61 = vld [vmem:[#allocation6 + $0x3f28] sm:$0xff]  ;;  %v17651_v13 = vcombine.low %v12136_v44, %v12140_v35 }
 0x77a   :  { %14942 = vmatprep.subr.bf16.mxu0 %v17612_v59  ;;  %15106 = vmatprep.subr.bf16.mxu1 %v17614_v23  ;;  %v17653_v59 = vcombine.low %v12137_v46, %v12141_v10  ;;  %v17660_v23 = vcombine.high %v12144_v24, %v12148_v20  ;;  %v17662_v62 = vcombine.high %v12145_v60, %v12149_v61  ;;  %v11674_v10 = vld [vmem:[#allocation6 + $0x3050] sm:$0xff] }
 0x77d   :  { %14943 = vmatpush1.bf16.msra.mxu0 %v17611_v9  ;;  %15107 = vmatpush1.bf16.msra.mxu1 %v17613_v1  ;;  %v12157_v9 = vld [vmem:[#allocation6 + $0x3f68] sm:$0xff]  ;;  %v17659_v1 = vcombine.low %v12144_v24, %v12148_v20 }
 0x77e   :  { %14944 = vmatprep.subr.bf16.mxu0 %v17620_v12  ;;  %15108 = vmatprep.subr.bf16.mxu1 %v17622_v18  ;;  %v17661_v12 = vcombine.low %v12145_v60, %v12149_v61  ;;  %v17668_v18 = vcombine.high %v12152_v56, %v12156_v5  ;;  %v17670_v14 = vcombine.high %v12153_v0, %v12157_v9  ;;  %v11682_v61 = vld [vmem:[#allocation6 + $0x3090] sm:$0xff] }
 0x781   :  { %14945 = vmatpush1.bf16.msra.mxu0 %v17619_v28  ;;  %15109 = vmatpush1.bf16.msra.mxu1 %v17621_v27  ;;  %v12165_v28 = vld [vmem:[#allocation6 + $0x3fa8] sm:$0xff]  ;;  %v17667_v27 = vcombine.low %v12152_v56, %v12156_v5 }
 0x782   :  { %14946 = vmatprep.subr.bf16.mxu0 %v17628_v15  ;;  %15110 = vmatprep.subr.bf16.mxu1 %v17630_v50  ;;  %v17669_v15 = vcombine.low %v12153_v0, %v12157_v9  ;;  %v8358_v50 = vrot.slane %v18444_v25, %v18298_v58  ;;  %v17678_v34 = vcombine.high %v12161_v21, %v12165_v28  ;;  %v11670_v25 = vld [vmem:[#allocation6 + $0x3030] sm:$0xff] }
 0x783   :  { %v17184_v35 = vcombine.high %v11666_v26, %v11670_v25  ;;  %v11690_v9 = vld [vmem:[#allocation6 + $0x30d0] sm:$0xff] }
 0x784   :  { %v17770_v17 = vadd.f32 %v18452_v7, %v8358_v50  ;;  %v11675_v7 = vld [vmem:[#allocation6 + $0x3058] sm:$0xff] }
 0x785   :  { %14947 = vmatpush1.bf16.msra.mxu0 %v17627_v63  ;;  %15111 = vmatpush1.bf16.msra.mxu1 %v17629_v4  ;;  %v12169_v63 = vld [vmem:[#allocation6 + $0x3fc8] sm:$0xff] }
 0x786   :  { %14948 = vmatprep.subr.bf16.mxu0 %v17636_v2  ;;  %15112 = vmatprep.subr.bf16.mxu1 %v17638_v22  ;;  %v12173_v4 = vld [vmem:[#allocation6 + $0x3fe8] sm:$0xff]  ;;  %v17675_v2 = vcombine.low %v12160_v29, %v12164_v8  ;;  %v17677_v22 = vcombine.low %v12161_v21, %v12165_v28  ;;  %v11621_v44 = vmax.f32 %v17770_v17, 0.0  ;;  %v11698_v28 = vld [vmem:[#allocation6 + $0x3110] sm:$0xff] }
 0x787   :  { %v17686_v40 = vcombine.high %v12169_v63, %v12173_v4 }
 0x789   :  { %14949 = vmatpush1.bf16.msra.mxu0 %v17635_v42  ;;  %15113 = vmatpush1.bf16.msra.mxu1 %v17637_v37  ;;  %v11667_v42 = vld [vmem:[#allocation6 + $0x3018] sm:$0xff] }
 0x78a   :  { %14950 = vmatprep.subr.bf16.mxu0 %v17644_v45  ;;  %15114 = vmatprep.subr.bf16.mxu1 %v17646_v43  ;;  %v11671_v37 = vld [vmem:[#allocation6 + $0x3038] sm:$0xff]  ;;  %v17683_v45 = vcombine.low %v12168_v6, %v12172_v36  ;;  %v17685_v43 = vcombine.low %v12169_v63, %v12173_v4  ;;  %v11706_v36 = vld [vmem:[#allocation6 + $0x3150] sm:$0xff] }
 0x78b   :  { %v17186_v46 = vcombine.high %v11667_v42, %v11671_v37  ;;  %v17185_v24 = vcombine.low %v11667_v42, %v11671_v37  ;;  %v11710_v63 = vld [vmem:[#allocation6 + $0x3170] sm:$0xff]  ;;  %v11707_v4 = vld [vmem:[#allocation6 + $0x3158] sm:$0xff] }
 0x78c   :  { %v11715_v42 = vld [vmem:[#allocation6 + $0x3198] sm:$0xff] }
 0x78d   :  { %14951 = vmatpush1.bf16.msra.mxu0 %v17643_v52  ;;  %15115 = vmatpush1.bf16.msra.mxu1 %v17645_v53  ;;  %v11678_v52 = vld [vmem:[#allocation6 + $0x3070] sm:$0xff]  ;;  %v11679_v53 = vld [vmem:[#allocation6 + $0x3078] sm:$0xff] }
 0x78e   :  { %14952 = vmatprep.subr.bf16.mxu0 %v17652_v57  ;;  %15116 = vmatprep.subr.bf16.mxu1 %v17654_v47  ;;  %v17183_v57 = vcombine.low %v11666_v26, %v11670_v25  ;;  %v18469_v47 = vpack.c.bf16 %v11621_v44, %v11621_v44  ;;  %v17192_v20 = vcombine.high %v11674_v10, %v11678_v52  ;;  %v11714_v26 = vld [vmem:[#allocation6 + $0x3190] sm:$0xff]  ;;  %v11719_v37 = vld [vmem:[#allocation6 + $0x31b8] sm:$0xff] }
 0x78f   :  { %v17194_v60 = vcombine.high %v11675_v7, %v11679_v53  ;;  %v17193_v56 = vcombine.low %v11675_v7, %v11679_v53  ;;  %v11718_v25 = vld [vmem:[#allocation6 + $0x31b0] sm:$0xff]  ;;  %v11727_v7 = vld [vmem:[#allocation6 + $0x31f8] sm:$0xff] }
 0x790   :  { %v17232_v44 = vcombine.high %v11714_v26, %v11718_v25  ;;  %v17231_v53 = vcombine.low %v11714_v26, %v11718_v25  ;;  %v11766_v26 = vld [vmem:[#allocation6 + $0x3330] sm:$0xff]  ;;  %v11763_v25 = vld [vmem:[#allocation6 + $0x3318] sm:$0xff] }
 0x791   :  { %14953 = vmatpush1.bf16.msra.mxu0 %v17651_v13  ;;  %15117 = vmatpush1.bf16.msra.mxu1 %v17653_v59  ;;  %v11686_v13 = vld [vmem:[#allocation6 + $0x30b0] sm:$0xff]  ;;  %v11683_v59 = vld [vmem:[#allocation6 + $0x3098] sm:$0xff] }
 0x792   :  { %14954 = vmatprep.subr.bf16.mxu0 %v17660_v23  ;;  %15118 = vmatprep.subr.bf16.mxu1 %v17662_v62  ;;  %v11687_v23 = vld [vmem:[#allocation6 + $0x30b8] sm:$0xff]  ;;  %v17191_v62 = vcombine.low %v11674_v10, %v11678_v52  ;;  %v17200_v5 = vcombine.high %v11682_v61, %v11686_v13  ;;  %v11726_v10 = vld [vmem:[#allocation6 + $0x31f0] sm:$0xff] }
 0x793   :  { %v17202_v0 = vcombine.high %v11683_v59, %v11687_v23  ;;  %v17201_v29 = vcombine.low %v11683_v59, %v11687_v23  ;;  %v11723_v52 = vld [vmem:[#allocation6 + $0x31d8] sm:$0xff] }
 0x794   :  { %v11735_v59 = vld [vmem:[#allocation6 + $0x3238] sm:$0xff] }
 0x795   :  { %14955 = vmatpush1.bf16.msra.mxu0 %v17659_v1  ;;  %15119 = vmatpush1.bf16.msra.mxu1 %v17661_v12  ;;  %v11694_v1 = vld [vmem:[#allocation6 + $0x30f0] sm:$0xff]  ;;  %v11691_v12 = vld [vmem:[#allocation6 + $0x30d8] sm:$0xff] }
 0x796   :  { %14956 = vmatprep.subr.bf16.mxu0 %v17668_v18  ;;  %15120 = vmatprep.subr.bf16.mxu1 %v17670_v14  ;;  %v11695_v18 = vld [vmem:[#allocation6 + $0x30f8] sm:$0xff]  ;;  %v17199_v14 = vcombine.low %v11682_v61, %v11686_v13  ;;  %v17208_v8 = vcombine.high %v11690_v9, %v11694_v1  ;;  %v17207_v50 = vcombine.low %v11690_v9, %v11694_v1  ;;  %v11734_v61 = vld [vmem:[#allocation6 + $0x3230] sm:$0xff] }
 0x797   :  { %v17210_v21 = vcombine.high %v11691_v12, %v11695_v18  ;;  %v11731_v13 = vld [vmem:[#allocation6 + $0x3218] sm:$0xff]  ;;  %v11742_v9 = vld [vmem:[#allocation6 + $0x3270] sm:$0xff] }
 0x798   :  { %v11739_v1 = vld [vmem:[#allocation6 + $0x3258] sm:$0xff] }
 0x799   :  { %14957 = vmatpush1.bf16.msra.mxu0 %v17667_v27  ;;  %15121 = vmatpush1.bf16.msra.mxu1 %v17669_v15  ;;  %v11702_v27 = vld [vmem:[#allocation6 + $0x3130] sm:$0xff]  ;;  %v11703_v15 = vld [vmem:[#allocation6 + $0x3138] sm:$0xff] }
 0x79a   :  { %14958 = vmatprep.subr.bf16.mxu0 %v17676_v32  ;;  %15122 = vmatprep.subr.bf16.mxu1 %v17678_v34  ;;  %v17209_v32 = vcombine.low %v11691_v12, %v11695_v18  ;;  %v17216_v34 = vcombine.high %v11698_v28, %v11702_v27  ;;  %v11743_v12 = vld [vmem:[#allocation6 + $0x3278] sm:$0xff] }
 0x79d   :  { %14959 = vmatpush1.bf16.msra.mxu0 %v17675_v2  ;;  %15123 = vmatpush1.bf16.msra.mxu1 %v17677_v22  ;;  %v11711_v2 = vld [vmem:[#allocation6 + $0x3178] sm:$0xff]  ;;  %v17215_v22 = vcombine.low %v11698_v28, %v11702_v27  ;;  %v11750_v28 = vld [vmem:[#allocation6 + $0x32b0] sm:$0xff] }
 0x79e   :  { %14960 = vmatprep.subr.bf16.mxu0 %v17684_v39  ;;  %15124 = vmatprep.subr.bf16.mxu1 %v17686_v40  ;;  %v17224_v39 = vcombine.high %v11706_v36, %v11710_v63  ;;  %v17226_v40 = vcombine.high %v11707_v4, %v11711_v2  ;;  %v11747_v27 = vld [vmem:[#allocation6 + $0x3298] sm:$0xff] }
 0x7a1   :  { %14961 = vmatpush1.bf16.msra.mxu0 %v17683_v45  ;;  %15125 = vmatpush1.bf16.msra.mxu1 %v17685_v43  ;;  %v17223_v45 = vcombine.low %v11706_v36, %v11710_v63  ;;  %v17225_v43 = vcombine.low %v11707_v4, %v11711_v2  ;;  %v11758_v36 = vld [vmem:[#allocation6 + $0x32f0] sm:$0xff]  ;;  %v11755_v63 = vld [vmem:[#allocation6 + $0x32d8] sm:$0xff] }
 0x7a2   :  { %15135 = vmatprep.subr.bf16.mxu0 %v17184_v35  ;;  %15299 = vmatprep.subr.bf16.mxu1 %v17186_v46  ;;  %v17234_v35 = vcombine.high %v11715_v42, %v11719_v37  ;;  %v11722_v46 = vld [vmem:[#allocation6 + $0x31d0] sm:$0xff]  ;;  %v11759_v4 = vld [vmem:[#allocation6 + $0x32f8] sm:$0xff] }
 0x7a3   :  { %v17239_v23 = vcombine.low %v11722_v46, %v11726_v10 }
 0x7a4   :  { %14963 = vmatmul.mubr.bf16.vlgmr.msra.gmra.mrb[24].mxu0 %v18469_v47  ;;  %15127 = vmatmul.mubr.bf16.vlgmr.msra.gmra.mrb[24].mxu1 %v18469_v47 }
 0x7a5   :  { %15136 = vmatpush1.bf16.msra.mxu0 %v17183_v57  ;;  %15167 = vmatprep.mubr.bf16.mxu0 %v18417_v3  ;;  %v17233_v57 = vcombine.low %v11715_v42, %v11719_v37  ;;  %v11767_v42 = vld [vmem:[#allocation6 + $0x3338] sm:$0xff] }
 0x7a6   :  { %15300 = vmatpush1.bf16.msra.mxu1 %v17185_v24  ;;  %15331 = vmatprep.mubr.bf16.mxu1 %v18417_v3  ;;  %v11699_v3 = vld [vmem:[#allocation6 + $0x3118] sm:$0xff]  ;;  %v17240_v24 = vcombine.high %v11722_v46, %v11726_v10  ;;  %v11774_v46 = vld [vmem:[#allocation6 + $0x3370] sm:$0xff] }
 0x7a7   :  { %15137 = vmatprep.subr.bf16.mxu0 %v17192_v20  ;;  %15301 = vmatprep.subr.bf16.mxu1 %v17194_v60  ;;  %v17218_v6 = vcombine.high %v11699_v3, %v11703_v15  ;;  %v17217_v17 = vcombine.low %v11699_v3, %v11703_v15  ;;  %v17242_v20 = vcombine.high %v11723_v52, %v11727_v7  ;;  %v11730_v60 = vld [vmem:[#allocation6 + $0x3210] sm:$0xff]  ;;  %v11751_v3 = vld [vmem:[#allocation6 + $0x32b8] sm:$0xff] }
 0x7a8   :  { %v17247_v18 = vcombine.low %v11730_v60, %v11734_v61  ;;  %v11771_v10 = vld [vmem:[#allocation6 + $0x3358] sm:$0xff] }
 0x7a9   :  { %15138 = vmatpush1.bf16.msra.mxu0 %v17191_v62  ;;  %v17241_v62 = vcombine.low %v11723_v52, %v11727_v7  ;;  %v11775_v52 = vld [vmem:[#allocation6 + $0x3378] sm:$0xff] }
 0x7aa   :  { %15302 = vmatpush1.bf16.msra.mxu1 %v17193_v56  ;;  %15139 = vmatprep.subr.bf16.mxu0 %v17200_v5  ;;  %v17248_v56 = vcombine.high %v11730_v60, %v11734_v61  ;;  %v17250_v5 = vcombine.high %v11731_v13, %v11735_v59  ;;  %v11782_v60 = vld [vmem:[#allocation6 + $0x33b0] sm:$0xff]  ;;  %v11779_v61 = vld [vmem:[#allocation6 + $0x3398] sm:$0xff] }
 0x7ab   :  { %15303 = vmatprep.subr.bf16.mxu1 %v17202_v0  ;;  %v11738_v0 = vld [vmem:[#allocation6 + $0x3250] sm:$0xff] }
 0x7ac   :  { %v17255_v15 = vcombine.low %v11738_v0, %v11742_v9 }
 0x7ad   :  { %15140 = vmatpush1.bf16.msra.mxu0 %v17199_v14  ;;  %v17249_v14 = vcombine.low %v11731_v13, %v11735_v59  ;;  %v11783_v13 = vld [vmem:[#allocation6 + $0x33b8] sm:$0xff] }
 0x7ae   :  { %15304 = vmatpush1.bf16.msra.mxu1 %v17201_v29  ;;  %15141 = vmatprep.subr.bf16.mxu0 %v17208_v8  ;;  %v17256_v29 = vcombine.high %v11738_v0, %v11742_v9  ;;  %v17258_v8 = vcombine.high %v11739_v1, %v11743_v12  ;;  %v11790_v0 = vld [vmem:[#allocation6 + $0x33f0] sm:$0xff]  ;;  %v11787_v9 = vld [vmem:[#allocation6 + $0x33d8] sm:$0xff] }
 0x7af   :  { %15305 = vmatprep.subr.bf16.mxu1 %v17210_v21  ;;  %v11746_v21 = vld [vmem:[#allocation6 + $0x3290] sm:$0xff] }
 0x7b0   :  { %v17263_v2 = vcombine.low %v11746_v21, %v11750_v28 }
 0x7b1   :  { %15142 = vmatpush1.bf16.msra.mxu0 %v17207_v50  ;;  %v17257_v50 = vcombine.low %v11739_v1, %v11743_v12  ;;  %v11791_v1 = vld [vmem:[#allocation6 + $0x33f8] sm:$0xff] }
 0x7b2   :  { %15306 = vmatpush1.bf16.msra.mxu1 %v17209_v32  ;;  %15143 = vmatprep.subr.bf16.mxu0 %v17216_v34  ;;  %v17264_v32 = vcombine.high %v11746_v21, %v11750_v28  ;;  %v17266_v34 = vcombine.high %v11747_v27, %v11751_v3  ;;  %v11798_v21 = vld [vmem:[#allocation6 + $0x3430] sm:$0xff]  ;;  %v11795_v28 = vld [vmem:[#allocation6 + $0x3418] sm:$0xff] }
 0x7b3   :  { %15307 = vmatprep.subr.bf16.mxu1 %v17218_v6  ;;  %v11754_v6 = vld [vmem:[#allocation6 + $0x32d0] sm:$0xff] }
 0x7b4   :  { %v17271_v37 = vcombine.low %v11754_v6, %v11758_v36 }
 0x7b5   :  { %15144 = vmatpush1.bf16.msra.mxu0 %v17215_v22  ;;  %v17265_v22 = vcombine.low %v11747_v27, %v11751_v3  ;;  %v11799_v27 = vld [vmem:[#allocation6 + $0x3438] sm:$0xff] }
 0x7b6   :  { %15308 = vmatpush1.bf16.msra.mxu1 %v17217_v17  ;;  %15145 = vmatprep.subr.bf16.mxu0 %v17224_v39  ;;  %v17272_v17 = vcombine.high %v11754_v6, %v11758_v36  ;;  %v17274_v39 = vcombine.high %v11755_v63, %v11759_v4  ;;  %v11806_v6 = vld [vmem:[#allocation6 + $0x3470] sm:$0xff] }
 0x7b7   :  { %15309 = vmatprep.subr.bf16.mxu1 %v17226_v40  ;;  %v11762_v40 = vld [vmem:[#allocation6 + $0x3310] sm:$0xff] }
 0x7b8   :  { %v17279_v7 = vcombine.low %v11762_v40, %v11766_v26 }
 0x7b9   :  { %15146 = vmatpush1.bf16.msra.mxu0 %v17223_v45  ;;  %v17273_v45 = vcombine.low %v11755_v63, %v11759_v4  ;;  %v11803_v63 = vld [vmem:[#allocation6 + $0x3458] sm:$0xff] }
 0x7ba   :  { %15310 = vmatpush1.bf16.msra.mxu1 %v17225_v43  ;;  %15147 = vmatprep.subr.bf16.mxu0 %v17232_v44  ;;  %v17280_v43 = vcombine.high %v11762_v40, %v11766_v26  ;;  %v17282_v44 = vcombine.high %v11763_v25, %v11767_v42  ;;  %v11807_v4 = vld [vmem:[#allocation6 + $0x3478] sm:$0xff] }
 0x7bb   :  { %15311 = vmatprep.subr.bf16.mxu1 %v17234_v35  ;;  %v11770_v35 = vld [vmem:[#allocation6 + $0x3350] sm:$0xff]  ;;  %v17322_v40 = vcombine.high %v11803_v63, %v11807_v4  ;;  %v11811_v26 = vld [vmem:[#allocation6 + $0x3498] sm:$0xff] }
 0x7bc   :  { %v17287_v59 = vcombine.low %v11770_v35, %v11774_v46 }
 0x7bd   :  { %15148 = vmatpush1.bf16.msra.mxu0 %v17231_v53  ;;  %v17281_v53 = vcombine.low %v11763_v25, %v11767_v42  ;;  %v11815_v25 = vld [vmem:[#allocation6 + $0x34b8] sm:$0xff] }
 0x7be   :  { %15312 = vmatpush1.bf16.msra.mxu1 %v17233_v57  ;;  %15149 = vmatprep.subr.bf16.mxu0 %v17240_v24  ;;  %v17288_v57 = vcombine.high %v11770_v35, %v11774_v46  ;;  %v17290_v24 = vcombine.high %v11771_v10, %v11775_v52  ;;  %v11822_v35 = vld [vmem:[#allocation6 + $0x34f0] sm:$0xff]  ;;  %v11819_v46 = vld [vmem:[#allocation6 + $0x34d8] sm:$0xff] }
 0x7bf   :  { %15313 = vmatprep.subr.bf16.mxu1 %v17242_v20  ;;  %v11778_v20 = vld [vmem:[#allocation6 + $0x3390] sm:$0xff] }
 0x7c0   :  { %v17295_v12 = vcombine.low %v11778_v20, %v11782_v60 }
 0x7c1   :  { %15150 = vmatpush1.bf16.msra.mxu0 %v17239_v23  ;;  %v17289_v23 = vcombine.low %v11771_v10, %v11775_v52  ;;  %v11823_v10 = vld [vmem:[#allocation6 + $0x34f8] sm:$0xff] }
 0x7c2   :  { %15314 = vmatpush1.bf16.msra.mxu1 %v17241_v62  ;;  %15151 = vmatprep.subr.bf16.mxu0 %v17248_v56  ;;  %v17296_v62 = vcombine.high %v11778_v20, %v11782_v60  ;;  %v17298_v56 = vcombine.high %v11779_v61, %v11783_v13  ;;  %v11827_v20 = vld [vmem:[#allocation6 + $0x3518] sm:$0xff] }
 0x7c3   :  { %15315 = vmatprep.subr.bf16.mxu1 %v17250_v5  ;;  %v11786_v5 = vld [vmem:[#allocation6 + $0x33d0] sm:$0xff]  ;;  %v11831_v60 = vld [vmem:[#allocation6 + $0x3538] sm:$0xff] }
 0x7c4   :  { %v17303_v3 = vcombine.low %v11786_v5, %v11790_v0 }
 0x7c5   :  { %15152 = vmatpush1.bf16.msra.mxu0 %v17247_v18  ;;  %v17297_v18 = vcombine.low %v11779_v61, %v11783_v13  ;;  %v17337_v61 = vcombine.low %v11819_v46, %v11823_v10 }
 0x7c6   :  { %15316 = vmatpush1.bf16.msra.mxu1 %v17249_v14  ;;  %15153 = vmatprep.subr.bf16.mxu0 %v17256_v29  ;;  %v17304_v14 = vcombine.high %v11786_v5, %v11790_v0  ;;  %v17306_v29 = vcombine.high %v11787_v9, %v11791_v1  ;;  %v11839_v5 = vld [vmem:[#allocation6 + $0x3578] sm:$0xff] }
 0x7c7   :  { %15317 = vmatprep.subr.bf16.mxu1 %v17258_v8  ;;  %v11794_v8 = vld [vmem:[#allocation6 + $0x3410] sm:$0xff] }
 0x7c8   :  { %v17311_v36 = vcombine.low %v11794_v8, %v11798_v21 }
 0x7c9   :  { %15154 = vmatpush1.bf16.msra.mxu0 %v17255_v15  ;;  %v17305_v15 = vcombine.low %v11787_v9, %v11791_v1  ;;  %v17345_v9 = vcombine.low %v11827_v20, %v11831_v60 }
 0x7ca   :  { %15318 = vmatpush1.bf16.msra.mxu1 %v17257_v50  ;;  %15155 = vmatprep.subr.bf16.mxu0 %v17264_v32  ;;  %v17312_v50 = vcombine.high %v11794_v8, %v11798_v21  ;;  %v17314_v32 = vcombine.high %v11795_v28, %v11799_v27  ;;  %v11847_v8 = vld [vmem:[#allocation6 + $0x35b8] sm:$0xff] }
 0x7cb   :  { %15319 = vmatprep.subr.bf16.mxu1 %v17266_v34  ;;  %v11802_v34 = vld [vmem:[#allocation6 + $0x3450] sm:$0xff] }
 0x7cc   :  { %v17319_v42 = vcombine.low %v11802_v34, %v11806_v6 }
 0x7cd   :  { %15156 = vmatpush1.bf16.msra.mxu0 %v17263_v2  ;;  %v17313_v2 = vcombine.low %v11795_v28, %v11799_v27 }
 0x7ce   :  { %15320 = vmatpush1.bf16.msra.mxu1 %v17265_v22  ;;  %15157 = vmatprep.subr.bf16.mxu0 %v17272_v17  ;;  %v17320_v22 = vcombine.high %v11802_v34, %v11806_v6  ;;  %v11810_v17 = vld [vmem:[#allocation6 + $0x3490] sm:$0xff]  ;;  %v11855_v34 = vld [vmem:[#allocation6 + $0x35f8] sm:$0xff] }
 0x7cf   :  { %15321 = vmatprep.subr.bf16.mxu1 %v17274_v39  ;;  %v11814_v39 = vld [vmem:[#allocation6 + $0x34b0] sm:$0xff] }
 0x7d0   :  { %v17327_v52 = vcombine.low %v11810_v17, %v11814_v39 }
 0x7d1   :  { %15158 = vmatpush1.bf16.msra.mxu0 %v17271_v37  ;;  %v17321_v37 = vcombine.low %v11803_v63, %v11807_v4 }
 0x7d2   :  { %15322 = vmatpush1.bf16.msra.mxu1 %v17273_v45  ;;  %15159 = vmatprep.subr.bf16.mxu0 %v17280_v43  ;;  %v17328_v45 = vcombine.high %v11810_v17, %v11814_v39  ;;  %v17330_v43 = vcombine.high %v11811_v26, %v11815_v25  ;;  %v11859_v17 = vld [vmem:[#allocation6 + $0x3618] sm:$0xff] }
 0x7d3   :  { %15323 = vmatprep.subr.bf16.mxu1 %v17282_v44  ;;  %v11818_v44 = vld [vmem:[#allocation6 + $0x34d0] sm:$0xff]  ;;  %v11863_v39 = vld [vmem:[#allocation6 + $0x3638] sm:$0xff] }
 0x7d5   :  { %15160 = vmatpush1.bf16.msra.mxu0 %v17279_v7  ;;  %v17336_v7 = vcombine.high %v11818_v44, %v11822_v35 }
 0x7d6   :  { %15324 = vmatpush1.bf16.msra.mxu1 %v17281_v53  ;;  %15161 = vmatprep.subr.bf16.mxu0 %v17288_v57  ;;  %v17338_v53 = vcombine.high %v11819_v46, %v11823_v10  ;;  %v11826_v57 = vld [vmem:[#allocation6 + $0x3510] sm:$0xff]  ;;  %v17377_v46 = vcombine.low %v11859_v17, %v11863_v39 }
 0x7d7   :  { %15325 = vmatprep.subr.bf16.mxu1 %v17290_v24  ;;  %v11830_v24 = vld [vmem:[#allocation6 + $0x3530] sm:$0xff] }
 0x7d8   :  { %v17344_v13 = vcombine.high %v11826_v57, %v11830_v24  ;;  %v17343_v0 = vcombine.low %v11826_v57, %v11830_v24  ;;  %v11879_v57 = vld [vmem:[#allocation6 + $0x36b8] sm:$0xff] }
 0x7d9   :  { %15162 = vmatpush1.bf16.msra.mxu0 %v17287_v59  ;;  %v17346_v59 = vcombine.high %v11827_v20, %v11831_v60 }
 0x7da   :  { %15326 = vmatpush1.bf16.msra.mxu1 %v17289_v23  ;;  %15163 = vmatprep.subr.bf16.mxu0 %v17296_v62  ;;  %v11834_v23 = vld [vmem:[#allocation6 + $0x3550] sm:$0xff] }
 0x7db   :  { %15327 = vmatprep.subr.bf16.mxu1 %v17298_v56  ;;  %v11838_v62 = vld [vmem:[#allocation6 + $0x3570] sm:$0xff]  ;;  %v11835_v56 = vld [vmem:[#allocation6 + $0x3558] sm:$0xff] }
 0x7dc   :  { %v17352_v1 = vcombine.high %v11834_v23, %v11838_v62  ;;  %v17351_v21 = vcombine.low %v11834_v23, %v11838_v62  ;;  %v17353_v28 = vcombine.low %v11835_v56, %v11839_v5  ;;  %v11887_v23 = vld [vmem:[#allocation6 + $0x36f8] sm:$0xff] }
 0x7dd   :  { %15164 = vmatpush1.bf16.msra.mxu0 %v17295_v12  ;;  %v17354_v12 = vcombine.high %v11835_v56, %v11839_v5 }
 0x7de   :  { %15328 = vmatpush1.bf16.msra.mxu1 %v17297_v18  ;;  %15165 = vmatprep.subr.bf16.mxu0 %v17304_v14  ;;  %v11842_v18 = vld [vmem:[#allocation6 + $0x3590] sm:$0xff] }
 0x7df   :  { %15329 = vmatprep.subr.bf16.mxu1 %v17306_v29  ;;  %v11846_v14 = vld [vmem:[#allocation6 + $0x35b0] sm:$0xff]  ;;  %v11843_v29 = vld [vmem:[#allocation6 + $0x3598] sm:$0xff] }
 0x7e0   :  { %v17360_v27 = vcombine.high %v11842_v18, %v11846_v14  ;;  %v17359_v6 = vcombine.low %v11842_v18, %v11846_v14  ;;  %v11895_v18 = vld [vmem:[#allocation6 + $0x3738] sm:$0xff] }
 0x7e1   :  { %15166 = vmatpush1.bf16.msra.mxu0 %v17303_v3  ;;  %v17362_v3 = vcombine.high %v11843_v29, %v11847_v8 }
 0x7e2   :  { %15330 = vmatpush1.bf16.msra.mxu1 %v17305_v15  ;;  %15176 = vmatprep.subr.bf16.mxu0 %v17312_v50  ;;  %v11850_v15 = vld [vmem:[#allocation6 + $0x35d0] sm:$0xff] }
 0x7e3   :  { %15340 = vmatprep.subr.bf16.mxu1 %v17314_v32  ;;  %v11854_v50 = vld [vmem:[#allocation6 + $0x35f0] sm:$0xff]  ;;  %v11851_v32 = vld [vmem:[#allocation6 + $0x35d8] sm:$0xff] }
 0x7e4   :  { %15168 = vmatmul.mubr.bf16.vlgmr.msra.gmra.mrb[28].mxu0 %v18429_v51  ;;  %v17368_v63 = vcombine.high %v11850_v15, %v11854_v50  ;;  %v17370_v4 = vcombine.high %v11851_v32, %v11855_v34 }
 0x7e5   :  { %15332 = vmatmul.mubr.bf16.vlgmr.msra.gmra.mrb[28].mxu1 %v18429_v51  ;;  %15177 = vmatpush1.bf16.msra.mxu0 %v17311_v36  ;;  %v17329_v51 = vcombine.low %v11811_v26, %v11815_v25  ;;  %v17361_v36 = vcombine.low %v11843_v29, %v11847_v8  ;;  %v17369_v26 = vcombine.low %v11851_v32, %v11855_v34 }
 0x7e6   :  { %15208 = vmatprep.mubr.bf16.mxu0 %v18431_v31  ;;  %15341 = vmatpush1.bf16.msra.mxu1 %v17313_v2  ;;  %v11858_v2 = vld [vmem:[#allocation6 + $0x3610] sm:$0xff] }
 0x7e7   :  { %15372 = vmatprep.mubr.bf16.mxu1 %v18431_v31  ;;  %15178 = vmatprep.subr.bf16.mxu0 %v17320_v22  ;;  %v17335_v31 = vcombine.low %v11818_v44, %v11822_v35  ;;  %v11862_v22 = vld [vmem:[#allocation6 + $0x3630] sm:$0xff]  ;;  %v11871_v44 = vld [vmem:[#allocation6 + $0x3678] sm:$0xff] }
 0x7e8   :  { %15342 = vmatprep.subr.bf16.mxu1 %v17322_v40  ;;  %v17367_v40 = vcombine.low %v11850_v15, %v11854_v50  ;;  %v17376_v25 = vcombine.high %v11858_v2, %v11862_v22  ;;  %v17375_v35 = vcombine.low %v11858_v2, %v11862_v22  ;;  %v11903_v15 = vld [vmem:[#allocation6 + $0x3778] sm:$0xff] }
 0x7e9   :  { %15179 = vmatpush1.bf16.msra.mxu0 %v17319_v42  ;;  %v17378_v42 = vcombine.high %v11859_v17, %v11863_v39  ;;  %v11911_v2 = vld [vmem:[#allocation6 + $0x37b8] sm:$0xff] }
 0x7ea   :  { %15343 = vmatpush1.bf16.msra.mxu1 %v17321_v37  ;;  %15180 = vmatprep.subr.bf16.mxu0 %v17328_v45  ;;  %v11866_v37 = vld [vmem:[#allocation6 + $0x3650] sm:$0xff] }
 0x7eb   :  { %15344 = vmatprep.subr.bf16.mxu1 %v17330_v43  ;;  %v11870_v45 = vld [vmem:[#allocation6 + $0x3670] sm:$0xff]  ;;  %v11867_v43 = vld [vmem:[#allocation6 + $0x3658] sm:$0xff] }
 0x7ec   :  { %v17384_v10 = vcombine.high %v11866_v37, %v11870_v45  ;;  %v17383_v24 = vcombine.low %v11866_v37, %v11870_v45  ;;  %v17385_v20 = vcombine.low %v11867_v43, %v11871_v44  ;;  %v11919_v37 = vld [vmem:[#allocation6 + $0x37f8] sm:$0xff] }
 0x7ed   :  { %15181 = vmatpush1.bf16.msra.mxu0 %v17327_v52  ;;  %v17386_v52 = vcombine.high %v11867_v43, %v11871_v44 }
 0x7ee   :  { %15345 = vmatpush1.bf16.msra.mxu1 %v17329_v51  ;;  %15182 = vmatprep.subr.bf16.mxu0 %v17336_v7  ;;  %v11874_v51 = vld [vmem:[#allocation6 + $0x3690] sm:$0xff] }
 0x7ef   :  { %15346 = vmatprep.subr.bf16.mxu1 %v17338_v53  ;;  %v11878_v7 = vld [vmem:[#allocation6 + $0x36b0] sm:$0xff]  ;;  %v11875_v53 = vld [vmem:[#allocation6 + $0x3698] sm:$0xff] }
 0x7f0   :  { %v17392_v60 = vcombine.high %v11874_v51, %v11878_v7  ;;  %v17391_v62 = vcombine.low %v11874_v51, %v11878_v7  ;;  %v17393_v56 = vcombine.low %v11875_v53, %v11879_v57  ;;  %v11927_v51 = vld [vmem:[#allocation6 + $0x3838] sm:$0xff] }
 0x7f1   :  { %15183 = vmatpush1.bf16.msra.mxu0 %v17335_v31  ;;  %v17394_v31 = vcombine.high %v11875_v53, %v11879_v57 }
 0x7f2   :  { %15347 = vmatpush1.bf16.msra.mxu1 %v17337_v61  ;;  %15184 = vmatprep.subr.bf16.mxu0 %v17344_v13  ;;  %v11882_v61 = vld [vmem:[#allocation6 + $0x36d0] sm:$0xff] }
 0x7f3   :  { %15348 = vmatprep.subr.bf16.mxu1 %v17346_v59  ;;  %v11886_v13 = vld [vmem:[#allocation6 + $0x36f0] sm:$0xff]  ;;  %v11883_v59 = vld [vmem:[#allocation6 + $0x36d8] sm:$0xff] }
 0x7f4   :  { %v17400_v5 = vcombine.high %v11882_v61, %v11886_v13  ;;  %v17399_v14 = vcombine.low %v11882_v61, %v11886_v13  ;;  %v17401_v29 = vcombine.low %v11883_v59, %v11887_v23  ;;  %v11931_v61 = vld [vmem:[#allocation6 + $0x3858] sm:$0xff] }
 0x7f5   :  { %15185 = vmatpush1.bf16.msra.mxu0 %v17343_v0  ;;  %v17402_v0 = vcombine.high %v11883_v59, %v11887_v23  ;;  %v11935_v13 = vld [vmem:[#allocation6 + $0x3878] sm:$0xff] }
 0x7f6   :  { %15349 = vmatpush1.bf16.msra.mxu1 %v17345_v9  ;;  %15186 = vmatprep.subr.bf16.mxu0 %v17352_v1  ;;  %v11890_v9 = vld [vmem:[#allocation6 + $0x3710] sm:$0xff] }
 0x7f7   :  { %15350 = vmatprep.subr.bf16.mxu1 %v17354_v12  ;;  %v11894_v1 = vld [vmem:[#allocation6 + $0x3730] sm:$0xff]  ;;  %v11891_v12 = vld [vmem:[#allocation6 + $0x3718] sm:$0xff] }
 0x7f8   :  { %v17408_v8 = vcombine.high %v11890_v9, %v11894_v1  ;;  %v17407_v50 = vcombine.low %v11890_v9, %v11894_v1  ;;  %v17409_v32 = vcombine.low %v11891_v12, %v11895_v18  ;;  %v11943_v9 = vld [vmem:[#allocation6 + $0x38b8] sm:$0xff] }
 0x7f9   :  { %15187 = vmatpush1.bf16.msra.mxu0 %v17351_v21  ;;  %v17410_v21 = vcombine.high %v11891_v12, %v11895_v18  ;;  %v17449_v12 = vcombine.low %v11931_v61, %v11935_v13 }
 0x7fa   :  { %15351 = vmatpush1.bf16.msra.mxu1 %v17353_v28  ;;  %15188 = vmatprep.subr.bf16.mxu0 %v17360_v27  ;;  %v11898_v28 = vld [vmem:[#allocation6 + $0x3750] sm:$0xff] }
 0x7fb   :  { %15352 = vmatprep.subr.bf16.mxu1 %v17362_v3  ;;  %v11902_v27 = vld [vmem:[#allocation6 + $0x3770] sm:$0xff]  ;;  %v11899_v3 = vld [vmem:[#allocation6 + $0x3758] sm:$0xff] }
 0x7fc   :  { %v17416_v34 = vcombine.high %v11898_v28, %v11902_v27  ;;  %v17415_v22 = vcombine.low %v11898_v28, %v11902_v27  ;;  %v17417_v17 = vcombine.low %v11899_v3, %v11903_v15  ;;  %v11951_v28 = vld [vmem:[#allocation6 + $0x38f8] sm:$0xff] }
 0x7fd   :  { %15189 = vmatpush1.bf16.msra.mxu0 %v17359_v6  ;;  %v17418_v6 = vcombine.high %v11899_v3, %v11903_v15 }
 0x7fe   :  { %15353 = vmatpush1.bf16.msra.mxu1 %v17361_v36  ;;  %15190 = vmatprep.subr.bf16.mxu0 %v17368_v63  ;;  %v11906_v36 = vld [vmem:[#allocation6 + $0x3790] sm:$0xff] }
 0x7ff   :  { %15354 = vmatprep.subr.bf16.mxu1 %v17370_v4  ;;  %v11910_v63 = vld [vmem:[#allocation6 + $0x37b0] sm:$0xff]  ;;  %v11907_v4 = vld [vmem:[#allocation6 + $0x3798] sm:$0xff] }
 0x800   :  { %v17424_v39 = vcombine.high %v11906_v36, %v11910_v63  ;;  %v17423_v45 = vcombine.low %v11906_v36, %v11910_v63  ;;  %v17425_v43 = vcombine.low %v11907_v4, %v11911_v2 }
 0x801   :  { %15191 = vmatpush1.bf16.msra.mxu0 %v17367_v40  ;;  %v17426_v40 = vcombine.high %v11907_v4, %v11911_v2  ;;  %v11962_v2 = vld [vmem:[#allocation6 + $0x3950] sm:$0xff] }
 0x802   :  { %15355 = vmatpush1.bf16.msra.mxu1 %v17369_v26  ;;  %15192 = vmatprep.subr.bf16.mxu0 %v17376_v25  ;;  %v11914_v26 = vld [vmem:[#allocation6 + $0x37d0] sm:$0xff] }
 0x803   :  { %15356 = vmatprep.subr.bf16.mxu1 %v17378_v42  ;;  %v11918_v25 = vld [vmem:[#allocation6 + $0x37f0] sm:$0xff]  ;;  %v11915_v42 = vld [vmem:[#allocation6 + $0x37d8] sm:$0xff] }
 0x804   :  { %v17432_v44 = vcombine.high %v11914_v26, %v11918_v25  ;;  %v17431_v7 = vcombine.low %v11914_v26, %v11918_v25  ;;  %v17433_v53 = vcombine.low %v11915_v42, %v11919_v37 }
 0x805   :  { %15193 = vmatpush1.bf16.msra.mxu0 %v17375_v35  ;;  %v17434_v35 = vcombine.high %v11915_v42, %v11919_v37  ;;  %v11970_v37 = vld [vmem:[#allocation6 + $0x3990] sm:$0xff] }
 0x806   :  { %15357 = vmatpush1.bf16.msra.mxu1 %v17377_v46  ;;  %15194 = vmatprep.subr.bf16.mxu0 %v17384_v10  ;;  %v11922_v46 = vld [vmem:[#allocation6 + $0x3810] sm:$0xff] }
 0x807   :  { %15358 = vmatprep.subr.bf16.mxu1 %v17386_v52  ;;  %v11926_v10 = vld [vmem:[#allocation6 + $0x3830] sm:$0xff]  ;;  %v11923_v52 = vld [vmem:[#allocation6 + $0x3818] sm:$0xff] }
 0x808   :  { %v17440_v57 = vcombine.high %v11922_v46, %v11926_v10  ;;  %v17441_v59 = vcombine.low %v11923_v52, %v11927_v51 }
 0x809   :  { %15195 = vmatpush1.bf16.msra.mxu0 %v17383_v24  ;;  %v17442_v24 = vcombine.high %v11923_v52, %v11927_v51  ;;  %v11978_v51 = vld [vmem:[#allocation6 + $0x39d0] sm:$0xff] }
 0x80a   :  { %15359 = vmatpush1.bf16.msra.mxu1 %v17385_v20  ;;  %15196 = vmatprep.subr.bf16.mxu0 %v17392_v60  ;;  %v11930_v20 = vld [vmem:[#allocation6 + $0x3850] sm:$0xff] }
 0x80b   :  { %15360 = vmatprep.subr.bf16.mxu1 %v17394_v31  ;;  %v11934_v60 = vld [vmem:[#allocation6 + $0x3870] sm:$0xff]  ;;  %v17439_v31 = vcombine.low %v11922_v46, %v11926_v10 }
 0x80c   :  { %v17448_v23 = vcombine.high %v11930_v20, %v11934_v60  ;;  %v17447_v1 = vcombine.low %v11930_v20, %v11934_v60 }
 0x80d   :  { %15197 = vmatpush1.bf16.msra.mxu0 %v17391_v62  ;;  %v11938_v62 = vld [vmem:[#allocation6 + $0x3890] sm:$0xff] }
 0x80e   :  { %15361 = vmatpush1.bf16.msra.mxu1 %v17393_v56  ;;  %15198 = vmatprep.subr.bf16.mxu0 %v17400_v5  ;;  %v11942_v56 = vld [vmem:[#allocation6 + $0x38b0] sm:$0xff]  ;;  %v17450_v5 = vcombine.high %v11931_v61, %v11935_v13 }
 0x80f   :  { %15362 = vmatprep.subr.bf16.mxu1 %v17402_v0  ;;  %v11939_v0 = vld [vmem:[#allocation6 + $0x3898] sm:$0xff]  ;;  %v17456_v18 = vcombine.high %v11938_v62, %v11942_v56  ;;  %v17455_v27 = vcombine.low %v11938_v62, %v11942_v56  ;;  %v11986_v61 = vld [vmem:[#allocation6 + $0x3a10] sm:$0xff] }
 0x810   :  { %v11990_v13 = vld [vmem:[#allocation6 + $0x3a30] sm:$0xff] }
 0x811   :  { %15199 = vmatpush1.bf16.msra.mxu0 %v17399_v14  ;;  %v17458_v14 = vcombine.high %v11939_v0, %v11943_v9 }
 0x812   :  { %15363 = vmatpush1.bf16.msra.mxu1 %v17401_v29  ;;  %15200 = vmatprep.subr.bf16.mxu0 %v17408_v8  ;;  %v11946_v29 = vld [vmem:[#allocation6 + $0x38d0] sm:$0xff] }
 0x813   :  { %15364 = vmatprep.subr.bf16.mxu1 %v17410_v21  ;;  %v11950_v8 = vld [vmem:[#allocation6 + $0x38f0] sm:$0xff]  ;;  %v11947_v21 = vld [vmem:[#allocation6 + $0x38d8] sm:$0xff] }
 0x814   :  { %v17464_v3 = vcombine.high %v11946_v29, %v11950_v8  ;;  %v17466_v15 = vcombine.high %v11947_v21, %v11951_v28  ;;  %v17465_v36 = vcombine.low %v11947_v21, %v11951_v28  ;;  %v12002_v28 = vld [vmem:[#allocation6 + $0x3a90] sm:$0xff] }
 0x815   :  { %15201 = vmatpush1.bf16.msra.mxu0 %v17407_v50  ;;  %v11954_v50 = vld [vmem:[#allocation6 + $0x3910] sm:$0xff] }
 0x816   :  { %15365 = vmatpush1.bf16.msra.mxu1 %v17409_v32  ;;  %15202 = vmatprep.subr.bf16.mxu0 %v17416_v34  ;;  %v11958_v32 = vld [vmem:[#allocation6 + $0x3930] sm:$0xff]  ;;  %v11955_v34 = vld [vmem:[#allocation6 + $0x3918] sm:$0xff] }
 0x817   :  { %15366 = vmatprep.subr.bf16.mxu1 %v17418_v6  ;;  %v11959_v6 = vld [vmem:[#allocation6 + $0x3938] sm:$0xff]  ;;  %v17472_v63 = vcombine.high %v11954_v50, %v11958_v32 }
 0x818   :  { %v17474_v4 = vcombine.high %v11955_v34, %v11959_v6  ;;  %v17473_v26 = vcombine.low %v11955_v34, %v11959_v6  ;;  %v12010_v6 = vld [vmem:[#allocation6 + $0x3ad0] sm:$0xff] }
 0x819   :  { %15203 = vmatpush1.bf16.msra.mxu0 %v17415_v22  ;;  %v11966_v22 = vld [vmem:[#allocation6 + $0x3970] sm:$0xff] }
 0x81a   :  { %15367 = vmatpush1.bf16.msra.mxu1 %v17417_v17  ;;  %15204 = vmatprep.subr.bf16.mxu0 %v17424_v39  ;;  %v11963_v17 = vld [vmem:[#allocation6 + $0x3958] sm:$0xff]  ;;  %v17480_v25 = vcombine.high %v11962_v2, %v11966_v22 }
 0x81b   :  { %15368 = vmatprep.subr.bf16.mxu1 %v17426_v40  ;;  %v11967_v39 = vld [vmem:[#allocation6 + $0x3978] sm:$0xff]  ;;  %v17471_v40 = vcombine.low %v11954_v50, %v11958_v32 }
 0x81c   :  { %v17482_v42 = vcombine.high %v11963_v17, %v11967_v39  ;;  %v17481_v46 = vcombine.low %v11963_v17, %v11967_v39  ;;  %v12018_v39 = vld [vmem:[#allocation6 + $0x3b10] sm:$0xff] }
 0x81d   :  { %15205 = vmatpush1.bf16.msra.mxu0 %v17423_v45  ;;  %v11974_v45 = vld [vmem:[#allocation6 + $0x39b0] sm:$0xff] }
 0x81e   :  { %15369 = vmatpush1.bf16.msra.mxu1 %v17425_v43  ;;  %15206 = vmatprep.subr.bf16.mxu0 %v17432_v44  ;;  %v11971_v43 = vld [vmem:[#allocation6 + $0x3998] sm:$0xff]  ;;  %v17488_v10 = vcombine.high %v11970_v37, %v11974_v45 }
 0x81f   :  { %15370 = vmatprep.subr.bf16.mxu1 %v17434_v35  ;;  %v11975_v44 = vld [vmem:[#allocation6 + $0x39b8] sm:$0xff]  ;;  %v17479_v35 = vcombine.low %v11962_v2, %v11966_v22 }
 0x820   :  { %v17490_v52 = vcombine.high %v11971_v43, %v11975_v44  ;;  %v17489_v20 = vcombine.low %v11971_v43, %v11975_v44  ;;  %v12026_v44 = vld [vmem:[#allocation6 + $0x3b50] sm:$0xff] }
 0x821   :  { %15207 = vmatpush1.bf16.msra.mxu0 %v17431_v7  ;;  %v11982_v7 = vld [vmem:[#allocation6 + $0x39f0] sm:$0xff] }
 0x822   :  { %15371 = vmatpush1.bf16.msra.mxu1 %v17433_v53  ;;  %15217 = vmatprep.subr.bf16.mxu0 %v17440_v57  ;;  %v11979_v53 = vld [vmem:[#allocation6 + $0x39d8] sm:$0xff]  ;;  %v17496_v60 = vcombine.high %v11978_v51, %v11982_v7  ;;  %v17495_v62 = vcombine.low %v11978_v51, %v11982_v7 }
 0x823   :  { %15381 = vmatprep.subr.bf16.mxu1 %v17442_v24  ;;  %v11983_v57 = vld [vmem:[#allocation6 + $0x39f8] sm:$0xff]  ;;  %v17487_v24 = vcombine.low %v11970_v37, %v11974_v45 }
 0x824   :  { %15209 = vmatmul.mubr.bf16.vlgmr.msra.gmra.mrb[28].mxu0 %v18440_v19  ;;  %v17497_v56 = vcombine.low %v11979_v53, %v11983_v57 }
 0x825   :  { %15373 = vmatmul.mubr.bf16.vlgmr.msra.gmra.mrb[28].mxu1 %v18440_v19  ;;  %15218 = vmatpush1.bf16.msra.mxu0 %v17439_v31  ;;  %v17457_v19 = vcombine.low %v11939_v0, %v11943_v9  ;;  %v17498_v31 = vcombine.high %v11979_v53, %v11983_v57  ;;  %v11994_v9 = vld [vmem:[#allocation6 + $0x3a50] sm:$0xff] }
 0x826   :  { %15249 = vmatprep.mubr.bf16.mxu0 %v18454_v55  ;;  %15382 = vmatpush1.bf16.msra.mxu1 %v17441_v59  ;;  %v11987_v59 = vld [vmem:[#allocation6 + $0x3a18] sm:$0xff]  ;;  %v12034_v57 = vld [vmem:[#allocation6 + $0x3b90] sm:$0xff] }
 0x827   :  { %15413 = vmatprep.mubr.bf16.mxu1 %v18454_v55  ;;  %15219 = vmatprep.subr.bf16.mxu0 %v17448_v23  ;;  %v17463_v55 = vcombine.low %v11946_v29, %v11950_v8  ;;  %v11991_v23 = vld [vmem:[#allocation6 + $0x3a38] sm:$0xff] }
 0x828   :  { %15383 = vmatprep.subr.bf16.mxu1 %v17450_v5  ;;  %v17504_v5 = vcombine.high %v11986_v61, %v11990_v13  ;;  %v17506_v0 = vcombine.high %v11987_v59, %v11991_v23  ;;  %v17505_v29 = vcombine.low %v11987_v59, %v11991_v23  ;;  %v12042_v23 = vld [vmem:[#allocation6 + $0x3bd0] sm:$0xff] }
 0x829   :  { %15220 = vmatpush1.bf16.msra.mxu0 %v17447_v1  ;;  %v11998_v1 = vld [vmem:[#allocation6 + $0x3a70] sm:$0xff] }
 0x82a   :  { %15384 = vmatpush1.bf16.msra.mxu1 %v17449_v12  ;;  %15221 = vmatprep.subr.bf16.mxu0 %v17456_v18  ;;  %v11995_v12 = vld [vmem:[#allocation6 + $0x3a58] sm:$0xff]  ;;  %v17512_v8 = vcombine.high %v11994_v9, %v11998_v1 }
 0x82b   :  { %15385 = vmatprep.subr.bf16.mxu1 %v17458_v14  ;;  %v11999_v18 = vld [vmem:[#allocation6 + $0x3a78] sm:$0xff]  ;;  %v17503_v14 = vcombine.low %v11986_v61, %v11990_v13 }
 0x82c   :  { %v17514_v21 = vcombine.high %v11995_v12, %v11999_v18  ;;  %v17513_v50 = vcombine.low %v11995_v12, %v11999_v18  ;;  %v12050_v18 = vld [vmem:[#allocation6 + $0x3c10] sm:$0xff] }
 0x82d   :  { %15222 = vmatpush1.bf16.msra.mxu0 %v17455_v27  ;;  %v12006_v27 = vld [vmem:[#allocation6 + $0x3ab0] sm:$0xff] }
 0x82e   :  { %15386 = vmatpush1.bf16.msra.mxu1 %v17457_v19  ;;  %15223 = vmatprep.subr.bf16.mxu0 %v17464_v3  ;;  %v12003_v19 = vld [vmem:[#allocation6 + $0x3a98] sm:$0xff]  ;;  %v17520_v32 = vcombine.high %v12002_v28, %v12006_v27 }
 0x82f   :  { %15387 = vmatprep.subr.bf16.mxu1 %v17466_v15  ;;  %v12007_v3 = vld [vmem:[#allocation6 + $0x3ab8] sm:$0xff]  ;;  %v17511_v15 = vcombine.low %v11994_v9, %v11998_v1 }
 0x830   :  { %v17522_v34 = vcombine.high %v12003_v19, %v12007_v3  ;;  %v17521_v2 = vcombine.low %v12003_v19, %v12007_v3  ;;  %v12058_v3 = vld [vmem:[#allocation6 + $0x3c50] sm:$0xff] }
 0x831   :  { %15224 = vmatpush1.bf16.msra.mxu0 %v17463_v55  ;;  %v12014_v55 = vld [vmem:[#allocation6 + $0x3af0] sm:$0xff] }
 0x832   :  { %15388 = vmatpush1.bf16.msra.mxu1 %v17465_v36  ;;  %15225 = vmatprep.subr.bf16.mxu0 %v17472_v63  ;;  %v12011_v36 = vld [vmem:[#allocation6 + $0x3ad8] sm:$0xff]  ;;  %v17528_v22 = vcombine.high %v12010_v6, %v12014_v55 }
 0x833   :  { %15389 = vmatprep.subr.bf16.mxu1 %v17474_v4  ;;  %v12015_v63 = vld [vmem:[#allocation6 + $0x3af8] sm:$0xff]  ;;  %v17519_v4 = vcombine.low %v12002_v28, %v12006_v27 }
 0x834   :  { %v17530_v17 = vcombine.high %v12011_v36, %v12015_v63  ;;  %v17529_v37 = vcombine.low %v12011_v36, %v12015_v63  ;;  %v12066_v36 = vld [vmem:[#allocation6 + $0x3c90] sm:$0xff] }
 0x835   :  { %15226 = vmatpush1.bf16.msra.mxu0 %v17471_v40  ;;  %v12022_v40 = vld [vmem:[#allocation6 + $0x3b30] sm:$0xff] }
 0x836   :  { %15390 = vmatpush1.bf16.msra.mxu1 %v17473_v26  ;;  %15227 = vmatprep.subr.bf16.mxu0 %v17480_v25  ;;  %v12019_v26 = vld [vmem:[#allocation6 + $0x3b18] sm:$0xff]  ;;  %v17536_v45 = vcombine.high %v12018_v39, %v12022_v40  ;;  %v12070_v63 = vld [vmem:[#allocation6 + $0x3cb0] sm:$0xff] }
 0x837   :  { %15391 = vmatprep.subr.bf16.mxu1 %v17482_v42  ;;  %v12023_v25 = vld [vmem:[#allocation6 + $0x3b38] sm:$0xff]  ;;  %v17527_v42 = vcombine.low %v12010_v6, %v12014_v55 }
 0x838   :  { %v17538_v43 = vcombine.high %v12019_v26, %v12023_v25  ;;  %v17537_v51 = vcombine.low %v12019_v26, %v12023_v25  ;;  %v12074_v25 = vld [vmem:[#allocation6 + $0x3cd0] sm:$0xff] }
 0x839   :  { %15228 = vmatpush1.bf16.msra.mxu0 %v17479_v35  ;;  %v12030_v35 = vld [vmem:[#allocation6 + $0x3b70] sm:$0xff] }
 0x83a   :  { %15392 = vmatpush1.bf16.msra.mxu1 %v17481_v46  ;;  %15229 = vmatprep.subr.bf16.mxu0 %v17488_v10  ;;  %v12027_v46 = vld [vmem:[#allocation6 + $0x3b58] sm:$0xff]  ;;  %v17544_v7 = vcombine.high %v12026_v44, %v12030_v35 }
 0x83b   :  { %15393 = vmatprep.subr.bf16.mxu1 %v17490_v52  ;;  %v12031_v10 = vld [vmem:[#allocation6 + $0x3b78] sm:$0xff]  ;;  %v17535_v52 = vcombine.low %v12018_v39, %v12022_v40  ;;  %v17584_v40 = vcombine.high %v12066_v36, %v12070_v63 }
 0x83c   :  { %v17546_v53 = vcombine.high %v12027_v46, %v12031_v10  ;;  %v17545_v61 = vcombine.low %v12027_v46, %v12031_v10  ;;  %v12082_v46 = vld [vmem:[#allocation6 + $0x3d10] sm:$0xff] }
 0x83d   :  { %15230 = vmatpush1.bf16.msra.mxu0 %v17487_v24  ;;  %v12038_v24 = vld [vmem:[#allocation6 + $0x3bb0] sm:$0xff] }
 0x83e   :  { %15394 = vmatpush1.bf16.msra.mxu1 %v17489_v20  ;;  %15231 = vmatprep.subr.bf16.mxu0 %v17496_v60  ;;  %v12035_v20 = vld [vmem:[#allocation6 + $0x3b98] sm:$0xff]  ;;  %v17552_v13 = vcombine.high %v12034_v57, %v12038_v24  ;;  %v12086_v10 = vld [vmem:[#allocation6 + $0x3d30] sm:$0xff] }
 0x83f   :  { %15395 = vmatprep.subr.bf16.mxu1 %v17498_v31  ;;  %v12039_v60 = vld [vmem:[#allocation6 + $0x3bb8] sm:$0xff]  ;;  %v17543_v31 = vcombine.low %v12026_v44, %v12030_v35 }
 0x840   :  { %v17554_v59 = vcombine.high %v12035_v20, %v12039_v60  ;;  %v17553_v9 = vcombine.low %v12035_v20, %v12039_v60  ;;  %v12094_v20 = vld [vmem:[#allocation6 + $0x3d70] sm:$0xff]  ;;  %v12091_v60 = vld [vmem:[#allocation6 + $0x3d58] sm:$0xff] }
 0x841   :  { %15232 = vmatpush1.bf16.msra.mxu0 %v17495_v62  ;;  %v12046_v62 = vld [vmem:[#allocation6 + $0x3bf0] sm:$0xff] }
 0x842   :  { %15396 = vmatpush1.bf16.msra.mxu1 %v17497_v56  ;;  %15233 = vmatprep.subr.bf16.mxu0 %v17504_v5  ;;  %v12043_v56 = vld [vmem:[#allocation6 + $0x3bd8] sm:$0xff]  ;;  %v17560_v1 = vcombine.high %v12042_v23, %v12046_v62 }
 0x843   :  { %15397 = vmatprep.subr.bf16.mxu1 %v17506_v0  ;;  %v12047_v5 = vld [vmem:[#allocation6 + $0x3bf8] sm:$0xff]  ;;  %v17551_v0 = vcombine.low %v12034_v57, %v12038_v24  ;;  %v12090_v24 = vld [vmem:[#allocation6 + $0x3d50] sm:$0xff] }
 0x844   :  { %v17562_v12 = vcombine.high %v12043_v56, %v12047_v5  ;;  %v17561_v28 = vcombine.low %v12043_v56, %v12047_v5  ;;  %v12098_v56 = vld [vmem:[#allocation6 + $0x3d90] sm:$0xff] }
 0x845   :  { %15234 = vmatpush1.bf16.msra.mxu0 %v17503_v14  ;;  %v12054_v14 = vld [vmem:[#allocation6 + $0x3c30] sm:$0xff] }
 0x846   :  { %15398 = vmatpush1.bf16.msra.mxu1 %v17505_v29  ;;  %15235 = vmatprep.subr.bf16.mxu0 %v17512_v8  ;;  %v12051_v29 = vld [vmem:[#allocation6 + $0x3c18] sm:$0xff]  ;;  %v17568_v27 = vcombine.high %v12050_v18, %v12054_v14  ;;  %v12102_v5 = vld [vmem:[#allocation6 + $0x3db0] sm:$0xff] }
 0x847   :  { %15399 = vmatprep.subr.bf16.mxu1 %v17514_v21  ;;  %v12055_v8 = vld [vmem:[#allocation6 + $0x3c38] sm:$0xff]  ;;  %v17559_v21 = vcombine.low %v12042_v23, %v12046_v62  ;;  %v17608_v23 = vcombine.high %v12090_v24, %v12094_v20 }
 0x848   :  { %v17570_v19 = vcombine.high %v12051_v29, %v12055_v8  ;;  %v17569_v6 = vcombine.low %v12051_v29, %v12055_v8  ;;  %v17607_v29 = vcombine.low %v12090_v24, %v12094_v20 }
 0x849   :  { %15236 = vmatpush1.bf16.msra.mxu0 %v17511_v15  ;;  %v12062_v15 = vld [vmem:[#allocation6 + $0x3c70] sm:$0xff] }
 0x84a   :  { %15400 = vmatpush1.bf16.msra.mxu1 %v17513_v50  ;;  %15237 = vmatprep.subr.bf16.mxu0 %v17520_v32  ;;  %v17567_v50 = vcombine.low %v12050_v18, %v12054_v14  ;;  %v12059_v32 = vld [vmem:[#allocation6 + $0x3c58] sm:$0xff]  ;;  %v17576_v55 = vcombine.high %v12058_v3, %v12062_v15 }
 0x84b   :  { %15401 = vmatprep.subr.bf16.mxu1 %v17522_v34  ;;  %v12063_v34 = vld [vmem:[#allocation6 + $0x3c78] sm:$0xff] }
 0x84c   :  { %v17577_v39 = vcombine.low %v12059_v32, %v12063_v34 }
 0x84d   :  { %15238 = vmatpush1.bf16.msra.mxu0 %v17519_v4  ;;  %v17578_v4 = vcombine.high %v12059_v32, %v12063_v34 }
 0x84e   :  { %15402 = vmatpush1.bf16.msra.mxu1 %v17521_v2  ;;  %15239 = vmatprep.subr.bf16.mxu0 %v17528_v22  ;;  %v12067_v2 = vld [vmem:[#allocation6 + $0x3c98] sm:$0xff] }
 0x84f   :  { %15403 = vmatprep.subr.bf16.mxu1 %v17530_v17  ;;  %v12071_v22 = vld [vmem:[#allocation6 + $0x3cb8] sm:$0xff]  ;;  %v17575_v17 = vcombine.low %v12058_v3, %v12062_v15  ;;  %v12106_v3 = vld [vmem:[#allocation6 + $0x3dd0] sm:$0xff] }
 0x850   :  { %v17586_v26 = vcombine.high %v12067_v2, %v12071_v22  ;;  %v12110_v15 = vld [vmem:[#allocation6 + $0x3df0] sm:$0xff] }
 0x851   :  { %15240 = vmatpush1.bf16.msra.mxu0 %v17527_v42  ;;  %v12078_v42 = vld [vmem:[#allocation6 + $0x3cf0] sm:$0xff] }
 0x852   :  { %15404 = vmatpush1.bf16.msra.mxu1 %v17529_v37  ;;  %15241 = vmatprep.subr.bf16.mxu0 %v17536_v45  ;;  %v12075_v37 = vld [vmem:[#allocation6 + $0x3cd8] sm:$0xff]  ;;  %v17592_v44 = vcombine.high %v12074_v25, %v12078_v42 }
 0x853   :  { %15405 = vmatprep.subr.bf16.mxu1 %v17538_v43  ;;  %v12079_v45 = vld [vmem:[#allocation6 + $0x3cf8] sm:$0xff]  ;;  %v17583_v43 = vcombine.low %v12066_v36, %v12070_v63 }
 0x854   :  { %v17594_v35 = vcombine.high %v12075_v37, %v12079_v45  ;;  %v12111_v36 = vld [vmem:[#allocation6 + $0x3df8] sm:$0xff] }
 0x855   :  { %15242 = vmatpush1.bf16.msra.mxu0 %v17535_v52  ;;  %v12083_v52 = vld [vmem:[#allocation6 + $0x3d18] sm:$0xff] }
 0x856   :  { %15406 = vmatpush1.bf16.msra.mxu1 %v17537_v51  ;;  %15243 = vmatprep.subr.bf16.mxu0 %v17544_v7  ;;  %v12087_v51 = vld [vmem:[#allocation6 + $0x3d38] sm:$0xff]  ;;  %v17593_v7 = vcombine.low %v12075_v37, %v12079_v45  ;;  %v17624_v45 = vcombine.high %v12106_v3, %v12110_v15 }
 0x857   :  { %15407 = vmatprep.subr.bf16.mxu1 %v17546_v53  ;;  %v17600_v53 = vcombine.high %v12082_v46, %v12086_v10  ;;  %v17602_v57 = vcombine.high %v12083_v52, %v12087_v51 }
 0x859   :  { %15244 = vmatpush1.bf16.msra.mxu0 %v17543_v31  ;;  %v12095_v31 = vld [vmem:[#allocation6 + $0x3d78] sm:$0xff] }
 0x85a   :  { %15408 = vmatpush1.bf16.msra.mxu1 %v17545_v61  ;;  %15245 = vmatprep.subr.bf16.mxu0 %v17552_v13  ;;  %v17599_v61 = vcombine.low %v12082_v46, %v12086_v10  ;;  %v18487_v13 = vld [vmem:[#allocation8 + $0x18] sm:$0xff]  ;;  %v17610_v62 = vcombine.high %v12091_v60, %v12095_v31  ;;  %v17609_v8 = vcombine.low %v12091_v60, %v12095_v31  ;;  %v12118_v46 = vld [vmem:[#allocation6 + $0x3e30] sm:$0xff] }
 0x85b   :  { %15409 = vmatprep.subr.bf16.mxu1 %v17554_v59  ;;  %v17601_v59 = vcombine.low %v12083_v52, %v12087_v51  ;;  %v12186_v18 = vrot.slane %v18487_v13, %v18223_v16  ;;  %v12194_v14 = vrot.slane %v18487_v13, %v18240_v38  ;;  %v12115_v52 = vld [vmem:[#allocation6 + $0x3e18] sm:$0xff] }
 0x85c   :  { %v12119_v51 = vld [vmem:[#allocation6 + $0x3e38] sm:$0xff] }
 0x85d   :  { %15246 = vmatpush1.bf16.msra.mxu0 %v17551_v0  ;;  %v12182_v0 = vrot.slane %v18487_v13, %v18237_v30 }
 0x85e   :  { %15410 = vmatpush1.bf16.msra.mxu1 %v17553_v9  ;;  %15247 = vmatprep.subr.bf16.mxu0 %v17560_v1  ;;  %v12190_v9 = vrot.slane %v18487_v13, %v18257_v54  ;;  %v12099_v1 = vld [vmem:[#allocation6 + $0x3d98] sm:$0xff] }
 0x85f   :  { %15411 = vmatprep.subr.bf16.mxu1 %v17562_v12  ;;  %v12103_v12 = vld [vmem:[#allocation6 + $0x3db8] sm:$0xff] }
 0x860   :  { %v17617_v37 = vcombine.low %v12099_v1, %v12103_v12 }
 0x861   :  { %15248 = vmatpush1.bf16.msra.mxu0 %v17559_v21  ;;  %v17616_v21 = vcombine.high %v12098_v56, %v12102_v5 }
 0x862   :  { %15412 = vmatpush1.bf16.msra.mxu1 %v17561_v28  ;;  %15258 = vmatprep.subr.bf16.mxu0 %v17568_v27 }
 0x863   :  { %15422 = vmatprep.subr.bf16.mxu1 %v17570_v19  ;;  %v17618_v19 = vcombine.high %v12099_v1, %v12103_v12  ;;  %v17633_v12 = vcombine.low %v12115_v52, %v12119_v51 }
 0x864   :  { %15250 = vmatmul.mubr.bf16.vlgmr.msra.gmra.mrb[28].mxu0 %v18456_v41 }
 0x865   :  { %15414 = vmatmul.mubr.bf16.vlgmr.msra.gmra.mrb[28].mxu1 %v18456_v41  ;;  %15259 = vmatpush1.bf16.msra.mxu0 %v17567_v50  ;;  %v17585_v41 = vcombine.low %v12067_v2, %v12071_v22 }
 0x866   :  { %15290 = vmatprep.mubr.bf16.mxu0 %v18460_v11  ;;  %15423 = vmatpush1.bf16.msra.mxu1 %v17569_v6 }
 0x867   :  { %15454 = vmatprep.mubr.bf16.mxu1 %v18460_v11  ;;  %15260 = vmatprep.subr.bf16.mxu0 %v17576_v55  ;;  %v17591_v11 = vcombine.low %v12074_v25, %v12078_v42  ;;  %v12107_v55 = vld [vmem:[#allocation6 + $0x3dd8] sm:$0xff] }
 0x868   :  { %15424 = vmatprep.subr.bf16.mxu1 %v17578_v4  ;;  %v18497_v4 = vld [vmem:[#allocation9] sm:$0xff]  ;;  %v17625_v20 = vcombine.low %v12107_v55, %v12111_v36 }
 0x869   :  { %15261 = vmatpush1.bf16.msra.mxu0 %v17575_v17  ;;  %v15524_v10 = vrot.slane %v18497_v4, %v18237_v30  ;;  %v15532_v24 = vrot.slane %v18497_v4, %v18257_v54  ;;  %v17634_v30 = vcombine.high %v12115_v52, %v12119_v51  ;;  %v12159_v52 = vld [vmem:[#allocation6 + $0x3f78] sm:$0xff] }
 0x86a   :  { %15425 = vmatpush1.bf16.msra.mxu1 %v17577_v39  ;;  %15262 = vmatprep.subr.bf16.mxu0 %v17584_v40  ;;  %v17615_v39 = vcombine.low %v12098_v56, %v12102_v5  ;;  %v12123_v56 = vld [vmem:[#allocation6 + $0x3e58] sm:$0xff] }
 0x86b   :  { %15426 = vmatprep.subr.bf16.mxu1 %v17586_v26  ;;  %v12127_v5 = vld [vmem:[#allocation6 + $0x3e78] sm:$0xff] }
 0x86d   :  { %15263 = vmatpush1.bf16.msra.mxu0 %v17583_v43 }
 0x86e   :  { %15427 = vmatpush1.bf16.msra.mxu1 %v17585_v41  ;;  %15264 = vmatprep.subr.bf16.mxu0 %v17592_v44  ;;  %v17626_v44 = vcombine.high %v12107_v55, %v12111_v36  ;;  %v12142_v55 = vld [vmem:[#allocation6 + $0x3ef0] sm:$0xff] }
 0x86f   :  { %15428 = vmatprep.subr.bf16.mxu1 %v17594_v35  ;;  %v12114_v35 = vld [vmem:[#allocation6 + $0x3e10] sm:$0xff] }
 0x870   :  { %v17632_v60 = vcombine.high %v12114_v35, %v12118_v46  ;;  %v17631_v54 = vcombine.low %v12114_v35, %v12118_v46  ;;  %v12154_v35 = vld [vmem:[#allocation6 + $0x3f50] sm:$0xff] }
 0x871   :  { %15265 = vmatpush1.bf16.msra.mxu0 %v17591_v11  ;;  %v12158_v46 = vld [vmem:[#allocation6 + $0x3f70] sm:$0xff] }
 0x872   :  { %15429 = vmatpush1.bf16.msra.mxu1 %v17593_v7  ;;  %15266 = vmatprep.subr.bf16.mxu0 %v17600_v53  ;;  %v15528_v7 = vrot.slane %v18497_v4, %v18223_v16  ;;  %v15536_v16 = vrot.slane %v18497_v4, %v18240_v38 }
 0x873   :  { %15430 = vmatprep.subr.bf16.mxu1 %v17602_v57  ;;  %v17623_v57 = vcombine.low %v12106_v3, %v12110_v15 }
 0x875   :  { %15267 = vmatpush1.bf16.msra.mxu0 %v17599_v61 }
 0x876   :  { %15431 = vmatpush1.bf16.msra.mxu1 %v17601_v59  ;;  %15268 = vmatprep.subr.bf16.mxu0 %v17608_v23  ;;  %v12122_v23 = vld [vmem:[#allocation6 + $0x3e50] sm:$0xff] }
 0x877   :  { %v14964_v28 = vpop.f32.mrb[24].mxu0  ;;  %v15128_v27 = vpop.f32.mrb[24].mxu1  ;;  %15432 = vmatprep.subr.bf16.mxu1 %v17610_v62  ;;  %v12126_v62 = vld [vmem:[#allocation6 + $0x3e70] sm:$0xff] }
 0x878   :  { %v17772_v50 = vadd.f32 %v14964_v28, %v12182_v0  ;;  %v17774_v32 = vadd.f32 %v15128_v27, %v12190_v9  ;;  %v14966_v34 = vpop.f32.mrb[25].mxu0  ;;  %v15130_v6 = vpop.f32.mrb[25].mxu1  ;;  %v12134_v28 = vld [vmem:[#allocation6 + $0x3eb0] sm:$0xff]  ;;  %v12131_v27 = vld [vmem:[#allocation6 + $0x3e98] sm:$0xff]  ;;  %v17639_v15 = vcombine.low %v12122_v23, %v12126_v62 }
 0x879   :  { %v17773_v63 = vadd.f32 %v14966_v34, %v12186_v18  ;;  %v17775_v2 = vadd.f32 %v15130_v6, %v12194_v14  ;;  %v14968_v22 = vpop.f32.mrb[26].mxu0  ;;  %v15132_v17 = vpop.f32.mrb[26].mxu1  ;;  %15269 = vmatpush1.bf16.msra.mxu0 %v17607_v29  ;;  %v17640_v18 = vcombine.high %v12122_v23, %v12126_v62  ;;  %v12138_v6 = vld [vmem:[#allocation6 + $0x3ed0] sm:$0xff] }
 0x87a   :  { %v15463_v40 = vmax.f32 %v17772_v50, 0.0  ;;  %v15465_v26 = vmax.f32 %v17774_v32, 0.0  ;;  %15433 = vmatpush1.bf16.msra.mxu1 %v17609_v8  ;;  %v14969_v25 = vpop.f32.mrb[27].mxu0  ;;  %v15133_v42 = vpop.f32.mrb[27].mxu1  ;;  %15270 = vmatprep.subr.bf16.mxu0 %v17616_v21  ;;  %v17642_v8 = vcombine.high %v12123_v56, %v12127_v5  ;;  %v12130_v21 = vld [vmem:[#allocation6 + $0x3e90] sm:$0xff]  ;;  %v17641_v50 = vcombine.low %v12123_v56, %v12127_v5  ;;  %v12175_v56 = vld [vmem:[#allocation6 + $0x3ff8] sm:$0xff] }
 0x87b   :  { %v15464_v43 = vmax.f32 %v17773_v63, 0.0  ;;  %v15466_v41 = vmax.f32 %v17775_v2, 0.0  ;;  %15434 = vmatprep.subr.bf16.mxu1 %v17618_v19  ;;  %v12135_v19 = vld [vmem:[#allocation6 + $0x3eb8] sm:$0xff]  ;;  %v17648_v32 = vcombine.high %v12130_v21, %v12134_v28  ;;  %v17647_v22 = vcombine.low %v12130_v21, %v12134_v28  ;;  %v12150_v25 = vld [vmem:[#allocation6 + $0x3f30] sm:$0xff] }
 0x87c   :  { %v17650_v34 = vcombine.high %v12131_v27, %v12135_v19  ;;  %v12139_v63 = vld [vmem:[#allocation6 + $0x3ed8] sm:$0xff]  ;;  %v17649_v17 = vcombine.low %v12131_v27, %v12135_v19  ;;  %v12170_v23 = vld [vmem:[#allocation6 + $0x3fd0] sm:$0xff] }
 0x87d   :  { %v17712_v11 = vpack.c.bf16 %v15464_v43, %v15463_v40  ;;  %v17713_v53 = vpack.c.bf16 %v15466_v41, %v15465_v26  ;;  %15271 = vmatpush1.bf16.msra.mxu0 %v17615_v39  ;;  %v12143_v2 = vld [vmem:[#allocation6 + $0x3ef8] sm:$0xff]  ;;  %v17656_v39 = vcombine.high %v12138_v6, %v12142_v55  ;;  %v12146_v26 = vld [vmem:[#allocation6 + $0x3f10] sm:$0xff] }
 0x87e   :  { %15435 = vmatpush1.bf16.msra.mxu1 %v17617_v37  ;;  %15272 = vmatprep.subr.bf16.mxu0 %v17624_v45  ;;  %v17658_v40 = vcombine.high %v12139_v63, %v12143_v2  ;;  %v12147_v42 = vld [vmem:[#allocation6 + $0x3f18] sm:$0xff]  ;;  %v17655_v45 = vcombine.low %v12138_v6, %v12142_v55  ;;  %v17657_v43 = vcombine.low %v12139_v63, %v12143_v2  ;;  %v12174_v62 = vld [vmem:[#allocation6 + $0x3ff0] sm:$0xff] }
 0x87f   :  { %v15511_v31 = vunpack.c.l.bf16 %v17712_v11  ;;  %v15512_v61 = vunpack.c.h.bf16 %v17712_v11  ;;  %v15513_v59 = vunpack.c.l.bf16 %v17713_v53  ;;  %15436 = vmatprep.subr.bf16.mxu1 %v17626_v44  ;;  %v15514_v1 = vunpack.c.h.bf16 %v17713_v53  ;;  %v12151_v37 = vld [vmem:[#allocation6 + $0x3f38] sm:$0xff] }
 0x880   :  { %v17664_v41 = vcombine.high %v12146_v26, %v12150_v25  ;;  %v17666_v44 = vcombine.high %v12147_v42, %v12151_v37  ;;  %v17663_v51 = vcombine.low %v12146_v26, %v12150_v25  ;;  %v17665_v11 = vcombine.low %v12147_v42, %v12151_v37 }
 0x881   :  { %v15561_v0 = vmul.f32 %v15524_v10, %v15511_v31  ;;  %v15562_v9 = vmul.f32 %v15528_v7, %v15512_v61  ;;  %15273 = vmatpush1.bf16.msra.mxu0 %v17623_v57  ;;  %v15563_v29 = vmul.f32 %v15532_v24, %v15513_v59  ;;  %v15564_v38 = vmul.f32 %v15536_v16, %v15514_v1  ;;  %v12155_v10 = vld [vmem:[#allocation6 + $0x3f58] sm:$0xff]  ;;  %v12162_v57 = vld [vmem:[#allocation6 + $0x3f90] sm:$0xff] }
 0x882   :  { %15437 = vmatpush1.bf16.msra.mxu1 %v17625_v20  ;;  %15274 = vmatprep.subr.bf16.mxu0 %v17632_v60  ;;  %v17672_v7 = vcombine.high %v12154_v35, %v12158_v46  ;;  %v17674_v53 = vcombine.high %v12155_v10, %v12159_v52  ;;  %v12166_v24 = vld [vmem:[#allocation6 + $0x3fb0] sm:$0xff]  ;;  %v12163_v20 = vld [vmem:[#allocation6 + $0x3f98] sm:$0xff]  ;;  %v17671_v31 = vcombine.low %v12154_v35, %v12158_v46 }
 0x883   :  { %v15569_v14 = vadd.f32 %v15562_v9, %v15561_v0  ;;  %15438 = vmatprep.subr.bf16.mxu1 %v17634_v30  ;;  %v12167_v60 = vld [vmem:[#allocation6 + $0x3fb8] sm:$0xff]  ;;  %v17673_v61 = vcombine.low %v12155_v10, %v12159_v52  ;;  %v17680_v59 = vcombine.high %v12162_v57, %v12166_v24  ;;  %v17679_v5 = vcombine.low %v12162_v57, %v12166_v24 }
 0x884   :  { %v17682_v30 = vcombine.high %v12163_v20, %v12167_v60  ;;  %v12171_v16 = vld [vmem:[#allocation6 + $0x3fd8] sm:$0xff]  ;;  %v17681_v0 = vcombine.low %v12163_v20, %v12167_v60  ;;  %v17688_v9 = vcombine.high %v12170_v23, %v12174_v62  ;;  %v15544_v25 = vrot.slane %v18497_v4, %v18270_v48 }
 0x885   :  { %v15570_v3 = vadd.f32 %v15569_v14, %v15563_v29  ;;  %15275 = vmatpush1.bf16.msra.mxu0 %v17631_v54  ;;  %v17690_v1 = vcombine.high %v12171_v16, %v12175_v56  ;;  %v17687_v54 = vcombine.low %v12170_v23, %v12174_v62  ;;  %v12206_v14 = vrot.slane %v18487_v13, %v18298_v58 }
 0x886   :  { %15439 = vmatpush1.bf16.msra.mxu1 %v17633_v12  ;;  %15276 = vmatprep.subr.bf16.mxu0 %v17640_v18  ;;  %v17689_v12 = vcombine.low %v12171_v16, %v12175_v56  ;;  %v12198_v18 = vrot.slane %v18487_v13, %v18267_v33  ;;  %v12202_v29 = vrot.slane %v18487_v13, %v18270_v48 }
 0x887   :  { %15440 = vmatprep.subr.bf16.mxu1 %v17642_v8  ;;  %v18507_v36 = vadd.f32 %v15570_v3, %v15564_v38  ;;  %v12210_v8 = vrot.slane %v18487_v13, %v18273_v49  ;;  %v15540_v13 = vrot.slane %v18497_v4, %v18267_v33 }
 0x889   :  { %15277 = vmatpush1.bf16.msra.mxu0 %v17639_v15 }
 0x88a   :  { %15441 = vmatpush1.bf16.msra.mxu1 %v17641_v50  ;;  %15278 = vmatprep.subr.bf16.mxu0 %v17648_v32 }
 0x88b   :  { %15442 = vmatprep.subr.bf16.mxu1 %v17650_v34 }
 0x88d   :  { %15279 = vmatpush1.bf16.msra.mxu0 %v17647_v22 }
 0x88e   :  { %15443 = vmatpush1.bf16.msra.mxu1 %v17649_v17  ;;  %15280 = vmatprep.subr.bf16.mxu0 %v17656_v39 }
 0x88f   :  { %15444 = vmatprep.subr.bf16.mxu1 %v17658_v40 }
 0x891   :  { %15281 = vmatpush1.bf16.msra.mxu0 %v17655_v45  ;;  %v15548_v45 = vrot.slane %v18497_v4, %v18298_v58 }
 0x892   :  { %15445 = vmatpush1.bf16.msra.mxu1 %v17657_v43  ;;  %15282 = vmatprep.subr.bf16.mxu0 %v17664_v41  ;;  %v15552_v41 = vrot.slane %v18497_v4, %v18273_v49 }
 0x893   :  { %15446 = vmatprep.subr.bf16.mxu1 %v17666_v44 }
 0x895   :  { %15283 = vmatpush1.bf16.msra.mxu0 %v17663_v51 }
 0x896   :  { %15447 = vmatpush1.bf16.msra.mxu1 %v17665_v11  ;;  %15284 = vmatprep.subr.bf16.mxu0 %v17672_v7  ;;  %v17695_v11 = vld [vmem:[#allocation3] ss:$0 sm:$0xff] }
 0x897   :  { %15448 = vmatprep.subr.bf16.mxu1 %v17674_v53 }
 0x899   :  { %15285 = vmatpush1.bf16.msra.mxu0 %v17671_v31 }
 0x89a   :  { %15449 = vmatpush1.bf16.msra.mxu1 %v17673_v61  ;;  %15286 = vmatprep.subr.bf16.mxu0 %v17680_v59 }
 0x89b   :  { %15450 = vmatprep.subr.bf16.mxu1 %v17682_v30 }
 0x89d   :  { %15287 = vmatpush1.bf16.msra.mxu0 %v17679_v5 }
 0x89e   :  { %15451 = vmatpush1.bf16.msra.mxu1 %v17681_v0  ;;  %15288 = vmatprep.subr.bf16.mxu0 %v17688_v9 }
 0x89f   :  { %15452 = vmatprep.subr.bf16.mxu1 %v17690_v1 }
 0x8a1   :  { %15289 = vmatpush1.bf16.msra.mxu0 %v17687_v54 }
 0x8a2   :  { %15453 = vmatpush1.bf16.msra.mxu1 %v17689_v12 }
 0x8a4   :  { %15291 = vmatmul.mubr.bf16.vlgmr.msra.gmra.mrb[28].mxu0 %v18469_v47 }
 0x8a5   :  { %15455 = vmatmul.mubr.bf16.vlgmr.msra.gmra.mrb[28].mxu1 %v18469_v47 }
 0x977   :  { %v15292_v21 = vpop.f32.mrb[28].mxu0 }
 0x978   :  { %v17776_v28 = vadd.f32 %v15292_v21, %v12198_v18  ;;  %v15456_v27 = vpop.f32.mrb[28].mxu1  ;;  %v15294_v19 = vpop.f32.mrb[29].mxu0 }
 0x979   :  { %v17778_v38 = vadd.f32 %v15456_v27, %v12206_v14  ;;  %v17777_v3 = vadd.f32 %v15294_v19, %v12202_v29  ;;  %v15458_v15 = vpop.f32.mrb[29].mxu1  ;;  %v15296_v47 = vpop.f32.mrb[30].mxu0 }
 0x97a   :  { %v15467_v50 = vmax.f32 %v17776_v28, 0.0  ;;  %v17779_v32 = vadd.f32 %v15458_v15, %v12210_v8  ;;  %v15460_v34 = vpop.f32.mrb[30].mxu1  ;;  %v15297_v6 = vpop.f32.mrb[31].mxu0 }
 0x97b   :  { %v15469_v55 = vmax.f32 %v17778_v38, 0.0  ;;  %v15468_v63 = vmax.f32 %v17777_v3, 0.0  ;;  %v15461_v2 = vpop.f32.mrb[31].mxu1 }
 0x97c   :  { %v15470_v22 = vmax.f32 %v17779_v32, 0.0 }
 0x97d   :  { %v17714_v17 = vpack.c.bf16 %v15468_v63, %v15467_v50 }
 0x97e   :  { %v17715_v39 = vpack.c.bf16 %v15470_v22, %v15469_v55 }
 0x97f   :  { %v15515_v40 = vunpack.c.l.bf16 %v17714_v17  ;;  %v15516_v26 = vunpack.c.h.bf16 %v17714_v17 }
 0x980   :  { %v15517_v37 = vunpack.c.l.bf16 %v17715_v39  ;;  %v15518_v43 = vunpack.c.h.bf16 %v17715_v39 }
 0x981   :  { %v15565_v42 = vmul.f32 %v15540_v13, %v15515_v40  ;;  %v15566_v44 = vmul.f32 %v15544_v25, %v15516_v26 }
 0x982   :  { %v15567_v46 = vmul.f32 %v15548_v45, %v15517_v37  ;;  %v15568_v10 = vmul.f32 %v15552_v41, %v15518_v43 }
 0x983   :  { %v15572_v35 = vadd.f32 %v18507_v36, %v15565_v42 }
 0x985   :  { %v15573_v33 = vadd.f32 %v15572_v35, %v15566_v44 }
 0x987   :  { %v15574_v52 = vadd.f32 %v15573_v33, %v15567_v46 }
 0x989   :  { %v15575_v51 = vadd.f32 %v15574_v52, %v15568_v10 }
 0x98b   :  { %15576 = vadd.xlane.f32.xlu0 %v15575_v51 }
 0xa18   :  { %v15577_v48 = vpop.xlane.xlu0 %15576 }
 0xa19   :  { %v15585_v7 = vadd.f32 %v17695_v11, %v15577_v48 }
 0xa1b   :  { %15587 = vst.msk [vmem:[%s18536_s5] sm:$0xff] %vm15586_vm0, %v15585_v7 }
 0xa1c   :  { %15592 = vsyncpa [#allocation5], 1 }
 0xa1d   :  { %15593 = vsyncpa [#allocation7], 1 }
 0xa1e   :  { %15594 = vsyncpa [#allocation10], 1 }

</bundles_post_ra>
